<compile_context>
chip_gen: v5e
topology: v5e:2x2
jax: 0.10.0
libtpu: 0.0.40
codegen_flags: <defaults>
</compile_context>

<pallas_src>
import functools

import jax
import jax.numpy as jnp
from jax.experimental import pallas as pl
from jax.experimental.pallas import tpu as pltpu


def _round_up(x, m):
    return (x + m - 1) // m * m


def channel_mixing_kernel(x_ref, wconv_ref, mask_ref, w1t_ref, b1_ref, gamma_ref,
                          beta_ref, w2t_ref, b2_ref, out_ref, pad_ref, *, W):
    """Processes `batch_block` elements per grid step, fully channel-major."""
    BB, C, HW = x_ref.shape
    PADW = pad_ref.shape[-1]
    off = 3 * W + 3              # left zero margin: covers the most-negative tap read
    f32 = jnp.float32

    for b in range(BB):          # batch elements packed into this grid step
        # ---- zero-margin line buffer (virtual pad) -------------------------------
        # Only the H boundary needs real zeros (they land in the margins); the W
        # boundary is handled by the per-dx column masks below.
        pad_ref[b] = jnp.zeros((C, PADW), f32)
        pad_ref[b, :, off:off + HW] = x_ref[b]

        # ---- depthwise 7x7 conv, lane-dense --------------------------------------
        # out[c, m] = sum_{dy,dx} mask_dx[m] * pad[c, m + dy*W + dx] * k[dy,dx,c]
        parts = [None, None, None, None]         # 4 independent accumulators (ILP)
        for dx in range(7):
            xdx = pad_ref[b, :, dx:dx + 6 * W + HW]            # (C, HW + 6W)
            sdx = None
            for dy in range(7):
                tap = xdx[:, dy * W:dy * W + HW] * wconv_ref[dy, dx]   # (C,HW)*(C,1)
                sdx = tap if sdx is None else sdx + tap
            sdx = sdx * mask_ref[dx]                           # W-boundary mask (1,HW)
            j = dx % 4
            parts[j] = sdx if parts[j] is None else parts[j] + sdx
        acc = (parts[0] + parts[1]) + (parts[2] + parts[3])    # (C, HW)

        # ---- LayerNorm over channels (eps=1e-5); affine pre-folded into fc1 ------
        mean = jnp.mean(acc, axis=0, keepdims=True)            # (1, HW) sublane reduce
        var = jnp.mean((acc - mean) ** 2, axis=0, keepdims=True)
        xn = (acc - mean) * jax.lax.rsqrt(var + 1e-5)          # (C, HW)

        # ---- fc1 (MXU) + exact (erf) GELU, feature-major (D, HW) -----------------
        h = jnp.dot(w1t_ref[...], xn, preferred_element_type=f32) + b1_ref[...]
        h = 0.5 * h * (1.0 + jax.lax.erf(h * jnp.float32(0.7071067811865476)))

        # ---- GRN: L2 norm over spatial positions of this batch element -----------
        gx = jnp.sqrt(jnp.sum(h * h, axis=1, keepdims=True))   # (D, 1) lane reduce
        nx = gx / (jnp.mean(gx, axis=0, keepdims=True) + 1e-6) # (D, 1)
        h = gamma_ref[...] * (h * nx) + beta_ref[...] + h

        # ---- fc2 -> (C, HW): lane-dense store, already channel-major -------------
        out_ref[b] = jnp.dot(w2t_ref[...], h, preferred_element_type=f32) + b2_ref[...]


def channel_mixing(x_nchw, wconv, lnw, lnb, w1, b1, gamma, beta, w2, b2,
                   batch_block=None):
    N, C, H, W = x_nchw.shape
    D = w1.shape[1]                      # alpha * C (must be 3*C for GRN broadcast)
    HW = H * W
    f32 = jnp.float32

    # Pack batch elements per grid step to amortize per-step overhead.
    # TODO(synk): on v7x, prefer a batch_block that keeps the grid length even so
    # both TensorCores are used under dimension_semantics=("parallel",).
    if batch_block is None:
        batch_block = max(d for d in (1, 2, 4, 8) if N % d == 0)
    assert N % batch_block == 0
    grid = (N // batch_block,)

    # Channel-major, lane-dense input: NCHW -> (N, C, H*W) is metadata-only, so no
    # host-side transpose or pad HBM pass remains.
    x2 = x_nchw.reshape(N, C, HW).astype(f32)

    # Depthwise conv weight as (7, 7, C, 1) columns (lane-broadcast in the kernel).
    wcol = wconv.astype(f32)[..., None]

    # Per-dx column-validity masks: virtual zero padding along W.
    wpos = jnp.arange(HW, dtype=jnp.int32) % W
    mask = jnp.stack([((wpos + dx - 3 >= 0) & (wpos + dx - 3 < W)).astype(f32)
                      for dx in range(7)]).reshape(7, 1, HW)

    # Fold LayerNorm affine into fc1; keep weights feature-major for (D,HW) matmuls.
    w1t = jnp.transpose(lnw[:, None] * w1).astype(f32)          # (D, C)
    b1c = (lnb @ w1 + b1).reshape(D, 1).astype(f32)
    gammac = gamma.reshape(D, 1).astype(f32)
    betac = beta.reshape(D, 1).astype(f32)
    w2t = jnp.transpose(w2).astype(f32)                          # (C, D)
    b2c = b2.reshape(C, 1).astype(f32)

    # Line-buffer width: data at [3W+3, 3W+3+HW), zero margins around it; taps read
    # lanes [0, HW + 6W + 6).  Rounded up to a multiple of 128 lanes.
    PADW = _round_up(HW + 6 * W + 6, 128)

    kernel = functools.partial(channel_mixing_kernel, W=W)

    out_flat = pl.pallas_call(
        kernel,
        out_shape=jax.ShapeDtypeStruct((N, C, HW), f32),
        grid_spec=pltpu.PrefetchScalarGridSpec(
            num_scalar_prefetch=0,
            grid=grid,
            in_specs=[
                pl.BlockSpec((batch_block, C, HW), lambda g: (g, 0, 0)),    # input (NC,HW)
                pl.BlockSpec((7, 7, C, 1),         lambda g: (0, 0, 0, 0)), # dw conv columns
                pl.BlockSpec((7, 1, HW),           lambda g: (0, 0, 0)),    # W-boundary masks
                pl.BlockSpec((D, C),               lambda g: (0, 0)),       # fc1 (LN folded, T)
                pl.BlockSpec((D, 1),               lambda g: (0, 0)),       # fc1 bias column
                pl.BlockSpec((D, 1),               lambda g: (0, 0)),       # GRN gamma column
                pl.BlockSpec((D, 1),               lambda g: (0, 0)),       # GRN beta column
                pl.BlockSpec((C, D),               lambda g: (0, 0)),       # fc2 transposed
                pl.BlockSpec((C, 1),               lambda g: (0, 0)),       # fc2 bias column
            ],
            out_specs=pl.BlockSpec((batch_block, C, HW), lambda g: (g, 0, 0)),
            scratch_shapes=[pltpu.VMEM((batch_block, C, PADW), f32)],       # line buffer
        ),
        compiler_params=pltpu.CompilerParams(dimension_semantics=("parallel",)),
    )(x2, wcol, mask, w1t, b1c, gammac, betac, w2t, b2c)

    # Output is already channel-major: splitting the flat spatial dim is metadata-only.
    return out_flat.reshape(N, C, H, W)


def reference(x_nchw, wconv, lnw, lnb, w1, b1, gamma, beta, w2, b2):
    """Pure-JAX reference of the PyTorch forward (for correctness check)."""
    N, C, H, W = x_nchw.shape
    y = jax.lax.conv_general_dilated(
        jnp.transpose(x_nchw, (0, 2, 3, 1)), wconv.reshape(7, 7, 1, C),
        window_strides=(1, 1), padding=((3, 3), (3, 3)),
        dimension_numbers=("NHWC", "HWIO", "NHWC"), feature_group_count=C)
    mean = y.mean(-1, keepdims=True)
    var = ((y - mean) ** 2).mean(-1, keepdims=True)
    yn = (y - mean) / jnp.sqrt(var + 1e-5) * lnw + lnb
    h = yn @ w1 + b1
    h = jax.nn.gelu(h, approximate=False)
    gx = jnp.sqrt(jnp.sum(h * h, axis=(1, 2), keepdims=True))
    nx = gx / (jnp.mean(gx, axis=-1, keepdims=True) + 1e-6)
    h = gamma * (h * nx) + beta + h
    out = h @ w2 + b2
    return jnp.transpose(out, (0, 3, 1, 2))


if __name__ == "__main__":
    key = jax.random.PRNGKey(0)
    N, C, H, W = 2, 16, 16, 16
    alpha = 3                      # forward only broadcasts if alpha == 3 (GRN uses 3*in_channel)
    D = alpha * C
    ks = jax.random.split(key, 10)

    x     = jax.random.normal(ks[0], (N, C, H, W), jnp.float32)
    wconv = 0.1 * jax.random.normal(ks[1], (7, 7, C), jnp.float32)      # depthwise conv weight
    lnw   = 1.0 + 0.1 * jax.random.normal(ks[2], (C,), jnp.float32)
    lnb   = 0.1 * jax.random.normal(ks[3], (C,), jnp.float32)
    w1    = jax.random.normal(ks[4], (C, D), jnp.float32) / jnp.sqrt(C)
    b1    = 0.1 * jax.random.normal(ks[5], (D,), jnp.float32)
    gamma = 0.1 * jax.random.normal(ks[6], (D,), jnp.float32)           # PyTorch inits zeros; nonzero to exercise GRN
    beta  = 0.1 * jax.random.normal(ks[7], (D,), jnp.float32)
    w2    = jax.random.normal(ks[8], (D, C), jnp.float32) / jnp.sqrt(D)
    b2    = 0.1 * jax.random.normal(ks[9], (C,), jnp.float32)

    # TODO(synk): nn.Dropout is declared in __init__ but never used in forward(), so it is omitted.

    out = channel_mixing(x, wconv, lnw, lnb, w1, b1, gamma, beta, w2, b2)
    out = jax.block_until_ready(out)

    ref = reference(x, wconv, lnw, lnb, w1, b1, gamma, beta, w2, b2)
    assert out.shape == (N, C, H, W)
    assert jnp.allclose(out, ref, atol=2e-4, rtol=2e-4), float(jnp.max(jnp.abs(out - ref)))
    print("KERNEL_OK")
</pallas_src>

<mosaic_0001>
module attributes {stable_mosaic.version = 11 : i64} {
  func.func @channel_mixing_kernel(%arg0: i32, %arg1: memref<2x16x256xf32, #tpu.memory_space<vmem>>, %arg2: memref<7x7x16x1xf32, #tpu.memory_space<vmem>>, %arg3: memref<7x1x256xf32, #tpu.memory_space<vmem>>, %arg4: memref<48x16xf32, #tpu.memory_space<vmem>>, %arg5: memref<48x1xf32, #tpu.memory_space<vmem>>, %arg6: memref<48x1xf32, #tpu.memory_space<vmem>>, %arg7: memref<48x1xf32, #tpu.memory_space<vmem>>, %arg8: memref<16x48xf32, #tpu.memory_space<vmem>>, %arg9: memref<16x1xf32, #tpu.memory_space<vmem>>, %arg10: memref<2x16x256xf32, #tpu.memory_space<vmem>>, %arg11: memref<2x16x384xf32, #tpu.memory_space<vmem>>) attributes {dimension_semantics = [#tpu.dimension_semantics<parallel>], iteration_bounds = array<i64: 1>, scalar_prefetch = 0 : i64, scratch_operands = 1 : i64, tpu.core_type = #tpu.core_type<tc>, window_params = [{transform_indices = @transform_0, window_bounds = array<i64: 2, 16, 256>}, {pipeline_mode = #tpu.pipeline_mode<synchronous>, transform_indices = @transform_1, window_bounds = array<i64: 7, 7, 16, 1>}, {pipeline_mode = #tpu.pipeline_mode<synchronous>, transform_indices = @transform_2, window_bounds = array<i64: 7, 1, 256>}, {pipeline_mode = #tpu.pipeline_mode<synchronous>, transform_indices = @transform_3, window_bounds = array<i64: 48, 16>}, {pipeline_mode = #tpu.pipeline_mode<synchronous>, transform_indices = @transform_4, window_bounds = array<i64: 48, 1>}, {pipeline_mode = #tpu.pipeline_mode<synchronous>, transform_indices = @transform_5, window_bounds = array<i64: 48, 1>}, {pipeline_mode = #tpu.pipeline_mode<synchronous>, transform_indices = @transform_6, window_bounds = array<i64: 48, 1>}, {pipeline_mode = #tpu.pipeline_mode<synchronous>, transform_indices = @transform_7, window_bounds = array<i64: 16, 48>}, {pipeline_mode = #tpu.pipeline_mode<synchronous>, transform_indices = @transform_8, window_bounds = array<i64: 16, 1>}, {transform_indices = @transform_9, window_bounds = array<i64: 2, 16, 256>}]} {
    %cst = arith.constant 0.000000e+00 : f32
    %0 = vector.broadcast %cst : f32 to vector<16x384xf32>
    %c0 = arith.constant 0 : index
    %c0_0 = arith.constant 0 : index
    %c0_1 = arith.constant 0 : index
    %1 = vector.load %arg11[%c0, %c0_0, %c0_1] : memref<2x16x384xf32, #tpu.memory_space<vmem>>, vector<1x16x384xf32>
    %2 = vector.shape_cast %1 : vector<1x16x384xf32> to vector<16x384xf32>
    %3 = vector.shape_cast %0 : vector<16x384xf32> to vector<1x16x384xf32>
    tpu.vector_store %arg11[%c0, %c0_0, %c0_1], %3 {strides = array<i32>} : memref<2x16x384xf32, #tpu.memory_space<vmem>>, vector<1x16x384xf32>,
    %c0_2 = arith.constant 0 : index
    %c0_3 = arith.constant 0 : index
    %c0_4 = arith.constant 0 : index
    %4 = vector.load %arg1[%c0_2, %c0_3, %c0_4] : memref<2x16x256xf32, #tpu.memory_space<vmem>>, vector<1x16x256xf32>
    %5 = vector.shape_cast %4 : vector<1x16x256xf32> to vector<16x256xf32>
    %c0_5 = arith.constant 0 : index
    %c0_6 = arith.constant 0 : index
    %c51 = arith.constant 51 : index
    %6 = vector.load %arg11[%c0_5, %c0_6, %c51] : memref<2x16x384xf32, #tpu.memory_space<vmem>>, vector<1x16x256xf32>
    %7 = vector.shape_cast %6 : vector<1x16x256xf32> to vector<16x256xf32>
    %8 = vector.shape_cast %5 : vector<16x256xf32> to vector<1x16x256xf32>
    tpu.vector_store %arg11[%c0_5, %c0_6, %c51], %8 {strides = array<i32>} : memref<2x16x384xf32, #tpu.memory_space<vmem>>, vector<1x16x256xf32>,
    %c0_7 = arith.constant 0 : index
    %c0_8 = arith.constant 0 : index
    %c0_9 = arith.constant 0 : index
    %9 = vector.load %arg11[%c0_7, %c0_8, %c0_9] : memref<2x16x384xf32, #tpu.memory_space<vmem>>, vector<1x16x352xf32>
    %10 = vector.shape_cast %9 : vector<1x16x352xf32> to vector<16x352xf32>
    %11 = vector.extract_strided_slice %10 {offsets = [0, 0], sizes = [16, 256], strides = [1, 1]} : vector<16x352xf32> to vector<16x256xf32>
    %c0_10 = arith.constant 0 : index
    %c0_11 = arith.constant 0 : index
    %c0_12 = arith.constant 0 : index
    %c0_13 = arith.constant 0 : index
    %12 = vector.load %arg2[%c0_10, %c0_11, %c0_12, %c0_13] : memref<7x7x16x1xf32, #tpu.memory_space<vmem>>, vector<1x1x16x1xf32>
    %13 = vector.shape_cast %12 : vector<1x1x16x1xf32> to vector<16x1xf32>
    %14 = vector.broadcast %13 : vector<16x1xf32> to vector<16x256xf32>
    %15 = arith.mulf %11, %14 : vector<16x256xf32>
    %16 = vector.extract_strided_slice %10 {offsets = [0, 16], sizes = [16, 256], strides = [1, 1]} : vector<16x352xf32> to vector<16x256xf32>
    %c1 = arith.constant 1 : index
    %c0_14 = arith.constant 0 : index
    %c0_15 = arith.constant 0 : index
    %c0_16 = arith.constant 0 : index
    %17 = vector.load %arg2[%c1, %c0_14, %c0_15, %c0_16] : memref<7x7x16x1xf32, #tpu.memory_space<vmem>>, vector<1x1x16x1xf32>
    %18 = vector.shape_cast %17 : vector<1x1x16x1xf32> to vector<16x1xf32>
    %19 = vector.broadcast %18 : vector<16x1xf32> to vector<16x256xf32>
    %20 = arith.mulf %16, %19 : vector<16x256xf32>
    %21 = arith.addf %15, %20 : vector<16x256xf32>
    %22 = vector.extract_strided_slice %10 {offsets = [0, 32], sizes = [16, 256], strides = [1, 1]} : vector<16x352xf32> to vector<16x256xf32>
    %c2 = arith.constant 2 : index
    %c0_17 = arith.constant 0 : index
    %c0_18 = arith.constant 0 : index
    %c0_19 = arith.constant 0 : index
    %23 = vector.load %arg2[%c2, %c0_17, %c0_18, %c0_19] : memref<7x7x16x1xf32, #tpu.memory_space<vmem>>, vector<1x1x16x1xf32>
    %24 = vector.shape_cast %23 : vector<1x1x16x1xf32> to vector<16x1xf32>
    %25 = vector.broadcast %24 : vector<16x1xf32> to vector<16x256xf32>
    %26 = arith.mulf %22, %25 : vector<16x256xf32>
    %27 = arith.addf %21, %26 : vector<16x256xf32>
    %28 = vector.extract_strided_slice %10 {offsets = [0, 48], sizes = [16, 256], strides = [1, 1]} : vector<16x352xf32> to vector<16x256xf32>
    %c3 = arith.constant 3 : index
    %c0_20 = arith.constant 0 : index
    %c0_21 = arith.constant 0 : index
    %c0_22 = arith.constant 0 : index
    %29 = vector.load %arg2[%c3, %c0_20, %c0_21, %c0_22] : memref<7x7x16x1xf32, #tpu.memory_space<vmem>>, vector<1x1x16x1xf32>
    %30 = vector.shape_cast %29 : vector<1x1x16x1xf32> to vector<16x1xf32>
    %31 = vector.broadcast %30 : vector<16x1xf32> to vector<16x256xf32>
    %32 = arith.mulf %28, %31 : vector<16x256xf32>
    %33 = arith.addf %27, %32 : vector<16x256xf32>
    %34 = vector.extract_strided_slice %10 {offsets = [0, 64], sizes = [16, 256], strides = [1, 1]} : vector<16x352xf32> to vector<16x256xf32>
    %c4 = arith.constant 4 : index
    %c0_23 = arith.constant 0 : index
    %c0_24 = arith.constant 0 : index
    %c0_25 = arith.constant 0 : index
    %35 = vector.load %arg2[%c4, %c0_23, %c0_24, %c0_25] : memref<7x7x16x1xf32, #tpu.memory_space<vmem>>, vector<1x1x16x1xf32>
    %36 = vector.shape_cast %35 : vector<1x1x16x1xf32> to vector<16x1xf32>
    %37 = vector.broadcast %36 : vector<16x1xf32> to vector<16x256xf32>
    %38 = arith.mulf %34, %37 : vector<16x256xf32>
    %39 = arith.addf %33, %38 : vector<16x256xf32>
    %40 = vector.extract_strided_slice %10 {offsets = [0, 80], sizes = [16, 256], strides = [1, 1]} : vector<16x352xf32> to vector<16x256xf32>
    %c5 = arith.constant 5 : index
    %c0_26 = arith.constant 0 : index
    %c0_27 = arith.constant 0 : index
    %c0_28 = arith.constant 0 : index
    %41 = vector.load %arg2[%c5, %c0_26, %c0_27, %c0_28] : memref<7x7x16x1xf32, #tpu.memory_space<vmem>>, vector<1x1x16x1xf32>
    %42 = vector.shape_cast %41 : vector<1x1x16x1xf32> to vector<16x1xf32>
    %43 = vector.broadcast %42 : vector<16x1xf32> to vector<16x256xf32>
    %44 = arith.mulf %40, %43 : vector<16x256xf32>
    %45 = arith.addf %39, %44 : vector<16x256xf32>
    %46 = vector.extract_strided_slice %10 {offsets = [0, 96], sizes = [16, 256], strides = [1, 1]} : vector<16x352xf32> to vector<16x256xf32>
    %c6 = arith.constant 6 : index
    %c0_29 = arith.constant 0 : index
    %c0_30 = arith.constant 0 : index
    %c0_31 = arith.constant 0 : index
    %47 = vector.load %arg2[%c6, %c0_29, %c0_30, %c0_31] : memref<7x7x16x1xf32, #tpu.memory_space<vmem>>, vector<1x1x16x1xf32>
    %48 = vector.shape_cast %47 : vector<1x1x16x1xf32> to vector<16x1xf32>
    %49 = vector.broadcast %48 : vector<16x1xf32> to vector<16x256xf32>
    %50 = arith.mulf %46, %49 : vector<16x256xf32>
    %51 = arith.addf %45, %50 : vector<16x256xf32>
    %c0_32 = arith.constant 0 : index
    %c0_33 = arith.constant 0 : index
    %c0_34 = arith.constant 0 : index
    %52 = vector.load %arg3[%c0_32, %c0_33, %c0_34] : memref<7x1x256xf32, #tpu.memory_space<vmem>>, vector<1x1x256xf32>
    %53 = vector.shape_cast %52 : vector<1x1x256xf32> to vector<1x256xf32>
    %54 = vector.broadcast %53 : vector<1x256xf32> to vector<16x256xf32>
    %55 = arith.mulf %51, %54 : vector<16x256xf32>
    %c0_35 = arith.constant 0 : index
    %c0_36 = arith.constant 0 : index
    %c1_37 = arith.constant 1 : index
    %56 = vector.load %arg11[%c0_35, %c0_36, %c1_37] : memref<2x16x384xf32, #tpu.memory_space<vmem>>, vector<1x16x352xf32>
    %57 = vector.shape_cast %56 : vector<1x16x352xf32> to vector<16x352xf32>
    %58 = vector.extract_strided_slice %57 {offsets = [0, 0], sizes = [16, 256], strides = [1, 1]} : vector<16x352xf32> to vector<16x256xf32>
    %c0_38 = arith.constant 0 : index
    %c1_39 = arith.constant 1 : index
    %c0_40 = arith.constant 0 : index
    %c0_41 = arith.constant 0 : index
    %59 = vector.load %arg2[%c0_38, %c1_39, %c0_40, %c0_41] : memref<7x7x16x1xf32, #tpu.memory_space<vmem>>, vector<1x1x16x1xf32>
    %60 = vector.shape_cast %59 : vector<1x1x16x1xf32> to vector<16x1xf32>
    %61 = vector.broadcast %60 : vector<16x1xf32> to vector<16x256xf32>
    %62 = arith.mulf %58, %61 : vector<16x256xf32>
    %63 = vector.extract_strided_slice %57 {offsets = [0, 16], sizes = [16, 256], strides = [1, 1]} : vector<16x352xf32> to vector<16x256xf32>
    %c1_42 = arith.constant 1 : index
    %c1_43 = arith.constant 1 : index
    %c0_44 = arith.constant 0 : index
    %c0_45 = arith.constant 0 : index
    %64 = vector.load %arg2[%c1_42, %c1_43, %c0_44, %c0_45] : memref<7x7x16x1xf32, #tpu.memory_space<vmem>>, vector<1x1x16x1xf32>
    %65 = vector.shape_cast %64 : vector<1x1x16x1xf32> to vector<16x1xf32>
    %66 = vector.broadcast %65 : vector<16x1xf32> to vector<16x256xf32>
    %67 = arith.mulf %63, %66 : vector<16x256xf32>
    %68 = arith.addf %62, %67 : vector<16x256xf32>
    %69 = vector.extract_strided_slice %57 {offsets = [0, 32], sizes = [16, 256], strides = [1, 1]} : vector<16x352xf32> to vector<16x256xf32>
    %c2_46 = arith.constant 2 : index
    %c1_47 = arith.constant 1 : index
    %c0_48 = arith.constant 0 : index
    %c0_49 = arith.constant 0 : index
    %70 = vector.load %arg2[%c2_46, %c1_47, %c0_48, %c0_49] : memref<7x7x16x1xf32, #tpu.memory_space<vmem>>, vector<1x1x16x1xf32>
    %71 = vector.shape_cast %70 : vector<1x1x16x1xf32> to vector<16x1xf32>
    %72 = vector.broadcast %71 : vector<16x1xf32> to vector<16x256xf32>
    %73 = arith.mulf %69, %72 : vector<16x256xf32>
    %74 = arith.addf %68, %73 : vector<16x256xf32>
    %75 = vector.extract_strided_slice %57 {offsets = [0, 48], sizes = [16, 256], strides = [1, 1]} : vector<16x352xf32> to vector<16x256xf32>
    %c3_50 = arith.constant 3 : index
    %c1_51 = arith.constant 1 : index
    %c0_52 = arith.constant 0 : index
    %c0_53 = arith.constant 0 : index
    %76 = vector.load %arg2[%c3_50, %c1_51, %c0_52, %c0_53] : memref<7x7x16x1xf32, #tpu.memory_space<vmem>>, vector<1x1x16x1xf32>
    %77 = vector.shape_cast %76 : vector<1x1x16x1xf32> to vector<16x1xf32>
    %78 = vector.broadcast %77 : vector<16x1xf32> to vector<16x256xf32>
    %79 = arith.mulf %75, %78 : vector<16x256xf32>
    %80 = arith.addf %74, %79 : vector<16x256xf32>
    %81 = vector.extract_strided_slice %57 {offsets = [0, 64], sizes = [16, 256], strides = [1, 1]} : vector<16x352xf32> to vector<16x256xf32>
    %c4_54 = arith.constant 4 : index
    %c1_55 = arith.constant 1 : index
    %c0_56 = arith.constant 0 : index
    %c0_57 = arith.constant 0 : index
    %82 = vector.load %arg2[%c4_54, %c1_55, %c0_56, %c0_57] : memref<7x7x16x1xf32, #tpu.memory_space<vmem>>, vector<1x1x16x1xf32>
    %83 = vector.shape_cast %82 : vector<1x1x16x1xf32> to vector<16x1xf32>
    %84 = vector.broadcast %83 : vector<16x1xf32> to vector<16x256xf32>
    %85 = arith.mulf %81, %84 : vector<16x256xf32>
    %86 = arith.addf %80, %85 : vector<16x256xf32>
    %87 = vector.extract_strided_slice %57 {offsets = [0, 80], sizes = [16, 256], strides = [1, 1]} : vector<16x352xf32> to vector<16x256xf32>
    %c5_58 = arith.constant 5 : index
    %c1_59 = arith.constant 1 : index
    %c0_60 = arith.constant 0 : index
    %c0_61 = arith.constant 0 : index
    %88 = vector.load %arg2[%c5_58, %c1_59, %c0_60, %c0_61] : memref<7x7x16x1xf32, #tpu.memory_space<vmem>>, vector<1x1x16x1xf32>
    %89 = vector.shape_cast %88 : vector<1x1x16x1xf32> to vector<16x1xf32>
    %90 = vector.broadcast %89 : vector<16x1xf32> to vector<16x256xf32>
    %91 = arith.mulf %87, %90 : vector<16x256xf32>
    %92 = arith.addf %86, %91 : vector<16x256xf32>
    %93 = vector.extract_strided_slice %57 {offsets = [0, 96], sizes = [16, 256], strides = [1, 1]} : vector<16x352xf32> to vector<16x256xf32>
    %c6_62 = arith.constant 6 : index
    %c1_63 = arith.constant 1 : index
    %c0_64 = arith.constant 0 : index
    %c0_65 = arith.constant 0 : index
    %94 = vector.load %arg2[%c6_62, %c1_63, %c0_64, %c0_65] : memref<7x7x16x1xf32, #tpu.memory_space<vmem>>, vector<1x1x16x1xf32>
    %95 = vector.shape_cast %94 : vector<1x1x16x1xf32> to vector<16x1xf32>
    %96 = vector.broadcast %95 : vector<16x1xf32> to vector<16x256xf32>
    %97 = arith.mulf %93, %96 : vector<16x256xf32>
    %98 = arith.addf %92, %97 : vector<16x256xf32>
    %c1_66 = arith.constant 1 : index
    %c0_67 = arith.constant 0 : index
    %c0_68 = arith.constant 0 : index
    %99 = vector.load %arg3[%c1_66, %c0_67, %c0_68] : memref<7x1x256xf32, #tpu.memory_space<vmem>>, vector<1x1x256xf32>
    %100 = vector.shape_cast %99 : vector<1x1x256xf32> to vector<1x256xf32>
    %101 = vector.broadcast %100 : vector<1x256xf32> to vector<16x256xf32>
    %102 = arith.mulf %98, %101 : vector<16x256xf32>
    %c0_69 = arith.constant 0 : index
    %c0_70 = arith.constant 0 : index
    %c2_71 = arith.constant 2 : index
    %103 = vector.load %arg11[%c0_69, %c0_70, %c2_71] : memref<2x16x384xf32, #tpu.memory_space<vmem>>, vector<1x16x352xf32>
    %104 = vector.shape_cast %103 : vector<1x16x352xf32> to vector<16x352xf32>
    %105 = vector.extract_strided_slice %104 {offsets = [0, 0], sizes = [16, 256], strides = [1, 1]} : vector<16x352xf32> to vector<16x256xf32>
    %c0_72 = arith.constant 0 : index
    %c2_73 = arith.constant 2 : index
    %c0_74 = arith.constant 0 : index
    %c0_75 = arith.constant 0 : index
    %106 = vector.load %arg2[%c0_72, %c2_73, %c0_74, %c0_75] : memref<7x7x16x1xf32, #tpu.memory_space<vmem>>, vector<1x1x16x1xf32>
    %107 = vector.shape_cast %106 : vector<1x1x16x1xf32> to vector<16x1xf32>
    %108 = vector.broadcast %107 : vector<16x1xf32> to vector<16x256xf32>
    %109 = arith.mulf %105, %108 : vector<16x256xf32>
    %110 = vector.extract_strided_slice %104 {offsets = [0, 16], sizes = [16, 256], strides = [1, 1]} : vector<16x352xf32> to vector<16x256xf32>
    %c1_76 = arith.constant 1 : index
    %c2_77 = arith.constant 2 : index
    %c0_78 = arith.constant 0 : index
    %c0_79 = arith.constant 0 : index
    %111 = vector.load %arg2[%c1_76, %c2_77, %c0_78, %c0_79] : memref<7x7x16x1xf32, #tpu.memory_space<vmem>>, vector<1x1x16x1xf32>
    %112 = vector.shape_cast %111 : vector<1x1x16x1xf32> to vector<16x1xf32>
    %113 = vector.broadcast %112 : vector<16x1xf32> to vector<16x256xf32>
    %114 = arith.mulf %110, %113 : vector<16x256xf32>
    %115 = arith.addf %109, %114 : vector<16x256xf32>
    %116 = vector.extract_strided_slice %104 {offsets = [0, 32], sizes = [16, 256], strides = [1, 1]} : vector<16x352xf32> to vector<16x256xf32>
    %c2_80 = arith.constant 2 : index
    %c2_81 = arith.constant 2 : index
    %c0_82 = arith.constant 0 : index
    %c0_83 = arith.constant 0 : index
    %117 = vector.load %arg2[%c2_80, %c2_81, %c0_82, %c0_83] : memref<7x7x16x1xf32, #tpu.memory_space<vmem>>, vector<1x1x16x1xf32>
    %118 = vector.shape_cast %117 : vector<1x1x16x1xf32> to vector<16x1xf32>
    %119 = vector.broadcast %118 : vector<16x1xf32> to vector<16x256xf32>
    %120 = arith.mulf %116, %119 : vector<16x256xf32>
    %121 = arith.addf %115, %120 : vector<16x256xf32>
    %122 = vector.extract_strided_slice %104 {offsets = [0, 48], sizes = [16, 256], strides = [1, 1]} : vector<16x352xf32> to vector<16x256xf32>
    %c3_84 = arith.constant 3 : index
    %c2_85 = arith.constant 2 : index
    %c0_86 = arith.constant 0 : index
    %c0_87 = arith.constant 0 : index
    %123 = vector.load %arg2[%c3_84, %c2_85, %c0_86, %c0_87] : memref<7x7x16x1xf32, #tpu.memory_space<vmem>>, vector<1x1x16x1xf32>
    %124 = vector.shape_cast %123 : vector<1x1x16x1xf32> to vector<16x1xf32>
    %125 = vector.broadcast %124 : vector<16x1xf32> to vector<16x256xf32>
    %126 = arith.mulf %122, %125 : vector<16x256xf32>
    %127 = arith.addf %121, %126 : vector<16x256xf32>
    %128 = vector.extract_strided_slice %104 {offsets = [0, 64], sizes = [16, 256], strides = [1, 1]} : vector<16x352xf32> to vector<16x256xf32>
    %c4_88 = arith.constant 4 : index
    %c2_89 = arith.constant 2 : index
    %c0_90 = arith.constant 0 : index
    %c0_91 = arith.constant 0 : index
    %129 = vector.load %arg2[%c4_88, %c2_89, %c0_90, %c0_91] : memref<7x7x16x1xf32, #tpu.memory_space<vmem>>, vector<1x1x16x1xf32>
    %130 = vector.shape_cast %129 : vector<1x1x16x1xf32> to vector<16x1xf32>
    %131 = vector.broadcast %130 : vector<16x1xf32> to vector<16x256xf32>
    %132 = arith.mulf %128, %131 : vector<16x256xf32>
    %133 = arith.addf %127, %132 : vector<16x256xf32>
    %134 = vector.extract_strided_slice %104 {offsets = [0, 80], sizes = [16, 256], strides = [1, 1]} : vector<16x352xf32> to vector<16x256xf32>
    %c5_92 = arith.constant 5 : index
    %c2_93 = arith.constant 2 : index
    %c0_94 = arith.constant 0 : index
    %c0_95 = arith.constant 0 : index
    %135 = vector.load %arg2[%c5_92, %c2_93, %c0_94, %c0_95] : memref<7x7x16x1xf32, #tpu.memory_space<vmem>>, vector<1x1x16x1xf32>
    %136 = vector.shape_cast %135 : vector<1x1x16x1xf32> to vector<16x1xf32>
    %137 = vector.broadcast %136 : vector<16x1xf32> to vector<16x256xf32>
    %138 = arith.mulf %134, %137 : vector<16x256xf32>
    %139 = arith.addf %133, %138 : vector<16x256xf32>
    %140 = vector.extract_strided_slice %104 {offsets = [0, 96], sizes = [16, 256], strides = [1, 1]} : vector<16x352xf32> to vector<16x256xf32>
    %c6_96 = arith.constant 6 : index
    %c2_97 = arith.constant 2 : index
    %c0_98 = arith.constant 0 : index
    %c0_99 = arith.constant 0 : index
    %141 = vector.load %arg2[%c6_96, %c2_97, %c0_98, %c0_99] : memref<7x7x16x1xf32, #tpu.memory_space<vmem>>, vector<1x1x16x1xf32>
    %142 = vector.shape_cast %141 : vector<1x1x16x1xf32> to vector<16x1xf32>
    %143 = vector.broadcast %142 : vector<16x1xf32> to vector<16x256xf32>
    %144 = arith.mulf %140, %143 : vector<16x256xf32>
    %145 = arith.addf %139, %144 : vector<16x256xf32>
    %c2_100 = arith.constant 2 : index
    %c0_101 = arith.constant 0 : index
    %c0_102 = arith.constant 0 : index
    %146 = vector.load %arg3[%c2_100, %c0_101, %c0_102] : memref<7x1x256xf32, #tpu.memory_space<vmem>>, vector<1x1x256xf32>
    %147 = vector.shape_cast %146 : vector<1x1x256xf32> to vector<1x256xf32>
    %148 = vector.broadcast %147 : vector<1x256xf32> to vector<16x256xf32>
    %149 = arith.mulf %145, %148 : vector<16x256xf32>
    %c0_103 = arith.constant 0 : index
    %c0_104 = arith.constant 0 : index
    %c3_105 = arith.constant 3 : index
    %150 = vector.load %arg11[%c0_103, %c0_104, %c3_105] : memref<2x16x384xf32, #tpu.memory_space<vmem>>, vector<1x16x352xf32>
    %151 = vector.shape_cast %150 : vector<1x16x352xf32> to vector<16x352xf32>
    %152 = vector.extract_strided_slice %151 {offsets = [0, 0], sizes = [16, 256], strides = [1, 1]} : vector<16x352xf32> to vector<16x256xf32>
    %c0_106 = arith.constant 0 : index
    %c3_107 = arith.constant 3 : index
    %c0_108 = arith.constant 0 : index
    %c0_109 = arith.constant 0 : index
    %153 = vector.load %arg2[%c0_106, %c3_107, %c0_108, %c0_109] : memref<7x7x16x1xf32, #tpu.memory_space<vmem>>, vector<1x1x16x1xf32>
    %154 = vector.shape_cast %153 : vector<1x1x16x1xf32> to vector<16x1xf32>
    %155 = vector.broadcast %154 : vector<16x1xf32> to vector<16x256xf32>
    %156 = arith.mulf %152, %155 : vector<16x256xf32>
    %157 = vector.extract_strided_slice %151 {offsets = [0, 16], sizes = [16, 256], strides = [1, 1]} : vector<16x352xf32> to vector<16x256xf32>
    %c1_110 = arith.constant 1 : index
    %c3_111 = arith.constant 3 : index
    %c0_112 = arith.constant 0 : index
    %c0_113 = arith.constant 0 : index
    %158 = vector.load %arg2[%c1_110, %c3_111, %c0_112, %c0_113] : memref<7x7x16x1xf32, #tpu.memory_space<vmem>>, vector<1x1x16x1xf32>
    %159 = vector.shape_cast %158 : vector<1x1x16x1xf32> to vector<16x1xf32>
    %160 = vector.broadcast %159 : vector<16x1xf32> to vector<16x256xf32>
    %161 = arith.mulf %157, %160 : vector<16x256xf32>
    %162 = arith.addf %156, %161 : vector<16x256xf32>
    %163 = vector.extract_strided_slice %151 {offsets = [0, 32], sizes = [16, 256], strides = [1, 1]} : vector<16x352xf32> to vector<16x256xf32>
    %c2_114 = arith.constant 2 : index
    %c3_115 = arith.constant 3 : index
    %c0_116 = arith.constant 0 : index
    %c0_117 = arith.constant 0 : index
    %164 = vector.load %arg2[%c2_114, %c3_115, %c0_116, %c0_117] : memref<7x7x16x1xf32, #tpu.memory_space<vmem>>, vector<1x1x16x1xf32>
    %165 = vector.shape_cast %164 : vector<1x1x16x1xf32> to vector<16x1xf32>
    %166 = vector.broadcast %165 : vector<16x1xf32> to vector<16x256xf32>
    %167 = arith.mulf %163, %166 : vector<16x256xf32>
    %168 = arith.addf %162, %167 : vector<16x256xf32>
    %169 = vector.extract_strided_slice %151 {offsets = [0, 48], sizes = [16, 256], strides = [1, 1]} : vector<16x352xf32> to vector<16x256xf32>
    %c3_118 = arith.constant 3 : index
    %c3_119 = arith.constant 3 : index
    %c0_120 = arith.constant 0 : index
    %c0_121 = arith.constant 0 : index
    %170 = vector.load %arg2[%c3_118, %c3_119, %c0_120, %c0_121] : memref<7x7x16x1xf32, #tpu.memory_space<vmem>>, vector<1x1x16x1xf32>
    %171 = vector.shape_cast %170 : vector<1x1x16x1xf32> to vector<16x1xf32>
    %172 = vector.broadcast %171 : vector<16x1xf32> to vector<16x256xf32>
    %173 = arith.mulf %169, %172 : vector<16x256xf32>
    %174 = arith.addf %168, %173 : vector<16x256xf32>
    %175 = vector.extract_strided_slice %151 {offsets = [0, 64], sizes = [16, 256], strides = [1, 1]} : vector<16x352xf32> to vector<16x256xf32>
    %c4_122 = arith.constant 4 : index
    %c3_123 = arith.constant 3 : index
    %c0_124 = arith.constant 0 : index
    %c0_125 = arith.constant 0 : index
    %176 = vector.load %arg2[%c4_122, %c3_123, %c0_124, %c0_125] : memref<7x7x16x1xf32, #tpu.memory_space<vmem>>, vector<1x1x16x1xf32>
    %177 = vector.shape_cast %176 : vector<1x1x16x1xf32> to vector<16x1xf32>
    %178 = vector.broadcast %177 : vector<16x1xf32> to vector<16x256xf32>
    %179 = arith.mulf %175, %178 : vector<16x256xf32>
    %180 = arith.addf %174, %179 : vector<16x256xf32>
    %181 = vector.extract_strided_slice %151 {offsets = [0, 80], sizes = [16, 256], strides = [1, 1]} : vector<16x352xf32> to vector<16x256xf32>
    %c5_126 = arith.constant 5 : index
    %c3_127 = arith.constant 3 : index
    %c0_128 = arith.constant 0 : index
    %c0_129 = arith.constant 0 : index
    %182 = vector.load %arg2[%c5_126, %c3_127, %c0_128, %c0_129] : memref<7x7x16x1xf32, #tpu.memory_space<vmem>>, vector<1x1x16x1xf32>
    %183 = vector.shape_cast %182 : vector<1x1x16x1xf32> to vector<16x1xf32>
    %184 = vector.broadcast %183 : vector<16x1xf32> to vector<16x256xf32>
    %185 = arith.mulf %181, %184 : vector<16x256xf32>
    %186 = arith.addf %180, %185 : vector<16x256xf32>
    %187 = vector.extract_strided_slice %151 {offsets = [0, 96], sizes = [16, 256], strides = [1, 1]} : vector<16x352xf32> to vector<16x256xf32>
    %c6_130 = arith.constant 6 : index
    %c3_131 = arith.constant 3 : index
    %c0_132 = arith.constant 0 : index
    %c0_133 = arith.constant 0 : index
    %188 = vector.load %arg2[%c6_130, %c3_131, %c0_132, %c0_133] : memref<7x7x16x1xf32, #tpu.memory_space<vmem>>, vector<1x1x16x1xf32>
    %189 = vector.shape_cast %188 : vector<1x1x16x1xf32> to vector<16x1xf32>
    %190 = vector.broadcast %189 : vector<16x1xf32> to vector<16x256xf32>
    %191 = arith.mulf %187, %190 : vector<16x256xf32>
    %192 = arith.addf %186, %191 : vector<16x256xf32>
    %c3_134 = arith.constant 3 : index
    %c0_135 = arith.constant 0 : index
    %c0_136 = arith.constant 0 : index
    %193 = vector.load %arg3[%c3_134, %c0_135, %c0_136] : memref<7x1x256xf32, #tpu.memory_space<vmem>>, vector<1x1x256xf32>
    %194 = vector.shape_cast %193 : vector<1x1x256xf32> to vector<1x256xf32>
    %195 = vector.broadcast %194 : vector<1x256xf32> to vector<16x256xf32>
    %196 = arith.mulf %192, %195 : vector<16x256xf32>
    %c0_137 = arith.constant 0 : index
    %c0_138 = arith.constant 0 : index
    %c4_139 = arith.constant 4 : index
    %197 = vector.load %arg11[%c0_137, %c0_138, %c4_139] : memref<2x16x384xf32, #tpu.memory_space<vmem>>, vector<1x16x352xf32>
    %198 = vector.shape_cast %197 : vector<1x16x352xf32> to vector<16x352xf32>
    %199 = vector.extract_strided_slice %198 {offsets = [0, 0], sizes = [16, 256], strides = [1, 1]} : vector<16x352xf32> to vector<16x256xf32>
    %c0_140 = arith.constant 0 : index
    %c4_141 = arith.constant 4 : index
    %c0_142 = arith.constant 0 : index
    %c0_143 = arith.constant 0 : index
    %200 = vector.load %arg2[%c0_140, %c4_141, %c0_142, %c0_143] : memref<7x7x16x1xf32, #tpu.memory_space<vmem>>, vector<1x1x16x1xf32>
    %201 = vector.shape_cast %200 : vector<1x1x16x1xf32> to vector<16x1xf32>
    %202 = vector.broadcast %201 : vector<16x1xf32> to vector<16x256xf32>
    %203 = arith.mulf %199, %202 : vector<16x256xf32>
    %204 = vector.extract_strided_slice %198 {offsets = [0, 16], sizes = [16, 256], strides = [1, 1]} : vector<16x352xf32> to vector<16x256xf32>
    %c1_144 = arith.constant 1 : index
    %c4_145 = arith.constant 4 : index
    %c0_146 = arith.constant 0 : index
    %c0_147 = arith.constant 0 : index
    %205 = vector.load %arg2[%c1_144, %c4_145, %c0_146, %c0_147] : memref<7x7x16x1xf32, #tpu.memory_space<vmem>>, vector<1x1x16x1xf32>
    %206 = vector.shape_cast %205 : vector<1x1x16x1xf32> to vector<16x1xf32>
    %207 = vector.broadcast %206 : vector<16x1xf32> to vector<16x256xf32>
    %208 = arith.mulf %204, %207 : vector<16x256xf32>
    %209 = arith.addf %203, %208 : vector<16x256xf32>
    %210 = vector.extract_strided_slice %198 {offsets = [0, 32], sizes = [16, 256], strides = [1, 1]} : vector<16x352xf32> to vector<16x256xf32>
    %c2_148 = arith.constant 2 : index
    %c4_149 = arith.constant 4 : index
    %c0_150 = arith.constant 0 : index
    %c0_151 = arith.constant 0 : index
    %211 = vector.load %arg2[%c2_148, %c4_149, %c0_150, %c0_151] : memref<7x7x16x1xf32, #tpu.memory_space<vmem>>, vector<1x1x16x1xf32>
    %212 = vector.shape_cast %211 : vector<1x1x16x1xf32> to vector<16x1xf32>
    %213 = vector.broadcast %212 : vector<16x1xf32> to vector<16x256xf32>
    %214 = arith.mulf %210, %213 : vector<16x256xf32>
    %215 = arith.addf %209, %214 : vector<16x256xf32>
    %216 = vector.extract_strided_slice %198 {offsets = [0, 48], sizes = [16, 256], strides = [1, 1]} : vector<16x352xf32> to vector<16x256xf32>
    %c3_152 = arith.constant 3 : index
    %c4_153 = arith.constant 4 : index
    %c0_154 = arith.constant 0 : index
    %c0_155 = arith.constant 0 : index
    %217 = vector.load %arg2[%c3_152, %c4_153, %c0_154, %c0_155] : memref<7x7x16x1xf32, #tpu.memory_space<vmem>>, vector<1x1x16x1xf32>
    %218 = vector.shape_cast %217 : vector<1x1x16x1xf32> to vector<16x1xf32>
    %219 = vector.broadcast %218 : vector<16x1xf32> to vector<16x256xf32>
    %220 = arith.mulf %216, %219 : vector<16x256xf32>
    %221 = arith.addf %215, %220 : vector<16x256xf32>
    %222 = vector.extract_strided_slice %198 {offsets = [0, 64], sizes = [16, 256], strides = [1, 1]} : vector<16x352xf32> to vector<16x256xf32>
    %c4_156 = arith.constant 4 : index
    %c4_157 = arith.constant 4 : index
    %c0_158 = arith.constant 0 : index
    %c0_159 = arith.constant 0 : index
    %223 = vector.load %arg2[%c4_156, %c4_157, %c0_158, %c0_159] : memref<7x7x16x1xf32, #tpu.memory_space<vmem>>, vector<1x1x16x1xf32>
    %224 = vector.shape_cast %223 : vector<1x1x16x1xf32> to vector<16x1xf32>
    %225 = vector.broadcast %224 : vector<16x1xf32> to vector<16x256xf32>
    %226 = arith.mulf %222, %225 : vector<16x256xf32>
    %227 = arith.addf %221, %226 : vector<16x256xf32>
    %228 = vector.extract_strided_slice %198 {offsets = [0, 80], sizes = [16, 256], strides = [1, 1]} : vector<16x352xf32> to vector<16x256xf32>
    %c5_160 = arith.constant 5 : index
    %c4_161 = arith.constant 4 : index
    %c0_162 = arith.constant 0 : index
    %c0_163 = arith.constant 0 : index
    %229 = vector.load %arg2[%c5_160, %c4_161, %c0_162, %c0_163] : memref<7x7x16x1xf32, #tpu.memory_space<vmem>>, vector<1x1x16x1xf32>
    %230 = vector.shape_cast %229 : vector<1x1x16x1xf32> to vector<16x1xf32>
    %231 = vector.broadcast %230 : vector<16x1xf32> to vector<16x256xf32>
    %232 = arith.mulf %228, %231 : vector<16x256xf32>
    %233 = arith.addf %227, %232 : vector<16x256xf32>
    %234 = vector.extract_strided_slice %198 {offsets = [0, 96], sizes = [16, 256], strides = [1, 1]} : vector<16x352xf32> to vector<16x256xf32>
    %c6_164 = arith.constant 6 : index
    %c4_165 = arith.constant 4 : index
    %c0_166 = arith.constant 0 : index
    %c0_167 = arith.constant 0 : index
    %235 = vector.load %arg2[%c6_164, %c4_165, %c0_166, %c0_167] : memref<7x7x16x1xf32, #tpu.memory_space<vmem>>, vector<1x1x16x1xf32>
    %236 = vector.shape_cast %235 : vector<1x1x16x1xf32> to vector<16x1xf32>
    %237 = vector.broadcast %236 : vector<16x1xf32> to vector<16x256xf32>
    %238 = arith.mulf %234, %237 : vector<16x256xf32>
    %239 = arith.addf %233, %238 : vector<16x256xf32>
    %c4_168 = arith.constant 4 : index
    %c0_169 = arith.constant 0 : index
    %c0_170 = arith.constant 0 : index
    %240 = vector.load %arg3[%c4_168, %c0_169, %c0_170] : memref<7x1x256xf32, #tpu.memory_space<vmem>>, vector<1x1x256xf32>
    %241 = vector.shape_cast %240 : vector<1x1x256xf32> to vector<1x256xf32>
    %242 = vector.broadcast %241 : vector<1x256xf32> to vector<16x256xf32>
    %243 = arith.mulf %239, %242 : vector<16x256xf32>
    %244 = arith.addf %55, %243 : vector<16x256xf32>
    %c0_171 = arith.constant 0 : index
    %c0_172 = arith.constant 0 : index
    %c5_173 = arith.constant 5 : index
    %245 = vector.load %arg11[%c0_171, %c0_172, %c5_173] : memref<2x16x384xf32, #tpu.memory_space<vmem>>, vector<1x16x352xf32>
    %246 = vector.shape_cast %245 : vector<1x16x352xf32> to vector<16x352xf32>
    %247 = vector.extract_strided_slice %246 {offsets = [0, 0], sizes = [16, 256], strides = [1, 1]} : vector<16x352xf32> to vector<16x256xf32>
    %c0_174 = arith.constant 0 : index
    %c5_175 = arith.constant 5 : index
    %c0_176 = arith.constant 0 : index
    %c0_177 = arith.constant 0 : index
    %248 = vector.load %arg2[%c0_174, %c5_175, %c0_176, %c0_177] : memref<7x7x16x1xf32, #tpu.memory_space<vmem>>, vector<1x1x16x1xf32>
    %249 = vector.shape_cast %248 : vector<1x1x16x1xf32> to vector<16x1xf32>
    %250 = vector.broadcast %249 : vector<16x1xf32> to vector<16x256xf32>
    %251 = arith.mulf %247, %250 : vector<16x256xf32>
    %252 = vector.extract_strided_slice %246 {offsets = [0, 16], sizes = [16, 256], strides = [1, 1]} : vector<16x352xf32> to vector<16x256xf32>
    %c1_178 = arith.constant 1 : index
    %c5_179 = arith.constant 5 : index
    %c0_180 = arith.constant 0 : index
    %c0_181 = arith.constant 0 : index
    %253 = vector.load %arg2[%c1_178, %c5_179, %c0_180, %c0_181] : memref<7x7x16x1xf32, #tpu.memory_space<vmem>>, vector<1x1x16x1xf32>
    %254 = vector.shape_cast %253 : vector<1x1x16x1xf32> to vector<16x1xf32>
    %255 = vector.broadcast %254 : vector<16x1xf32> to vector<16x256xf32>
    %256 = arith.mulf %252, %255 : vector<16x256xf32>
    %257 = arith.addf %251, %256 : vector<16x256xf32>
    %258 = vector.extract_strided_slice %246 {offsets = [0, 32], sizes = [16, 256], strides = [1, 1]} : vector<16x352xf32> to vector<16x256xf32>
    %c2_182 = arith.constant 2 : index
    %c5_183 = arith.constant 5 : index
    %c0_184 = arith.constant 0 : index
    %c0_185 = arith.constant 0 : index
    %259 = vector.load %arg2[%c2_182, %c5_183, %c0_184, %c0_185] : memref<7x7x16x1xf32, #tpu.memory_space<vmem>>, vector<1x1x16x1xf32>
    %260 = vector.shape_cast %259 : vector<1x1x16x1xf32> to vector<16x1xf32>
    %261 = vector.broadcast %260 : vector<16x1xf32> to vector<16x256xf32>
    %262 = arith.mulf %258, %261 : vector<16x256xf32>
    %263 = arith.addf %257, %262 : vector<16x256xf32>
    %264 = vector.extract_strided_slice %246 {offsets = [0, 48], sizes = [16, 256], strides = [1, 1]} : vector<16x352xf32> to vector<16x256xf32>
    %c3_186 = arith.constant 3 : index
    %c5_187 = arith.constant 5 : index
    %c0_188 = arith.constant 0 : index
    %c0_189 = arith.constant 0 : index
    %265 = vector.load %arg2[%c3_186, %c5_187, %c0_188, %c0_189] : memref<7x7x16x1xf32, #tpu.memory_space<vmem>>, vector<1x1x16x1xf32>
    %266 = vector.shape_cast %265 : vector<1x1x16x1xf32> to vector<16x1xf32>
    %267 = vector.broadcast %266 : vector<16x1xf32> to vector<16x256xf32>
    %268 = arith.mulf %264, %267 : vector<16x256xf32>
    %269 = arith.addf %263, %268 : vector<16x256xf32>
    %270 = vector.extract_strided_slice %246 {offsets = [0, 64], sizes = [16, 256], strides = [1, 1]} : vector<16x352xf32> to vector<16x256xf32>
    %c4_190 = arith.constant 4 : index
    %c5_191 = arith.constant 5 : index
    %c0_192 = arith.constant 0 : index
    %c0_193 = arith.constant 0 : index
    %271 = vector.load %arg2[%c4_190, %c5_191, %c0_192, %c0_193] : memref<7x7x16x1xf32, #tpu.memory_space<vmem>>, vector<1x1x16x1xf32>
    %272 = vector.shape_cast %271 : vector<1x1x16x1xf32> to vector<16x1xf32>
    %273 = vector.broadcast %272 : vector<16x1xf32> to vector<16x256xf32>
    %274 = arith.mulf %270, %273 : vector<16x256xf32>
    %275 = arith.addf %269, %274 : vector<16x256xf32>
    %276 = vector.extract_strided_slice %246 {offsets = [0, 80], sizes = [16, 256], strides = [1, 1]} : vector<16x352xf32> to vector<16x256xf32>
    %c5_194 = arith.constant 5 : index
    %c5_195 = arith.constant 5 : index
    %c0_196 = arith.constant 0 : index
    %c0_197 = arith.constant 0 : index
    %277 = vector.load %arg2[%c5_194, %c5_195, %c0_196, %c0_197] : memref<7x7x16x1xf32, #tpu.memory_space<vmem>>, vector<1x1x16x1xf32>
    %278 = vector.shape_cast %277 : vector<1x1x16x1xf32> to vector<16x1xf32>
    %279 = vector.broadcast %278 : vector<16x1xf32> to vector<16x256xf32>
    %280 = arith.mulf %276, %279 : vector<16x256xf32>
    %281 = arith.addf %275, %280 : vector<16x256xf32>
    %282 = vector.extract_strided_slice %246 {offsets = [0, 96], sizes = [16, 256], strides = [1, 1]} : vector<16x352xf32> to vector<16x256xf32>
    %c6_198 = arith.constant 6 : index
    %c5_199 = arith.constant 5 : index
    %c0_200 = arith.constant 0 : index
    %c0_201 = arith.constant 0 : index
    %283 = vector.load %arg2[%c6_198, %c5_199, %c0_200, %c0_201] : memref<7x7x16x1xf32, #tpu.memory_space<vmem>>, vector<1x1x16x1xf32>
    %284 = vector.shape_cast %283 : vector<1x1x16x1xf32> to vector<16x1xf32>
    %285 = vector.broadcast %284 : vector<16x1xf32> to vector<16x256xf32>
    %286 = arith.mulf %282, %285 : vector<16x256xf32>
    %287 = arith.addf %281, %286 : vector<16x256xf32>
    %c5_202 = arith.constant 5 : index
    %c0_203 = arith.constant 0 : index
    %c0_204 = arith.constant 0 : index
    %288 = vector.load %arg3[%c5_202, %c0_203, %c0_204] : memref<7x1x256xf32, #tpu.memory_space<vmem>>, vector<1x1x256xf32>
    %289 = vector.shape_cast %288 : vector<1x1x256xf32> to vector<1x256xf32>
    %290 = vector.broadcast %289 : vector<1x256xf32> to vector<16x256xf32>
    %291 = arith.mulf %287, %290 : vector<16x256xf32>
    %292 = arith.addf %102, %291 : vector<16x256xf32>
    %c0_205 = arith.constant 0 : index
    %c0_206 = arith.constant 0 : index
    %c6_207 = arith.constant 6 : index
    %293 = vector.load %arg11[%c0_205, %c0_206, %c6_207] : memref<2x16x384xf32, #tpu.memory_space<vmem>>, vector<1x16x352xf32>
    %294 = vector.shape_cast %293 : vector<1x16x352xf32> to vector<16x352xf32>
    %295 = vector.extract_strided_slice %294 {offsets = [0, 0], sizes = [16, 256], strides = [1, 1]} : vector<16x352xf32> to vector<16x256xf32>
    %c0_208 = arith.constant 0 : index
    %c6_209 = arith.constant 6 : index
    %c0_210 = arith.constant 0 : index
    %c0_211 = arith.constant 0 : index
    %296 = vector.load %arg2[%c0_208, %c6_209, %c0_210, %c0_211] : memref<7x7x16x1xf32, #tpu.memory_space<vmem>>, vector<1x1x16x1xf32>
    %297 = vector.shape_cast %296 : vector<1x1x16x1xf32> to vector<16x1xf32>
    %298 = vector.broadcast %297 : vector<16x1xf32> to vector<16x256xf32>
    %299 = arith.mulf %295, %298 : vector<16x256xf32>
    %300 = vector.extract_strided_slice %294 {offsets = [0, 16], sizes = [16, 256], strides = [1, 1]} : vector<16x352xf32> to vector<16x256xf32>
    %c1_212 = arith.constant 1 : index
    %c6_213 = arith.constant 6 : index
    %c0_214 = arith.constant 0 : index
    %c0_215 = arith.constant 0 : index
    %301 = vector.load %arg2[%c1_212, %c6_213, %c0_214, %c0_215] : memref<7x7x16x1xf32, #tpu.memory_space<vmem>>, vector<1x1x16x1xf32>
    %302 = vector.shape_cast %301 : vector<1x1x16x1xf32> to vector<16x1xf32>
    %303 = vector.broadcast %302 : vector<16x1xf32> to vector<16x256xf32>
    %304 = arith.mulf %300, %303 : vector<16x256xf32>
    %305 = arith.addf %299, %304 : vector<16x256xf32>
    %306 = vector.extract_strided_slice %294 {offsets = [0, 32], sizes = [16, 256], strides = [1, 1]} : vector<16x352xf32> to vector<16x256xf32>
    %c2_216 = arith.constant 2 : index
    %c6_217 = arith.constant 6 : index
    %c0_218 = arith.constant 0 : index
    %c0_219 = arith.constant 0 : index
    %307 = vector.load %arg2[%c2_216, %c6_217, %c0_218, %c0_219] : memref<7x7x16x1xf32, #tpu.memory_space<vmem>>, vector<1x1x16x1xf32>
    %308 = vector.shape_cast %307 : vector<1x1x16x1xf32> to vector<16x1xf32>
    %309 = vector.broadcast %308 : vector<16x1xf32> to vector<16x256xf32>
    %310 = arith.mulf %306, %309 : vector<16x256xf32>
    %311 = arith.addf %305, %310 : vector<16x256xf32>
    %312 = vector.extract_strided_slice %294 {offsets = [0, 48], sizes = [16, 256], strides = [1, 1]} : vector<16x352xf32> to vector<16x256xf32>
    %c3_220 = arith.constant 3 : index
    %c6_221 = arith.constant 6 : index
    %c0_222 = arith.constant 0 : index
    %c0_223 = arith.constant 0 : index
    %313 = vector.load %arg2[%c3_220, %c6_221, %c0_222, %c0_223] : memref<7x7x16x1xf32, #tpu.memory_space<vmem>>, vector<1x1x16x1xf32>
    %314 = vector.shape_cast %313 : vector<1x1x16x1xf32> to vector<16x1xf32>
    %315 = vector.broadcast %314 : vector<16x1xf32> to vector<16x256xf32>
    %316 = arith.mulf %312, %315 : vector<16x256xf32>
    %317 = arith.addf %311, %316 : vector<16x256xf32>
    %318 = vector.extract_strided_slice %294 {offsets = [0, 64], sizes = [16, 256], strides = [1, 1]} : vector<16x352xf32> to vector<16x256xf32>
    %c4_224 = arith.constant 4 : index
    %c6_225 = arith.constant 6 : index
    %c0_226 = arith.constant 0 : index
    %c0_227 = arith.constant 0 : index
    %319 = vector.load %arg2[%c4_224, %c6_225, %c0_226, %c0_227] : memref<7x7x16x1xf32, #tpu.memory_space<vmem>>, vector<1x1x16x1xf32>
    %320 = vector.shape_cast %319 : vector<1x1x16x1xf32> to vector<16x1xf32>
    %321 = vector.broadcast %320 : vector<16x1xf32> to vector<16x256xf32>
    %322 = arith.mulf %318, %321 : vector<16x256xf32>
    %323 = arith.addf %317, %322 : vector<16x256xf32>
    %324 = vector.extract_strided_slice %294 {offsets = [0, 80], sizes = [16, 256], strides = [1, 1]} : vector<16x352xf32> to vector<16x256xf32>
    %c5_228 = arith.constant 5 : index
    %c6_229 = arith.constant 6 : index
    %c0_230 = arith.constant 0 : index
    %c0_231 = arith.constant 0 : index
    %325 = vector.load %arg2[%c5_228, %c6_229, %c0_230, %c0_231] : memref<7x7x16x1xf32, #tpu.memory_space<vmem>>, vector<1x1x16x1xf32>
    %326 = vector.shape_cast %325 : vector<1x1x16x1xf32> to vector<16x1xf32>
    %327 = vector.broadcast %326 : vector<16x1xf32> to vector<16x256xf32>
    %328 = arith.mulf %324, %327 : vector<16x256xf32>
    %329 = arith.addf %323, %328 : vector<16x256xf32>
    %330 = vector.extract_strided_slice %294 {offsets = [0, 96], sizes = [16, 256], strides = [1, 1]} : vector<16x352xf32> to vector<16x256xf32>
    %c6_232 = arith.constant 6 : index
    %c6_233 = arith.constant 6 : index
    %c0_234 = arith.constant 0 : index
    %c0_235 = arith.constant 0 : index
    %331 = vector.load %arg2[%c6_232, %c6_233, %c0_234, %c0_235] : memref<7x7x16x1xf32, #tpu.memory_space<vmem>>, vector<1x1x16x1xf32>
    %332 = vector.shape_cast %331 : vector<1x1x16x1xf32> to vector<16x1xf32>
    %333 = vector.broadcast %332 : vector<16x1xf32> to vector<16x256xf32>
    %334 = arith.mulf %330, %333 : vector<16x256xf32>
    %335 = arith.addf %329, %334 : vector<16x256xf32>
    %c6_236 = arith.constant 6 : index
    %c0_237 = arith.constant 0 : index
    %c0_238 = arith.constant 0 : index
    %336 = vector.load %arg3[%c6_236, %c0_237, %c0_238] : memref<7x1x256xf32, #tpu.memory_space<vmem>>, vector<1x1x256xf32>
    %337 = vector.shape_cast %336 : vector<1x1x256xf32> to vector<1x256xf32>
    %338 = vector.broadcast %337 : vector<1x256xf32> to vector<16x256xf32>
    %339 = arith.mulf %335, %338 : vector<16x256xf32>
    %340 = arith.addf %149, %339 : vector<16x256xf32>
    %341 = arith.addf %244, %292 : vector<16x256xf32>
    %342 = arith.addf %340, %196 : vector<16x256xf32>
    %343 = arith.addf %341, %342 : vector<16x256xf32>
    %cst_239 = arith.constant dense<0.000000e+00> : vector<256xf32>
    %344 = vector.multi_reduction <add>, %343, %cst_239 [0] : vector<16x256xf32> to vector<256xf32>
    %345 = vector.shape_cast %344 : vector<256xf32> to vector<1x256xf32>
    %cst_240 = arith.constant 1.600000e+01 : f32
    %346 = vector.broadcast %cst_240 : f32 to vector<1x256xf32>
    %347 = arith.divf %345, %346 : vector<1x256xf32>
    %348 = vector.broadcast %347 : vector<1x256xf32> to vector<16x256xf32>
    %349 = arith.subf %343, %348 : vector<16x256xf32>
    %350 = arith.mulf %349, %349 : vector<16x256xf32>
    %cst_241 = arith.constant dense<0.000000e+00> : vector<256xf32>
    %351 = vector.multi_reduction <add>, %350, %cst_241 [0] : vector<16x256xf32> to vector<256xf32>
    %352 = vector.shape_cast %351 : vector<256xf32> to vector<1x256xf32>
    %cst_242 = arith.constant 1.600000e+01 : f32
    %353 = vector.broadcast %cst_242 : f32 to vector<1x256xf32>
    %354 = arith.divf %352, %353 : vector<1x256xf32>
    %355 = vector.broadcast %347 : vector<1x256xf32> to vector<16x256xf32>
    %356 = arith.subf %343, %355 : vector<16x256xf32>
    %cst_243 = arith.constant 9.99999974E-6 : f32
    %357 = vector.broadcast %cst_243 : f32 to vector<1x256xf32>
    %358 = arith.addf %354, %357 : vector<1x256xf32>
    %359 = math.rsqrt %358 : vector<1x256xf32>
    %360 = vector.broadcast %359 : vector<1x256xf32> to vector<16x256xf32>
    %361 = arith.mulf %356, %360 : vector<16x256xf32>
    %c0_244 = arith.constant 0 : index
    %c0_245 = arith.constant 0 : index
    %362 = vector.load %arg4[%c0_244, %c0_245] : memref<48x16xf32, #tpu.memory_space<vmem>>, vector<48x16xf32>
    %cst_246 = arith.constant dense<0.000000e+00> : vector<48x256xf32>
    %363 = tpu.matmul %362, %361, %cst_246 {dimension_numbers = #tpu.dot_dimension_numbers<[1], [0], [0], [1], [0, 0, 1, 1], [], []>} : vector<48x16xf32>, vector<16x256xf32>, vector<48x256xf32> -> vector<48x256xf32>
    %c0_247 = arith.constant 0 : index
    %c0_248 = arith.constant 0 : index
    %364 = vector.load %arg5[%c0_247, %c0_248] : memref<48x1xf32, #tpu.memory_space<vmem>>, vector<48x1xf32>
    %365 = vector.broadcast %364 : vector<48x1xf32> to vector<48x256xf32>
    %366 = arith.addf %363, %365 : vector<48x256xf32>
    %cst_249 = arith.constant 5.000000e-01 : f32
    %367 = vector.broadcast %cst_249 : f32 to vector<48x256xf32>
    %368 = arith.mulf %367, %366 : vector<48x256xf32>
    %cst_250 = arith.constant 0.707106769 : f32
    %369 = vector.broadcast %cst_250 : f32 to vector<48x256xf32>
    %370 = arith.mulf %366, %369 : vector<48x256xf32>
    %371 = math.erf %370 : vector<48x256xf32>
    %cst_251 = arith.constant 1.000000e+00 : f32
    %372 = vector.broadcast %cst_251 : f32 to vector<48x256xf32>
    %373 = arith.addf %372, %371 : vector<48x256xf32>
    %374 = arith.mulf %368, %373 : vector<48x256xf32>
    %375 = arith.mulf %374, %374 : vector<48x256xf32>
    %cst_252 = arith.constant dense<0.000000e+00> : vector<48xf32>
    %376 = vector.multi_reduction <add>, %375, %cst_252 [1] : vector<48x256xf32> to vector<48xf32>
    %377 = vector.shape_cast %376 : vector<48xf32> to vector<48x1xf32>
    %378 = math.sqrt %377 : vector<48x1xf32>
    %cst_253 = arith.constant dense<0.000000e+00> : vector<1xf32>
    %379 = vector.multi_reduction <add>, %378, %cst_253 [0] : vector<48x1xf32> to vector<1xf32>
    %380 = vector.shape_cast %379 : vector<1xf32> to vector<1x1xf32>
    %cst_254 = arith.constant 4.800000e+01 : f32
    %381 = vector.broadcast %cst_254 : f32 to vector<1x1xf32>
    %382 = arith.divf %380, %381 : vector<1x1xf32>
    %cst_255 = arith.constant 9.99999997E-7 : f32
    %383 = vector.broadcast %cst_255 : f32 to vector<1x1xf32>
    %384 = arith.addf %382, %383 : vector<1x1xf32>
    %385 = vector.broadcast %384 : vector<1x1xf32> to vector<48x1xf32>
    %386 = arith.divf %378, %385 : vector<48x1xf32>
    %c0_256 = arith.constant 0 : index
    %c0_257 = arith.constant 0 : index
    %387 = vector.load %arg6[%c0_256, %c0_257] : memref<48x1xf32, #tpu.memory_space<vmem>>, vector<48x1xf32>
    %388 = vector.broadcast %386 : vector<48x1xf32> to vector<48x256xf32>
    %389 = arith.mulf %374, %388 : vector<48x256xf32>
    %390 = vector.broadcast %387 : vector<48x1xf32> to vector<48x256xf32>
    %391 = arith.mulf %390, %389 : vector<48x256xf32>
    %c0_258 = arith.constant 0 : index
    %c0_259 = arith.constant 0 : index
    %392 = vector.load %arg7[%c0_258, %c0_259] : memref<48x1xf32, #tpu.memory_space<vmem>>, vector<48x1xf32>
    %393 = vector.broadcast %392 : vector<48x1xf32> to vector<48x256xf32>
    %394 = arith.addf %391, %393 : vector<48x256xf32>
    %395 = arith.addf %394, %374 : vector<48x256xf32>
    %c0_260 = arith.constant 0 : index
    %c0_261 = arith.constant 0 : index
    %396 = vector.load %arg8[%c0_260, %c0_261] : memref<16x48xf32, #tpu.memory_space<vmem>>, vector<16x48xf32>
    %cst_262 = arith.constant dense<0.000000e+00> : vector<16x256xf32>
    %397 = tpu.matmul %396, %395, %cst_262 {dimension_numbers = #tpu.dot_dimension_numbers<[1], [0], [0], [1], [0, 0, 1, 1], [], []>} : vector<16x48xf32>, vector<48x256xf32>, vector<16x256xf32> -> vector<16x256xf32>
    %c0_263 = arith.constant 0 : index
    %c0_264 = arith.constant 0 : index
    %398 = vector.load %arg9[%c0_263, %c0_264] : memref<16x1xf32, #tpu.memory_space<vmem>>, vector<16x1xf32>
    %399 = vector.broadcast %398 : vector<16x1xf32> to vector<16x256xf32>
    %400 = arith.addf %397, %399 : vector<16x256xf32>
    %c0_265 = arith.constant 0 : index
    %c0_266 = arith.constant 0 : index
    %c0_267 = arith.constant 0 : index
    %401 = vector.load %arg10[%c0_265, %c0_266, %c0_267] : memref<2x16x256xf32, #tpu.memory_space<vmem>>, vector<1x16x256xf32>
    %402 = vector.shape_cast %401 : vector<1x16x256xf32> to vector<16x256xf32>
    %403 = vector.shape_cast %400 : vector<16x256xf32> to vector<1x16x256xf32>
    tpu.vector_store %arg10[%c0_265, %c0_266, %c0_267], %403 {strides = array<i32>} : memref<2x16x256xf32, #tpu.memory_space<vmem>>, vector<1x16x256xf32>,
    %cst_268 = arith.constant 0.000000e+00 : f32
    %404 = vector.broadcast %cst_268 : f32 to vector<16x384xf32>
    %c1_269 = arith.constant 1 : index
    %c0_270 = arith.constant 0 : index
    %c0_271 = arith.constant 0 : index
    %405 = vector.load %arg11[%c1_269, %c0_270, %c0_271] : memref<2x16x384xf32, #tpu.memory_space<vmem>>, vector<1x16x384xf32>
    %406 = vector.shape_cast %405 : vector<1x16x384xf32> to vector<16x384xf32>
    %407 = vector.shape_cast %404 : vector<16x384xf32> to vector<1x16x384xf32>
    tpu.vector_store %arg11[%c1_269, %c0_270, %c0_271], %407 {strides = array<i32>} : memref<2x16x384xf32, #tpu.memory_space<vmem>>, vector<1x16x384xf32>,
    %c1_272 = arith.constant 1 : index
    %c0_273 = arith.constant 0 : index
    %c0_274 = arith.constant 0 : index
    %408 = vector.load %arg1[%c1_272, %c0_273, %c0_274] : memref<2x16x256xf32, #tpu.memory_space<vmem>>, vector<1x16x256xf32>
    %409 = vector.shape_cast %408 : vector<1x16x256xf32> to vector<16x256xf32>
    %c1_275 = arith.constant 1 : index
    %c0_276 = arith.constant 0 : index
    %c51_277 = arith.constant 51 : index
    %410 = vector.load %arg11[%c1_275, %c0_276, %c51_277] : memref<2x16x384xf32, #tpu.memory_space<vmem>>, vector<1x16x256xf32>
    %411 = vector.shape_cast %410 : vector<1x16x256xf32> to vector<16x256xf32>
    %412 = vector.shape_cast %409 : vector<16x256xf32> to vector<1x16x256xf32>
    tpu.vector_store %arg11[%c1_275, %c0_276, %c51_277], %412 {strides = array<i32>} : memref<2x16x384xf32, #tpu.memory_space<vmem>>, vector<1x16x256xf32>,
    %c1_278 = arith.constant 1 : index
    %c0_279 = arith.constant 0 : index
    %c0_280 = arith.constant 0 : index
    %413 = vector.load %arg11[%c1_278, %c0_279, %c0_280] : memref<2x16x384xf32, #tpu.memory_space<vmem>>, vector<1x16x352xf32>
    %414 = vector.shape_cast %413 : vector<1x16x352xf32> to vector<16x352xf32>
    %415 = vector.extract_strided_slice %414 {offsets = [0, 0], sizes = [16, 256], strides = [1, 1]} : vector<16x352xf32> to vector<16x256xf32>
    %c0_281 = arith.constant 0 : index
    %c0_282 = arith.constant 0 : index
    %c0_283 = arith.constant 0 : index
    %c0_284 = arith.constant 0 : index
    %416 = vector.load %arg2[%c0_281, %c0_282, %c0_283, %c0_284] : memref<7x7x16x1xf32, #tpu.memory_space<vmem>>, vector<1x1x16x1xf32>
    %417 = vector.shape_cast %416 : vector<1x1x16x1xf32> to vector<16x1xf32>
    %418 = vector.broadcast %417 : vector<16x1xf32> to vector<16x256xf32>
    %419 = arith.mulf %415, %418 : vector<16x256xf32>
    %420 = vector.extract_strided_slice %414 {offsets = [0, 16], sizes = [16, 256], strides = [1, 1]} : vector<16x352xf32> to vector<16x256xf32>
    %c1_285 = arith.constant 1 : index
    %c0_286 = arith.constant 0 : index
    %c0_287 = arith.constant 0 : index
    %c0_288 = arith.constant 0 : index
    %421 = vector.load %arg2[%c1_285, %c0_286, %c0_287, %c0_288] : memref<7x7x16x1xf32, #tpu.memory_space<vmem>>, vector<1x1x16x1xf32>
    %422 = vector.shape_cast %421 : vector<1x1x16x1xf32> to vector<16x1xf32>
    %423 = vector.broadcast %422 : vector<16x1xf32> to vector<16x256xf32>
    %424 = arith.mulf %420, %423 : vector<16x256xf32>
    %425 = arith.addf %419, %424 : vector<16x256xf32>
    %426 = vector.extract_strided_slice %414 {offsets = [0, 32], sizes = [16, 256], strides = [1, 1]} : vector<16x352xf32> to vector<16x256xf32>
    %c2_289 = arith.constant 2 : index
    %c0_290 = arith.constant 0 : index
    %c0_291 = arith.constant 0 : index
    %c0_292 = arith.constant 0 : index
    %427 = vector.load %arg2[%c2_289, %c0_290, %c0_291, %c0_292] : memref<7x7x16x1xf32, #tpu.memory_space<vmem>>, vector<1x1x16x1xf32>
    %428 = vector.shape_cast %427 : vector<1x1x16x1xf32> to vector<16x1xf32>
    %429 = vector.broadcast %428 : vector<16x1xf32> to vector<16x256xf32>
    %430 = arith.mulf %426, %429 : vector<16x256xf32>
    %431 = arith.addf %425, %430 : vector<16x256xf32>
    %432 = vector.extract_strided_slice %414 {offsets = [0, 48], sizes = [16, 256], strides = [1, 1]} : vector<16x352xf32> to vector<16x256xf32>
    %c3_293 = arith.constant 3 : index
    %c0_294 = arith.constant 0 : index
    %c0_295 = arith.constant 0 : index
    %c0_296 = arith.constant 0 : index
    %433 = vector.load %arg2[%c3_293, %c0_294, %c0_295, %c0_296] : memref<7x7x16x1xf32, #tpu.memory_space<vmem>>, vector<1x1x16x1xf32>
    %434 = vector.shape_cast %433 : vector<1x1x16x1xf32> to vector<16x1xf32>
    %435 = vector.broadcast %434 : vector<16x1xf32> to vector<16x256xf32>
    %436 = arith.mulf %432, %435 : vector<16x256xf32>
    %437 = arith.addf %431, %436 : vector<16x256xf32>
    %438 = vector.extract_strided_slice %414 {offsets = [0, 64], sizes = [16, 256], strides = [1, 1]} : vector<16x352xf32> to vector<16x256xf32>
    %c4_297 = arith.constant 4 : index
    %c0_298 = arith.constant 0 : index
    %c0_299 = arith.constant 0 : index
    %c0_300 = arith.constant 0 : index
    %439 = vector.load %arg2[%c4_297, %c0_298, %c0_299, %c0_300] : memref<7x7x16x1xf32, #tpu.memory_space<vmem>>, vector<1x1x16x1xf32>
    %440 = vector.shape_cast %439 : vector<1x1x16x1xf32> to vector<16x1xf32>
    %441 = vector.broadcast %440 : vector<16x1xf32> to vector<16x256xf32>
    %442 = arith.mulf %438, %441 : vector<16x256xf32>
    %443 = arith.addf %437, %442 : vector<16x256xf32>
    %444 = vector.extract_strided_slice %414 {offsets = [0, 80], sizes = [16, 256], strides = [1, 1]} : vector<16x352xf32> to vector<16x256xf32>
    %c5_301 = arith.constant 5 : index
    %c0_302 = arith.constant 0 : index
    %c0_303 = arith.constant 0 : index
    %c0_304 = arith.constant 0 : index
    %445 = vector.load %arg2[%c5_301, %c0_302, %c0_303, %c0_304] : memref<7x7x16x1xf32, #tpu.memory_space<vmem>>, vector<1x1x16x1xf32>
    %446 = vector.shape_cast %445 : vector<1x1x16x1xf32> to vector<16x1xf32>
    %447 = vector.broadcast %446 : vector<16x1xf32> to vector<16x256xf32>
    %448 = arith.mulf %444, %447 : vector<16x256xf32>
    %449 = arith.addf %443, %448 : vector<16x256xf32>
    %450 = vector.extract_strided_slice %414 {offsets = [0, 96], sizes = [16, 256], strides = [1, 1]} : vector<16x352xf32> to vector<16x256xf32>
    %c6_305 = arith.constant 6 : index
    %c0_306 = arith.constant 0 : index
    %c0_307 = arith.constant 0 : index
    %c0_308 = arith.constant 0 : index
    %451 = vector.load %arg2[%c6_305, %c0_306, %c0_307, %c0_308] : memref<7x7x16x1xf32, #tpu.memory_space<vmem>>, vector<1x1x16x1xf32>
    %452 = vector.shape_cast %451 : vector<1x1x16x1xf32> to vector<16x1xf32>
    %453 = vector.broadcast %452 : vector<16x1xf32> to vector<16x256xf32>
    %454 = arith.mulf %450, %453 : vector<16x256xf32>
    %455 = arith.addf %449, %454 : vector<16x256xf32>
    %c0_309 = arith.constant 0 : index
    %c0_310 = arith.constant 0 : index
    %c0_311 = arith.constant 0 : index
    %456 = vector.load %arg3[%c0_309, %c0_310, %c0_311] : memref<7x1x256xf32, #tpu.memory_space<vmem>>, vector<1x1x256xf32>
    %457 = vector.shape_cast %456 : vector<1x1x256xf32> to vector<1x256xf32>
    %458 = vector.broadcast %457 : vector<1x256xf32> to vector<16x256xf32>
    %459 = arith.mulf %455, %458 : vector<16x256xf32>
    %c1_312 = arith.constant 1 : index
    %c0_313 = arith.constant 0 : index
    %c1_314 = arith.constant 1 : index
    %460 = vector.load %arg11[%c1_312, %c0_313, %c1_314] : memref<2x16x384xf32, #tpu.memory_space<vmem>>, vector<1x16x352xf32>
    %461 = vector.shape_cast %460 : vector<1x16x352xf32> to vector<16x352xf32>
    %462 = vector.extract_strided_slice %461 {offsets = [0, 0], sizes = [16, 256], strides = [1, 1]} : vector<16x352xf32> to vector<16x256xf32>
    %c0_315 = arith.constant 0 : index
    %c1_316 = arith.constant 1 : index
    %c0_317 = arith.constant 0 : index
    %c0_318 = arith.constant 0 : index
    %463 = vector.load %arg2[%c0_315, %c1_316, %c0_317, %c0_318] : memref<7x7x16x1xf32, #tpu.memory_space<vmem>>, vector<1x1x16x1xf32>
    %464 = vector.shape_cast %463 : vector<1x1x16x1xf32> to vector<16x1xf32>
    %465 = vector.broadcast %464 : vector<16x1xf32> to vector<16x256xf32>
    %466 = arith.mulf %462, %465 : vector<16x256xf32>
    %467 = vector.extract_strided_slice %461 {offsets = [0, 16], sizes = [16, 256], strides = [1, 1]} : vector<16x352xf32> to vector<16x256xf32>
    %c1_319 = arith.constant 1 : index
    %c1_320 = arith.constant 1 : index
    %c0_321 = arith.constant 0 : index
    %c0_322 = arith.constant 0 : index
    %468 = vector.load %arg2[%c1_319, %c1_320, %c0_321, %c0_322] : memref<7x7x16x1xf32, #tpu.memory_space<vmem>>, vector<1x1x16x1xf32>
    %469 = vector.shape_cast %468 : vector<1x1x16x1xf32> to vector<16x1xf32>
    %470 = vector.broadcast %469 : vector<16x1xf32> to vector<16x256xf32>
    %471 = arith.mulf %467, %470 : vector<16x256xf32>
    %472 = arith.addf %466, %471 : vector<16x256xf32>
    %473 = vector.extract_strided_slice %461 {offsets = [0, 32], sizes = [16, 256], strides = [1, 1]} : vector<16x352xf32> to vector<16x256xf32>
    %c2_323 = arith.constant 2 : index
    %c1_324 = arith.constant 1 : index
    %c0_325 = arith.constant 0 : index
    %c0_326 = arith.constant 0 : index
    %474 = vector.load %arg2[%c2_323, %c1_324, %c0_325, %c0_326] : memref<7x7x16x1xf32, #tpu.memory_space<vmem>>, vector<1x1x16x1xf32>
    %475 = vector.shape_cast %474 : vector<1x1x16x1xf32> to vector<16x1xf32>
    %476 = vector.broadcast %475 : vector<16x1xf32> to vector<16x256xf32>
    %477 = arith.mulf %473, %476 : vector<16x256xf32>
    %478 = arith.addf %472, %477 : vector<16x256xf32>
    %479 = vector.extract_strided_slice %461 {offsets = [0, 48], sizes = [16, 256], strides = [1, 1]} : vector<16x352xf32> to vector<16x256xf32>
    %c3_327 = arith.constant 3 : index
    %c1_328 = arith.constant 1 : index
    %c0_329 = arith.constant 0 : index
    %c0_330 = arith.constant 0 : index
    %480 = vector.load %arg2[%c3_327, %c1_328, %c0_329, %c0_330] : memref<7x7x16x1xf32, #tpu.memory_space<vmem>>, vector<1x1x16x1xf32>
    %481 = vector.shape_cast %480 : vector<1x1x16x1xf32> to vector<16x1xf32>
    %482 = vector.broadcast %481 : vector<16x1xf32> to vector<16x256xf32>
    %483 = arith.mulf %479, %482 : vector<16x256xf32>
    %484 = arith.addf %478, %483 : vector<16x256xf32>
    %485 = vector.extract_strided_slice %461 {offsets = [0, 64], sizes = [16, 256], strides = [1, 1]} : vector<16x352xf32> to vector<16x256xf32>
    %c4_331 = arith.constant 4 : index
    %c1_332 = arith.constant 1 : index
    %c0_333 = arith.constant 0 : index
    %c0_334 = arith.constant 0 : index
    %486 = vector.load %arg2[%c4_331, %c1_332, %c0_333, %c0_334] : memref<7x7x16x1xf32, #tpu.memory_space<vmem>>, vector<1x1x16x1xf32>
    %487 = vector.shape_cast %486 : vector<1x1x16x1xf32> to vector<16x1xf32>
    %488 = vector.broadcast %487 : vector<16x1xf32> to vector<16x256xf32>
    %489 = arith.mulf %485, %488 : vector<16x256xf32>
    %490 = arith.addf %484, %489 : vector<16x256xf32>
    %491 = vector.extract_strided_slice %461 {offsets = [0, 80], sizes = [16, 256], strides = [1, 1]} : vector<16x352xf32> to vector<16x256xf32>
    %c5_335 = arith.constant 5 : index
    %c1_336 = arith.constant 1 : index
    %c0_337 = arith.constant 0 : index
    %c0_338 = arith.constant 0 : index
    %492 = vector.load %arg2[%c5_335, %c1_336, %c0_337, %c0_338] : memref<7x7x16x1xf32, #tpu.memory_space<vmem>>, vector<1x1x16x1xf32>
    %493 = vector.shape_cast %492 : vector<1x1x16x1xf32> to vector<16x1xf32>
    %494 = vector.broadcast %493 : vector<16x1xf32> to vector<16x256xf32>
    %495 = arith.mulf %491, %494 : vector<16x256xf32>
    %496 = arith.addf %490, %495 : vector<16x256xf32>
    %497 = vector.extract_strided_slice %461 {offsets = [0, 96], sizes = [16, 256], strides = [1, 1]} : vector<16x352xf32> to vector<16x256xf32>
    %c6_339 = arith.constant 6 : index
    %c1_340 = arith.constant 1 : index
    %c0_341 = arith.constant 0 : index
    %c0_342 = arith.constant 0 : index
    %498 = vector.load %arg2[%c6_339, %c1_340, %c0_341, %c0_342] : memref<7x7x16x1xf32, #tpu.memory_space<vmem>>, vector<1x1x16x1xf32>
    %499 = vector.shape_cast %498 : vector<1x1x16x1xf32> to vector<16x1xf32>
    %500 = vector.broadcast %499 : vector<16x1xf32> to vector<16x256xf32>
    %501 = arith.mulf %497, %500 : vector<16x256xf32>
    %502 = arith.addf %496, %501 : vector<16x256xf32>
    %c1_343 = arith.constant 1 : index
    %c0_344 = arith.constant 0 : index
    %c0_345 = arith.constant 0 : index
    %503 = vector.load %arg3[%c1_343, %c0_344, %c0_345] : memref<7x1x256xf32, #tpu.memory_space<vmem>>, vector<1x1x256xf32>
    %504 = vector.shape_cast %503 : vector<1x1x256xf32> to vector<1x256xf32>
    %505 = vector.broadcast %504 : vector<1x256xf32> to vector<16x256xf32>
    %506 = arith.mulf %502, %505 : vector<16x256xf32>
    %c1_346 = arith.constant 1 : index
    %c0_347 = arith.constant 0 : index
    %c2_348 = arith.constant 2 : index
    %507 = vector.load %arg11[%c1_346, %c0_347, %c2_348] : memref<2x16x384xf32, #tpu.memory_space<vmem>>, vector<1x16x352xf32>
    %508 = vector.shape_cast %507 : vector<1x16x352xf32> to vector<16x352xf32>
    %509 = vector.extract_strided_slice %508 {offsets = [0, 0], sizes = [16, 256], strides = [1, 1]} : vector<16x352xf32> to vector<16x256xf32>
    %c0_349 = arith.constant 0 : index
    %c2_350 = arith.constant 2 : index
    %c0_351 = arith.constant 0 : index
    %c0_352 = arith.constant 0 : index
    %510 = vector.load %arg2[%c0_349, %c2_350, %c0_351, %c0_352] : memref<7x7x16x1xf32, #tpu.memory_space<vmem>>, vector<1x1x16x1xf32>
    %511 = vector.shape_cast %510 : vector<1x1x16x1xf32> to vector<16x1xf32>
    %512 = vector.broadcast %511 : vector<16x1xf32> to vector<16x256xf32>
    %513 = arith.mulf %509, %512 : vector<16x256xf32>
    %514 = vector.extract_strided_slice %508 {offsets = [0, 16], sizes = [16, 256], strides = [1, 1]} : vector<16x352xf32> to vector<16x256xf32>
    %c1_353 = arith.constant 1 : index
    %c2_354 = arith.constant 2 : index
    %c0_355 = arith.constant 0 : index
    %c0_356 = arith.constant 0 : index
    %515 = vector.load %arg2[%c1_353, %c2_354, %c0_355, %c0_356] : memref<7x7x16x1xf32, #tpu.memory_space<vmem>>, vector<1x1x16x1xf32>
    %516 = vector.shape_cast %515 : vector<1x1x16x1xf32> to vector<16x1xf32>
    %517 = vector.broadcast %516 : vector<16x1xf32> to vector<16x256xf32>
    %518 = arith.mulf %514, %517 : vector<16x256xf32>
    %519 = arith.addf %513, %518 : vector<16x256xf32>
    %520 = vector.extract_strided_slice %508 {offsets = [0, 32], sizes = [16, 256], strides = [1, 1]} : vector<16x352xf32> to vector<16x256xf32>
    %c2_357 = arith.constant 2 : index
    %c2_358 = arith.constant 2 : index
    %c0_359 = arith.constant 0 : index
    %c0_360 = arith.constant 0 : index
    %521 = vector.load %arg2[%c2_357, %c2_358, %c0_359, %c0_360] : memref<7x7x16x1xf32, #tpu.memory_space<vmem>>, vector<1x1x16x1xf32>
    %522 = vector.shape_cast %521 : vector<1x1x16x1xf32> to vector<16x1xf32>
    %523 = vector.broadcast %522 : vector<16x1xf32> to vector<16x256xf32>
    %524 = arith.mulf %520, %523 : vector<16x256xf32>
    %525 = arith.addf %519, %524 : vector<16x256xf32>
    %526 = vector.extract_strided_slice %508 {offsets = [0, 48], sizes = [16, 256], strides = [1, 1]} : vector<16x352xf32> to vector<16x256xf32>
    %c3_361 = arith.constant 3 : index
    %c2_362 = arith.constant 2 : index
    %c0_363 = arith.constant 0 : index
    %c0_364 = arith.constant 0 : index
    %527 = vector.load %arg2[%c3_361, %c2_362, %c0_363, %c0_364] : memref<7x7x16x1xf32, #tpu.memory_space<vmem>>, vector<1x1x16x1xf32>
    %528 = vector.shape_cast %527 : vector<1x1x16x1xf32> to vector<16x1xf32>
    %529 = vector.broadcast %528 : vector<16x1xf32> to vector<16x256xf32>
    %530 = arith.mulf %526, %529 : vector<16x256xf32>
    %531 = arith.addf %525, %530 : vector<16x256xf32>
    %532 = vector.extract_strided_slice %508 {offsets = [0, 64], sizes = [16, 256], strides = [1, 1]} : vector<16x352xf32> to vector<16x256xf32>
    %c4_365 = arith.constant 4 : index
    %c2_366 = arith.constant 2 : index
    %c0_367 = arith.constant 0 : index
    %c0_368 = arith.constant 0 : index
    %533 = vector.load %arg2[%c4_365, %c2_366, %c0_367, %c0_368] : memref<7x7x16x1xf32, #tpu.memory_space<vmem>>, vector<1x1x16x1xf32>
    %534 = vector.shape_cast %533 : vector<1x1x16x1xf32> to vector<16x1xf32>
    %535 = vector.broadcast %534 : vector<16x1xf32> to vector<16x256xf32>
    %536 = arith.mulf %532, %535 : vector<16x256xf32>
    %537 = arith.addf %531, %536 : vector<16x256xf32>
    %538 = vector.extract_strided_slice %508 {offsets = [0, 80], sizes = [16, 256], strides = [1, 1]} : vector<16x352xf32> to vector<16x256xf32>
    %c5_369 = arith.constant 5 : index
    %c2_370 = arith.constant 2 : index
    %c0_371 = arith.constant 0 : index
    %c0_372 = arith.constant 0 : index
    %539 = vector.load %arg2[%c5_369, %c2_370, %c0_371, %c0_372] : memref<7x7x16x1xf32, #tpu.memory_space<vmem>>, vector<1x1x16x1xf32>
    %540 = vector.shape_cast %539 : vector<1x1x16x1xf32> to vector<16x1xf32>
    %541 = vector.broadcast %540 : vector<16x1xf32> to vector<16x256xf32>
    %542 = arith.mulf %538, %541 : vector<16x256xf32>
    %543 = arith.addf %537, %542 : vector<16x256xf32>
    %544 = vector.extract_strided_slice %508 {offsets = [0, 96], sizes = [16, 256], strides = [1, 1]} : vector<16x352xf32> to vector<16x256xf32>
    %c6_373 = arith.constant 6 : index
    %c2_374 = arith.constant 2 : index
    %c0_375 = arith.constant 0 : index
    %c0_376 = arith.constant 0 : index
    %545 = vector.load %arg2[%c6_373, %c2_374, %c0_375, %c0_376] : memref<7x7x16x1xf32, #tpu.memory_space<vmem>>, vector<1x1x16x1xf32>
    %546 = vector.shape_cast %545 : vector<1x1x16x1xf32> to vector<16x1xf32>
    %547 = vector.broadcast %546 : vector<16x1xf32> to vector<16x256xf32>
    %548 = arith.mulf %544, %547 : vector<16x256xf32>
    %549 = arith.addf %543, %548 : vector<16x256xf32>
    %c2_377 = arith.constant 2 : index
    %c0_378 = arith.constant 0 : index
    %c0_379 = arith.constant 0 : index
    %550 = vector.load %arg3[%c2_377, %c0_378, %c0_379] : memref<7x1x256xf32, #tpu.memory_space<vmem>>, vector<1x1x256xf32>
    %551 = vector.shape_cast %550 : vector<1x1x256xf32> to vector<1x256xf32>
    %552 = vector.broadcast %551 : vector<1x256xf32> to vector<16x256xf32>
    %553 = arith.mulf %549, %552 : vector<16x256xf32>
    %c1_380 = arith.constant 1 : index
    %c0_381 = arith.constant 0 : index
    %c3_382 = arith.constant 3 : index
    %554 = vector.load %arg11[%c1_380, %c0_381, %c3_382] : memref<2x16x384xf32, #tpu.memory_space<vmem>>, vector<1x16x352xf32>
    %555 = vector.shape_cast %554 : vector<1x16x352xf32> to vector<16x352xf32>
    %556 = vector.extract_strided_slice %555 {offsets = [0, 0], sizes = [16, 256], strides = [1, 1]} : vector<16x352xf32> to vector<16x256xf32>
    %c0_383 = arith.constant 0 : index
    %c3_384 = arith.constant 3 : index
    %c0_385 = arith.constant 0 : index
    %c0_386 = arith.constant 0 : index
    %557 = vector.load %arg2[%c0_383, %c3_384, %c0_385, %c0_386] : memref<7x7x16x1xf32, #tpu.memory_space<vmem>>, vector<1x1x16x1xf32>
    %558 = vector.shape_cast %557 : vector<1x1x16x1xf32> to vector<16x1xf32>
    %559 = vector.broadcast %558 : vector<16x1xf32> to vector<16x256xf32>
    %560 = arith.mulf %556, %559 : vector<16x256xf32>
    %561 = vector.extract_strided_slice %555 {offsets = [0, 16], sizes = [16, 256], strides = [1, 1]} : vector<16x352xf32> to vector<16x256xf32>
    %c1_387 = arith.constant 1 : index
    %c3_388 = arith.constant 3 : index
    %c0_389 = arith.constant 0 : index
    %c0_390 = arith.constant 0 : index
    %562 = vector.load %arg2[%c1_387, %c3_388, %c0_389, %c0_390] : memref<7x7x16x1xf32, #tpu.memory_space<vmem>>, vector<1x1x16x1xf32>
    %563 = vector.shape_cast %562 : vector<1x1x16x1xf32> to vector<16x1xf32>
    %564 = vector.broadcast %563 : vector<16x1xf32> to vector<16x256xf32>
    %565 = arith.mulf %561, %564 : vector<16x256xf32>
    %566 = arith.addf %560, %565 : vector<16x256xf32>
    %567 = vector.extract_strided_slice %555 {offsets = [0, 32], sizes = [16, 256], strides = [1, 1]} : vector<16x352xf32> to vector<16x256xf32>
    %c2_391 = arith.constant 2 : index
    %c3_392 = arith.constant 3 : index
    %c0_393 = arith.constant 0 : index
    %c0_394 = arith.constant 0 : index
    %568 = vector.load %arg2[%c2_391, %c3_392, %c0_393, %c0_394] : memref<7x7x16x1xf32, #tpu.memory_space<vmem>>, vector<1x1x16x1xf32>
    %569 = vector.shape_cast %568 : vector<1x1x16x1xf32> to vector<16x1xf32>
    %570 = vector.broadcast %569 : vector<16x1xf32> to vector<16x256xf32>
    %571 = arith.mulf %567, %570 : vector<16x256xf32>
    %572 = arith.addf %566, %571 : vector<16x256xf32>
    %573 = vector.extract_strided_slice %555 {offsets = [0, 48], sizes = [16, 256], strides = [1, 1]} : vector<16x352xf32> to vector<16x256xf32>
    %c3_395 = arith.constant 3 : index
    %c3_396 = arith.constant 3 : index
    %c0_397 = arith.constant 0 : index
    %c0_398 = arith.constant 0 : index
    %574 = vector.load %arg2[%c3_395, %c3_396, %c0_397, %c0_398] : memref<7x7x16x1xf32, #tpu.memory_space<vmem>>, vector<1x1x16x1xf32>
    %575 = vector.shape_cast %574 : vector<1x1x16x1xf32> to vector<16x1xf32>
    %576 = vector.broadcast %575 : vector<16x1xf32> to vector<16x256xf32>
    %577 = arith.mulf %573, %576 : vector<16x256xf32>
    %578 = arith.addf %572, %577 : vector<16x256xf32>
    %579 = vector.extract_strided_slice %555 {offsets = [0, 64], sizes = [16, 256], strides = [1, 1]} : vector<16x352xf32> to vector<16x256xf32>
    %c4_399 = arith.constant 4 : index
    %c3_400 = arith.constant 3 : index
    %c0_401 = arith.constant 0 : index
    %c0_402 = arith.constant 0 : index
    %580 = vector.load %arg2[%c4_399, %c3_400, %c0_401, %c0_402] : memref<7x7x16x1xf32, #tpu.memory_space<vmem>>, vector<1x1x16x1xf32>
    %581 = vector.shape_cast %580 : vector<1x1x16x1xf32> to vector<16x1xf32>
    %582 = vector.broadcast %581 : vector<16x1xf32> to vector<16x256xf32>
    %583 = arith.mulf %579, %582 : vector<16x256xf32>
    %584 = arith.addf %578, %583 : vector<16x256xf32>
    %585 = vector.extract_strided_slice %555 {offsets = [0, 80], sizes = [16, 256], strides = [1, 1]} : vector<16x352xf32> to vector<16x256xf32>
    %c5_403 = arith.constant 5 : index
    %c3_404 = arith.constant 3 : index
    %c0_405 = arith.constant 0 : index
    %c0_406 = arith.constant 0 : index
    %586 = vector.load %arg2[%c5_403, %c3_404, %c0_405, %c0_406] : memref<7x7x16x1xf32, #tpu.memory_space<vmem>>, vector<1x1x16x1xf32>
    %587 = vector.shape_cast %586 : vector<1x1x16x1xf32> to vector<16x1xf32>
    %588 = vector.broadcast %587 : vector<16x1xf32> to vector<16x256xf32>
    %589 = arith.mulf %585, %588 : vector<16x256xf32>
    %590 = arith.addf %584, %589 : vector<16x256xf32>
    %591 = vector.extract_strided_slice %555 {offsets = [0, 96], sizes = [16, 256], strides = [1, 1]} : vector<16x352xf32> to vector<16x256xf32>
    %c6_407 = arith.constant 6 : index
    %c3_408 = arith.constant 3 : index
    %c0_409 = arith.constant 0 : index
    %c0_410 = arith.constant 0 : index
    %592 = vector.load %arg2[%c6_407, %c3_408, %c0_409, %c0_410] : memref<7x7x16x1xf32, #tpu.memory_space<vmem>>, vector<1x1x16x1xf32>
    %593 = vector.shape_cast %592 : vector<1x1x16x1xf32> to vector<16x1xf32>
    %594 = vector.broadcast %593 : vector<16x1xf32> to vector<16x256xf32>
    %595 = arith.mulf %591, %594 : vector<16x256xf32>
    %596 = arith.addf %590, %595 : vector<16x256xf32>
    %c3_411 = arith.constant 3 : index
    %c0_412 = arith.constant 0 : index
    %c0_413 = arith.constant 0 : index
    %597 = vector.load %arg3[%c3_411, %c0_412, %c0_413] : memref<7x1x256xf32, #tpu.memory_space<vmem>>, vector<1x1x256xf32>
    %598 = vector.shape_cast %597 : vector<1x1x256xf32> to vector<1x256xf32>
    %599 = vector.broadcast %598 : vector<1x256xf32> to vector<16x256xf32>
    %600 = arith.mulf %596, %599 : vector<16x256xf32>
    %c1_414 = arith.constant 1 : index
    %c0_415 = arith.constant 0 : index
    %c4_416 = arith.constant 4 : index
    %601 = vector.load %arg11[%c1_414, %c0_415, %c4_416] : memref<2x16x384xf32, #tpu.memory_space<vmem>>, vector<1x16x352xf32>
    %602 = vector.shape_cast %601 : vector<1x16x352xf32> to vector<16x352xf32>
    %603 = vector.extract_strided_slice %602 {offsets = [0, 0], sizes = [16, 256], strides = [1, 1]} : vector<16x352xf32> to vector<16x256xf32>
    %c0_417 = arith.constant 0 : index
    %c4_418 = arith.constant 4 : index
    %c0_419 = arith.constant 0 : index
    %c0_420 = arith.constant 0 : index
    %604 = vector.load %arg2[%c0_417, %c4_418, %c0_419, %c0_420] : memref<7x7x16x1xf32, #tpu.memory_space<vmem>>, vector<1x1x16x1xf32>
    %605 = vector.shape_cast %604 : vector<1x1x16x1xf32> to vector<16x1xf32>
    %606 = vector.broadcast %605 : vector<16x1xf32> to vector<16x256xf32>
    %607 = arith.mulf %603, %606 : vector<16x256xf32>
    %608 = vector.extract_strided_slice %602 {offsets = [0, 16], sizes = [16, 256], strides = [1, 1]} : vector<16x352xf32> to vector<16x256xf32>
    %c1_421 = arith.constant 1 : index
    %c4_422 = arith.constant 4 : index
    %c0_423 = arith.constant 0 : index
    %c0_424 = arith.constant 0 : index
    %609 = vector.load %arg2[%c1_421, %c4_422, %c0_423, %c0_424] : memref<7x7x16x1xf32, #tpu.memory_space<vmem>>, vector<1x1x16x1xf32>
    %610 = vector.shape_cast %609 : vector<1x1x16x1xf32> to vector<16x1xf32>
    %611 = vector.broadcast %610 : vector<16x1xf32> to vector<16x256xf32>
    %612 = arith.mulf %608, %611 : vector<16x256xf32>
    %613 = arith.addf %607, %612 : vector<16x256xf32>
    %614 = vector.extract_strided_slice %602 {offsets = [0, 32], sizes = [16, 256], strides = [1, 1]} : vector<16x352xf32> to vector<16x256xf32>
    %c2_425 = arith.constant 2 : index
    %c4_426 = arith.constant 4 : index
    %c0_427 = arith.constant 0 : index
    %c0_428 = arith.constant 0 : index
    %615 = vector.load %arg2[%c2_425, %c4_426, %c0_427, %c0_428] : memref<7x7x16x1xf32, #tpu.memory_space<vmem>>, vector<1x1x16x1xf32>
    %616 = vector.shape_cast %615 : vector<1x1x16x1xf32> to vector<16x1xf32>
    %617 = vector.broadcast %616 : vector<16x1xf32> to vector<16x256xf32>
    %618 = arith.mulf %614, %617 : vector<16x256xf32>
    %619 = arith.addf %613, %618 : vector<16x256xf32>
    %620 = vector.extract_strided_slice %602 {offsets = [0, 48], sizes = [16, 256], strides = [1, 1]} : vector<16x352xf32> to vector<16x256xf32>
    %c3_429 = arith.constant 3 : index
    %c4_430 = arith.constant 4 : index
    %c0_431 = arith.constant 0 : index
    %c0_432 = arith.constant 0 : index
    %621 = vector.load %arg2[%c3_429, %c4_430, %c0_431, %c0_432] : memref<7x7x16x1xf32, #tpu.memory_space<vmem>>, vector<1x1x16x1xf32>
    %622 = vector.shape_cast %621 : vector<1x1x16x1xf32> to vector<16x1xf32>
    %623 = vector.broadcast %622 : vector<16x1xf32> to vector<16x256xf32>
    %624 = arith.mulf %620, %623 : vector<16x256xf32>
    %625 = arith.addf %619, %624 : vector<16x256xf32>
    %626 = vector.extract_strided_slice %602 {offsets = [0, 64], sizes = [16, 256], strides = [1, 1]} : vector<16x352xf32> to vector<16x256xf32>
    %c4_433 = arith.constant 4 : index
    %c4_434 = arith.constant 4 : index
    %c0_435 = arith.constant 0 : index
    %c0_436 = arith.constant 0 : index
    %627 = vector.load %arg2[%c4_433, %c4_434, %c0_435, %c0_436] : memref<7x7x16x1xf32, #tpu.memory_space<vmem>>, vector<1x1x16x1xf32>
    %628 = vector.shape_cast %627 : vector<1x1x16x1xf32> to vector<16x1xf32>
    %629 = vector.broadcast %628 : vector<16x1xf32> to vector<16x256xf32>
    %630 = arith.mulf %626, %629 : vector<16x256xf32>
    %631 = arith.addf %625, %630 : vector<16x256xf32>
    %632 = vector.extract_strided_slice %602 {offsets = [0, 80], sizes = [16, 256], strides = [1, 1]} : vector<16x352xf32> to vector<16x256xf32>
    %c5_437 = arith.constant 5 : index
    %c4_438 = arith.constant 4 : index
    %c0_439 = arith.constant 0 : index
    %c0_440 = arith.constant 0 : index
    %633 = vector.load %arg2[%c5_437, %c4_438, %c0_439, %c0_440] : memref<7x7x16x1xf32, #tpu.memory_space<vmem>>, vector<1x1x16x1xf32>
    %634 = vector.shape_cast %633 : vector<1x1x16x1xf32> to vector<16x1xf32>
    %635 = vector.broadcast %634 : vector<16x1xf32> to vector<16x256xf32>
    %636 = arith.mulf %632, %635 : vector<16x256xf32>
    %637 = arith.addf %631, %636 : vector<16x256xf32>
    %638 = vector.extract_strided_slice %602 {offsets = [0, 96], sizes = [16, 256], strides = [1, 1]} : vector<16x352xf32> to vector<16x256xf32>
    %c6_441 = arith.constant 6 : index
    %c4_442 = arith.constant 4 : index
    %c0_443 = arith.constant 0 : index
    %c0_444 = arith.constant 0 : index
    %639 = vector.load %arg2[%c6_441, %c4_442, %c0_443, %c0_444] : memref<7x7x16x1xf32, #tpu.memory_space<vmem>>, vector<1x1x16x1xf32>
    %640 = vector.shape_cast %639 : vector<1x1x16x1xf32> to vector<16x1xf32>
    %641 = vector.broadcast %640 : vector<16x1xf32> to vector<16x256xf32>
    %642 = arith.mulf %638, %641 : vector<16x256xf32>
    %643 = arith.addf %637, %642 : vector<16x256xf32>
    %c4_445 = arith.constant 4 : index
    %c0_446 = arith.constant 0 : index
    %c0_447 = arith.constant 0 : index
    %644 = vector.load %arg3[%c4_445, %c0_446, %c0_447] : memref<7x1x256xf32, #tpu.memory_space<vmem>>, vector<1x1x256xf32>
    %645 = vector.shape_cast %644 : vector<1x1x256xf32> to vector<1x256xf32>
    %646 = vector.broadcast %645 : vector<1x256xf32> to vector<16x256xf32>
    %647 = arith.mulf %643, %646 : vector<16x256xf32>
    %648 = arith.addf %459, %647 : vector<16x256xf32>
    %c1_448 = arith.constant 1 : index
    %c0_449 = arith.constant 0 : index
    %c5_450 = arith.constant 5 : index
    %649 = vector.load %arg11[%c1_448, %c0_449, %c5_450] : memref<2x16x384xf32, #tpu.memory_space<vmem>>, vector<1x16x352xf32>
    %650 = vector.shape_cast %649 : vector<1x16x352xf32> to vector<16x352xf32>
    %651 = vector.extract_strided_slice %650 {offsets = [0, 0], sizes = [16, 256], strides = [1, 1]} : vector<16x352xf32> to vector<16x256xf32>
    %c0_451 = arith.constant 0 : index
    %c5_452 = arith.constant 5 : index
    %c0_453 = arith.constant 0 : index
    %c0_454 = arith.constant 0 : index
    %652 = vector.load %arg2[%c0_451, %c5_452, %c0_453, %c0_454] : memref<7x7x16x1xf32, #tpu.memory_space<vmem>>, vector<1x1x16x1xf32>
    %653 = vector.shape_cast %652 : vector<1x1x16x1xf32> to vector<16x1xf32>
    %654 = vector.broadcast %653 : vector<16x1xf32> to vector<16x256xf32>
    %655 = arith.mulf %651, %654 : vector<16x256xf32>
    %656 = vector.extract_strided_slice %650 {offsets = [0, 16], sizes = [16, 256], strides = [1, 1]} : vector<16x352xf32> to vector<16x256xf32>
    %c1_455 = arith.constant 1 : index
    %c5_456 = arith.constant 5 : index
    %c0_457 = arith.constant 0 : index
    %c0_458 = arith.constant 0 : index
    %657 = vector.load %arg2[%c1_455, %c5_456, %c0_457, %c0_458] : memref<7x7x16x1xf32, #tpu.memory_space<vmem>>, vector<1x1x16x1xf32>
    %658 = vector.shape_cast %657 : vector<1x1x16x1xf32> to vector<16x1xf32>
    %659 = vector.broadcast %658 : vector<16x1xf32> to vector<16x256xf32>
    %660 = arith.mulf %656, %659 : vector<16x256xf32>
    %661 = arith.addf %655, %660 : vector<16x256xf32>
    %662 = vector.extract_strided_slice %650 {offsets = [0, 32], sizes = [16, 256], strides = [1, 1]} : vector<16x352xf32> to vector<16x256xf32>
    %c2_459 = arith.constant 2 : index
    %c5_460 = arith.constant 5 : index
    %c0_461 = arith.constant 0 : index
    %c0_462 = arith.constant 0 : index
    %663 = vector.load %arg2[%c2_459, %c5_460, %c0_461, %c0_462] : memref<7x7x16x1xf32, #tpu.memory_space<vmem>>, vector<1x1x16x1xf32>
    %664 = vector.shape_cast %663 : vector<1x1x16x1xf32> to vector<16x1xf32>
    %665 = vector.broadcast %664 : vector<16x1xf32> to vector<16x256xf32>
    %666 = arith.mulf %662, %665 : vector<16x256xf32>
    %667 = arith.addf %661, %666 : vector<16x256xf32>
    %668 = vector.extract_strided_slice %650 {offsets = [0, 48], sizes = [16, 256], strides = [1, 1]} : vector<16x352xf32> to vector<16x256xf32>
    %c3_463 = arith.constant 3 : index
    %c5_464 = arith.constant 5 : index
    %c0_465 = arith.constant 0 : index
    %c0_466 = arith.constant 0 : index
    %669 = vector.load %arg2[%c3_463, %c5_464, %c0_465, %c0_466] : memref<7x7x16x1xf32, #tpu.memory_space<vmem>>, vector<1x1x16x1xf32>
    %670 = vector.shape_cast %669 : vector<1x1x16x1xf32> to vector<16x1xf32>
    %671 = vector.broadcast %670 : vector<16x1xf32> to vector<16x256xf32>
    %672 = arith.mulf %668, %671 : vector<16x256xf32>
    %673 = arith.addf %667, %672 : vector<16x256xf32>
    %674 = vector.extract_strided_slice %650 {offsets = [0, 64], sizes = [16, 256], strides = [1, 1]} : vector<16x352xf32> to vector<16x256xf32>
    %c4_467 = arith.constant 4 : index
    %c5_468 = arith.constant 5 : index
    %c0_469 = arith.constant 0 : index
    %c0_470 = arith.constant 0 : index
    %675 = vector.load %arg2[%c4_467, %c5_468, %c0_469, %c0_470] : memref<7x7x16x1xf32, #tpu.memory_space<vmem>>, vector<1x1x16x1xf32>
    %676 = vector.shape_cast %675 : vector<1x1x16x1xf32> to vector<16x1xf32>
    %677 = vector.broadcast %676 : vector<16x1xf32> to vector<16x256xf32>
    %678 = arith.mulf %674, %677 : vector<16x256xf32>
    %679 = arith.addf %673, %678 : vector<16x256xf32>
    %680 = vector.extract_strided_slice %650 {offsets = [0, 80], sizes = [16, 256], strides = [1, 1]} : vector<16x352xf32> to vector<16x256xf32>
    %c5_471 = arith.constant 5 : index
    %c5_472 = arith.constant 5 : index
    %c0_473 = arith.constant 0 : index
    %c0_474 = arith.constant 0 : index
    %681 = vector.load %arg2[%c5_471, %c5_472, %c0_473, %c0_474] : memref<7x7x16x1xf32, #tpu.memory_space<vmem>>, vector<1x1x16x1xf32>
    %682 = vector.shape_cast %681 : vector<1x1x16x1xf32> to vector<16x1xf32>
    %683 = vector.broadcast %682 : vector<16x1xf32> to vector<16x256xf32>
    %684 = arith.mulf %680, %683 : vector<16x256xf32>
    %685 = arith.addf %679, %684 : vector<16x256xf32>
    %686 = vector.extract_strided_slice %650 {offsets = [0, 96], sizes = [16, 256], strides = [1, 1]} : vector<16x352xf32> to vector<16x256xf32>
    %c6_475 = arith.constant 6 : index
    %c5_476 = arith.constant 5 : index
    %c0_477 = arith.constant 0 : index
    %c0_478 = arith.constant 0 : index
    %687 = vector.load %arg2[%c6_475, %c5_476, %c0_477, %c0_478] : memref<7x7x16x1xf32, #tpu.memory_space<vmem>>, vector<1x1x16x1xf32>
    %688 = vector.shape_cast %687 : vector<1x1x16x1xf32> to vector<16x1xf32>
    %689 = vector.broadcast %688 : vector<16x1xf32> to vector<16x256xf32>
    %690 = arith.mulf %686, %689 : vector<16x256xf32>
    %691 = arith.addf %685, %690 : vector<16x256xf32>
    %c5_479 = arith.constant 5 : index
    %c0_480 = arith.constant 0 : index
    %c0_481 = arith.constant 0 : index
    %692 = vector.load %arg3[%c5_479, %c0_480, %c0_481] : memref<7x1x256xf32, #tpu.memory_space<vmem>>, vector<1x1x256xf32>
    %693 = vector.shape_cast %692 : vector<1x1x256xf32> to vector<1x256xf32>
    %694 = vector.broadcast %693 : vector<1x256xf32> to vector<16x256xf32>
    %695 = arith.mulf %691, %694 : vector<16x256xf32>
    %696 = arith.addf %506, %695 : vector<16x256xf32>
    %c1_482 = arith.constant 1 : index
    %c0_483 = arith.constant 0 : index
    %c6_484 = arith.constant 6 : index
    %697 = vector.load %arg11[%c1_482, %c0_483, %c6_484] : memref<2x16x384xf32, #tpu.memory_space<vmem>>, vector<1x16x352xf32>
    %698 = vector.shape_cast %697 : vector<1x16x352xf32> to vector<16x352xf32>
    %699 = vector.extract_strided_slice %698 {offsets = [0, 0], sizes = [16, 256], strides = [1, 1]} : vector<16x352xf32> to vector<16x256xf32>
    %c0_485 = arith.constant 0 : index
    %c6_486 = arith.constant 6 : index
    %c0_487 = arith.constant 0 : index
    %c0_488 = arith.constant 0 : index
    %700 = vector.load %arg2[%c0_485, %c6_486, %c0_487, %c0_488] : memref<7x7x16x1xf32, #tpu.memory_space<vmem>>, vector<1x1x16x1xf32>
    %701 = vector.shape_cast %700 : vector<1x1x16x1xf32> to vector<16x1xf32>
    %702 = vector.broadcast %701 : vector<16x1xf32> to vector<16x256xf32>
    %703 = arith.mulf %699, %702 : vector<16x256xf32>
    %704 = vector.extract_strided_slice %698 {offsets = [0, 16], sizes = [16, 256], strides = [1, 1]} : vector<16x352xf32> to vector<16x256xf32>
    %c1_489 = arith.constant 1 : index
    %c6_490 = arith.constant 6 : index
    %c0_491 = arith.constant 0 : index
    %c0_492 = arith.constant 0 : index
    %705 = vector.load %arg2[%c1_489, %c6_490, %c0_491, %c0_492] : memref<7x7x16x1xf32, #tpu.memory_space<vmem>>, vector<1x1x16x1xf32>
    %706 = vector.shape_cast %705 : vector<1x1x16x1xf32> to vector<16x1xf32>
    %707 = vector.broadcast %706 : vector<16x1xf32> to vector<16x256xf32>
    %708 = arith.mulf %704, %707 : vector<16x256xf32>
    %709 = arith.addf %703, %708 : vector<16x256xf32>
    %710 = vector.extract_strided_slice %698 {offsets = [0, 32], sizes = [16, 256], strides = [1, 1]} : vector<16x352xf32> to vector<16x256xf32>
    %c2_493 = arith.constant 2 : index
    %c6_494 = arith.constant 6 : index
    %c0_495 = arith.constant 0 : index
    %c0_496 = arith.constant 0 : index
    %711 = vector.load %arg2[%c2_493, %c6_494, %c0_495, %c0_496] : memref<7x7x16x1xf32, #tpu.memory_space<vmem>>, vector<1x1x16x1xf32>
    %712 = vector.shape_cast %711 : vector<1x1x16x1xf32> to vector<16x1xf32>
    %713 = vector.broadcast %712 : vector<16x1xf32> to vector<16x256xf32>
    %714 = arith.mulf %710, %713 : vector<16x256xf32>
    %715 = arith.addf %709, %714 : vector<16x256xf32>
    %716 = vector.extract_strided_slice %698 {offsets = [0, 48], sizes = [16, 256], strides = [1, 1]} : vector<16x352xf32> to vector<16x256xf32>
    %c3_497 = arith.constant 3 : index
    %c6_498 = arith.constant 6 : index
    %c0_499 = arith.constant 0 : index
    %c0_500 = arith.constant 0 : index
    %717 = vector.load %arg2[%c3_497, %c6_498, %c0_499, %c0_500] : memref<7x7x16x1xf32, #tpu.memory_space<vmem>>, vector<1x1x16x1xf32>
    %718 = vector.shape_cast %717 : vector<1x1x16x1xf32> to vector<16x1xf32>
    %719 = vector.broadcast %718 : vector<16x1xf32> to vector<16x256xf32>
    %720 = arith.mulf %716, %719 : vector<16x256xf32>
    %721 = arith.addf %715, %720 : vector<16x256xf32>
    %722 = vector.extract_strided_slice %698 {offsets = [0, 64], sizes = [16, 256], strides = [1, 1]} : vector<16x352xf32> to vector<16x256xf32>
    %c4_501 = arith.constant 4 : index
    %c6_502 = arith.constant 6 : index
    %c0_503 = arith.constant 0 : index
    %c0_504 = arith.constant 0 : index
    %723 = vector.load %arg2[%c4_501, %c6_502, %c0_503, %c0_504] : memref<7x7x16x1xf32, #tpu.memory_space<vmem>>, vector<1x1x16x1xf32>
    %724 = vector.shape_cast %723 : vector<1x1x16x1xf32> to vector<16x1xf32>
    %725 = vector.broadcast %724 : vector<16x1xf32> to vector<16x256xf32>
    %726 = arith.mulf %722, %725 : vector<16x256xf32>
    %727 = arith.addf %721, %726 : vector<16x256xf32>
    %728 = vector.extract_strided_slice %698 {offsets = [0, 80], sizes = [16, 256], strides = [1, 1]} : vector<16x352xf32> to vector<16x256xf32>
    %c5_505 = arith.constant 5 : index
    %c6_506 = arith.constant 6 : index
    %c0_507 = arith.constant 0 : index
    %c0_508 = arith.constant 0 : index
    %729 = vector.load %arg2[%c5_505, %c6_506, %c0_507, %c0_508] : memref<7x7x16x1xf32, #tpu.memory_space<vmem>>, vector<1x1x16x1xf32>
    %730 = vector.shape_cast %729 : vector<1x1x16x1xf32> to vector<16x1xf32>
    %731 = vector.broadcast %730 : vector<16x1xf32> to vector<16x256xf32>
    %732 = arith.mulf %728, %731 : vector<16x256xf32>
    %733 = arith.addf %727, %732 : vector<16x256xf32>
    %734 = vector.extract_strided_slice %698 {offsets = [0, 96], sizes = [16, 256], strides = [1, 1]} : vector<16x352xf32> to vector<16x256xf32>
    %c6_509 = arith.constant 6 : index
    %c6_510 = arith.constant 6 : index
    %c0_511 = arith.constant 0 : index
    %c0_512 = arith.constant 0 : index
    %735 = vector.load %arg2[%c6_509, %c6_510, %c0_511, %c0_512] : memref<7x7x16x1xf32, #tpu.memory_space<vmem>>, vector<1x1x16x1xf32>
    %736 = vector.shape_cast %735 : vector<1x1x16x1xf32> to vector<16x1xf32>
    %737 = vector.broadcast %736 : vector<16x1xf32> to vector<16x256xf32>
    %738 = arith.mulf %734, %737 : vector<16x256xf32>
    %739 = arith.addf %733, %738 : vector<16x256xf32>
    %c6_513 = arith.constant 6 : index
    %c0_514 = arith.constant 0 : index
    %c0_515 = arith.constant 0 : index
    %740 = vector.load %arg3[%c6_513, %c0_514, %c0_515] : memref<7x1x256xf32, #tpu.memory_space<vmem>>, vector<1x1x256xf32>
    %741 = vector.shape_cast %740 : vector<1x1x256xf32> to vector<1x256xf32>
    %742 = vector.broadcast %741 : vector<1x256xf32> to vector<16x256xf32>
    %743 = arith.mulf %739, %742 : vector<16x256xf32>
    %744 = arith.addf %553, %743 : vector<16x256xf32>
    %745 = arith.addf %648, %696 : vector<16x256xf32>
    %746 = arith.addf %744, %600 : vector<16x256xf32>
    %747 = arith.addf %745, %746 : vector<16x256xf32>
    %cst_516 = arith.constant dense<0.000000e+00> : vector<256xf32>
    %748 = vector.multi_reduction <add>, %747, %cst_516 [0] : vector<16x256xf32> to vector<256xf32>
    %749 = vector.shape_cast %748 : vector<256xf32> to vector<1x256xf32>
    %cst_517 = arith.constant 1.600000e+01 : f32
    %750 = vector.broadcast %cst_517 : f32 to vector<1x256xf32>
    %751 = arith.divf %749, %750 : vector<1x256xf32>
    %752 = vector.broadcast %751 : vector<1x256xf32> to vector<16x256xf32>
    %753 = arith.subf %747, %752 : vector<16x256xf32>
    %754 = arith.mulf %753, %753 : vector<16x256xf32>
    %cst_518 = arith.constant dense<0.000000e+00> : vector<256xf32>
    %755 = vector.multi_reduction <add>, %754, %cst_518 [0] : vector<16x256xf32> to vector<256xf32>
    %756 = vector.shape_cast %755 : vector<256xf32> to vector<1x256xf32>
    %cst_519 = arith.constant 1.600000e+01 : f32
    %757 = vector.broadcast %cst_519 : f32 to vector<1x256xf32>
    %758 = arith.divf %756, %757 : vector<1x256xf32>
    %759 = vector.broadcast %751 : vector<1x256xf32> to vector<16x256xf32>
    %760 = arith.subf %747, %759 : vector<16x256xf32>
    %cst_520 = arith.constant 9.99999974E-6 : f32
    %761 = vector.broadcast %cst_520 : f32 to vector<1x256xf32>
    %762 = arith.addf %758, %761 : vector<1x256xf32>
    %763 = math.rsqrt %762 : vector<1x256xf32>
    %764 = vector.broadcast %763 : vector<1x256xf32> to vector<16x256xf32>
    %765 = arith.mulf %760, %764 : vector<16x256xf32>
    %c0_521 = arith.constant 0 : index
    %c0_522 = arith.constant 0 : index
    %766 = vector.load %arg4[%c0_521, %c0_522] : memref<48x16xf32, #tpu.memory_space<vmem>>, vector<48x16xf32>
    %cst_523 = arith.constant dense<0.000000e+00> : vector<48x256xf32>
    %767 = tpu.matmul %766, %765, %cst_523 {dimension_numbers = #tpu.dot_dimension_numbers<[1], [0], [0], [1], [0, 0, 1, 1], [], []>} : vector<48x16xf32>, vector<16x256xf32>, vector<48x256xf32> -> vector<48x256xf32>
    %c0_524 = arith.constant 0 : index
    %c0_525 = arith.constant 0 : index
    %768 = vector.load %arg5[%c0_524, %c0_525] : memref<48x1xf32, #tpu.memory_space<vmem>>, vector<48x1xf32>
    %769 = vector.broadcast %768 : vector<48x1xf32> to vector<48x256xf32>
    %770 = arith.addf %767, %769 : vector<48x256xf32>
    %cst_526 = arith.constant 5.000000e-01 : f32
    %771 = vector.broadcast %cst_526 : f32 to vector<48x256xf32>
    %772 = arith.mulf %771, %770 : vector<48x256xf32>
    %cst_527 = arith.constant 0.707106769 : f32
    %773 = vector.broadcast %cst_527 : f32 to vector<48x256xf32>
    %774 = arith.mulf %770, %773 : vector<48x256xf32>
    %775 = math.erf %774 : vector<48x256xf32>
    %cst_528 = arith.constant 1.000000e+00 : f32
    %776 = vector.broadcast %cst_528 : f32 to vector<48x256xf32>
    %777 = arith.addf %776, %775 : vector<48x256xf32>
    %778 = arith.mulf %772, %777 : vector<48x256xf32>
    %779 = arith.mulf %778, %778 : vector<48x256xf32>
    %cst_529 = arith.constant dense<0.000000e+00> : vector<48xf32>
    %780 = vector.multi_reduction <add>, %779, %cst_529 [1] : vector<48x256xf32> to vector<48xf32>
    %781 = vector.shape_cast %780 : vector<48xf32> to vector<48x1xf32>
    %782 = math.sqrt %781 : vector<48x1xf32>
    %cst_530 = arith.constant dense<0.000000e+00> : vector<1xf32>
    %783 = vector.multi_reduction <add>, %782, %cst_530 [0] : vector<48x1xf32> to vector<1xf32>
    %784 = vector.shape_cast %783 : vector<1xf32> to vector<1x1xf32>
    %cst_531 = arith.constant 4.800000e+01 : f32
    %785 = vector.broadcast %cst_531 : f32 to vector<1x1xf32>
    %786 = arith.divf %784, %785 : vector<1x1xf32>
    %cst_532 = arith.constant 9.99999997E-7 : f32
    %787 = vector.broadcast %cst_532 : f32 to vector<1x1xf32>
    %788 = arith.addf %786, %787 : vector<1x1xf32>
    %789 = vector.broadcast %788 : vector<1x1xf32> to vector<48x1xf32>
    %790 = arith.divf %782, %789 : vector<48x1xf32>
    %c0_533 = arith.constant 0 : index
    %c0_534 = arith.constant 0 : index
    %791 = vector.load %arg6[%c0_533, %c0_534] : memref<48x1xf32, #tpu.memory_space<vmem>>, vector<48x1xf32>
    %792 = vector.broadcast %790 : vector<48x1xf32> to vector<48x256xf32>
    %793 = arith.mulf %778, %792 : vector<48x256xf32>
    %794 = vector.broadcast %791 : vector<48x1xf32> to vector<48x256xf32>
    %795 = arith.mulf %794, %793 : vector<48x256xf32>
    %c0_535 = arith.constant 0 : index
    %c0_536 = arith.constant 0 : index
    %796 = vector.load %arg7[%c0_535, %c0_536] : memref<48x1xf32, #tpu.memory_space<vmem>>, vector<48x1xf32>
    %797 = vector.broadcast %796 : vector<48x1xf32> to vector<48x256xf32>
    %798 = arith.addf %795, %797 : vector<48x256xf32>
    %799 = arith.addf %798, %778 : vector<48x256xf32>
    %c0_537 = arith.constant 0 : index
    %c0_538 = arith.constant 0 : index
    %800 = vector.load %arg8[%c0_537, %c0_538] : memref<16x48xf32, #tpu.memory_space<vmem>>, vector<16x48xf32>
    %cst_539 = arith.constant dense<0.000000e+00> : vector<16x256xf32>
    %801 = tpu.matmul %800, %799, %cst_539 {dimension_numbers = #tpu.dot_dimension_numbers<[1], [0], [0], [1], [0, 0, 1, 1], [], []>} : vector<16x48xf32>, vector<48x256xf32>, vector<16x256xf32> -> vector<16x256xf32>
    %c0_540 = arith.constant 0 : index
    %c0_541 = arith.constant 0 : index
    %802 = vector.load %arg9[%c0_540, %c0_541] : memref<16x1xf32, #tpu.memory_space<vmem>>, vector<16x1xf32>
    %803 = vector.broadcast %802 : vector<16x1xf32> to vector<16x256xf32>
    %804 = arith.addf %801, %803 : vector<16x256xf32>
    %c1_542 = arith.constant 1 : index
    %c0_543 = arith.constant 0 : index
    %c0_544 = arith.constant 0 : index
    %805 = vector.load %arg10[%c1_542, %c0_543, %c0_544] : memref<2x16x256xf32, #tpu.memory_space<vmem>>, vector<1x16x256xf32>
    %806 = vector.shape_cast %805 : vector<1x16x256xf32> to vector<16x256xf32>
    %807 = vector.shape_cast %804 : vector<16x256xf32> to vector<1x16x256xf32>
    tpu.vector_store %arg10[%c1_542, %c0_543, %c0_544], %807 {strides = array<i32>} : memref<2x16x256xf32, #tpu.memory_space<vmem>>, vector<1x16x256xf32>,
    return
  }
  func.func @transform_0(%arg0: i32) -> (i32, i32, i32) {
    %c0_i32 = arith.constant 0 : i32
    %c0_i32_0 = arith.constant 0 : i32
    %c0_i32_1 = arith.constant 0 : i32
    return %arg0, %c0_i32, %c0_i32_0 : i32, i32, i32
  }
  func.func @transform_1(%arg0: i32) -> (i32, i32, i32, i32) {
    %c0_i32 = arith.constant 0 : i32
    %c0_i32_0 = arith.constant 0 : i32
    %c0_i32_1 = arith.constant 0 : i32
    %c0_i32_2 = arith.constant 0 : i32
    %c0_i32_3 = arith.constant 0 : i32
    return %c0_i32, %c0_i32_0, %c0_i32_1, %c0_i32_2 : i32, i32, i32, i32
  }
  func.func @transform_2(%arg0: i32) -> (i32, i32, i32) {
    %c0_i32 = arith.constant 0 : i32
    %c0_i32_0 = arith.constant 0 : i32
    %c0_i32_1 = arith.constant 0 : i32
    %c0_i32_2 = arith.constant 0 : i32
    return %c0_i32, %c0_i32_0, %c0_i32_1 : i32, i32, i32
  }
  func.func @transform_3(%arg0: i32) -> (i32, i32) {
    %c0_i32 = arith.constant 0 : i32
    %c0_i32_0 = arith.constant 0 : i32
    %c0_i32_1 = arith.constant 0 : i32
    return %c0_i32, %c0_i32_0 : i32, i32
  }
  func.func @transform_4(%arg0: i32) -> (i32, i32) {
    %c0_i32 = arith.constant 0 : i32
    %c0_i32_0 = arith.constant 0 : i32
    %c0_i32_1 = arith.constant 0 : i32
    return %c0_i32, %c0_i32_0 : i32, i32
  }
  func.func @transform_5(%arg0: i32) -> (i32, i32) {
    %c0_i32 = arith.constant 0 : i32
    %c0_i32_0 = arith.constant 0 : i32
    %c0_i32_1 = arith.constant 0 : i32
    return %c0_i32, %c0_i32_0 : i32, i32
  }
  func.func @transform_6(%arg0: i32) -> (i32, i32) {
    %c0_i32 = arith.constant 0 : i32
    %c0_i32_0 = arith.constant 0 : i32
    %c0_i32_1 = arith.constant 0 : i32
    return %c0_i32, %c0_i32_0 : i32, i32
  }
  func.func @transform_7(%arg0: i32) -> (i32, i32) {
    %c0_i32 = arith.constant 0 : i32
    %c0_i32_0 = arith.constant 0 : i32
    %c0_i32_1 = arith.constant 0 : i32
    return %c0_i32, %c0_i32_0 : i32, i32
  }
  func.func @transform_8(%arg0: i32) -> (i32, i32) {
    %c0_i32 = arith.constant 0 : i32
    %c0_i32_0 = arith.constant 0 : i32
    %c0_i32_1 = arith.constant 0 : i32
    return %c0_i32, %c0_i32_0 : i32, i32
  }
  func.func @transform_9(%arg0: i32) -> (i32, i32, i32) {
    %c0_i32 = arith.constant 0 : i32
    %c0_i32_0 = arith.constant 0 : i32
    %c0_i32_1 = arith.constant 0 : i32
    return %arg0, %c0_i32, %c0_i32_0 : i32, i32, i32
  }
}

</mosaic_0001>

<bundles_post_ra>
// kernel: tpu_custom_call.1
= control target key start
LH: loop header
LB: loop body
LE: loop exit
PB: predicated region body
PF: predicated region fallthrough
CT: control target
= control target key end

     0   :  { %v7948_v3 = vmov 0   ;;  %s7949_s15 = smov 51   ;;  %s13795_s0 = inlined_call_operand.vmem [shape: f32[2,16,256], index: 0, kind: input, shape index: {}]   ;;  %s13796_s1 = inlined_call_operand.vmem [shape: f32[7,7,16,1], index: 1, kind: input, shape index: {}]   ;;  %s13797_s2 = inlined_call_operand.vmem [shape: f32[7,1,256], index: 2, kind: input, shape index: {}]   ;;  %s13798_s3 = inlined_call_operand.vmem [shape: f32[48,16], index: 3, kind: input, shape index: {}]   ;;  %s13799_s4 = inlined_call_operand.vmem [shape: f32[48,1], index: 4, kind: input, shape index: {}]   ;;  %s13800_s5 = inlined_call_operand.vmem [shape: f32[48,1], index: 5, kind: input, shape index: {}]   ;;  %s13801_s6 = inlined_call_operand.vmem [shape: f32[48,1], index: 6, kind: input, shape index: {}]   ;;  %s13802_s7 = inlined_call_operand.vmem [shape: f32[16,48], index: 7, kind: input, shape index: {}]   ;;  %s13803_s8 = inlined_call_operand.vmem [shape: f32[16,1], index: 8, kind: input, shape index: {}]   ;;  %s13804_s9 = inlined_call_operand.hbm [shape: f32[2,16,256], index: 9, kind: output, shape index: {}]  }
   0x1   :  { %v41_v0 = vld [vmem:[%s13795_s0 + $0x10] sm:$0xff]  ;;  %v39_v1 = vld [vmem:[%s13795_s0] sm:$0xff]  ;;  %7797 = vset.pattern.permute.xlu2 %v7948_v3  ;;  %7799 = vset.pattern.permute.xlu1 %v7948_v3 }
   0x2   :  { %v77_v2 = vld [vmem:[%s13796_s1] sm:$0xff]  ;;  %51 = vrot.lane.b32.xlu1 %v41_v0, %s7949_s15  ;;  %47 = vrot.lane.b32.xlu0 %v39_v1, %s7949_s15 }
   0x3   :  { %81 = vperm.xlu2 %7797, %v77_v2   ;;  %7798 = vset.pattern.permute.xlu0 %v7948_v3 }
   0x4   :  { %14 = vsyncpa [#allocation4], 0  ;;  %v42_v4 = vld [vmem:[%s13795_s0 + $0x18] sm:$0xff]  ;;  %v40_v5 = vld [vmem:[%s13795_s0 + $0x8] sm:$0xff]  ;;  %v7950_v18 = vmov 0.0   ;;  %vm64_vm0 = vcmask 1047960  }
   0x5   :  { %v78_v6 = vld [vmem:[%s13796_s1 + $0x8] sm:$0xff]  ;;  %v7511_v7 = vld [vmem:[%s13796_s1 + $0x78] sm:$0xff]  ;;  %v7510_v8 = vld [vmem:[%s13796_s1 + $0x70] sm:$0xff]  ;;  %36 = vst [vmem:[#allocation2 + $0x18] sm:$0xff] %v7950_v18  ;;  %vm55_vm1 = vcmask 416768   ;;  %s7951_s24 = smov 112  }
   0x6   :  { %v7514_v9 = vld [vmem:[%s13796_s1 + $0x150] sm:$0xff]  ;;  %v7513_v10 = vld [vmem:[%s13796_s1 + $0xe8] sm:$0xff]  ;;  %v7512_v11 = vld [vmem:[%s13796_s1 + $0xe0] sm:$0xff]  ;;  %33 = vst [vmem:[#allocation2] sm:$0xff] %v7950_v18  ;;  %s7952_s25 = smov 80   ;;  %s7953_s26 = smov 96  }
   0x7   :  { %v7517_v12 = vld [vmem:[%s13796_s1 + $0x1c8] sm:$0xff]  ;;  %v7516_v13 = vld [vmem:[%s13796_s1 + $0x1c0] sm:$0xff]  ;;  %v7515_v14 = vld [vmem:[%s13796_s1 + $0x158] sm:$0xff]  ;;  %35 = vst [vmem:[#allocation2 + $0x10] sm:$0xff] %v7950_v18  ;;  %s7954_s27 = smov 64   ;;  %s7955_s28 = smov 48  }
   0x8   :  { %v7520_v15 = vld [vmem:[%s13796_s1 + $0x2a0] sm:$0xff]  ;;  %v7519_v16 = vld [vmem:[%s13796_s1 + $0x238] sm:$0xff]  ;;  %v7518_v17 = vld [vmem:[%s13796_s1 + $0x230] sm:$0xff]  ;;  %38 = vst [vmem:[#allocation2 + $0x28] sm:$0xff] %v7950_v18  ;;  %s7956_s10 = smov 32   ;;  %s7957_s16 = smov 1  }
   0x9   :  { %3805 = vst [vmem:[#allocation2 + $0x30] sm:$0xff] %v7950_v18  ;;  %v7521_v3 = vld [vmem:[%s13796_s1 + $0x2a8] sm:$0xff]  ;;  %s7958_s21 = smov 2   ;;  %s7959_s13 = smov 3   ;;  %vm130_vm2 = vcmask 916480   ;;  %vm180_vm3 = vcmask 785408  }
   0xa   :  { %53 = vrot.lane.b32.xlu1 %v42_v4, %s7949_s15  ;;  %49 = vrot.lane.b32.xlu0 %v40_v5, %s7949_s15  ;;  %3807 = vst [vmem:[#allocation2 + $0x40] sm:$0xff] %v7950_v18  ;;  %s13906_s23 = smov 4   ;;  %vm230_vm4 = vcmask 654336   ;;  %vm330_vm5 = vcmask 392192   ;;  %vm280_vm6 = vcmask 523264   ;;  %vm380_vm7 = vcmask 261120  }
   0xb   :  { %86 = vperm.xlu2 %7797, %v78_v6   ;;  %3808 = vst [vmem:[#allocation2 + $0x48] sm:$0xff] %v7950_v18  ;;  %vm13913_vm8 = vcmask 31744   ;;  %s13904_s29 = smov 124   ;;  %s7962_s14 = smov 5   ;;  %vm13921_vm9 = vcmask 39936   ;;  %vm13915_vm10 = vcmask 48128  }
   0xc   :  { %3810 = vst [vmem:[#allocation2 + $0x58] sm:$0xff] %v7950_v18  ;;  %s13919_s11 = smov 6   ;;  %vm13909_vm11 = vcmask 1014784   ;;  %s13902_s12 = smov 127   ;;  %vm13912_vm12 = vcmask 7168   ;;  %vm13914_vm13 = vcmask 23552  }
   0xd   :  { %vm13911_vm14 = vcmask 1039360   ;;  %s13917_s17 = smov 126   ;;  %vm13908_vm15 = vcmask 15360  }
  0x12   :  { %103 = vperm.xlu1 %7799, %v7511_v7   ;;  %98 = vperm.xlu0 %7798, %v7510_v8  }
  0x13   :  { %198 = vperm.xlu2 %7797, %v7514_v9  }
  0x1a   :  { %153 = vperm.xlu1 %7799, %v7513_v10   ;;  %148 = vperm.xlu0 %7798, %v7512_v11  }
  0x1b   :  { %253 = vperm.xlu2 %7797, %v7517_v12  }
  0x22   :  { %248 = vperm.xlu1 %7799, %v7516_v13   ;;  %203 = vperm.xlu0 %7798, %v7515_v14  }
  0x23   :  { %348 = vperm.xlu2 %7797, %v7520_v15  }
  0x2a   :  { %303 = vperm.xlu1 %7799, %v7519_v16   ;;  %298 = vperm.xlu0 %7798, %v7518_v17  }
  0x5d   :  { %v8078_v21 = vpop.permute.xlu2 %81 }
  0x5e   :  { %14032 = vst [vmem:[#allocation6_spill] sm:$0xff] %v8078_v21 }
  0x65   :  { %v8090_v26 = vpop.permute.xlu2 %86 }
  0x66   :  { %14033 = vst [vmem:[#allocation7_spill] sm:$0xff] %v8090_v26 }
  0x6d   :  { %v8105_v34 = vpop.permute.xlu2 %198 }
  0x74   :  { %v52_v19 = vpop.permute.xlu1 %51  ;;  %v48_v20 = vpop.permute.xlu0 %47 }
  0x75   :  { %68 = vst.msk [vmem:[#allocation2 + $0x18] sm:$0xff] %vm64_vm0, %v52_v19  ;;  %v254_v49 = vpop.permute.xlu2 %253 }
  0x76   :  { %65 = vst.msk [vmem:[#allocation2] sm:$0xff] %vm64_vm0, %v48_v20 }
  0x7c   :  { %v54_v22 = vpop.permute.xlu1 %53  ;;  %v50_v24 = vpop.permute.xlu0 %49  ;;  %v8092_v27 = vld [vmem:[#allocation2 + $0x18] sm:$0xff] }
  0x7d   :  { %v8081_v23 = vsel %vm55_vm1, %v52_v19, %v54_v22  ;;  %70 = vst.msk [vmem:[#allocation2 + $0x28] sm:$0xff] %vm55_vm1, %v54_v22  ;;  %v8086_v25 = vsel %vm55_vm1, %v48_v20, %v50_v24  ;;  %v8096_v29 = vld [vmem:[#allocation2] sm:$0xff]  ;;  %v259_v50 = vmul.f32 %v254_v49, %v8092_v27  ;;  %v349_v6 = vpop.permute.xlu2 %348 }
  0x7e   :  { %69 = vst [vmem:[#allocation2 + $0x20] sm:$0xff] %v8081_v23  ;;  %v206_v47 = vmul.f32 %v8105_v34, %v8096_v29  ;;  %v207_v5 = vmul.f32 %v8105_v34, %v8086_v25  ;;  %v260_v8 = vmul.f32 %v254_v49, %v8081_v23  ;;  %v356_v10 = vmul.f32 %v349_v6, %v8096_v29 }
  0x7f   :  { %66 = vst [vmem:[#allocation2 + $0x8] sm:$0xff] %v8086_v25  ;;  %v357_v11 = vmul.f32 %v349_v6, %v8086_v25 }
  0x80   :  { %67 = vst.msk [vmem:[#allocation2 + $0x10] sm:$0xff] %vm55_vm1, %v50_v24 }
  0x84   :  { %v8094_v28 = vpop.permute.xlu1 %103  ;;  %v99_v30 = vpop.permute.xlu0 %98  ;;  %v8114_v40 = vld [vmem:[#allocation2 + $0x28] sm:$0xff] }
  0x85   :  { %v109_v31 = vmul.f32 %v8094_v28, %v8092_v27  ;;  %v106_v32 = vmul.f32 %v99_v30, %v8096_v29  ;;  %v111_v44 = vmul.f32 %v8094_v28, %v8114_v40  ;;  %v261_v60 = vmul.f32 %v254_v49, %v8114_v40 }
  0x86   :  { %v107_v62 = vmul.f32 %v99_v30, %v8086_v25  ;;  %v110_v1 = vmul.f32 %v8094_v28, %v8081_v23 }
  0x87   :  { %124 = vrot.lane.b32.xlu0 %v109_v31, %s7951_s24  ;;  %118 = vrot.lane.b32.xlu2 %v106_v32, %s7951_s24  ;;  %v8103_v33 = vld [vmem:[#allocation2 + $0x10] sm:$0xff]  ;;  %v7524_v31 = vld [vmem:[%s13796_s1 + $0x80] sm:$0xff] }
  0x88   :  { %v208_v36 = vmul.f32 %v8105_v34, %v8103_v33  ;;  %v108_v38 = vmul.f32 %v99_v30, %v8103_v33  ;;  %v358_v7 = vmul.f32 %v349_v6, %v8103_v33  ;;  %v7522_v32 = vld [vmem:[%s13796_s1 + $0x10] sm:$0xff] }
  0x8c   :  { %v149_v35 = vpop.permute.xlu0 %148  ;;  %v154_v39 = vpop.permute.xlu1 %153 }
  0x8d   :  { %v158_v37 = vmul.f32 %v149_v35, %v8103_v33  ;;  %v161_v43 = vmul.f32 %v154_v39, %v8114_v40  ;;  %v156_v48 = vmul.f32 %v149_v35, %v8096_v29  ;;  %v159_v52 = vmul.f32 %v154_v39, %v8092_v27 }
  0x8e   :  { %v157_v54 = vmul.f32 %v149_v35, %v8086_v25  ;;  %v160_v58 = vmul.f32 %v154_v39, %v8081_v23  ;;  %v7523_v35 = vld [vmem:[%s13796_s1 + $0x18] sm:$0xff] }
  0x8f   :  { %222 = vrot.lane.b32.xlu0 %v208_v36, %s7952_s25  ;;  %172 = vrot.lane.b32.xlu1 %v158_v37, %s7953_s26  ;;  %v7525_v36 = vld [vmem:[%s13796_s1 + $0x88] sm:$0xff] }
  0x90   :  { %122 = vrot.lane.b32.xlu2 %v108_v38, %s7951_s24 }
  0x94   :  { %v204_v41 = vpop.permute.xlu0 %203  ;;  %v249_v45 = vpop.permute.xlu1 %248 }
  0x95   :  { %v211_v42 = vmul.f32 %v204_v41, %v8114_v40  ;;  %v256_v46 = vmul.f32 %v249_v45, %v8096_v29  ;;  %v209_v51 = vmul.f32 %v204_v41, %v8092_v27  ;;  %v258_v56 = vmul.f32 %v249_v45, %v8103_v33 }
  0x96   :  { %v257_v4 = vmul.f32 %v249_v45, %v8086_v25  ;;  %v210_v9 = vmul.f32 %v204_v41, %v8081_v23 }
  0x97   :  { %228 = vrot.lane.b32.xlu0 %v211_v42, %s7952_s25  ;;  %178 = vrot.lane.b32.xlu1 %v161_v43, %s7953_s26 }
  0x98   :  { %128 = vrot.lane.b32.xlu2 %v111_v44, %s7951_s24 }
  0x9c   :  { %v299_v53 = vpop.permute.xlu0 %298  ;;  %v304_v57 = vpop.permute.xlu1 %303 }
  0x9d   :  { %v308_v55 = vmul.f32 %v299_v53, %v8103_v33  ;;  %v311_v59 = vmul.f32 %v304_v57, %v8114_v40  ;;  %v307_v61 = vmul.f32 %v299_v53, %v8086_v25  ;;  %v306_v63 = vmul.f32 %v299_v53, %v8096_v29 }
  0x9e   :  { %v310_v0 = vmul.f32 %v304_v57, %v8081_v23  ;;  %v309_v2 = vmul.f32 %v304_v57, %v8092_v27 }
  0x9f   :  { %268 = vrot.lane.b32.xlu0 %v256_v46, %s7954_s27  ;;  %218 = vrot.lane.b32.xlu1 %v206_v47, %s7952_s25 }
  0xa0   :  { %168 = vrot.lane.b32.xlu2 %v156_v48, %s7953_s26 }
  0xa7   :  { %274 = vrot.lane.b32.xlu0 %v259_v50, %s7954_s27  ;;  %224 = vrot.lane.b32.xlu1 %v209_v51, %s7952_s25 }
  0xa8   :  { %174 = vrot.lane.b32.xlu2 %v159_v52, %s7953_s26 }
  0xaf   :  { %170 = vrot.lane.b32.xlu0 %v157_v54, %s7953_s26  ;;  %322 = vrot.lane.b32.xlu1 %v308_v55, %s7955_s28 }
  0xb0   :  { %272 = vrot.lane.b32.xlu2 %v258_v56, %s7954_s27 }
  0xb7   :  { %176 = vrot.lane.b32.xlu0 %v160_v58, %s7953_s26  ;;  %328 = vrot.lane.b32.xlu1 %v311_v59, %s7955_s28 }
  0xb8   :  { %278 = vrot.lane.b32.xlu2 %v261_v60, %s7954_s27 }
  0xbf   :  { %320 = vrot.lane.b32.xlu0 %v307_v61, %s7955_s28  ;;  %120 = vrot.lane.b32.xlu1 %v107_v62, %s7951_s24 }
  0xc0   :  { %318 = vrot.lane.b32.xlu2 %v306_v63, %s7955_s28 }
  0xc7   :  { %326 = vrot.lane.b32.xlu0 %v310_v0, %s7955_s28  ;;  %126 = vrot.lane.b32.xlu1 %v110_v1, %s7951_s24 }
  0xc8   :  { %324 = vrot.lane.b32.xlu2 %v309_v2, %s7955_s28  ;;  %v7527_v2 = vld [vmem:[%s13796_s1 + $0xf8] sm:$0xff] }
  0xcf   :  { %353 = vperm.xlu0 %7798, %v7521_v3   ;;  %270 = vrot.lane.b32.xlu1 %v257_v4, %s7954_s27  ;;  %v7526_v3 = vld [vmem:[%s13796_s1 + $0xf0] sm:$0xff] }
  0xd0   :  { %220 = vrot.lane.b32.xlu2 %v207_v5, %s7952_s25 }
  0xd7   :  { %372 = vrot.lane.b32.xlu0 %v358_v7, %s7956_s10  ;;  %276 = vrot.lane.b32.xlu1 %v260_v8, %s7954_s27 }
  0xd8   :  { %226 = vrot.lane.b32.xlu2 %v210_v9, %s7952_s25 }
  0xdf   :  { %368 = vrot.lane.b32.xlu1 %v356_v10, %s7956_s10 }
  0xe0   :  { %370 = vrot.lane.b32.xlu2 %v357_v11, %s7956_s10 }
  0xe1   :  { %v8231_v45 = vpop.permute.xlu2 %118 }
  0xe2   :  { %14051 = vst [vmem:[#allocation25_spill] sm:$0xff] %v8231_v45 }
  0xea   :  { %v8235_v47 = vpop.permute.xlu2 %122 }
  0xeb   :  { %14053 = vst [vmem:[#allocation27_spill] sm:$0xff] %v8235_v47 }
  0xf2   :  { %v8239_v49 = vpop.permute.xlu2 %128 }
  0xf3   :  { %14055 = vst [vmem:[#allocation29_spill] sm:$0xff] %v8239_v49 }
  0xf9   :  { %v8179_v12 = vpop.permute.xlu0 %124 }
  0xfa   :  { %14034 = vst [vmem:[#allocation8_spill] sm:$0xff] %v8179_v12  ;;  %v8245_v52 = vpop.permute.xlu2 %168 }
  0xfb   :  { %14058 = vst [vmem:[#allocation32_spill] sm:$0xff] %v8245_v52 }
 0x101   :  { %v8181_v13 = vpop.permute.xlu0 %222  ;;  %v8209_v34 = vpop.permute.xlu1 %172 }
 0x102   :  { %14035 = vst [vmem:[#allocation9_spill] sm:$0xff] %v8181_v13  ;;  %v8251_v55 = vpop.permute.xlu2 %174 }
 0x103   :  { %14043 = vst [vmem:[#allocation17_spill] sm:$0xff] %v8209_v34 }
 0x104   :  { %14061 = vst [vmem:[#allocation35_spill] sm:$0xff] %v8251_v55 }
 0x109   :  { %v8183_v14 = vpop.permute.xlu0 %228  ;;  %v8217_v37 = vpop.permute.xlu1 %178 }
 0x10a   :  { %14036 = vst [vmem:[#allocation10_spill] sm:$0xff] %v8183_v14  ;;  %v8261_v61 = vpop.permute.xlu2 %272 }
 0x10b   :  { %14044 = vst [vmem:[#allocation18_spill] sm:$0xff] %v8217_v37 }
 0x10c   :  { %14062 = vst [vmem:[#allocation36_spill] sm:$0xff] %v8261_v61 }
 0x111   :  { %v8185_v15 = vpop.permute.xlu0 %268  ;;  %v8219_v38 = vpop.permute.xlu1 %218 }
 0x112   :  { %14037 = vst [vmem:[#allocation11_spill] sm:$0xff] %v8185_v15  ;;  %v8275_v4 = vpop.permute.xlu2 %278 }
 0x113   :  { %14045 = vst [vmem:[#allocation19_spill] sm:$0xff] %v8219_v38 }
 0x114   :  { %14063 = vst [vmem:[#allocation37_spill] sm:$0xff] %v8275_v4 }
 0x119   :  { %v8187_v16 = vpop.permute.xlu0 %274  ;;  %v8221_v39 = vpop.permute.xlu1 %224 }
 0x11a   :  { %14038 = vst [vmem:[#allocation12_spill] sm:$0xff] %v8187_v16  ;;  %v8277_v5 = vpop.permute.xlu2 %318 }
 0x11b   :  { %14046 = vst [vmem:[#allocation20_spill] sm:$0xff] %v8221_v39 }
 0x11c   :  { %14064 = vst [vmem:[#allocation38_spill] sm:$0xff] %v8277_v5 }
 0x121   :  { %v8189_v17 = vpop.permute.xlu0 %170  ;;  %v8223_v41 = vpop.permute.xlu1 %322 }
 0x122   :  { %14039 = vst [vmem:[#allocation13_spill] sm:$0xff] %v8189_v17  ;;  %v8279_v6 = vpop.permute.xlu2 %324 }
 0x123   :  { %14047 = vst [vmem:[#allocation21_spill] sm:$0xff] %v8223_v41 }
 0x124   :  { %14065 = vst [vmem:[#allocation39_spill] sm:$0xff] %v8279_v6 }
 0x129   :  { %v8191_v18 = vpop.permute.xlu0 %176  ;;  %v8225_v42 = vpop.permute.xlu1 %328 }
 0x12a   :  { %14040 = vst [vmem:[#allocation14_spill] sm:$0xff] %v8191_v18  ;;  %v8281_v7 = vpop.permute.xlu2 %220 }
 0x12b   :  { %14048 = vst [vmem:[#allocation22_spill] sm:$0xff] %v8225_v42 }
 0x12c   :  { %14066 = vst [vmem:[#allocation40_spill] sm:$0xff] %v8281_v7 }
 0x131   :  { %v8193_v19 = vpop.permute.xlu0 %320  ;;  %v8227_v43 = vpop.permute.xlu1 %120 }
 0x132   :  { %14041 = vst [vmem:[#allocation15_spill] sm:$0xff] %v8193_v19  ;;  %v8283_v8 = vpop.permute.xlu2 %226 }
 0x133   :  { %14049 = vst [vmem:[#allocation23_spill] sm:$0xff] %v8227_v43 }
 0x134   :  { %14067 = vst [vmem:[#allocation41_spill] sm:$0xff] %v8283_v8 }
 0x139   :  { %v8195_v20 = vpop.permute.xlu0 %326  ;;  %v8229_v44 = vpop.permute.xlu1 %126 }
 0x13a   :  { %14042 = vst [vmem:[#allocation16_spill] sm:$0xff] %v8195_v20  ;;  %v8285_v9 = vpop.permute.xlu2 %370 }
 0x13b   :  { %14050 = vst [vmem:[#allocation24_spill] sm:$0xff] %v8229_v44 }
 0x13c   :  { %14068 = vst [vmem:[#allocation42_spill] sm:$0xff] %v8285_v9 }
 0x141   :  { %v354_v22 = vpop.permute.xlu0 %353  ;;  %v8233_v46 = vpop.permute.xlu1 %270 }
 0x142   :  { %v361_v24 = vmul.f32 %v354_v22, %v8114_v40  ;;  %v359_v28 = vmul.f32 %v354_v22, %v8092_v27  ;;  %v360_v30 = vmul.f32 %v354_v22, %v8081_v23  ;;  %14052 = vst [vmem:[#allocation26_spill] sm:$0xff] %v8233_v46 }
 0x144   :  { %378 = vrot.lane.b32.xlu0 %v361_v24, %s7956_s10  ;;  %374 = vrot.lane.b32.xlu1 %v359_v28, %s7956_s10 }
 0x145   :  { %376 = vrot.lane.b32.xlu2 %v360_v30, %s7956_s10 }
 0x149   :  { %v8237_v48 = vpop.permute.xlu1 %276  ;;  %v8241_v50 = vpop.permute.xlu0 %372 }
 0x14a   :  { %14054 = vst [vmem:[#allocation28_spill] sm:$0xff] %v8237_v48 }
 0x14b   :  { %14056 = vst [vmem:[#allocation30_spill] sm:$0xff] %v8241_v50 }
 0x14c   :  { %427 = vperm.xlu0 %7798, %v7524_v31   ;;  %408 = vperm.xlu1 %7799, %v7522_v32  }
 0x14d   :  { %413 = vperm.xlu2 %7797, %v7523_v35  }
 0x151   :  { %v8243_v51 = vpop.permute.xlu1 %368 }
 0x152   :  { %14057 = vst [vmem:[#allocation31_spill] sm:$0xff] %v8243_v51 }
 0x154   :  { %432 = vperm.xlu1 %7799, %v7525_v36  }
 0x19f   :  { %v8287_v10 = vpop.permute.xlu2 %376 }
 0x1a0   :  { %14069 = vst [vmem:[#allocation43_spill] sm:$0xff] %v8287_v10 }
 0x1a7   :  { %v8289_v11 = vpop.permute.xlu2 %413 }
 0x1b6   :  { %v8247_v53 = vpop.permute.xlu0 %378  ;;  %v8249_v54 = vpop.permute.xlu1 %374 }
 0x1b7   :  { %14059 = vst [vmem:[#allocation33_spill] sm:$0xff] %v8247_v53 }
 0x1b8   :  { %14060 = vst [vmem:[#allocation34_spill] sm:$0xff] %v8249_v54 }
 0x1be   :  { %v428_v56 = vpop.permute.xlu0 %427  ;;  %v8253_v57 = vpop.permute.xlu1 %408 }
 0x1bf   :  { %v436_v58 = vmul.f32 %v428_v56, %v8086_v25  ;;  %v437_v59 = vmul.f32 %v428_v56, %v8103_v33  ;;  %v435_v60 = vmul.f32 %v428_v56, %v8096_v29 }
 0x1c1   :  { %449 = vrot.lane.b32.xlu0 %v436_v58, %s7951_s24  ;;  %451 = vrot.lane.b32.xlu1 %v437_v59, %s7951_s24 }
 0x1c2   :  { %447 = vrot.lane.b32.xlu2 %v435_v60, %s7951_s24 }
 0x1c6   :  { %v433_v62 = vpop.permute.xlu1 %432 }
 0x1c7   :  { %v440_v63 = vmul.f32 %v433_v62, %v8114_v40  ;;  %v439_v0 = vmul.f32 %v433_v62, %v8081_v23  ;;  %v438_v1 = vmul.f32 %v433_v62, %v8092_v27  ;;  %v7529_v62 = vld [vmem:[%s13796_s1 + $0x168] sm:$0xff] }
 0x1c9   :  { %457 = vrot.lane.b32.xlu1 %v440_v63, %s7951_s24  ;;  %455 = vrot.lane.b32.xlu0 %v439_v0, %s7951_s24  ;;  %v7528_v63 = vld [vmem:[%s13796_s1 + $0x160] sm:$0xff] }
 0x1ca   :  { %453 = vrot.lane.b32.xlu2 %v438_v1, %s7951_s24 }
 0x1d1   :  { %485 = vperm.xlu0 %7798, %v7527_v2  }
 0x1d2   :  { %480 = vperm.xlu2 %7797, %v7526_v3  }
 0x21c   :  { %v8291_v22 = vpop.permute.xlu2 %447 }
 0x224   :  { %v8293_v24 = vpop.permute.xlu2 %453 }
 0x22c   :  { %v481_v28 = vpop.permute.xlu2 %480 }
 0x22d   :  { %v490_v30 = vmul.f32 %v481_v28, %v8103_v33  ;;  %v489_v31 = vmul.f32 %v481_v28, %v8086_v25  ;;  %v488_v32 = vmul.f32 %v481_v28, %v8096_v29 }
 0x22f   :  { %504 = vrot.lane.b32.xlu0 %v490_v30, %s7953_s26  ;;  %502 = vrot.lane.b32.xlu2 %v489_v31, %s7953_s26 }
 0x230   :  { %500 = vrot.lane.b32.xlu1 %v488_v32, %s7953_s26 }
 0x233   :  { %v8301_v35 = vpop.permute.xlu0 %449  ;;  %v8317_v0 = vpop.permute.xlu1 %451 }
 0x23b   :  { %v8303_v36 = vpop.permute.xlu0 %455  ;;  %v8319_v1 = vpop.permute.xlu1 %457 }
 0x243   :  { %v486_v56 = vpop.permute.xlu0 %485 }
 0x244   :  { %v493_v58 = vmul.f32 %v486_v56, %v8114_v40  ;;  %v492_v59 = vmul.f32 %v486_v56, %v8081_v23  ;;  %v491_v60 = vmul.f32 %v486_v56, %v8092_v27 }
 0x246   :  { %510 = vrot.lane.b32.xlu0 %v493_v58, %s7953_s26  ;;  %508 = vrot.lane.b32.xlu2 %v492_v59, %s7953_s26 }
 0x247   :  { %506 = vrot.lane.b32.xlu1 %v491_v60, %s7953_s26 }
 0x24e   :  { %538 = vperm.xlu2 %7797, %v7529_v62  }
 0x24f   :  { %533 = vperm.xlu1 %7799, %v7528_v63  }
 0x289   :  { %v8323_v3 = vpop.permute.xlu2 %502 }
 0x2a0   :  { %v8327_v30 = vpop.permute.xlu2 %508 }
 0x2a2   :  { %v8321_v2 = vpop.permute.xlu1 %500 }
 0x2a8   :  { %v539_v59 = vpop.permute.xlu2 %538 }
 0x2a9   :  { %v546_v60 = vmul.f32 %v539_v59, %v8114_v40  ;;  %v545_v62 = vmul.f32 %v539_v59, %v8081_v23  ;;  %v544_v63 = vmul.f32 %v539_v59, %v8092_v27 }
 0x2b9   :  { %v8325_v28 = vpop.permute.xlu1 %506 }
 0x2c1   :  { %v534_v31 = vpop.permute.xlu1 %533 }
 0x2c2   :  { %v543_v32 = vmul.f32 %v534_v31, %v8103_v33  ;;  %v542_v56 = vmul.f32 %v534_v31, %v8086_v25  ;;  %v541_v58 = vmul.f32 %v534_v31, %v8096_v29  ;;  %v7531_v31 = vld [vmem:[%s13796_s1 + $0x1d8] sm:$0xff] }
 0x2c4   :  { %557 = vrot.lane.b32.xlu2 %v543_v32, %s7952_s25  ;;  %555 = vrot.lane.b32.xlu1 %v542_v56, %s7952_s25  ;;  %v7530_v32 = vld [vmem:[%s13796_s1 + $0x1d0] sm:$0xff]  ;;  %v8347_v56 = vpop.permute.xlu0 %504 }
 0x2c5   :  { %553 = vrot.lane.b32.xlu0 %v541_v58, %s7952_s25 }
 0x2cc   :  { %563 = vrot.lane.b32.xlu2 %v546_v60, %s7952_s25  ;;  %561 = vrot.lane.b32.xlu1 %v545_v62, %s7952_s25  ;;  %v8349_v58 = vpop.permute.xlu0 %510 }
 0x2cd   :  { %559 = vrot.lane.b32.xlu0 %v544_v63, %s7952_s25 }
 0x2d4   :  { %591 = vperm.xlu1 %7799, %v7531_v31  }
 0x2d5   :  { %586 = vperm.xlu0 %7798, %v7530_v32  }
 0x336   :  { %v8353_v60 = vpop.permute.xlu1 %555 }
 0x337   :  { %v8351_v59 = vpop.permute.xlu0 %553  ;;  %14071 = vst [vmem:[#allocation45_spill] sm:$0xff] %v8353_v60 }
 0x338   :  { %14070 = vst [vmem:[#allocation44_spill] sm:$0xff] %v8351_v59 }
 0x33e   :  { %v8357_v63 = vpop.permute.xlu1 %561 }
 0x33f   :  { %v8355_v62 = vpop.permute.xlu0 %559  ;;  %14073 = vst [vmem:[#allocation47_spill] sm:$0xff] %v8357_v63 }
 0x340   :  { %14072 = vst [vmem:[#allocation46_spill] sm:$0xff] %v8355_v62 }
 0x346   :  { %v592_v32 = vpop.permute.xlu1 %591 }
 0x347   :  { %v587_v53 = vpop.permute.xlu0 %586  ;;  %v599_v41 = vmul.f32 %v592_v32, %v8114_v40  ;;  %v598_v4 = vmul.f32 %v592_v32, %v8081_v23  ;;  %v597_v61 = vmul.f32 %v592_v32, %v8092_v27 }
 0x348   :  { %v596_v50 = vmul.f32 %v587_v53, %v8103_v33  ;;  %v595_v42 = vmul.f32 %v587_v53, %v8086_v25  ;;  %v594_v31 = vmul.f32 %v587_v53, %v8096_v29  ;;  %v8377_v53 = vpop.permute.xlu2 %557 }
 0x349   :  { %14074 = vst [vmem:[#allocation48_spill] sm:$0xff] %v8377_v53 }
 0x34a   :  { %610 = vrot.lane.b32.xlu1 %v596_v50, %s7954_s27  ;;  %608 = vrot.lane.b32.xlu0 %v595_v42, %s7954_s27  ;;  %v7533_v50 = vld [vmem:[%s13796_s1 + $0x248] sm:$0xff]  ;;  %v7532_v42 = vld [vmem:[%s13796_s1 + $0x240] sm:$0xff] }
 0x34b   :  { %606 = vrot.lane.b32.xlu2 %v594_v31, %s7954_s27 }
 0x350   :  { %v8379_v31 = vpop.permute.xlu2 %563 }
 0x351   :  { %14075 = vst [vmem:[#allocation49_spill] sm:$0xff] %v8379_v31 }
 0x352   :  { %616 = vrot.lane.b32.xlu1 %v599_v41, %s7954_s27  ;;  %614 = vrot.lane.b32.xlu0 %v598_v4, %s7954_s27 }
 0x353   :  { %612 = vrot.lane.b32.xlu2 %v597_v61, %s7954_s27 }
 0x35a   :  { %644 = vperm.xlu0 %7798, %v7533_v50  }
 0x35b   :  { %639 = vperm.xlu2 %7797, %v7532_v42  }
 0x3a5   :  { %v8381_v32 = vpop.permute.xlu2 %606 }
 0x3a6   :  { %14076 = vst [vmem:[#allocation50_spill] sm:$0xff] %v8381_v32 }
 0x3ad   :  { %v8383_v41 = vpop.permute.xlu2 %612 }
 0x3ae   :  { %14077 = vst [vmem:[#allocation51_spill] sm:$0xff] %v8383_v41 }
 0x3b5   :  { %v640_v4 = vpop.permute.xlu2 %639 }
 0x3b6   :  { %v649_v61 = vmul.f32 %v640_v4, %v8103_v33  ;;  %v648_v14 = vmul.f32 %v640_v4, %v8086_v25  ;;  %v647_v13 = vmul.f32 %v640_v4, %v8096_v29 }
 0x3b8   :  { %663 = vrot.lane.b32.xlu0 %v649_v61, %s7955_s28  ;;  %661 = vrot.lane.b32.xlu2 %v648_v14, %s7955_s28  ;;  %v7534_v14 = vld [vmem:[%s13796_s1 + $0x2b0] sm:$0xff] }
 0x3b9   :  { %659 = vrot.lane.b32.xlu1 %v647_v13, %s7955_s28  ;;  %v7535_v13 = vld [vmem:[%s13796_s1 + $0x2b8] sm:$0xff] }
 0x3bc   :  { %v8391_v50 = vpop.permute.xlu0 %608  ;;  %v8407_v4 = vpop.permute.xlu1 %610 }
 0x3bd   :  { %14078 = vst [vmem:[#allocation52_spill] sm:$0xff] %v8391_v50 }
 0x3be   :  { %14080 = vst [vmem:[#allocation54_spill] sm:$0xff] %v8407_v4 }
 0x3c4   :  { %v8393_v42 = vpop.permute.xlu0 %614  ;;  %v8409_v61 = vpop.permute.xlu1 %616 }
 0x3c5   :  { %14079 = vst [vmem:[#allocation53_spill] sm:$0xff] %v8393_v42 }
 0x3c6   :  { %14081 = vst [vmem:[#allocation55_spill] sm:$0xff] %v8409_v61 }
 0x3cc   :  { %v645_v37 = vpop.permute.xlu0 %644 }
 0x3cd   :  { %v652_v54 = vmul.f32 %v645_v37, %v8114_v40  ;;  %v651_v10 = vmul.f32 %v645_v37, %v8081_v23  ;;  %v650_v51 = vmul.f32 %v645_v37, %v8092_v27 }
 0x3cf   :  { %669 = vrot.lane.b32.xlu0 %v652_v54, %s7955_s28  ;;  %667 = vrot.lane.b32.xlu2 %v651_v10, %s7955_s28 }
 0x3d0   :  { %665 = vrot.lane.b32.xlu1 %v650_v51, %s7955_s28 }
 0x3d7   :  { %697 = vperm.xlu2 %7797, %v7535_v13  }
 0x3d8   :  { %692 = vperm.xlu1 %7799, %v7534_v14  }
 0x412   :  { %v8413_v54 = vpop.permute.xlu2 %661 }
 0x413   :  { %14083 = vst [vmem:[#allocation57_spill] sm:$0xff] %v8413_v54 }
 0x429   :  { %v8417_v51 = vpop.permute.xlu2 %667 }
 0x42a   :  { %14085 = vst [vmem:[#allocation59_spill] sm:$0xff] %v8417_v51 }
 0x42b   :  { %v8411_v37 = vpop.permute.xlu1 %659 }
 0x42c   :  { %14082 = vst [vmem:[#allocation56_spill] sm:$0xff] %v8411_v37 }
 0x431   :  { %v698_v14 = vpop.permute.xlu2 %697 }
 0x432   :  { %v705_v5 = vmul.f32 %v698_v14, %v8114_v40  ;;  %v704_v19 = vmul.f32 %v698_v14, %v8081_v23  ;;  %v703_v34 = vmul.f32 %v698_v14, %v8092_v27 }
 0x442   :  { %v8415_v10 = vpop.permute.xlu1 %665 }
 0x443   :  { %14084 = vst [vmem:[#allocation58_spill] sm:$0xff] %v8415_v10 }
 0x44a   :  { %v693_v9 = vpop.permute.xlu1 %692 }
 0x44b   :  { %v702_v6 = vmul.f32 %v693_v9, %v8103_v33  ;;  %v701_v20 = vmul.f32 %v693_v9, %v8086_v25  ;;  %v700_v13 = vmul.f32 %v693_v9, %v8096_v29  ;;  %v7537_v9 = vld [vmem:[%s13796_s1 + $0x20] sm:$0xff] }
 0x44d   :  { %716 = vrot.lane.b32.xlu2 %v702_v6, %s7956_s10  ;;  %714 = vrot.lane.b32.xlu1 %v701_v20, %s7956_s10  ;;  %v7536_v6 = vld [vmem:[%s13797_s2 + $0x2] sm:$0x3] }
 0x44e   :  { %712 = vrot.lane.b32.xlu0 %v700_v13, %s7956_s10  ;;  %v744_v20 = vperm.slane %v7536_v6, 1  ;;  %v743_v13 = vperm.slane %v7536_v6, 0 }
 0x455   :  { %722 = vrot.lane.b32.xlu2 %v705_v5, %s7956_s10  ;;  %720 = vrot.lane.b32.xlu1 %v704_v19, %s7956_s10  ;;  %v7540_v19 = vld [vmem:[%s13796_s1 + $0x98] sm:$0xff]  ;;  %v7538_v5 = vld [vmem:[%s13796_s1 + $0x28] sm:$0xff] }
 0x456   :  { %718 = vrot.lane.b32.xlu0 %v703_v34, %s7956_s10  ;;  %v7539_v34 = vld [vmem:[%s13796_s1 + $0x90] sm:$0xff] }
 0x45d   :  { %765 = vperm.xlu2 %7797, %v7537_v9   ;;  %747 = vrot.lane.b32.xlu1 %v744_v20, %s7957_s16 }
 0x45e   :  { %745 = vrot.lane.b32.xlu0 %v743_v13, %s7957_s16 }
 0x465   :  { %789 = vperm.xlu2 %7797, %v7540_v19   ;;  %784 = vperm.xlu1 %7799, %v7539_v34  }
 0x466   :  { %770 = vperm.xlu0 %7798, %v7538_v5  }
 0x4a7   :  { %v8448_v14 = vpop.permute.xlu2 %716 }
 0x4a8   :  { %14086 = vst [vmem:[#allocation60_spill] sm:$0xff] %v8448_v14 }
 0x4af   :  { %v8454_v9 = vpop.permute.xlu2 %722 }
 0x4b0   :  { %14089 = vst [vmem:[#allocation63_spill] sm:$0xff] %v8454_v9 }
 0x4b7   :  { %v8458_v49 = vpop.permute.xlu2 %765 }
 0x4b8   :  { %14091 = vst [vmem:[#allocation65_spill] sm:$0xff] %v8458_v49  ;;  %v8733_v49 = vld [vmem:[#allocation2 + $0x20] sm:$0xff] }
 0x4bf   :  { %v8450_v6 = vpop.permute.xlu1 %714  ;;  %v790_v34 = vpop.permute.xlu2 %789 }
 0x4c0   :  { %14087 = vst [vmem:[#allocation61_spill] sm:$0xff] %v8450_v6  ;;  %v797_v5 = vmul.f32 %v790_v34, %v8114_v40  ;;  %v796_v46 = vmul.f32 %v790_v34, %v8081_v23  ;;  %v795_v39 = vmul.f32 %v790_v34, %v8092_v27 }
 0x4c7   :  { %v8452_v20 = vpop.permute.xlu1 %720 }
 0x4c8   :  { %14088 = vst [vmem:[#allocation62_spill] sm:$0xff] %v8452_v20 }
 0x4cf   :  { %v8456_v13 = vpop.permute.xlu1 %747 }
 0x4d0   :  { %14090 = vst [vmem:[#allocation64_spill] sm:$0xff] %v8456_v13 }
 0x4d7   :  { %v785_v16 = vpop.permute.xlu1 %784 }
 0x4d8   :  { %v794_v48 = vmul.f32 %v785_v16, %v8103_v33  ;;  %v793_v15 = vmul.f32 %v785_v16, %v8086_v25  ;;  %v792_v19 = vmul.f32 %v785_v16, %v8096_v29  ;;  %v7542_v16 = vld [vmem:[%s13796_s1 + $0x108] sm:$0xff] }
 0x4da   :  { %808 = vrot.lane.b32.xlu2 %v794_v48, %s7951_s24  ;;  %806 = vrot.lane.b32.xlu1 %v793_v15, %s7951_s24  ;;  %v7541_v15 = vld [vmem:[%s13796_s1 + $0x100] sm:$0xff]  ;;  %v8478_v48 = vpop.permute.xlu0 %663 }
 0x4db   :  { %804 = vrot.lane.b32.xlu0 %v792_v19, %s7951_s24  ;;  %14092 = vst [vmem:[#allocation66_spill] sm:$0xff] %v8478_v48 }
 0x4e2   :  { %814 = vrot.lane.b32.xlu2 %v797_v5, %s7951_s24  ;;  %812 = vrot.lane.b32.xlu1 %v796_v46, %s7951_s24  ;;  %v8480_v19 = vpop.permute.xlu0 %669 }
 0x4e3   :  { %810 = vrot.lane.b32.xlu0 %v795_v39, %s7951_s24  ;;  %14093 = vst [vmem:[#allocation67_spill] sm:$0xff] %v8480_v19 }
 0x4ea   :  { %842 = vperm.xlu1 %7799, %v7542_v16   ;;  %v8482_v34 = vpop.permute.xlu0 %712 }
 0x4eb   :  { %837 = vperm.xlu0 %7798, %v7541_v15   ;;  %14094 = vst [vmem:[#allocation68_spill] sm:$0xff] %v8482_v34 }
 0x4f2   :  { %v8484_v5 = vpop.permute.xlu0 %718 }
 0x4f3   :  { %14095 = vst [vmem:[#allocation69_spill] sm:$0xff] %v8484_v5 }
 0x4fa   :  { %v8486_v46 = vpop.permute.xlu0 %745 }
 0x4fb   :  { %14096 = vst [vmem:[#allocation70_spill] sm:$0xff] %v8486_v46 }
 0x502   :  { %v8488_v39 = vpop.permute.xlu0 %770 }
 0x503   :  { %14097 = vst [vmem:[#allocation71_spill] sm:$0xff] %v8488_v39 }
 0x54c   :  { %v8492_v47 = vpop.permute.xlu1 %806 }
 0x54d   :  { %v8490_v8 = vpop.permute.xlu0 %804  ;;  %14099 = vst [vmem:[#allocation73_spill] sm:$0xff] %v8492_v47 }
 0x54e   :  { %14098 = vst [vmem:[#allocation72_spill] sm:$0xff] %v8490_v8 }
 0x554   :  { %v8496_v16 = vpop.permute.xlu1 %812 }
 0x555   :  { %v8494_v38 = vpop.permute.xlu0 %810  ;;  %14101 = vst [vmem:[#allocation75_spill] sm:$0xff] %v8496_v16 }
 0x556   :  { %14100 = vst [vmem:[#allocation74_spill] sm:$0xff] %v8494_v38 }
 0x55c   :  { %v843_v52 = vpop.permute.xlu1 %842 }
 0x55d   :  { %v838_v15 = vpop.permute.xlu0 %837  ;;  %v850_v17 = vmul.f32 %v843_v52, %v8114_v40  ;;  %v849_v21 = vmul.f32 %v843_v52, %v8081_v23  ;;  %v848_v26 = vmul.f32 %v843_v52, %v8092_v27 }
 0x55e   :  { %v847_v7 = vmul.f32 %v838_v15, %v8103_v33  ;;  %v846_v55 = vmul.f32 %v838_v15, %v8086_v25  ;;  %v845_v18 = vmul.f32 %v838_v15, %v8096_v29 }
 0x560   :  { %861 = vrot.lane.b32.xlu1 %v847_v7, %s7953_s26  ;;  %859 = vrot.lane.b32.xlu0 %v846_v55, %s7953_s26  ;;  %v7544_v7 = vld [vmem:[%s13796_s1 + $0x178] sm:$0xff]  ;;  %v8516_v55 = vpop.permute.xlu2 %808 }
 0x561   :  { %857 = vrot.lane.b32.xlu2 %v845_v18, %s7953_s26  ;;  %v7543_v18 = vld [vmem:[%s13796_s1 + $0x170] sm:$0xff]  ;;  %14102 = vst [vmem:[#allocation76_spill] sm:$0xff] %v8516_v55 }
 0x568   :  { %867 = vrot.lane.b32.xlu1 %v850_v17, %s7953_s26  ;;  %865 = vrot.lane.b32.xlu0 %v849_v21, %s7953_s26  ;;  %v8518_v15 = vpop.permute.xlu2 %814 }
 0x569   :  { %863 = vrot.lane.b32.xlu2 %v848_v26, %s7953_s26  ;;  %14103 = vst [vmem:[#allocation77_spill] sm:$0xff] %v8518_v15 }
 0x570   :  { %895 = vperm.xlu0 %7798, %v7544_v7  }
 0x571   :  { %890 = vperm.xlu2 %7797, %v7543_v18  }
 0x5bb   :  { %v8520_v52 = vpop.permute.xlu2 %857 }
 0x5bc   :  { %14104 = vst [vmem:[#allocation78_spill] sm:$0xff] %v8520_v52 }
 0x5c3   :  { %v8522_v17 = vpop.permute.xlu2 %863 }
 0x5c4   :  { %14105 = vst [vmem:[#allocation79_spill] sm:$0xff] %v8522_v17 }
 0x5cb   :  { %v891_v21 = vpop.permute.xlu2 %890 }
 0x5cc   :  { %v900_v26 = vmul.f32 %v891_v21, %v8103_v33  ;;  %v899_v12 = vmul.f32 %v891_v21, %v8086_v25  ;;  %v898_v44 = vmul.f32 %v891_v21, %v8096_v29 }
 0x5ce   :  { %914 = vrot.lane.b32.xlu0 %v900_v26, %s7952_s25  ;;  %912 = vrot.lane.b32.xlu2 %v899_v12, %s7952_s25  ;;  %v7546_v12 = vld [vmem:[%s13796_s1 + $0x1e8] sm:$0xff] }
 0x5cf   :  { %910 = vrot.lane.b32.xlu1 %v898_v44, %s7952_s25  ;;  %v7545_v44 = vld [vmem:[%s13796_s1 + $0x1e0] sm:$0xff] }
 0x5d2   :  { %v8530_v7 = vpop.permute.xlu0 %859  ;;  %v8546_v21 = vpop.permute.xlu1 %861 }
 0x5d3   :  { %14106 = vst [vmem:[#allocation80_spill] sm:$0xff] %v8530_v7 }
 0x5d4   :  { %14108 = vst [vmem:[#allocation82_spill] sm:$0xff] %v8546_v21 }
 0x5da   :  { %v8532_v18 = vpop.permute.xlu0 %865  ;;  %v8548_v26 = vpop.permute.xlu1 %867 }
 0x5db   :  { %14107 = vst [vmem:[#allocation81_spill] sm:$0xff] %v8532_v18 }
 0x5dc   :  { %14109 = vst [vmem:[#allocation83_spill] sm:$0xff] %v8548_v26 }
 0x5e2   :  { %v896_v45 = vpop.permute.xlu0 %895 }
 0x5e3   :  { %v903_v43 = vmul.f32 %v896_v45, %v8114_v40  ;;  %v902_v15 = vmul.f32 %v896_v45, %v8081_v23  ;;  %v901_v55 = vmul.f32 %v896_v45, %v8092_v27 }
 0x5e5   :  { %920 = vrot.lane.b32.xlu0 %v903_v43, %s7952_s25  ;;  %918 = vrot.lane.b32.xlu2 %v902_v15, %s7952_s25 }
 0x5e6   :  { %916 = vrot.lane.b32.xlu1 %v901_v55, %s7952_s25 }
 0x5ed   :  { %948 = vperm.xlu2 %7797, %v7546_v12  }
 0x5ee   :  { %943 = vperm.xlu1 %7799, %v7545_v44  }
 0x628   :  { %v8552_v43 = vpop.permute.xlu2 %912 }
 0x629   :  { %14111 = vst [vmem:[#allocation85_spill] sm:$0xff] %v8552_v43 }
 0x63f   :  { %v8556_v55 = vpop.permute.xlu2 %918 }
 0x640   :  { %14113 = vst [vmem:[#allocation87_spill] sm:$0xff] %v8556_v55 }
 0x641   :  { %v8550_v45 = vpop.permute.xlu1 %910 }
 0x642   :  { %14110 = vst [vmem:[#allocation84_spill] sm:$0xff] %v8550_v45 }
 0x647   :  { %v949_v44 = vpop.permute.xlu2 %948 }
 0x648   :  { %v956_v26 = vmul.f32 %v949_v44, %v8114_v40  ;;  %v955_v21 = vmul.f32 %v949_v44, %v8081_v23 }
 0x658   :  { %v8554_v15 = vpop.permute.xlu1 %916 }
 0x659   :  { %14112 = vst [vmem:[#allocation86_spill] sm:$0xff] %v8554_v15  ;;  %v954_v15 = vmul.f32 %v949_v44, %v8092_v27 }
 0x660   :  { %v944_v17 = vpop.permute.xlu1 %943 }
 0x661   :  { %v953_v18 = vmul.f32 %v944_v17, %v8103_v33  ;;  %v952_v39 = vmul.f32 %v944_v17, %v8086_v25  ;;  %v951_v12 = vmul.f32 %v944_v17, %v8096_v29  ;;  %v7548_v17 = vld [vmem:[%s13796_s1 + $0x258] sm:$0xff] }
 0x663   :  { %967 = vrot.lane.b32.xlu2 %v953_v18, %s7954_s27  ;;  %965 = vrot.lane.b32.xlu1 %v952_v39, %s7954_s27  ;;  %v7547_v39 = vld [vmem:[%s13796_s1 + $0x250] sm:$0xff]  ;;  %v8576_v18 = vpop.permute.xlu0 %914 }
 0x664   :  { %963 = vrot.lane.b32.xlu0 %v951_v12, %s7954_s27  ;;  %14114 = vst [vmem:[#allocation88_spill] sm:$0xff] %v8576_v18 }
 0x66b   :  { %973 = vrot.lane.b32.xlu2 %v956_v26, %s7954_s27  ;;  %971 = vrot.lane.b32.xlu1 %v955_v21, %s7954_s27  ;;  %v8578_v12 = vpop.permute.xlu0 %920 }
 0x66c   :  { %969 = vrot.lane.b32.xlu0 %v954_v15, %s7954_s27  ;;  %14115 = vst [vmem:[#allocation89_spill] sm:$0xff] %v8578_v12 }
 0x673   :  { %1001 = vperm.xlu1 %7799, %v7548_v17  }
 0x674   :  { %996 = vperm.xlu0 %7798, %v7547_v39  }
 0x6d5   :  { %v8582_v26 = vpop.permute.xlu1 %965 }
 0x6d6   :  { %v8580_v44 = vpop.permute.xlu0 %963  ;;  %14117 = vst [vmem:[#allocation91_spill] sm:$0xff] %v8582_v26 }
 0x6d7   :  { %14116 = vst [vmem:[#allocation90_spill] sm:$0xff] %v8580_v44 }
 0x6dd   :  { %v8586_v15 = vpop.permute.xlu1 %971 }
 0x6de   :  { %v8584_v21 = vpop.permute.xlu0 %969  ;;  %14119 = vst [vmem:[#allocation93_spill] sm:$0xff] %v8586_v15 }
 0x6df   :  { %14118 = vst [vmem:[#allocation92_spill] sm:$0xff] %v8584_v21 }
 0x6e5   :  { %v1002_v39 = vpop.permute.xlu1 %1001 }
 0x6e6   :  { %v997_v55 = vpop.permute.xlu0 %996  ;;  %v1009_v12 = vmul.f32 %v1002_v39, %v8114_v40  ;;  %v1008_v18 = vmul.f32 %v1002_v39, %v8081_v23  ;;  %v1007_v21 = vmul.f32 %v1002_v39, %v8092_v27 }
 0x6e7   :  { %v1006_v38 = vmul.f32 %v997_v55, %v8103_v33  ;;  %v1005_v16 = vmul.f32 %v997_v55, %v8086_v25  ;;  %v1004_v17 = vmul.f32 %v997_v55, %v8096_v29  ;;  %v8606_v55 = vpop.permute.xlu2 %967 }
 0x6e8   :  { %14120 = vst [vmem:[#allocation94_spill] sm:$0xff] %v8606_v55 }
 0x6e9   :  { %1020 = vrot.lane.b32.xlu1 %v1006_v38, %s7955_s28  ;;  %1018 = vrot.lane.b32.xlu0 %v1005_v16, %s7955_s28  ;;  %v7550_v38 = vld [vmem:[%s13796_s1 + $0x2c8] sm:$0xff]  ;;  %v7549_v16 = vld [vmem:[%s13796_s1 + $0x2c0] sm:$0xff] }
 0x6ea   :  { %1016 = vrot.lane.b32.xlu2 %v1004_v17, %s7955_s28 }
 0x6ef   :  { %v8608_v17 = vpop.permute.xlu2 %973 }
 0x6f0   :  { %14121 = vst [vmem:[#allocation95_spill] sm:$0xff] %v8608_v17 }
 0x6f1   :  { %1026 = vrot.lane.b32.xlu1 %v1009_v12, %s7955_s28  ;;  %1024 = vrot.lane.b32.xlu0 %v1008_v18, %s7955_s28 }
 0x6f2   :  { %1022 = vrot.lane.b32.xlu2 %v1007_v21, %s7955_s28 }
 0x6f9   :  { %1054 = vperm.xlu0 %7798, %v7550_v38  }
 0x6fa   :  { %1049 = vperm.xlu2 %7797, %v7549_v16  }
 0x744   :  { %v8610_v39 = vpop.permute.xlu2 %1016 }
 0x745   :  { %14122 = vst [vmem:[#allocation96_spill] sm:$0xff] %v8610_v39 }
 0x74c   :  { %v8612_v12 = vpop.permute.xlu2 %1022 }
 0x74d   :  { %14123 = vst [vmem:[#allocation97_spill] sm:$0xff] %v8612_v12 }
 0x754   :  { %v1050_v18 = vpop.permute.xlu2 %1049 }
 0x755   :  { %v1057_v21 = vmul.f32 %v1050_v18, %v8096_v29  ;;  %v1058_v15 = vmul.f32 %v1050_v18, %v8086_v25  ;;  %v1059_v44 = vmul.f32 %v1050_v18, %v8103_v33  ;;  %v7552_v18 = vld [vmem:[%s13796_s1 + $0x30] sm:$0xff] }
 0x757   :  { %1073 = vrot.lane.b32.xlu0 %v1059_v44, %s7956_s10  ;;  %1071 = vrot.lane.b32.xlu2 %v1058_v15, %s7956_s10  ;;  %v7551_v44 = vld [vmem:[%s13797_s2 + $0x4] sm:$0x3] }
 0x758   :  { %1069 = vrot.lane.b32.xlu1 %v1057_v21, %s7956_s10  ;;  %v1101_v15 = vperm.slane %v7551_v44, 1  ;;  %v1100_v21 = vperm.slane %v7551_v44, 0 }
 0x75b   :  { %v8620_v38 = vpop.permute.xlu0 %1018 }
 0x75c   :  { %14124 = vst [vmem:[#allocation98_spill] sm:$0xff] %v8620_v38 }
 0x763   :  { %v8622_v16 = vpop.permute.xlu0 %1024 }
 0x764   :  { %14125 = vst [vmem:[#allocation99_spill] sm:$0xff] %v8622_v16 }
 0x76b   :  { %v1055_v17 = vpop.permute.xlu0 %1054 }
 0x76c   :  { %v1060_v55 = vmul.f32 %v1055_v17, %v8092_v27  ;;  %v1061_v12 = vmul.f32 %v1055_v17, %v8081_v23  ;;  %v1062_v39 = vmul.f32 %v1055_v17, %v8114_v40  ;;  %v7554_v17 = vld [vmem:[%s13796_s1 + $0xa0] sm:$0xff] }
 0x76e   :  { %1079 = vrot.lane.b32.xlu0 %v1062_v39, %s7956_s10  ;;  %1077 = vrot.lane.b32.xlu2 %v1061_v12, %s7956_s10  ;;  %v7553_v39 = vld [vmem:[%s13796_s1 + $0x38] sm:$0xff] }
 0x76f   :  { %1075 = vrot.lane.b32.xlu1 %v1060_v55, %s7956_s10  ;;  %v7555_v55 = vld [vmem:[%s13796_s1 + $0xa8] sm:$0xff] }
 0x776   :  { %1122 = vperm.xlu0 %7798, %v7552_v18   ;;  %1104 = vrot.lane.b32.xlu2 %v1101_v15, %s7958_s21 }
 0x777   :  { %1102 = vrot.lane.b32.xlu1 %v1100_v21, %s7958_s21 }
 0x77e   :  { %1146 = vperm.xlu0 %7798, %v7555_v55   ;;  %1141 = vperm.xlu2 %7797, %v7554_v17  }
 0x77f   :  { %1127 = vperm.xlu1 %7799, %v7553_v39  }
 0x7b1   :  { %v8647_v12 = vpop.permute.xlu2 %1071 }
 0x7b2   :  { %14126 = vst [vmem:[#allocation100_spill] sm:$0xff] %v8647_v12 }
 0x7c8   :  { %v8649_v44 = vpop.permute.xlu2 %1077 }
 0x7c9   :  { %14127 = vst [vmem:[#allocation101_spill] sm:$0xff] %v8649_v44  ;;  %v8653_v18 = vpop.permute.xlu0 %1073 }
 0x7ca   :  { %14129 = vst [vmem:[#allocation103_spill] sm:$0xff] %v8653_v18 }
 0x7d0   :  { %v8651_v15 = vpop.permute.xlu2 %1104 }
 0x7d1   :  { %14128 = vst [vmem:[#allocation102_spill] sm:$0xff] %v8651_v15 }
 0x7d8   :  { %v1142_v21 = vpop.permute.xlu2 %1141 }
 0x7d9   :  { %v1149_v16 = vmul.f32 %v1142_v21, %v8096_v29  ;;  %v1150_v38 = vmul.f32 %v1142_v21, %v8086_v25  ;;  %v1151_v26 = vmul.f32 %v1142_v21, %v8103_v33 }
 0x7db   :  { %1165 = vrot.lane.b32.xlu0 %v1151_v26, %s7951_s24  ;;  %1163 = vrot.lane.b32.xlu2 %v1150_v38, %s7951_s24  ;;  %v7557_v26 = vld [vmem:[%s13796_s1 + $0x118] sm:$0xff]  ;;  %v7556_v38 = vld [vmem:[%s13796_s1 + $0x110] sm:$0xff] }
 0x7dc   :  { %1161 = vrot.lane.b32.xlu1 %v1149_v16, %s7951_s24  ;;  %v8677_v16 = vpop.permute.xlu1 %1020 }
 0x7dd   :  { %14132 = vst [vmem:[#allocation106_spill] sm:$0xff] %v8677_v16 }
 0x7e0   :  { %v8661_v55 = vpop.permute.xlu0 %1079 }
 0x7e1   :  { %14130 = vst [vmem:[#allocation104_spill] sm:$0xff] %v8661_v55 }
 0x7e4   :  { %v8679_v21 = vpop.permute.xlu1 %1026 }
 0x7e5   :  { %14133 = vst [vmem:[#allocation107_spill] sm:$0xff] %v8679_v21 }
 0x7e8   :  { %v8663_v17 = vpop.permute.xlu0 %1122 }
 0x7e9   :  { %14131 = vst [vmem:[#allocation105_spill] sm:$0xff] %v8663_v17 }
 0x7f0   :  { %v1147_v39 = vpop.permute.xlu0 %1146 }
 0x7f1   :  { %v1152_v15 = vmul.f32 %v1147_v39, %v8092_v27  ;;  %v1153_v18 = vmul.f32 %v1147_v39, %v8081_v23  ;;  %v1154_v44 = vmul.f32 %v1147_v39, %v8114_v40  ;;  %v8681_v39 = vpop.permute.xlu1 %1069 }
 0x7f2   :  { %14134 = vst [vmem:[#allocation108_spill] sm:$0xff] %v8681_v39 }
 0x7f3   :  { %1171 = vrot.lane.b32.xlu0 %v1154_v44, %s7951_s24  ;;  %1169 = vrot.lane.b32.xlu2 %v1153_v18, %s7951_s24 }
 0x7f4   :  { %1167 = vrot.lane.b32.xlu1 %v1152_v15, %s7951_s24 }
 0x7f9   :  { %v8683_v44 = vpop.permute.xlu1 %1075 }
 0x7fa   :  { %14135 = vst [vmem:[#allocation109_spill] sm:$0xff] %v8683_v44 }
 0x7fb   :  { %1199 = vperm.xlu2 %7797, %v7557_v26  }
 0x7fc   :  { %1194 = vperm.xlu1 %7799, %v7556_v38  }
 0x801   :  { %v8685_v18 = vpop.permute.xlu1 %1102 }
 0x802   :  { %14136 = vst [vmem:[#allocation110_spill] sm:$0xff] %v8685_v18 }
 0x809   :  { %v8687_v15 = vpop.permute.xlu1 %1127 }
 0x80a   :  { %14137 = vst [vmem:[#allocation111_spill] sm:$0xff] %v8687_v15 }
 0x835   :  { %v8691_v12 = vpop.permute.xlu2 %1163 }
 0x836   :  { %14139 = vst [vmem:[#allocation113_spill] sm:$0xff] %v8691_v12 }
 0x84d   :  { %v8695_v26 = vpop.permute.xlu2 %1169 }
 0x84e   :  { %v8689_v55 = vpop.permute.xlu1 %1161  ;;  %14141 = vst [vmem:[#allocation115_spill] sm:$0xff] %v8695_v26 }
 0x84f   :  { %14138 = vst [vmem:[#allocation112_spill] sm:$0xff] %v8689_v55 }
 0x855   :  { %v1200_v44 = vpop.permute.xlu2 %1199 }
 0x856   :  { %v1206_v18 = vmul.f32 %v1200_v44, %v8081_v23  ;;  %v1207_v43 = vmul.f32 %v1200_v44, %v8114_v40  ;;  %v1205_v52 = vmul.f32 %v1200_v44, %v8092_v27  ;;  %v8715_v23 = vpop.permute.xlu0 %1165 }
 0x857   :  { %14142 = vst [vmem:[#allocation116_spill] sm:$0xff] %v8715_v23  ;;  %v8763_v23 = vld [vmem:[#allocation2 + $0x10] sm:$0xff] }
 0x866   :  { %v8693_v45 = vpop.permute.xlu1 %1167 }
 0x867   :  { %14140 = vst [vmem:[#allocation114_spill] sm:$0xff] %v8693_v45 }
 0x86e   :  { %v1195_v38 = vpop.permute.xlu1 %1194 }
 0x86f   :  { %v1202_v16 = vmul.f32 %v1195_v38, %v8096_v29  ;;  %v1203_v21 = vmul.f32 %v1195_v38, %v8086_v25  ;;  %v1204_v39 = vmul.f32 %v1195_v38, %v8103_v33 }
 0x871   :  { %1218 = vrot.lane.b32.xlu2 %v1204_v39, %s7953_s26  ;;  %1216 = vrot.lane.b32.xlu1 %v1203_v21, %s7953_s26  ;;  %v7559_v39 = vld [vmem:[%s13796_s1 + $0x188] sm:$0xff]  ;;  %v8717_v21 = vpop.permute.xlu0 %1171 }
 0x872   :  { %1214 = vrot.lane.b32.xlu0 %v1202_v16, %s7953_s26  ;;  %v7558_v16 = vld [vmem:[%s13796_s1 + $0x180] sm:$0xff]  ;;  %14143 = vst [vmem:[#allocation117_spill] sm:$0xff] %v8717_v21  ;;  %v8737_v21 = vld [vmem:[#allocation2 + $0x18] sm:$0xff] }
 0x879   :  { %1224 = vrot.lane.b32.xlu2 %v1207_v43, %s7953_s26  ;;  %1222 = vrot.lane.b32.xlu1 %v1206_v18, %s7953_s26 }
 0x87a   :  { %1220 = vrot.lane.b32.xlu0 %v1205_v52, %s7953_s26 }
 0x881   :  { %1252 = vperm.xlu1 %7799, %v7559_v39  }
 0x882   :  { %1247 = vperm.xlu0 %7798, %v7558_v16  }
 0x8e3   :  { %v8721_v43 = vpop.permute.xlu1 %1216 }
 0x8e4   :  { %v8719_v27 = vpop.permute.xlu0 %1214  ;;  %14145 = vst [vmem:[#allocation119_spill] sm:$0xff] %v8721_v43 }
 0x8e5   :  { %14144 = vst [vmem:[#allocation118_spill] sm:$0xff] %v8719_v27 }
 0x8eb   :  { %v8725_v52 = vpop.permute.xlu1 %1222 }
 0x8ec   :  { %v8723_v44 = vpop.permute.xlu0 %1220  ;;  %14147 = vst [vmem:[#allocation121_spill] sm:$0xff] %v8725_v52 }
 0x8ed   :  { %14146 = vst [vmem:[#allocation120_spill] sm:$0xff] %v8723_v44 }
 0x8f3   :  { %v1253_v16 = vpop.permute.xlu1 %1252 }
 0x8f4   :  { %v1248_v18 = vpop.permute.xlu0 %1247  ;;  %v1259_v8 = vmul.f32 %v8733_v49, %v1253_v16  ;;  %v1260_v47 = vmul.f32 %v1253_v16, %v8114_v40  ;;  %v8749_v40 = vpop.permute.xlu2 %1218 }
 0x8f5   :  { %v1255_v38 = vmul.f32 %v1248_v18, %v8096_v29  ;;  %v1256_v7 = vmul.f32 %v1248_v18, %v8086_v25  ;;  %v1257_v39 = vmul.f32 %v1248_v18, %v8103_v33  ;;  %v1258_v29 = vmul.f32 %v8737_v21, %v1253_v16  ;;  %v7561_v25 = vld [vmem:[%s13796_s1 + $0x1f8] sm:$0xff]  ;;  %v7560_v33 = vld [vmem:[%s13796_s1 + $0x1f0] sm:$0xff]  ;;  %14148 = vst [vmem:[#allocation122_spill] sm:$0xff] %v8749_v40  ;;  %v8760_v16 = vld [vmem:[#allocation2 + $0x8] sm:$0xff] }
 0x8f7   :  { %1271 = vrot.lane.b32.xlu1 %v1257_v39, %s7952_s25  ;;  %1269 = vrot.lane.b32.xlu0 %v1256_v7, %s7952_s25 }
 0x8f8   :  { %1267 = vrot.lane.b32.xlu2 %v1255_v38, %s7952_s25  ;;  %v8757_v38 = vld [vmem:[#allocation2] sm:$0xff] }
 0x8fc   :  { %v8751_v7 = vpop.permute.xlu2 %1224 }
 0x8fd   :  { %14149 = vst [vmem:[#allocation123_spill] sm:$0xff] %v8751_v7 }
 0x8ff   :  { %1277 = vrot.lane.b32.xlu1 %v1260_v47, %s7952_s25  ;;  %1275 = vrot.lane.b32.xlu0 %v1259_v8, %s7952_s25 }
 0x900   :  { %1273 = vrot.lane.b32.xlu2 %v1258_v29, %s7952_s25 }
 0x907   :  { %1305 = vperm.xlu0 %7798, %v7561_v25  }
 0x908   :  { %1300 = vperm.xlu2 %7797, %v7560_v33  }
 0x952   :  { %v8753_v18 = vpop.permute.xlu2 %1267 }
 0x953   :  { %14150 = vst [vmem:[#allocation124_spill] sm:$0xff] %v8753_v18 }
 0x95a   :  { %v8755_v47 = vpop.permute.xlu2 %1273 }
 0x95b   :  { %14151 = vst [vmem:[#allocation125_spill] sm:$0xff] %v8755_v47  ;;  %v8775_v47 = vld [vmem:[#allocation2 + $0x28] sm:$0xff] }
 0x962   :  { %v1301_v8 = vpop.permute.xlu2 %1300 }
 0x963   :  { %v1308_v39 = vmul.f32 %v8757_v38, %v1301_v8  ;;  %v1309_v29 = vmul.f32 %v8760_v16, %v1301_v8  ;;  %v1310_v25 = vmul.f32 %v8763_v23, %v1301_v8  ;;  %v7563_v8 = vld [vmem:[%s13796_s1 + $0x268] sm:$0xff] }
 0x965   :  { %1324 = vrot.lane.b32.xlu0 %v1310_v25, %s7954_s27  ;;  %1322 = vrot.lane.b32.xlu2 %v1309_v29, %s7954_s27 }
 0x966   :  { %1320 = vrot.lane.b32.xlu1 %v1308_v39, %s7954_s27  ;;  %v7562_v39 = vld [vmem:[%s13796_s1 + $0x260] sm:$0xff] }
 0x969   :  { %v8769_v33 = vpop.permute.xlu0 %1269  ;;  %v8787_v29 = vpop.permute.xlu1 %1271 }
 0x96a   :  { %14152 = vst [vmem:[#allocation126_spill] sm:$0xff] %v8769_v33 }
 0x96b   :  { %14154 = vst [vmem:[#allocation128_spill] sm:$0xff] %v8787_v29 }
 0x971   :  { %v8771_v7 = vpop.permute.xlu0 %1275  ;;  %v8789_v25 = vpop.permute.xlu1 %1277 }
 0x972   :  { %14153 = vst [vmem:[#allocation127_spill] sm:$0xff] %v8771_v7 }
 0x973   :  { %14155 = vst [vmem:[#allocation129_spill] sm:$0xff] %v8789_v25 }
 0x979   :  { %v1306_v40 = vpop.permute.xlu0 %1305 }
 0x97a   :  { %v1311_v9 = vmul.f32 %v8737_v21, %v1306_v40  ;;  %v1312_v19 = vmul.f32 %v8733_v49, %v1306_v40  ;;  %v1313_v61 = vmul.f32 %v8775_v47, %v1306_v40 }
 0x97c   :  { %1330 = vrot.lane.b32.xlu0 %v1313_v61, %s7954_s27  ;;  %1328 = vrot.lane.b32.xlu2 %v1312_v19, %s7954_s27 }
 0x97d   :  { %1326 = vrot.lane.b32.xlu1 %v1311_v9, %s7954_s27 }
 0x984   :  { %1358 = vperm.xlu2 %7797, %v7563_v8  }
 0x985   :  { %1353 = vperm.xlu1 %7799, %v7562_v39  }
 0x9bf   :  { %v8793_v61 = vpop.permute.xlu2 %1322 }
 0x9c0   :  { %14157 = vst [vmem:[#allocation131_spill] sm:$0xff] %v8793_v61 }
 0x9d6   :  { %v8797_v9 = vpop.permute.xlu2 %1328 }
 0x9d7   :  { %14159 = vst [vmem:[#allocation133_spill] sm:$0xff] %v8797_v9 }
 0x9d8   :  { %v8791_v40 = vpop.permute.xlu1 %1320 }
 0x9d9   :  { %14156 = vst [vmem:[#allocation130_spill] sm:$0xff] %v8791_v40 }
 0x9de   :  { %v1359_v39 = vpop.permute.xlu2 %1358 }
 0x9df   :  { %v1365_v25 = vmul.f32 %v8733_v49, %v1359_v39  ;;  %v1366_v29 = vmul.f32 %v8775_v47, %v1359_v39 }
 0x9ef   :  { %v8795_v19 = vpop.permute.xlu1 %1326 }
 0x9f0   :  { %14158 = vst [vmem:[#allocation132_spill] sm:$0xff] %v8795_v19  ;;  %v1364_v19 = vmul.f32 %v8737_v21, %v1359_v39 }
 0x9f7   :  { %v1354_v7 = vpop.permute.xlu1 %1353 }
 0x9f8   :  { %v1361_v44 = vmul.f32 %v8757_v38, %v1354_v7  ;;  %v1362_v52 = vmul.f32 %v8760_v16, %v1354_v7  ;;  %v1363_v8 = vmul.f32 %v8763_v23, %v1354_v7  ;;  %v7565_v7 = vld [vmem:[%s13796_s1 + $0x2d8] sm:$0xff] }
 0x9fa   :  { %1377 = vrot.lane.b32.xlu2 %v1363_v8, %s7955_s28  ;;  %1375 = vrot.lane.b32.xlu1 %v1362_v52, %s7955_s28  ;;  %v8817_v52 = vpop.permute.xlu0 %1324 }
 0x9fb   :  { %1373 = vrot.lane.b32.xlu0 %v1361_v44, %s7955_s28  ;;  %v7564_v44 = vld [vmem:[%s13796_s1 + $0x2d0] sm:$0xff]  ;;  %14160 = vst [vmem:[#allocation134_spill] sm:$0xff] %v8817_v52 }
 0xa02   :  { %1383 = vrot.lane.b32.xlu2 %v1366_v29, %s7955_s28  ;;  %1381 = vrot.lane.b32.xlu1 %v1365_v25, %s7955_s28  ;;  %v8819_v8 = vpop.permute.xlu0 %1330 }
 0xa03   :  { %1379 = vrot.lane.b32.xlu0 %v1364_v19, %s7955_s28  ;;  %14161 = vst [vmem:[#allocation135_spill] sm:$0xff] %v8819_v8 }
 0xa0a   :  { %1411 = vperm.xlu1 %7799, %v7565_v7  }
 0xa0b   :  { %1406 = vperm.xlu0 %7798, %v7564_v44  }
 0xa6c   :  { %v8823_v29 = vpop.permute.xlu1 %1375 }
 0xa6d   :  { %v8821_v39 = vpop.permute.xlu0 %1373  ;;  %14163 = vst [vmem:[#allocation137_spill] sm:$0xff] %v8823_v29 }
 0xa6e   :  { %14162 = vst [vmem:[#allocation136_spill] sm:$0xff] %v8821_v39 }
 0xa74   :  { %v8827_v19 = vpop.permute.xlu1 %1381 }
 0xa75   :  { %v8825_v25 = vpop.permute.xlu0 %1379  ;;  %14165 = vst [vmem:[#allocation139_spill] sm:$0xff] %v8827_v19 }
 0xa76   :  { %14164 = vst [vmem:[#allocation138_spill] sm:$0xff] %v8825_v25 }
 0xa7c   :  { %v1412_v44 = vpop.permute.xlu1 %1411 }
 0xa7d   :  { %v1407_v9 = vpop.permute.xlu0 %1406  ;;  %v1418_v8 = vmul.f32 %v8733_v49, %v1412_v44  ;;  %v1419_v52 = vmul.f32 %v8775_v47, %v1412_v44  ;;  %v1417_v25 = vmul.f32 %v8737_v21, %v1412_v44 }
 0xa7e   :  { %v1414_v13 = vmul.f32 %v8757_v38, %v1407_v9  ;;  %v1415_v15 = vmul.f32 %v8760_v16, %v1407_v9  ;;  %v1416_v7 = vmul.f32 %v8763_v23, %v1407_v9  ;;  %v7566_v9 = vld [vmem:[%s13797_s2 + $0x6] sm:$0x3] }
 0xa80   :  { %1430 = vrot.lane.b32.xlu1 %v1416_v7, %s7956_s10  ;;  %1428 = vrot.lane.b32.xlu0 %v1415_v15, %s7956_s10  ;;  %v1458_v15 = vperm.slane %v7566_v9, 1  ;;  %v1457_v7 = vperm.slane %v7566_v9, 0 }
 0xa81   :  { %1426 = vrot.lane.b32.xlu2 %v1414_v13, %s7956_s10  ;;  %v7567_v13 = vld [vmem:[%s13796_s1 + $0x40] sm:$0xff] }
 0xa88   :  { %1436 = vrot.lane.b32.xlu1 %v1419_v52, %s7956_s10  ;;  %1434 = vrot.lane.b32.xlu0 %v1418_v8, %s7956_s10  ;;  %v7570_v52 = vld [vmem:[%s13796_s1 + $0xb8] sm:$0xff]  ;;  %v7569_v8 = vld [vmem:[%s13796_s1 + $0xb0] sm:$0xff] }
 0xa89   :  { %1432 = vrot.lane.b32.xlu2 %v1417_v25, %s7956_s10  ;;  %v7568_v25 = vld [vmem:[%s13796_s1 + $0x48] sm:$0xff] }
 0xa90   :  { %1479 = vperm.xlu1 %7799, %v7567_v13   ;;  %1461 = vrot.lane.b32.xlu0 %v1458_v15, %s7959_s13 }
 0xa91   :  { %1459 = vrot.lane.b32.xlu2 %v1457_v7, %s7959_s13 }
 0xa98   :  { %1503 = vperm.xlu1 %7799, %v7570_v52   ;;  %1498 = vperm.xlu0 %7798, %v7569_v8  }
 0xa99   :  { %1484 = vperm.xlu2 %7797, %v7568_v25  }
 0xaf2   :  { %v8858_v44 = vpop.permute.xlu1 %1430  ;;  %v8860_v9 = vpop.permute.xlu0 %1428 }
 0xaf3   :  { %14166 = vst [vmem:[#allocation140_spill] sm:$0xff] %v8858_v44 }
 0xaf4   :  { %14167 = vst [vmem:[#allocation141_spill] sm:$0xff] %v8860_v9 }
 0xafa   :  { %v8862_v15 = vpop.permute.xlu0 %1434  ;;  %v8864_v13 = vpop.permute.xlu1 %1436 }
 0xafb   :  { %14168 = vst [vmem:[#allocation142_spill] sm:$0xff] %v8862_v15 }
 0xafc   :  { %14169 = vst [vmem:[#allocation143_spill] sm:$0xff] %v8864_v13 }
 0xb02   :  { %v8866_v7 = vpop.permute.xlu0 %1461  ;;  %v8868_v19 = vpop.permute.xlu1 %1479 }
 0xb03   :  { %14170 = vst [vmem:[#allocation144_spill] sm:$0xff] %v8866_v7 }
 0xb0a   :  { %v1499_v39 = vpop.permute.xlu0 %1498  ;;  %v1504_v8 = vpop.permute.xlu1 %1503 }
 0xb0b   :  { %v1506_v29 = vmul.f32 %v8757_v38, %v1499_v39  ;;  %v1507_v45 = vmul.f32 %v8760_v16, %v1499_v39  ;;  %v1508_v52 = vmul.f32 %v8763_v23, %v1499_v39  ;;  %v1509_v25 = vmul.f32 %v8737_v21, %v1504_v8  ;;  %v7571_v39 = vld [vmem:[%s13796_s1 + $0x120] sm:$0xff] }
 0xb0c   :  { %v1510_v13 = vmul.f32 %v8733_v49, %v1504_v8  ;;  %v1511_v7 = vmul.f32 %v8775_v47, %v1504_v8 }
 0xb0d   :  { %1518 = vrot.lane.b32.xlu2 %v1506_v29, %s7951_s24  ;;  %1522 = vrot.lane.b32.xlu1 %v1508_v52, %s7951_s24  ;;  %v8888_v29 = vpop.permute.xlu2 %1377 }
 0xb0e   :  { %1520 = vrot.lane.b32.xlu0 %v1507_v45, %s7951_s24  ;;  %v7572_v45 = vld [vmem:[%s13796_s1 + $0x128] sm:$0xff]  ;;  %14171 = vst [vmem:[#allocation145_spill] sm:$0xff] %v8888_v29 }
 0xb15   :  { %1524 = vrot.lane.b32.xlu2 %v1509_v25, %s7951_s24  ;;  %1528 = vrot.lane.b32.xlu1 %v1511_v7, %s7951_s24  ;;  %v8890_v52 = vpop.permute.xlu2 %1383 }
 0xb16   :  { %1526 = vrot.lane.b32.xlu0 %v1510_v13, %s7951_s24  ;;  %14172 = vst [vmem:[#allocation146_spill] sm:$0xff] %v8890_v52 }
 0xb1d   :  { %1551 = vperm.xlu2 %7797, %v7571_v39   ;;  %v8892_v8 = vpop.permute.xlu2 %1426 }
 0xb1e   :  { %1556 = vperm.xlu0 %7798, %v7572_v45   ;;  %14173 = vst [vmem:[#allocation147_spill] sm:$0xff] %v8892_v8 }
 0xb25   :  { %v8894_v25 = vpop.permute.xlu2 %1432 }
 0xb26   :  { %14174 = vst [vmem:[#allocation148_spill] sm:$0xff] %v8894_v25 }
 0xb2d   :  { %v8896_v7 = vpop.permute.xlu2 %1459 }
 0xb2e   :  { %14175 = vst [vmem:[#allocation149_spill] sm:$0xff] %v8896_v7 }
 0xb35   :  { %v8898_v13 = vpop.permute.xlu2 %1484 }
 0xb67   :  { %v8900_v44 = vpop.permute.xlu2 %1518 }
 0xb6f   :  { %v8902_v15 = vpop.permute.xlu2 %1524 }
 0xb77   :  { %v1552_v9 = vpop.permute.xlu2 %1551 }
 0xb78   :  { %v1559_v39 = vmul.f32 %v8757_v38, %v1552_v9  ;;  %v1560_v45 = vmul.f32 %v8760_v16, %v1552_v9  ;;  %v1561_v29 = vmul.f32 %v8763_v23, %v1552_v9  ;;  %v7574_v9 = vld [vmem:[%s13796_s1 + $0x198] sm:$0xff] }
 0xb7a   :  { %1575 = vrot.lane.b32.xlu0 %v1561_v29, %s7953_s26  ;;  %1573 = vrot.lane.b32.xlu2 %v1560_v45, %s7953_s26  ;;  %v7573_v29 = vld [vmem:[%s13796_s1 + $0x190] sm:$0xff] }
 0xb7b   :  { %1571 = vrot.lane.b32.xlu1 %v1559_v39, %s7953_s26 }
 0xb7f   :  { %v8926_v39 = vpop.permute.xlu1 %1522 }
 0xb80   :  { %v8910_v52 = vpop.permute.xlu0 %1520 }
 0xb87   :  { %v8928_v45 = vpop.permute.xlu1 %1528 }
 0xb88   :  { %v8912_v25 = vpop.permute.xlu0 %1526 }
 0xb90   :  { %v1557_v7 = vpop.permute.xlu0 %1556 }
 0xb91   :  { %v1562_v8 = vmul.f32 %v8737_v21, %v1557_v7  ;;  %v1563_v26 = vmul.f32 %v8733_v49, %v1557_v7  ;;  %v1564_v14 = vmul.f32 %v8775_v47, %v1557_v7 }
 0xb93   :  { %1581 = vrot.lane.b32.xlu0 %v1564_v14, %s7953_s26  ;;  %1579 = vrot.lane.b32.xlu2 %v1563_v26, %s7953_s26 }
 0xb94   :  { %1577 = vrot.lane.b32.xlu1 %v1562_v8, %s7953_s26 }
 0xb9b   :  { %1609 = vperm.xlu2 %7797, %v7574_v9  }
 0xb9c   :  { %1604 = vperm.xlu1 %7799, %v7573_v29  }
 0xbd4   :  { %v8932_v14 = vpop.permute.xlu2 %1573 }
 0xbed   :  { %v8930_v7 = vpop.permute.xlu1 %1571  ;;  %v8936_v8 = vpop.permute.xlu2 %1579 }
 0xbee   :  { %v1583_v62 = vsel %vm180_vm3, %v8930_v7, %v8932_v14  ;;  %v1492_v7 = vmul.f32 %v8775_v47, %v8898_v13 }
 0xbf5   :  { %v1610_v29 = vpop.permute.xlu2 %1609 }
 0xbf6   :  { %v1616_v18 = vmul.f32 %v8733_v49, %v1610_v29  ;;  %v1617_v33 = vmul.f32 %v8775_v47, %v1610_v29  ;;  %v1615_v27 = vmul.f32 %v8737_v21, %v1610_v29 }
 0xc06   :  { %v8934_v26 = vpop.permute.xlu1 %1577 }
 0xc0e   :  { %v1605_v40 = vpop.permute.xlu1 %1604 }
 0xc0f   :  { %v1612_v61 = vmul.f32 %v8757_v38, %v1605_v40  ;;  %v1613_v48 = vmul.f32 %v8760_v16, %v1605_v40  ;;  %v1614_v9 = vmul.f32 %v8763_v23, %v1605_v40  ;;  %v7576_v40 = vld [vmem:[%s13796_s1 + $0x208] sm:$0xff] }
 0xc11   :  { %1628 = vrot.lane.b32.xlu2 %v1614_v9, %s7952_s25  ;;  %1626 = vrot.lane.b32.xlu1 %v1613_v48, %s7952_s25  ;;  %v7575_v48 = vld [vmem:[%s13796_s1 + $0x200] sm:$0xff] }
 0xc12   :  { %1624 = vrot.lane.b32.xlu0 %v1612_v61, %s7952_s25  ;;  %v8956_v61 = vpop.permute.xlu0 %1575 }
 0xc13   :  { %v1584_v63 = vsel %vm180_vm3, %v8932_v14, %v8956_v61 }
 0xc19   :  { %1634 = vrot.lane.b32.xlu2 %v1617_v33, %s7952_s25  ;;  %1632 = vrot.lane.b32.xlu1 %v1616_v18, %s7952_s25 }
 0xc1a   :  { %1630 = vrot.lane.b32.xlu0 %v1615_v27, %s7952_s25  ;;  %v8958_v9 = vpop.permute.xlu0 %1581 }
 0xc21   :  { %1662 = vperm.xlu1 %7799, %v7576_v40  }
 0xc22   :  { %1657 = vperm.xlu0 %7798, %v7575_v48  }
 0xc83   :  { %v8962_v33 = vpop.permute.xlu1 %1626 }
 0xc84   :  { %v8960_v29 = vpop.permute.xlu0 %1624 }
 0xc8b   :  { %v8966_v27 = vpop.permute.xlu1 %1632 }
 0xc8c   :  { %v8964_v18 = vpop.permute.xlu0 %1630 }
 0xc93   :  { %v1663_v48 = vpop.permute.xlu1 %1662 }
 0xc94   :  { %v1658_v43 = vpop.permute.xlu0 %1657  ;;  %v1669_v17 = vmul.f32 %v8733_v49, %v1663_v48  ;;  %v1670_v55 = vmul.f32 %v8775_v47, %v1663_v48  ;;  %v1668_v12 = vmul.f32 %v8737_v21, %v1663_v48 }
 0xc95   :  { %v1665_v5 = vmul.f32 %v8757_v38, %v1658_v43  ;;  %v1666_v20 = vmul.f32 %v8760_v16, %v1658_v43  ;;  %v1667_v40 = vmul.f32 %v8763_v23, %v1658_v43  ;;  %v7578_v43 = vld [vmem:[%s13796_s1 + $0x278] sm:$0xff] }
 0xc97   :  { %1681 = vrot.lane.b32.xlu1 %v1667_v40, %s7954_s27  ;;  %1679 = vrot.lane.b32.xlu0 %v1666_v20, %s7954_s27  ;;  %v7577_v20 = vld [vmem:[%s13796_s1 + $0x270] sm:$0xff] }
 0xc98   :  { %1677 = vrot.lane.b32.xlu2 %v1665_v5, %s7954_s27  ;;  %v8986_v5 = vpop.permute.xlu2 %1628 }
 0xc9f   :  { %1687 = vrot.lane.b32.xlu1 %v1670_v55, %s7954_s27  ;;  %1685 = vrot.lane.b32.xlu0 %v1669_v17, %s7954_s27 }
 0xca0   :  { %1683 = vrot.lane.b32.xlu2 %v1668_v12, %s7954_s27  ;;  %v8988_v40 = vpop.permute.xlu2 %1634 }
 0xca7   :  { %1715 = vperm.xlu0 %7798, %v7578_v43  }
 0xca8   :  { %1710 = vperm.xlu2 %7797, %v7577_v20  }
 0xcf2   :  { %v8990_v48 = vpop.permute.xlu2 %1677 }
 0xcfa   :  { %v8992_v55 = vpop.permute.xlu2 %1683 }
 0xd02   :  { %v1711_v17 = vpop.permute.xlu2 %1710 }
 0xd03   :  { %v1718_v12 = vmul.f32 %v8757_v38, %v1711_v17  ;;  %v1719_v10 = vmul.f32 %v8760_v16, %v1711_v17  ;;  %v1720_v51 = vmul.f32 %v8763_v23, %v1711_v17 }
 0xd05   :  { %1734 = vrot.lane.b32.xlu0 %v1720_v51, %s7955_s28  ;;  %1732 = vrot.lane.b32.xlu2 %v1719_v10, %s7955_s28  ;;  %v7580_v10 = vld [vmem:[%s13796_s1 + $0x2e8] sm:$0xff]  ;;  %v7579_v51 = vld [vmem:[%s13796_s1 + $0x2e0] sm:$0xff] }
 0xd06   :  { %1730 = vrot.lane.b32.xlu1 %v1718_v12, %s7955_s28 }
 0xd09   :  { %v9000_v43 = vpop.permute.xlu0 %1679  ;;  %v9016_v17 = vpop.permute.xlu1 %1681 }
 0xd11   :  { %v9002_v20 = vpop.permute.xlu0 %1685  ;;  %v9018_v12 = vpop.permute.xlu1 %1687 }
 0xd19   :  { %v1716_v46 = vpop.permute.xlu0 %1715 }
 0xd1a   :  { %v1721_v4 = vmul.f32 %v8737_v21, %v1716_v46  ;;  %v1722_v34 = vmul.f32 %v8733_v49, %v1716_v46  ;;  %v1723_v6 = vmul.f32 %v8775_v47, %v1716_v46 }
 0xd1c   :  { %1740 = vrot.lane.b32.xlu0 %v1723_v6, %s7955_s28  ;;  %1738 = vrot.lane.b32.xlu2 %v1722_v34, %s7955_s28 }
 0xd1d   :  { %1736 = vrot.lane.b32.xlu1 %v1721_v4, %s7955_s28 }
 0xd24   :  { %1768 = vperm.xlu2 %7797, %v7580_v10  }
 0xd25   :  { %1763 = vperm.xlu1 %7799, %v7579_v51  }
 0xd5f   :  { %v9022_v6 = vpop.permute.xlu2 %1732 }
 0xd76   :  { %v9026_v4 = vpop.permute.xlu2 %1738 }
 0xd78   :  { %v9020_v46 = vpop.permute.xlu1 %1730 }
 0xd7e   :  { %v1769_v51 = vpop.permute.xlu2 %1768 }
 0xd7f   :  { %v1775_v42 = vmul.f32 %v8733_v49, %v1769_v51  ;;  %v1776_v31 = vmul.f32 %v8775_v47, %v1769_v51  ;;  %v1774_v32 = vmul.f32 %v8737_v21, %v1769_v51 }
 0xd8f   :  { %v9024_v34 = vpop.permute.xlu1 %1736 }
 0xd97   :  { %v1764_v37 = vpop.permute.xlu1 %1763 }
 0xd98   :  { %v1771_v54 = vmul.f32 %v8757_v38, %v1764_v37  ;;  %v1772_v41 = vmul.f32 %v8760_v16, %v1764_v37  ;;  %v1773_v10 = vmul.f32 %v8763_v23, %v1764_v37  ;;  %v7581_v37 = vld [vmem:[%s13797_s2 + $0x8] sm:$0x3] }
 0xd9a   :  { %1787 = vrot.lane.b32.xlu2 %v1773_v10, %s7956_s10  ;;  %1785 = vrot.lane.b32.xlu1 %v1772_v41, %s7956_s10  ;;  %v1815_v41 = vperm.slane %v7581_v37, 1  ;;  %v1814_v10 = vperm.slane %v7581_v37, 0  ;;  %v1487_v37 = vmul.f32 %v8757_v38, %v8868_v19 }
 0xd9b   :  { %1783 = vrot.lane.b32.xlu0 %v1771_v54, %s7956_s10  ;;  %v1735_v54 = vpop.permute.xlu0 %1734 }
 0xda2   :  { %1793 = vrot.lane.b32.xlu2 %v1776_v31, %s7956_s10  ;;  %1791 = vrot.lane.b32.xlu1 %v1775_v42, %s7956_s10  ;;  %v1530_v42 = vsel %vm130_vm2, %v8900_v44, %v8910_v52 }
 0xda3   :  { %1789 = vrot.lane.b32.xlu0 %v1774_v32, %s7956_s10  ;;  %v9045_v50 = vpop.permute.xlu0 %1740  ;;  %v1489_v32 = vmul.f32 %v8763_v23, %v8868_v19  ;;  %v1540_v44 = vadd.f32 %v1530_v42, %v1487_v37  ;;  %v1637_v42 = vsel %vm230_vm4, %v8962_v33, %v8986_v5 }
 0xda5   :  { %v1542_v53 = vadd.f32 %v8926_v39, %v1489_v32  ;;  %v1593_v32 = vadd.f32 %v1583_v62, %v1540_v44  ;;  %v1491_v62 = vmul.f32 %v8733_v49, %v8898_v13 }
 0xdaa   :  { %1818 = vrot.lane.b32.xlu1 %v1815_v41, %s13906_s23  ;;  %v1531_v41 = vsel %vm130_vm2, %v8910_v52, %v8926_v39  ;;  %v1595_v52 = vadd.f32 %v8956_v61, %v1542_v53  ;;  %v1490_v39 = vmul.f32 %v8737_v21, %v8898_v13  ;;  %v1532_v53 = vsel %vm130_vm2, %v8902_v15, %v8912_v25 }
 0xdab   :  { %1816 = vrot.lane.b32.xlu0 %v1814_v10, %s13906_s23  ;;  %v1488_v10 = vmul.f32 %v8760_v16, %v8868_v19  ;;  %v1636_v19 = vsel %vm230_vm4, %v8960_v29, %v8962_v33  ;;  %v1689_v29 = vsel %vm280_vm6, %v8990_v48, %v9000_v43  ;;  %v1690_v33 = vsel %vm280_vm6, %v9000_v43, %v9016_v17  ;;  %s14687_s23 = smov 126  }
 0xdac   :  { %v1648_v37 = vadd.f32 %v8986_v5, %v1595_v52  ;;  %v1646_v44 = vadd.f32 %v1636_v19, %v1593_v32  ;;  %v1742_v5 = vsel %vm330_vm5, %v9020_v46, %v9022_v6  ;;  %v1543_v13 = vadd.f32 %v1532_v53, %v1490_v39 }
 0xdad   :  { %v1541_v59 = vadd.f32 %v1531_v41, %v1488_v10  ;;  %v1545_v10 = vadd.f32 %v8928_v45, %v1492_v7  ;;  %v1586_v48 = vsel %vm180_vm3, %v8936_v8, %v8958_v9  ;;  %v1743_v43 = vsel %vm330_vm5, %v9022_v6, %v1735_v54 }
 0xdae   :  { %v1701_v15 = vadd.f32 %v9016_v17, %v1648_v37  ;;  %v1699_v52 = vadd.f32 %v1689_v29, %v1646_v44 }
 0xdaf   :  { %v1594_v61 = vadd.f32 %v1584_v63, %v1541_v59  ;;  %v1533_v59 = vsel %vm130_vm2, %v8912_v25, %v8928_v45  ;;  %v1585_v25 = vsel %vm180_vm3, %v8934_v26, %v8936_v8  ;;  %v1598_v46 = vadd.f32 %v8958_v9, %v1545_v10 }
 0xdb0   :  { %v1754_v19 = vadd.f32 %v1735_v54, %v1701_v15  ;;  %v1544_v7 = vadd.f32 %v1533_v59, %v1491_v62  ;;  %v1752_v39 = vadd.f32 %v1742_v5, %v1699_v52  ;;  %v1596_v37 = vadd.f32 %v1585_v25, %v1543_v13 }
 0xdb1   :  { %v1647_v63 = vadd.f32 %v1637_v42, %v1594_v61  ;;  %v1638_v42 = vsel %vm230_vm4, %v8964_v18, %v8966_v27  ;;  %v1639_v26 = vsel %vm230_vm4, %v8966_v27, %v8988_v40  ;;  %v1651_v9 = vadd.f32 %v8988_v40, %v1598_v46 }
 0xdb2   :  { %v1597_v61 = vadd.f32 %v1586_v48, %v1544_v7  ;;  %v1649_v62 = vadd.f32 %v1638_v42, %v1596_v37  ;;  %v1744_v40 = vsel %vm330_vm5, %v9024_v34, %v9026_v4 }
 0xdb3   :  { %v1700_v45 = vadd.f32 %v1690_v33, %v1647_v63  ;;  %v1704_v33 = vadd.f32 %v9018_v12, %v1651_v9  ;;  %v1745_v63 = vsel %vm330_vm5, %v9026_v4, %v9045_v50 }
 0xdb4   :  { %v1650_v27 = vadd.f32 %v1639_v26, %v1597_v61 }
 0xdb5   :  { %v1753_v53 = vadd.f32 %v1743_v43, %v1700_v45  ;;  %v1757_v5 = vadd.f32 %v9045_v50, %v1704_v33  ;;  %v7584_v50 = vld [vmem:[%s13796_s1 + $0xc0] sm:$0xff] }
 0xdf4   :  { %v1788_v60 = vpop.permute.xlu2 %1787 }
 0xdf5   :  { %v1807_v6 = vadd.f32 %v1788_v60, %v1754_v19 }
 0xe0c   :  { %v1786_v51 = vpop.permute.xlu1 %1785 }
 0xe0d   :  { %v1784_v31 = vpop.permute.xlu0 %1783  ;;  %v1796_v32 = vsel %vm380_vm7, %v1786_v51, %v1788_v60  ;;  %v1692_v60 = vsel %vm280_vm6, %v9002_v20, %v9018_v12 }
 0xe0e   :  { %v1795_v17 = vsel %vm380_vm7, %v1784_v31, %v1786_v51  ;;  %v1691_v51 = vsel %vm280_vm6, %v8992_v55, %v9002_v20  ;;  %v1806_v31 = vadd.f32 %v1796_v32, %v1753_v53  ;;  %v1794_v20 = vpop.permute.xlu2 %1793  ;;  %v1703_v15 = vadd.f32 %v1692_v60, %v1650_v27 }
 0xe0f   :  { %v1805_v8 = vadd.f32 %v1795_v17, %v1752_v39  ;;  %v1702_v55 = vadd.f32 %v1691_v51, %v1649_v62  ;;  %v1810_v52 = vadd.f32 %v1794_v20, %v1757_v5  ;;  %v7585_v17 = vld [vmem:[%s13796_s1 + $0xc8] sm:$0xff]  ;;  %v7587_v51 = vld [vmem:[%s13796_s1 + $0x138] sm:$0xff] }
 0xe10   :  { %v1756_v48 = vadd.f32 %v1745_v63, %v1703_v15 }
 0xe11   :  { %v1755_v34 = vadd.f32 %v1744_v40, %v1702_v55 }
 0xe14   :  { %v1792_v14 = vpop.permute.xlu1 %1791 }
 0xe15   :  { %v1790_v41 = vpop.permute.xlu0 %1789  ;;  %v1798_v13 = vsel %vm380_vm7, %v1792_v14, %v1794_v20 }
 0xe16   :  { %v1797_v12 = vsel %vm380_vm7, %v1790_v41, %v1792_v14  ;;  %v1809_v25 = vadd.f32 %v1798_v13, %v1756_v48  ;;  %v7582_v14 = vld [vmem:[%s13796_s1 + $0x50] sm:$0xff]  ;;  %v7583_v41 = vld [vmem:[%s13796_s1 + $0x58] sm:$0xff] }
 0xe17   :  { %v1808_v43 = vadd.f32 %v1797_v12, %v1755_v34  ;;  %v7589_v12 = vld [vmem:[%s13796_s1 + $0x1a8] sm:$0xff]  ;;  %v7588_v34 = vld [vmem:[%s13796_s1 + $0x1a0] sm:$0xff] }
 0xe1c   :  { %v1819_v54 = vpop.permute.xlu1 %1818 }
 0xe1d   :  { %v1827_v29 = vmul.f32 %v1819_v54, %v1807_v6  ;;  %v1817_v18 = vpop.permute.xlu0 %1816  ;;  %v1830_v45 = vmul.f32 %v1819_v54, %v1810_v52 }
 0xe1e   :  { %v1821_v10 = vsel %vm13913_vm8, %v1817_v18, %v1819_v54  ;;  %v1825_v44 = vmul.f32 %v1817_v18, %v1805_v8  ;;  %v1828_v19 = vmul.f32 %v1817_v18, %v1808_v43 }
 0xe1f   :  { %v1826_v59 = vmul.f32 %v1821_v10, %v1806_v31  ;;  %1841 = vrot.lane.b32.xlu1 %v1827_v29, %s13904_s29  ;;  %v1829_v4 = vmul.f32 %v1821_v10, %v1809_v25  ;;  %v7586_v31 = vld [vmem:[%s13796_s1 + $0x130] sm:$0xff] }
 0xe20   :  { %1837 = vrot.lane.b32.xlu2 %v1825_v44, %s13904_s29 }
 0xe21   :  { %1839 = vrot.lane.b32.xlu0 %v1826_v59, %s13904_s29 }
 0xe27   :  { %1847 = vrot.lane.b32.xlu1 %v1830_v45, %s13904_s29 }
 0xe28   :  { %1843 = vrot.lane.b32.xlu2 %v1828_v19, %s13904_s29 }
 0xe29   :  { %1845 = vrot.lane.b32.xlu0 %v1829_v4, %s13904_s29 }
 0xe2f   :  { %1886 = vperm.xlu1 %7799, %v7584_v50  }
 0xe30   :  { %1867 = vperm.xlu2 %7797, %v7582_v14  }
 0xe31   :  { %1872 = vperm.xlu0 %7798, %v7583_v41  }
 0xe38   :  { %1891 = vperm.xlu2 %7797, %v7585_v17  }
 0xe7a   :  { %v9150_v7 = vpop.permute.xlu2 %1837 }
 0xe7b   :  { %14176 = vst [vmem:[#allocation150_spill] sm:$0xff] %v9150_v7 }
 0xe82   :  { %v9154_v39 = vpop.permute.xlu2 %1843 }
 0xe83   :  { %14178 = vst [vmem:[#allocation152_spill] sm:$0xff] %v9154_v39 }
 0xe8a   :  { %v9158_v42 = vpop.permute.xlu2 %1867 }
 0xe91   :  { %v9152_v46 = vpop.permute.xlu1 %1841 }
 0xe92   :  { %14177 = vst [vmem:[#allocation151_spill] sm:$0xff] %v9152_v46  ;;  %v1892_v26 = vpop.permute.xlu2 %1891 }
 0xe93   :  { %v1898_v8 = vmul.f32 %v8733_v49, %v1892_v26  ;;  %v1899_v54 = vmul.f32 %v8775_v47, %v1892_v26  ;;  %v1897_v9 = vmul.f32 %v8737_v21, %v1892_v26  ;;  %v9178_v29 = vpop.permute.xlu0 %1839 }
 0xe94   :  { %14180 = vst [vmem:[#allocation154_spill] sm:$0xff] %v9178_v29 }
 0xe99   :  { %v9156_v32 = vpop.permute.xlu1 %1847 }
 0xe9a   :  { %14179 = vst [vmem:[#allocation153_spill] sm:$0xff] %v9156_v32 }
 0xe9b   :  { %v9180_v18 = vpop.permute.xlu0 %1845 }
 0xe9c   :  { %14181 = vst [vmem:[#allocation155_spill] sm:$0xff] %v9180_v18 }
 0xea1   :  { %v1887_v53 = vpop.permute.xlu1 %1886 }
 0xea2   :  { %v1894_v6 = vmul.f32 %v8757_v38, %v1887_v53  ;;  %v1895_v61 = vmul.f32 %v8760_v16, %v1887_v53  ;;  %v1896_v37 = vmul.f32 %v8763_v23, %v1887_v53 }
 0xea3   :  { %v9182_v62 = vpop.permute.xlu0 %1872 }
 0xea4   :  { %1908 = vrot.lane.b32.xlu1 %v1895_v61, %s7951_s24  ;;  %1910 = vrot.lane.b32.xlu2 %v1896_v37, %s7951_s24  ;;  %v7591_v61 = vld [vmem:[%s13796_s1 + $0x218] sm:$0xff]  ;;  %v7590_v37 = vld [vmem:[%s13796_s1 + $0x210] sm:$0xff] }
 0xea5   :  { %1906 = vrot.lane.b32.xlu0 %v1894_v6, %s7951_s24 }
 0xeac   :  { %1916 = vrot.lane.b32.xlu2 %v1899_v54, %s7951_s24  ;;  %1914 = vrot.lane.b32.xlu1 %v1898_v8, %s7951_s24 }
 0xead   :  { %1912 = vrot.lane.b32.xlu0 %v1897_v9, %s7951_s24 }
 0xeb4   :  { %1944 = vperm.xlu1 %7799, %v7587_v51  }
 0xeb5   :  { %1939 = vperm.xlu0 %7798, %v7586_v31  }
 0xefe   :  { %v9210_v13 = vpop.permute.xlu2 %1910 }
 0xf06   :  { %v9212_v48 = vpop.permute.xlu2 %1916 }
 0xf16   :  { %v9186_v10 = vpop.permute.xlu1 %1908 }
 0xf17   :  { %v9184_v60 = vpop.permute.xlu0 %1906 }
 0xf1e   :  { %v9190_v27 = vpop.permute.xlu1 %1914 }
 0xf1f   :  { %v9188_v44 = vpop.permute.xlu0 %1912 }
 0xf26   :  { %v1945_v63 = vpop.permute.xlu1 %1944 }
 0xf27   :  { %v1940_v33 = vpop.permute.xlu0 %1939  ;;  %v1951_v20 = vmul.f32 %v8733_v49, %v1945_v63  ;;  %v1952_v15 = vmul.f32 %v8775_v47, %v1945_v63  ;;  %v1950_v5 = vmul.f32 %v8737_v21, %v1945_v63 }
 0xf28   :  { %v1947_v40 = vmul.f32 %v8757_v38, %v1940_v33  ;;  %v1948_v59 = vmul.f32 %v8760_v16, %v1940_v33  ;;  %v1949_v55 = vmul.f32 %v8763_v23, %v1940_v33 }
 0xf2a   :  { %1963 = vrot.lane.b32.xlu1 %v1949_v55, %s7953_s26  ;;  %1961 = vrot.lane.b32.xlu0 %v1948_v59, %s7953_s26 }
 0xf2b   :  { %1959 = vrot.lane.b32.xlu2 %v1947_v40, %s7953_s26 }
 0xf32   :  { %1969 = vrot.lane.b32.xlu1 %v1952_v15, %s7953_s26  ;;  %1967 = vrot.lane.b32.xlu0 %v1951_v20, %s7953_s26 }
 0xf33   :  { %1965 = vrot.lane.b32.xlu2 %v1950_v5, %s7953_s26 }
 0xf3a   :  { %1997 = vperm.xlu0 %7798, %v7589_v12   ;;  %v7593_v12 = vld [vmem:[%s13796_s1 + $0x288] sm:$0xff] }
 0xf3b   :  { %1992 = vperm.xlu2 %7797, %v7588_v34   ;;  %v7592_v34 = vld [vmem:[%s13796_s1 + $0x280] sm:$0xff] }
 0xf85   :  { %v9214_v52 = vpop.permute.xlu2 %1959 }
 0xf8d   :  { %v9216_v43 = vpop.permute.xlu2 %1965 }
 0xf95   :  { %v1993_v25 = vpop.permute.xlu2 %1992 }
 0xf96   :  { %v2000_v45 = vmul.f32 %v8757_v38, %v1993_v25  ;;  %v2001_v19 = vmul.f32 %v8760_v16, %v1993_v25  ;;  %v2002_v4 = vmul.f32 %v8763_v23, %v1993_v25 }
 0xf98   :  { %2016 = vrot.lane.b32.xlu0 %v2002_v4, %s7952_s25  ;;  %2014 = vrot.lane.b32.xlu2 %v2001_v19, %s7952_s25 }
 0xf99   :  { %2012 = vrot.lane.b32.xlu1 %v2000_v45, %s7952_s25 }
 0xf9c   :  { %v9224_v50 = vpop.permute.xlu0 %1961  ;;  %v9240_v26 = vpop.permute.xlu1 %1963 }
 0xfa4   :  { %v9226_v14 = vpop.permute.xlu0 %1967  ;;  %v9242_v8 = vpop.permute.xlu1 %1969 }
 0xfac   :  { %v1998_v41 = vpop.permute.xlu0 %1997 }
 0xfad   :  { %v2003_v17 = vmul.f32 %v8737_v21, %v1998_v41  ;;  %v2004_v53 = vmul.f32 %v8733_v49, %v1998_v41  ;;  %v2005_v6 = vmul.f32 %v8775_v47, %v1998_v41 }
 0xfaf   :  { %2022 = vrot.lane.b32.xlu0 %v2005_v6, %s7952_s25  ;;  %2020 = vrot.lane.b32.xlu2 %v2004_v53, %s7952_s25 }
 0xfb0   :  { %2018 = vrot.lane.b32.xlu1 %v2003_v17, %s7952_s25 }
 0xfb7   :  { %2050 = vperm.xlu2 %7797, %v7591_v61  }
 0xfb8   :  { %2045 = vperm.xlu1 %7799, %v7590_v37  }
 0xff2   :  { %v9246_v9 = vpop.permute.xlu2 %2014 }
0x1009   :  { %v9250_v31 = vpop.permute.xlu2 %2020 }
0x100a   :  { %v9270_v25 = vpop.permute.xlu0 %2016 }
0x100b   :  { %v9244_v54 = vpop.permute.xlu1 %2012 }
0x1011   :  { %v2051_v63 = vpop.permute.xlu2 %2050 }
0x1012   :  { %v2057_v20 = vmul.f32 %v8733_v49, %v2051_v63  ;;  %v2058_v15 = vmul.f32 %v8775_v47, %v2051_v63  ;;  %v2056_v5 = vmul.f32 %v8737_v21, %v2051_v63  ;;  %v7595_v63 = vld [vmem:[%s13796_s1 + $0x2f8] sm:$0xff] }
0x1021   :  { %v9272_v45 = vpop.permute.xlu0 %2022 }
0x1022   :  { %v9248_v51 = vpop.permute.xlu1 %2018 }
0x102a   :  { %v2046_v33 = vpop.permute.xlu1 %2045 }
0x102b   :  { %v2053_v40 = vmul.f32 %v8757_v38, %v2046_v33  ;;  %v2054_v59 = vmul.f32 %v8760_v16, %v2046_v33  ;;  %v2055_v55 = vmul.f32 %v8763_v23, %v2046_v33 }
0x102d   :  { %2069 = vrot.lane.b32.xlu2 %v2055_v55, %s7954_s27  ;;  %2067 = vrot.lane.b32.xlu1 %v2054_v59, %s7954_s27 }
0x102e   :  { %2065 = vrot.lane.b32.xlu0 %v2053_v40, %s7954_s27 }
0x1035   :  { %2075 = vrot.lane.b32.xlu2 %v2058_v15, %s7954_s27  ;;  %2073 = vrot.lane.b32.xlu1 %v2057_v20, %s7954_s27  ;;  %v7594_v20 = vld [vmem:[%s13796_s1 + $0x2f0] sm:$0xff] }
0x1036   :  { %2071 = vrot.lane.b32.xlu0 %v2056_v5, %s7954_s27 }
0x103d   :  { %2103 = vperm.xlu1 %7799, %v7593_v12  }
0x103e   :  { %2098 = vperm.xlu0 %7798, %v7592_v34  }
0x1087   :  { %v9300_v15 = vpop.permute.xlu2 %2069 }
0x108f   :  { %v9302_v5 = vpop.permute.xlu2 %2075 }
0x109f   :  { %v9276_v4 = vpop.permute.xlu1 %2067 }
0x10a0   :  { %v9274_v19 = vpop.permute.xlu0 %2065 }
0x10a7   :  { %v9280_v17 = vpop.permute.xlu1 %2073 }
0x10a8   :  { %v9278_v41 = vpop.permute.xlu0 %2071 }
0x10af   :  { %v2104_v33 = vpop.permute.xlu1 %2103 }
0x10b0   :  { %v2099_v53 = vpop.permute.xlu0 %2098  ;;  %v2110_v40 = vmul.f32 %v8733_v49, %v2104_v33  ;;  %v2111_v59 = vmul.f32 %v8775_v47, %v2104_v33  ;;  %v2109_v55 = vmul.f32 %v8737_v21, %v2104_v33 }
0x10b1   :  { %v2106_v6 = vmul.f32 %v8757_v38, %v2099_v53  ;;  %v2107_v61 = vmul.f32 %v8760_v16, %v2099_v53  ;;  %v2108_v37 = vmul.f32 %v8763_v23, %v2099_v53 }
0x10b3   :  { %2122 = vrot.lane.b32.xlu1 %v2108_v37, %s7955_s28  ;;  %2120 = vrot.lane.b32.xlu0 %v2107_v61, %s7955_s28 }
0x10b4   :  { %2118 = vrot.lane.b32.xlu2 %v2106_v6, %s7955_s28 }
0x10bb   :  { %2128 = vrot.lane.b32.xlu1 %v2111_v59, %s7955_s28  ;;  %2126 = vrot.lane.b32.xlu0 %v2110_v40, %s7955_s28 }
0x10bc   :  { %2124 = vrot.lane.b32.xlu2 %v2109_v55, %s7955_s28 }
0x10c3   :  { %2156 = vperm.xlu0 %7798, %v7595_v63  }
0x10c4   :  { %2151 = vperm.xlu2 %7797, %v7594_v20  }
0x110e   :  { %v9304_v12 = vpop.permute.xlu2 %2118 }
0x1116   :  { %v9306_v34 = vpop.permute.xlu2 %2124 }
0x111e   :  { %v2152_v53 = vpop.permute.xlu2 %2151 }
0x111f   :  { %v2159_v6 = vmul.f32 %v8757_v38, %v2152_v53  ;;  %v2160_v61 = vmul.f32 %v8760_v16, %v2152_v53  ;;  %v2161_v37 = vmul.f32 %v8763_v23, %v2152_v53  ;;  %v7596_v53 = vld [vmem:[%s13797_s2 + $0xa] sm:$0x3] }
0x1121   :  { %2175 = vrot.lane.b32.xlu0 %v2161_v37, %s7956_s10  ;;  %2173 = vrot.lane.b32.xlu2 %v2160_v61, %s7956_s10  ;;  %v2202_v61 = vperm.slane %v7596_v53, 0 }
0x1122   :  { %2171 = vrot.lane.b32.xlu1 %v2159_v6, %s7956_s10  ;;  %v2203_v6 = vperm.slane %v7596_v53, 1 }
0x1125   :  { %v9314_v33 = vpop.permute.xlu0 %2120 }
0x112d   :  { %v9316_v40 = vpop.permute.xlu0 %2126 }
0x1135   :  { %v2157_v59 = vpop.permute.xlu0 %2156 }
0x1136   :  { %v2162_v55 = vmul.f32 %v8737_v21, %v2157_v59  ;;  %v2163_v63 = vmul.f32 %v8733_v49, %v2157_v59  ;;  %v2164_v20 = vmul.f32 %v8775_v47, %v2157_v59  ;;  %v1877_v21 = vmul.f32 %v8763_v23, %v9158_v42 }
0x1137   :  { %v1880_v23 = vmul.f32 %v8775_v47, %v9182_v62  ;;  %v1876_v47 = vmul.f32 %v8760_v16, %v9158_v42  ;;  %v2025_v16 = vsel %vm230_vm4, %v9246_v9, %v9270_v25 }
0x1138   :  { %2181 = vrot.lane.b32.xlu0 %v2164_v20, %s7956_s10  ;;  %2179 = vrot.lane.b32.xlu2 %v2163_v63, %s7956_s10  ;;  %v1930_v37 = vadd.f32 %v9210_v13, %v1877_v21 }
0x1139   :  { %2177 = vrot.lane.b32.xlu1 %v2162_v55, %s7956_s10  ;;  %v2123_v55 = vpop.permute.xlu1 %2122  ;;  %v1933_v21 = vadd.f32 %v9212_v48, %v1880_v23 }
0x113a   :  { %v1983_v59 = vadd.f32 %v9240_v26, %v1930_v37 }
0x113b   :  { %v1986_v37 = vadd.f32 %v9242_v8, %v1933_v21 }
0x113c   :  { %v2036_v20 = vadd.f32 %v9270_v25, %v1983_v59  ;;  %v1918_v59 = vsel %vm130_vm2, %v9184_v60, %v9186_v10  ;;  %v1972_v60 = vsel %vm180_vm3, %v9224_v50, %v9240_v26 }
0x113e   :  { %v2089_v53 = vadd.f32 %v9300_v15, %v2036_v20  ;;  %v1919_v20 = vsel %vm130_vm2, %v9186_v10, %v9210_v13  ;;  %v2024_v10 = vsel %vm230_vm4, %v9244_v54, %v9246_v9  ;;  %v2078_v54 = vsel %vm280_vm6, %v9276_v4, %v9300_v15 }
0x113f   :  { %v1929_v21 = vadd.f32 %v1919_v20, %v1876_v47  ;;  %v2130_v9 = vsel %vm330_vm5, %v9304_v12, %v9314_v33  ;;  %v2131_v15 = vsel %vm330_vm5, %v9314_v33, %v2123_v55  ;;  %v1973_v12 = vsel %vm180_vm3, %v9216_v43, %v9226_v14 }
0x1140   :  { %2206 = vrot.lane.b32.xlu2 %v2203_v6, %s7962_s14  ;;  %v2142_v46 = vadd.f32 %v2123_v55, %v2089_v53  ;;  %v1971_v53 = vsel %vm180_vm3, %v9214_v52, %v9224_v50 }
0x1141   :  { %2204 = vrot.lane.b32.xlu1 %v2202_v61, %s7962_s14  ;;  %v9337_v61 = vpop.permute.xlu1 %2128  ;;  %v1982_v52 = vadd.f32 %v1972_v60, %v1929_v21 }
0x1143   :  { %v2035_v20 = vadd.f32 %v2025_v16, %v1982_v52  ;;  %v2132_v52 = vsel %vm330_vm5, %v9306_v34, %v9316_v40 }
0x117b   :  { %v2174_v49 = vpop.permute.xlu2 %2173 }
0x1192   :  { %v9333_v63 = vpop.permute.xlu2 %2179 }
0x1193   :  { %v2176_v32 = vpop.permute.xlu0 %2175 }
0x1194   :  { %v2195_v6 = vadd.f32 %v2176_v32, %v2142_v46  ;;  %v2172_v7 = vpop.permute.xlu1 %2171  ;;  %v2039_v46 = vadd.f32 %v9272_v45, %v1986_v37  ;;  %v2077_v37 = vsel %vm280_vm6, %v9274_v19, %v9276_v4  ;;  %v1921_v19 = vsel %vm130_vm2, %v9190_v27, %v9212_v48 }
0x1195   :  { %v2184_v55 = vsel %vm380_vm7, %v2174_v49, %v2176_v32 }
0x119a   :  { %v2207_v39 = vpop.permute.xlu2 %2206 }
0x119b   :  { %v2215_v18 = vmul.f32 %v2207_v39, %v2195_v6  ;;  %v2092_v6 = vadd.f32 %v9302_v5, %v2039_v46  ;;  %v1920_v46 = vsel %vm130_vm2, %v9188_v44, %v9190_v27  ;;  %v9390_v44 = vld [vmem:[#allocation2 + $0x20] sm:$0xff]  ;;  %v2183_v27 = vsel %vm380_vm7, %v2172_v7, %v2174_v49 }
0x119c   :  { %v2027_v7 = vsel %vm230_vm4, %v9250_v31, %v9272_v45 }
0x119d   :  { %2229 = vrot.lane.b32.xlu2 %v2215_v18, %s13904_s29  ;;  %v1875_v18 = vmul.f32 %v8757_v38, %v9158_v42  ;;  %v2145_v38 = vadd.f32 %v9337_v61, %v2092_v6  ;;  %v2088_v6 = vadd.f32 %v2078_v54, %v2035_v20 }
0x119f   :  { %v1928_v23 = vadd.f32 %v1918_v59, %v1875_v18  ;;  %v9384_v18 = vld [vmem:[#allocation2 + $0x18] sm:$0xff]  ;;  %v2141_v21 = vadd.f32 %v2131_v15, %v2088_v6 }
0x11a0   :  { %v1878_v47 = vmul.f32 %v9384_v18, %v9182_v62 }
0x11a1   :  { %v1981_v13 = vadd.f32 %v1971_v53, %v1928_v23  ;;  %v1879_v53 = vmul.f32 %v9390_v44, %v9182_v62  ;;  %v1974_v23 = vsel %vm180_vm3, %v9226_v14, %v9242_v8  ;;  %v2026_v62 = vsel %vm230_vm4, %v9248_v51, %v9250_v31  ;;  %v7599_v31 = vld [vmem:[%s13796_s1 + $0xd0] sm:$0xff] }
0x11a2   :  { %v1931_v48 = vadd.f32 %v1920_v46, %v1878_v47  ;;  %v2079_v14 = vsel %vm280_vm6, %v9278_v41, %v9280_v17  ;;  %v2194_v8 = vadd.f32 %v2184_v55, %v2141_v21  ;;  %v2080_v51 = vsel %vm280_vm6, %v9280_v17, %v9302_v5  ;;  %v7602_v21 = vld [vmem:[%s13796_s1 + $0x148] sm:$0xff] }
0x11a3   :  { %v2034_v26 = vadd.f32 %v2024_v10, %v1981_v13  ;;  %v1932_v60 = vadd.f32 %v1921_v19, %v1879_v53  ;;  %v9446_v19 = vld [vmem:[#allocation2] sm:$0xff]  ;;  %v9452_v53 = vld [vmem:[#allocation2 + $0x10] sm:$0xff] }
0x11a4   :  { %v1984_v43 = vadd.f32 %v1973_v12, %v1931_v48  ;;  %14184 = vst [vmem:[#allocation158_spill] sm:$0xff] %v9446_v19 }
0x11a5   :  { %v2087_v4 = vadd.f32 %v2077_v37, %v2034_v26 }
0x11a6   :  { %v2037_v49 = vadd.f32 %v2026_v62, %v1984_v43  ;;  %v7601_v43 = vld [vmem:[%s13796_s1 + $0x140] sm:$0xff] }
0x11a7   :  { %v2140_v33 = vadd.f32 %v2130_v9, %v2087_v4  ;;  %v9449_v4 = vld [vmem:[#allocation2 + $0x8] sm:$0xff] }
0x11a8   :  { %v2090_v37 = vadd.f32 %v2079_v14, %v2037_v49 }
0x11a9   :  { %v2193_v10 = vadd.f32 %v2183_v27, %v2140_v33 }
0x11aa   :  { %v2182_v42 = vpop.permute.xlu0 %2181  ;;  %v2143_v5 = vadd.f32 %v2132_v52, %v2090_v37 }
0x11ab   :  { %v2198_v59 = vadd.f32 %v2182_v42, %v2145_v38  ;;  %v2178_v50 = vpop.permute.xlu1 %2177  ;;  %v1985_v38 = vadd.f32 %v1974_v23, %v1932_v60  ;;  %v2186_v26 = vsel %vm380_vm7, %v9333_v63, %v2182_v42  ;;  %v9466_v60 = vld [vmem:[#allocation2 + $0x28] sm:$0xff] }
0x11ad   :  { %v2218_v25 = vmul.f32 %v2207_v39, %v2198_v59  ;;  %v2038_v45 = vadd.f32 %v2027_v7, %v1985_v38  ;;  %v2133_v59 = vsel %vm330_vm5, %v9316_v40, %v9337_v61  ;;  %v7597_v40 = vld [vmem:[%s13796_s1 + $0x60] sm:$0xff]  ;;  %v7598_v61 = vld [vmem:[%s13796_s1 + $0x68] sm:$0xff] }
0x11af   :  { %2235 = vrot.lane.b32.xlu2 %v2218_v25, %s13904_s29  ;;  %v2091_v17 = vadd.f32 %v2080_v51, %v2038_v45 }
0x11b1   :  { %v2144_v34 = vadd.f32 %v2133_v59, %v2091_v17  ;;  %v7604_v59 = vld [vmem:[%s13796_s1 + $0x1b8] sm:$0xff]  ;;  %v7603_v17 = vld [vmem:[%s13796_s1 + $0x1b0] sm:$0xff] }
0x11b3   :  { %v2205_v32 = vpop.permute.xlu1 %2204  ;;  %v2197_v46 = vadd.f32 %v2186_v26, %v2144_v34 }
0x11b4   :  { %v2209_v13 = vsel %vm13921_vm9, %v2205_v32, %v2207_v39  ;;  %v2213_v16 = vmul.f32 %v2205_v32, %v2193_v10  ;;  %v2185_v39 = vsel %vm380_vm7, %v2178_v50, %v9333_v63  ;;  %v7600_v63 = vld [vmem:[%s13796_s1 + $0xd8] sm:$0xff] }
0x11b5   :  { %v2214_v41 = vmul.f32 %v2209_v13, %v2194_v8  ;;  %v2196_v54 = vadd.f32 %v2185_v39, %v2143_v5  ;;  %v2217_v9 = vmul.f32 %v2209_v13, %v2197_v46 }
0x11b6   :  { %2225 = vrot.lane.b32.xlu0 %v2213_v16, %s13904_s29 }
0x11b7   :  { %2227 = vrot.lane.b32.xlu1 %v2214_v41, %s13904_s29  ;;  %2277 = vperm.xlu2 %7797, %v7599_v31   ;;  %v2216_v20 = vmul.f32 %v2205_v32, %v2196_v54 }
0x11be   :  { %2231 = vrot.lane.b32.xlu0 %v2216_v20, %s13904_s29 }
0x11bf   :  { %2233 = vrot.lane.b32.xlu1 %v2217_v9, %s13904_s29 }
0x11c6   :  { %2258 = vperm.xlu0 %7798, %v7597_v40  }
0x11c7   :  { %2263 = vperm.xlu1 %7799, %v7598_v61  }
0x11ce   :  { %2282 = vperm.xlu0 %7798, %v7600_v63  }
0x11f7   :  { %v9442_v42 = vpop.permute.xlu2 %2229 }
0x11f8   :  { %14182 = vst [vmem:[#allocation156_spill] sm:$0xff] %v9442_v42  ;;  %v418_v42 = vmul.f32 %v9452_v53, %v8253_v57 }
0x1209   :  { %v9444_v50 = vpop.permute.xlu2 %2235 }
0x120a   :  { %14183 = vst [vmem:[#allocation157_spill] sm:$0xff] %v9444_v50 }
0x1211   :  { %v2278_v25 = vpop.permute.xlu2 %2277 }
0x1212   :  { %v2285_v47 = vmul.f32 %v9446_v19, %v2278_v25  ;;  %v2286_v15 = vmul.f32 %v9449_v4, %v2278_v25  ;;  %v2287_v12 = vmul.f32 %v9452_v53, %v2278_v25 }
0x1214   :  { %2299 = vrot.lane.b32.xlu2 %v2286_v15, %s7951_s24  ;;  %2301 = vrot.lane.b32.xlu0 %v2287_v12, %s7951_s24  ;;  %v7606_v12 = vld [vmem:[%s13796_s1 + $0x228] sm:$0xff] }
0x1215   :  { %2297 = vrot.lane.b32.xlu1 %v2285_v47, %s7951_s24 }
0x1228   :  { %v9458_v6 = vpop.permute.xlu0 %2225 }
0x1229   :  { %14185 = vst [vmem:[#allocation159_spill] sm:$0xff] %v9458_v6  ;;  %v9478_v7 = vpop.permute.xlu1 %2227 }
0x1230   :  { %v9460_v27 = vpop.permute.xlu0 %2231 }
0x1231   :  { %14186 = vst [vmem:[#allocation160_spill] sm:$0xff] %v9460_v27  ;;  %v9480_v10 = vpop.permute.xlu1 %2233 }
0x1232   :  { %14187 = vst [vmem:[#allocation161_spill] sm:$0xff] %v9480_v10  ;;  %v417_v10 = vmul.f32 %v9449_v4, %v8253_v57 }
0x1238   :  { %v9462_v48 = vpop.permute.xlu0 %2258 }
0x1239   :  { %v9482_v38 = vpop.permute.xlu1 %2263 }
0x1240   :  { %v2283_v23 = vpop.permute.xlu0 %2282 }
0x1241   :  { %v2288_v33 = vmul.f32 %v9384_v18, %v2283_v23  ;;  %v2289_v55 = vmul.f32 %v9390_v44, %v2283_v23  ;;  %v2290_v62 = vmul.f32 %v9466_v60, %v2283_v23  ;;  %v7605_v23 = vld [vmem:[%s13796_s1 + $0x220] sm:$0xff] }
0x1243   :  { %2307 = vrot.lane.b32.xlu0 %v2290_v62, %s7951_s24  ;;  %2305 = vrot.lane.b32.xlu2 %v2289_v55, %s7951_s24 }
0x1244   :  { %2303 = vrot.lane.b32.xlu1 %v2288_v33, %s7951_s24 }
0x124b   :  { %2335 = vperm.xlu2 %7797, %v7602_v21  }
0x124c   :  { %2330 = vperm.xlu1 %7799, %v7601_v43  }
0x126e   :  { %v9486_v8 = vpop.permute.xlu2 %2299 }
0x1286   :  { %v9510_v39 = vpop.permute.xlu0 %2301 }
0x1287   :  { %v9484_v14 = vpop.permute.xlu1 %2297 }
0x129d   :  { %v9490_v49 = vpop.permute.xlu2 %2305 }
0x12a5   :  { %v2336_v45 = vpop.permute.xlu2 %2335 }
0x12a6   :  { %v2342_v52 = vmul.f32 %v9390_v44, %v2336_v45  ;;  %v2343_v41 = vmul.f32 %v9466_v60, %v2336_v45  ;;  %v2341_v37 = vmul.f32 %v9384_v18, %v2336_v45 }
0x12b5   :  { %v9512_v5 = vpop.permute.xlu0 %2307 }
0x12b6   :  { %v9488_v32 = vpop.permute.xlu1 %2303 }
0x12be   :  { %v2331_v51 = vpop.permute.xlu1 %2330 }
0x12bf   :  { %v2338_v13 = vmul.f32 %v9446_v19, %v2331_v51  ;;  %v2339_v16 = vmul.f32 %v9449_v4, %v2331_v51  ;;  %v2340_v31 = vmul.f32 %v9452_v53, %v2331_v51 }
0x12c1   :  { %2354 = vrot.lane.b32.xlu2 %v2340_v31, %s7953_s26  ;;  %2352 = vrot.lane.b32.xlu1 %v2339_v16, %s7953_s26 }
0x12c2   :  { %2350 = vrot.lane.b32.xlu0 %v2338_v13, %s7953_s26 }
0x12c9   :  { %2360 = vrot.lane.b32.xlu2 %v2343_v41, %s7953_s26  ;;  %2358 = vrot.lane.b32.xlu1 %v2342_v52, %s7953_s26 }
0x12ca   :  { %2356 = vrot.lane.b32.xlu0 %v2341_v37, %s7953_s26 }
0x12d1   :  { %2388 = vperm.xlu1 %7799, %v7604_v59  }
0x12d2   :  { %2383 = vperm.xlu0 %7798, %v7603_v17   ;;  %v7608_v17 = vld [vmem:[%s13796_s1 + $0x298] sm:$0xff] }
0x131b   :  { %v9540_v33 = vpop.permute.xlu2 %2354 }
0x1323   :  { %v9542_v55 = vpop.permute.xlu2 %2360 }
0x1333   :  { %v9516_v34 = vpop.permute.xlu1 %2352 }
0x1334   :  { %v9514_v26 = vpop.permute.xlu0 %2350 }
0x133b   :  { %v9520_v46 = vpop.permute.xlu1 %2358 }
0x133c   :  { %v9518_v54 = vpop.permute.xlu0 %2356 }
0x1343   :  { %v2389_v63 = vpop.permute.xlu1 %2388 }
0x1344   :  { %v2384_v20 = vpop.permute.xlu0 %2383  ;;  %v2395_v25 = vmul.f32 %v9390_v44, %v2389_v63  ;;  %v2396_v47 = vmul.f32 %v9466_v60, %v2389_v63  ;;  %v2394_v15 = vmul.f32 %v9384_v18, %v2389_v63 }
0x1345   :  { %v2391_v9 = vmul.f32 %v9446_v19, %v2384_v20  ;;  %v2392_v40 = vmul.f32 %v9449_v4, %v2384_v20  ;;  %v2393_v61 = vmul.f32 %v9452_v53, %v2384_v20  ;;  %v7607_v20 = vld [vmem:[%s13796_s1 + $0x290] sm:$0xff] }
0x1347   :  { %2407 = vrot.lane.b32.xlu1 %v2393_v61, %s7952_s25  ;;  %2405 = vrot.lane.b32.xlu0 %v2392_v40, %s7952_s25 }
0x1348   :  { %2403 = vrot.lane.b32.xlu2 %v2391_v9, %s7952_s25 }
0x134f   :  { %2413 = vrot.lane.b32.xlu1 %v2396_v47, %s7952_s25  ;;  %2411 = vrot.lane.b32.xlu0 %v2395_v25, %s7952_s25 }
0x1350   :  { %2409 = vrot.lane.b32.xlu2 %v2394_v15, %s7952_s25 }
0x1357   :  { %2441 = vperm.xlu0 %7798, %v7606_v12  }
0x1358   :  { %2436 = vperm.xlu2 %7797, %v7605_v23  }
0x13a2   :  { %v9544_v62 = vpop.permute.xlu2 %2403 }
0x13aa   :  { %v9546_v21 = vpop.permute.xlu2 %2409 }
0x13b2   :  { %v2437_v43 = vpop.permute.xlu2 %2436 }
0x13b3   :  { %v2444_v51 = vmul.f32 %v9446_v19, %v2437_v43  ;;  %v2445_v13 = vmul.f32 %v9449_v4, %v2437_v43  ;;  %v2446_v16 = vmul.f32 %v9452_v53, %v2437_v43 }
0x13b5   :  { %2460 = vrot.lane.b32.xlu0 %v2446_v16, %s7954_s27  ;;  %2458 = vrot.lane.b32.xlu2 %v2445_v13, %s7954_s27 }
0x13b6   :  { %2456 = vrot.lane.b32.xlu1 %v2444_v51, %s7954_s27 }
0x13b9   :  { %v9554_v31 = vpop.permute.xlu0 %2405  ;;  %v9570_v9 = vpop.permute.xlu1 %2407 }
0x13c1   :  { %v9556_v45 = vpop.permute.xlu0 %2411  ;;  %v9572_v40 = vpop.permute.xlu1 %2413 }
0x13c9   :  { %v2442_v52 = vpop.permute.xlu0 %2441 }
0x13ca   :  { %v2447_v41 = vmul.f32 %v9384_v18, %v2442_v52  ;;  %v2448_v37 = vmul.f32 %v9390_v44, %v2442_v52  ;;  %v2449_v59 = vmul.f32 %v9466_v60, %v2442_v52 }
0x13cc   :  { %2466 = vrot.lane.b32.xlu0 %v2449_v59, %s7954_s27  ;;  %2464 = vrot.lane.b32.xlu2 %v2448_v37, %s7954_s27  ;;  %v7609_v37 = vld [vmem:[%s13796_s1 + $0x300] sm:$0xff] }
0x13cd   :  { %2462 = vrot.lane.b32.xlu1 %v2447_v41, %s7954_s27  ;;  %v7610_v41 = vld [vmem:[%s13796_s1 + $0x308] sm:$0xff] }
0x13d4   :  { %2494 = vperm.xlu2 %7797, %v7608_v17  }
0x13d5   :  { %2489 = vperm.xlu1 %7799, %v7607_v20  }
0x140f   :  { %v9576_v63 = vpop.permute.xlu2 %2458 }
0x1426   :  { %v9580_v47 = vpop.permute.xlu2 %2464 }
0x1427   :  { %v9600_v59 = vpop.permute.xlu0 %2460 }
0x1428   :  { %v9574_v61 = vpop.permute.xlu1 %2456 }
0x142e   :  { %v2495_v51 = vpop.permute.xlu2 %2494 }
0x142f   :  { %v2501_v13 = vmul.f32 %v9390_v44, %v2495_v51  ;;  %v2502_v16 = vmul.f32 %v9466_v60, %v2495_v51  ;;  %v2500_v52 = vmul.f32 %v9384_v18, %v2495_v51 }
0x143e   :  { %v9602_v17 = vpop.permute.xlu0 %2466 }
0x143f   :  { %v9578_v25 = vpop.permute.xlu1 %2462  ;;  %14188 = vst [vmem:[#allocation162_spill] sm:$0xff] %v9602_v17  ;;  %v2468_v17 = vsel %vm280_vm6, %v9574_v61, %v9576_v63  ;;  %v513_v61 = vsel %vm180_vm3, %v8323_v3, %v8347_v56 }
0x1447   :  { %v2490_v15 = vpop.permute.xlu1 %2489 }
0x1448   :  { %v2497_v12 = vmul.f32 %v9446_v19, %v2490_v15  ;;  %v2498_v23 = vmul.f32 %v9449_v4, %v2490_v15  ;;  %v2499_v43 = vmul.f32 %v9452_v53, %v2490_v15 }
0x144a   :  { %2513 = vrot.lane.b32.xlu2 %v2499_v43, %s7955_s28  ;;  %2511 = vrot.lane.b32.xlu1 %v2498_v23, %s7955_s28 }
0x144b   :  { %2509 = vrot.lane.b32.xlu0 %v2497_v12, %s7955_s28 }
0x1452   :  { %2519 = vrot.lane.b32.xlu2 %v2502_v16, %s7955_s28  ;;  %2517 = vrot.lane.b32.xlu1 %v2501_v13, %s7955_s28 }
0x1453   :  { %2515 = vrot.lane.b32.xlu0 %v2500_v52, %s7955_s28 }
0x145a   :  { %2547 = vperm.xlu1 %7799, %v7610_v41  }
0x145b   :  { %2542 = vperm.xlu0 %7798, %v7609_v37  }
0x14bc   :  { %v9604_v15 = vpop.permute.xlu1 %2511 }
0x14bd   :  { %v2510_v20 = vpop.permute.xlu0 %2509 }
0x14c4   :  { %v9608_v23 = vpop.permute.xlu1 %2517 }
0x14c5   :  { %v9606_v12 = vpop.permute.xlu0 %2515 }
0x14cc   :  { %v2548_v52 = vpop.permute.xlu1 %2547 }
0x14cd   :  { %v2543_v43 = vpop.permute.xlu0 %2542  ;;  %v2554_v41 = vmul.f32 %v9390_v44, %v2548_v52  ;;  %v2555_v37 = vmul.f32 %v9466_v60, %v2548_v52  ;;  %v2553_v29 = vmul.f32 %v9384_v18, %v2548_v52 }
0x14ce   :  { %v2550_v51 = vmul.f32 %v9446_v19, %v2543_v43  ;;  %v2551_v13 = vmul.f32 %v9449_v4, %v2543_v43  ;;  %v2552_v16 = vmul.f32 %v9452_v53, %v2543_v43  ;;  %v7611_v43 = vld [vmem:[%s13797_s2 + $0xc] sm:$0x3] }
0x14d0   :  { %2566 = vrot.lane.b32.xlu1 %v2552_v16, %s7956_s10  ;;  %2564 = vrot.lane.b32.xlu0 %v2551_v13, %s7956_s10  ;;  %v2594_v13 = vperm.slane %v7611_v43, 1  ;;  %v2593_v16 = vperm.slane %v7611_v43, 0  ;;  %v2362_v43 = vsel %vm180_vm3, %v9514_v26, %v9516_v34  ;;  %v420_v26 = vmul.f32 %v9390_v44, %v8289_v11 }
0x14d1   :  { %2562 = vrot.lane.b32.xlu2 %v2550_v51, %s7956_s10  ;;  %v9627_v51 = vpop.permute.xlu2 %2513 }
0x14d8   :  { %2572 = vrot.lane.b32.xlu1 %v2555_v37, %s7956_s10  ;;  %2570 = vrot.lane.b32.xlu0 %v2554_v41, %s7956_s10  ;;  %v2266_v41 = vmul.f32 %v9446_v19, %v9462_v48 }
0x14d9   :  { %2568 = vrot.lane.b32.xlu2 %v2553_v29, %s7956_s10  ;;  %v9629_v52 = vpop.permute.xlu2 %2519  ;;  %v2309_v29 = vsel %vm130_vm2, %v9484_v14, %v9486_v8  ;;  %v2415_v14 = vsel %vm230_vm4, %v9544_v62, %v9554_v31  ;;  %v421_v62 = vmul.f32 %v9466_v60, %v8289_v11 }
0x14da   :  { %14189 = vst [vmem:[#allocation163_spill] sm:$0xff] %v9629_v52  ;;  %v2319_v50 = vadd.f32 %v2309_v29, %v2266_v41  ;;  %v416_v29 = vmul.f32 %v9446_v19, %v8253_v57  ;;  %v460_v41 = vsel %vm130_vm2, %v8301_v35, %v8317_v0  ;;  %v471_v52 = vadd.f32 %v8317_v0, %v418_v42 }
0x14db   :  { %v461_v19 = vsel %vm130_vm2, %v8293_v24, %v8303_v36  ;;  %v470_v57 = vadd.f32 %v460_v41, %v417_v10  ;;  %v474_v0 = vadd.f32 %v8319_v1, %v421_v62  ;;  %v2521_v42 = vsel %vm330_vm5, %v2510_v20, %v9604_v15  ;;  %v14191_v62 = vld [vmem:[#allocation44_spill] sm:$0xff] }
0x14dc   :  { %v512_v24 = vsel %vm180_vm3, %v8321_v2, %v8323_v3  ;;  %v2364_v20 = vsel %vm180_vm3, %v9518_v54, %v9520_v46  ;;  %v514_v2 = vsel %vm180_vm3, %v8325_v28, %v8327_v30 }
0x14e0   :  { %2597 = vrot.lane.b32.xlu0 %v2594_v13, %s13919_s11  ;;  %v419_v13 = vmul.f32 %v9384_v18, %v8289_v11  ;;  %v2311_v11 = vsel %vm130_vm2, %v9488_v32, %v9490_v49  ;;  %v515_v32 = vsel %vm180_vm3, %v8327_v30, %v8349_v58 }
0x14e1   :  { %2595 = vrot.lane.b32.xlu2 %v2593_v16, %s13919_s11  ;;  %v459_v16 = vsel %vm130_vm2, %v8291_v22, %v8301_v35  ;;  %v2372_v22 = vadd.f32 %v2362_v43, %v2319_v50  ;;  %v462_v35 = vsel %vm130_vm2, %v8303_v36, %v8319_v1  ;;  %v2269_v36 = vmul.f32 %v9384_v18, %v9482_v38  ;;  %s14562_s11 = smov 127  }
0x14e2   :  { %v469_v6 = vadd.f32 %v459_v16, %v416_v29  ;;  %v472_v1 = vadd.f32 %v461_v19, %v419_v13  ;;  %v473_v43 = vadd.f32 %v462_v35, %v420_v26  ;;  %v524_v16 = vadd.f32 %v8347_v56, %v471_v52 }
0x14e3   :  { %v2425_v50 = vadd.f32 %v2415_v14, %v2372_v22  ;;  %v2322_v3 = vadd.f32 %v2311_v11, %v2269_v36  ;;  %v2417_v13 = vsel %vm230_vm4, %v9546_v21, %v9556_v45  ;;  %v527_v56 = vadd.f32 %v8349_v58, %v474_v0  ;;  %v14192_v0 = vld [vmem:[#allocation47_spill] sm:$0xff]  ;;  %v14193_v11 = vld [vmem:[#allocation46_spill] sm:$0xff] }
0x14e4   :  { %v522_v19 = vadd.f32 %v512_v24, %v469_v6  ;;  %v9704_v54 = vadd.f32 %v515_v32, %v473_v43  ;;  %v525_v30 = vadd.f32 %v514_v2, %v472_v1  ;;  %v2268_v22 = vmul.f32 %v9452_v53, %v9462_v48  ;;  %v14194_v24 = vld [vmem:[#allocation48_spill] sm:$0xff] }
0x14e5   :  { %v2478_v10 = vadd.f32 %v2468_v17, %v2425_v50  ;;  %v9696_v17 = vadd.f32 %v513_v61, %v470_v57  ;;  %v2375_v52 = vadd.f32 %v2364_v20, %v2322_v3  ;;  %v2310_v6 = vsel %vm130_vm2, %v9486_v8, %v9510_v39 }
0x14e6   :  { %v2470_v21 = vsel %vm280_vm6, %v9578_v25, %v9580_v47  ;;  %v2267_v58 = vmul.f32 %v9449_v4, %v9462_v48  ;;  %v2321_v8 = vadd.f32 %v9510_v39, %v2268_v22  ;;  %v2363_v25 = vsel %vm180_vm3, %v9516_v34, %v9540_v33  ;;  %v14195_v48 = vld [vmem:[#allocation52_spill] sm:$0xff]  ;;  %v14197_v39 = vld [vmem:[#allocation49_spill] sm:$0xff]  ;;  %v14199_v22 = vld [vmem:[#allocation51_spill] sm:$0xff] }
0x14e7   :  { %v2531_v14 = vadd.f32 %v2521_v42, %v2478_v10  ;;  %v2428_v50 = vadd.f32 %v2417_v13, %v2375_v52  ;;  %v567_v42 = vsel %vm230_vm4, %v14193_v11, %v14192_v0  ;;  %v2523_v61 = vsel %vm330_vm5, %v9606_v12, %v9608_v23  ;;  %v14196_v10 = vld [vmem:[#allocation50_spill] sm:$0xff] }
0x14e8   :  { %v9732_v36 = vadd.f32 %v14194_v24, %v524_v16  ;;  %v618_v1 = vsel %vm280_vm6, %v14196_v10, %v14195_v48  ;;  %v2320_v43 = vadd.f32 %v2310_v6, %v2267_v58  ;;  %v9739_v20 = vadd.f32 %v14197_v39, %v527_v56 }
0x14e9   :  { %v2481_v32 = vadd.f32 %v2470_v21, %v2428_v50  ;;  %v2374_v34 = vadd.f32 %v9540_v33, %v2321_v8  ;;  %v2416_v12 = vsel %vm230_vm4, %v9554_v31, %v9570_v9  ;;  %v578_v3 = vadd.f32 %v567_v42, %v525_v30  ;;  %v14200_v21 = vld [vmem:[#allocation57_spill] sm:$0xff]  ;;  %v14201_v30 = vld [vmem:[#allocation56_spill] sm:$0xff] }
0x14ea   :  { %v2469_v33 = vsel %vm280_vm6, %v9576_v63, %v9600_v59  ;;  %v2312_v63 = vsel %vm130_vm2, %v9490_v49, %v9512_v5  ;;  %v14202_v50 = vld [vmem:[#allocation61_spill] sm:$0xff]  ;;  %v2270_v42 = vmul.f32 %v9390_v44, %v9482_v38  ;;  %v2365_v49 = vsel %vm180_vm3, %v9520_v46, %v9542_v55  ;;  %v14204_v46 = vld [vmem:[#allocation159_spill] sm:$0xff] }
0x14eb   :  { %v2534_v13 = vadd.f32 %v2523_v61, %v2481_v32  ;;  %v2427_v56 = vadd.f32 %v9570_v9, %v2374_v34  ;;  %v2271_v9 = vmul.f32 %v9466_v60, %v9482_v38 }
0x14ec   :  { %v2323_v10 = vadd.f32 %v2312_v63, %v2270_v42  ;;  %v14212_v63 = vld [vmem:[#allocation163_spill] sm:$0xff] }
0x14ed   :  { %v2480_v58 = vadd.f32 %v9600_v59, %v2427_v56  ;;  %v2324_v61 = vadd.f32 %v9512_v5, %v2271_v9  ;;  %v2418_v5 = vsel %vm230_vm4, %v9556_v45, %v9572_v40  ;;  %v14206_v45 = vld [vmem:[#allocation54_spill] sm:$0xff]  ;;  %v14211_v9 = vld [vmem:[#allocation112_spill] sm:$0xff] }
0x14ee   :  { %v14207_v56 = vld [vmem:[#allocation70_spill] sm:$0xff] }
0x14ef   :  { %v2533_v59 = vadd.f32 %v9627_v51, %v2480_v58  ;;  %v2377_v38 = vadd.f32 %v9542_v55, %v2324_v61  ;;  %v2524_v58 = vsel %vm330_vm5, %v9608_v23, %v14212_v63  ;;  %v14216_v61 = vld [vmem:[#allocation69_spill] sm:$0xff] }
0x152b   :  { %v2563_v37 = vpop.permute.xlu2 %2562 }
0x1533   :  { %v9649_v27 = vpop.permute.xlu2 %2568 }
0x153b   :  { %v9702_v41 = vpop.permute.xlu2 %2595 }
0x1542   :  { %v2565_v29 = vpop.permute.xlu0 %2564 }
0x1543   :  { %v2574_v26 = vsel %vm380_vm7, %v2563_v37, %v2565_v29  ;;  %v14190_v37 = vld [vmem:[#allocation45_spill] sm:$0xff] }
0x1544   :  { %v2584_v28 = vadd.f32 %v2574_v26, %v2531_v14  ;;  %v565_v35 = vsel %vm230_vm4, %v14191_v62, %v14190_v37  ;;  %v9748_v16 = vsel %vm230_vm4, %v14190_v37, %v14194_v24  ;;  %v2373_v14 = vadd.f32 %v2363_v25, %v2320_v43  ;;  %v2567_v26 = vpop.permute.xlu1 %2566 }
0x1545   :  { %v575_v2 = vadd.f32 %v565_v35, %v522_v19  ;;  %v14198_v19 = vld [vmem:[#allocation53_spill] sm:$0xff]  ;;  %v671_v37 = vsel %vm330_vm5, %v14201_v30, %v14200_v21  ;;  %v2586_v43 = vadd.f32 %v2567_v26, %v2533_v59  ;;  %v14217_v59 = vld [vmem:[#allocation119_spill] sm:$0xff] }
0x1546   :  { %v2604_v57 = vmul.f32 %v9702_v41, %v2584_v28  ;;  %v620_v6 = vsel %vm280_vm6, %v14199_v22, %v14198_v19  ;;  %v2426_v62 = vadd.f32 %v2416_v12, %v2373_v14  ;;  %v2430_v12 = vadd.f32 %v9572_v40, %v2377_v38  ;;  %v14205_v14 = vld [vmem:[#allocation162_spill] sm:$0xff] }
0x1547   :  { %v628_v28 = vadd.f32 %v618_v1, %v575_v2 }
0x1548   :  { %2616 = vrot.lane.b32.xlu1 %v2604_v57, %s13904_s29  ;;  %v14203_v57 = vld [vmem:[#allocation68_spill] sm:$0xff]  ;;  %v2479_v8 = vadd.f32 %v2469_v33, %v2426_v62  ;;  %v14209_v62 = vld [vmem:[#allocation58_spill] sm:$0xff] }
0x1549   :  { %v724_v11 = vsel %vm380_vm7, %v14203_v57, %v14202_v50  ;;  %v681_v24 = vadd.f32 %v671_v37, %v628_v28  ;;  %v14208_v37 = vld [vmem:[#allocation59_spill] sm:$0xff]  ;;  %v14214_v57 = vld [vmem:[#allocation158_spill] sm:$0xff] }
0x154a   :  { %v2571_v52 = vpop.permute.xlu0 %2570  ;;  %v673_v40 = vsel %vm330_vm5, %v14209_v62, %v14208_v37  ;;  %v14226_v62 = vld [vmem:[#allocation60_spill] sm:$0xff] }
0x154b   :  { %v2576_v31 = vsel %vm380_vm7, %v9649_v27, %v2571_v52  ;;  %v2522_v27 = vsel %vm330_vm5, %v9604_v15, %v9627_v51  ;;  %v2575_v15 = vsel %vm380_vm7, %v2565_v29, %v2567_v26  ;;  %v734_v32 = vadd.f32 %v724_v11, %v681_v24 }
0x154c   :  { %v2587_v35 = vadd.f32 %v2576_v31, %v2534_v13  ;;  %v2532_v1 = vadd.f32 %v2522_v27, %v2479_v8  ;;  %v2237_v51 = vsel %vm13909_vm11, %v14204_v46, %v9478_v7  ;;  %v2376_v29 = vadd.f32 %v2365_v49, %v2323_v10  ;;  %v2573_v22 = vpop.permute.xlu1 %2572  ;;  %v14213_v27 = vld [vmem:[#allocation105_spill] sm:$0xff]  ;;  %v14220_v46 = vld [vmem:[#allocation124_spill] sm:$0xff] }
0x154d   :  { %v2471_v13 = vsel %vm280_vm6, %v9580_v47, %v14205_v14  ;;  %v619_v26 = vsel %vm280_vm6, %v14195_v48, %v14206_v45  ;;  %v754_v33 = vmul.f32 %v14207_v56, %v734_v32  ;;  %v631_v48 = vadd.f32 %v620_v6, %v578_v3  ;;  %v14219_v32 = vld [vmem:[#allocation126_spill] sm:$0xff] }
0x154e   :  { %v2607_v25 = vmul.f32 %v9702_v41, %v2587_v35  ;;  %v2585_v2 = vadd.f32 %v2575_v15, %v2532_v1  ;;  %v2429_v31 = vadd.f32 %v2418_v5, %v2376_v29  ;;  %v14210_v35 = vld [vmem:[#allocation113_spill] sm:$0xff]  ;;  %v1130_v11 = vmul.f32 %v14214_v57, %v14213_v27  ;;  %v14218_v15 = vld [vmem:[#allocation118_spill] sm:$0xff] }
0x154f   :  { %v1173_v47 = vsel %vm130_vm2, %v14211_v9, %v14210_v35  ;;  %v2247_v42 = vadd.f32 %v2237_v51, %v754_v33  ;;  %v1226_v24 = vsel %vm180_vm3, %v14218_v15, %v14217_v59  ;;  %v2577_v10 = vsel %vm380_vm7, %v2571_v52, %v2573_v22  ;;  %v14225_v33 = vld [vmem:[#allocation160_spill] sm:$0xff]  ;;  %v14228_v9 = vld [vmem:[#allocation114_spill] sm:$0xff] }
0x1550   :  { %2622 = vrot.lane.b32.xlu1 %v2607_v25, %s13904_s29  ;;  %v2482_v8 = vadd.f32 %v2471_v13, %v2429_v31  ;;  %v14215_v25 = vld [vmem:[#allocation62_spill] sm:$0xff]  ;;  %v576_v3 = vadd.f32 %v9748_v16, %v9696_v17  ;;  %v684_v6 = vadd.f32 %v673_v40, %v631_v48  ;;  %v1183_v1 = vadd.f32 %v1173_v47, %v1130_v11  ;;  %v14222_v13 = vld [vmem:[#allocation131_spill] sm:$0xff]  ;;  %v14234_v15 = vld [vmem:[#allocation120_spill] sm:$0xff] }
0x1551   :  { %v726_v49 = vsel %vm380_vm7, %v14216_v61, %v14215_v25  ;;  %v568_v5 = vsel %vm230_vm4, %v14192_v0, %v14197_v39  ;;  %v1279_v52 = vsel %vm230_vm4, %v14220_v46, %v14219_v32  ;;  %v14224_v39 = vld [vmem:[#allocation161_spill] sm:$0xff]  ;;  %v14227_v40 = vld [vmem:[#allocation115_spill] sm:$0xff] }
0x1552   :  { %v2598_v34 = vpop.permute.xlu0 %2597  ;;  %v2535_v38 = vadd.f32 %v2524_v58, %v2482_v8  ;;  %v629_v29 = vadd.f32 %v619_v26, %v576_v3  ;;  %v737_v17 = vadd.f32 %v726_v49, %v684_v6  ;;  %v1236_v16 = vadd.f32 %v1226_v24, %v1183_v1  ;;  %v14231_v48 = vld [vmem:[#allocation111_spill] sm:$0xff]  ;;  %v14232_v8 = vld [vmem:[#allocation64_spill] sm:$0xff]  ;;  %v14233_v49 = vld [vmem:[#allocation121_spill] sm:$0xff] }
0x1553   :  { %v2600_v55 = vsel %vm13915_vm10, %v9702_v41, %v2598_v34  ;;  %v2606_v28 = vmul.f32 %v2598_v34, %v2586_v43  ;;  %v2483_v41 = vadd.f32 %v14205_v14, %v2430_v12  ;;  %v630_v43 = vadd.f32 %v14206_v45, %v9732_v36  ;;  %v14221_v12 = vld [vmem:[#allocation66_spill] sm:$0xff]  ;;  %v14237_v46 = vld [vmem:[#allocation55_spill] sm:$0xff] }
0x1554   :  { %v2605_v30 = vmul.f32 %v2600_v55, %v2585_v2  ;;  %v2588_v2 = vadd.f32 %v2577_v10, %v2535_v38  ;;  %v672_v14 = vsel %vm330_vm5, %v14200_v21, %v14221_v12  ;;  %v2239_v36 = vsel %vm13909_vm11, %v14225_v33, %v14224_v39  ;;  %v14236_v10 = vld [vmem:[#allocation147_spill] sm:$0xff]  ;;  %v14243_v33 = vld [vmem:[#allocation132_spill] sm:$0xff] }
0x1555   :  { %2620 = vrot.lane.b32.xlu0 %v2606_v28, %s13904_s29  ;;  %v2536_v23 = vadd.f32 %v14212_v63, %v2483_v41  ;;  %v14223_v28 = vld [vmem:[#allocation130_spill] sm:$0xff]  ;;  %v757_v31 = vmul.f32 %v14207_v56, %v737_v17  ;;  %v1289_v26 = vadd.f32 %v1279_v52, %v1236_v16  ;;  %v725_v21 = vsel %vm380_vm7, %v14202_v50, %v14226_v62  ;;  %v14229_v41 = vld [vmem:[#allocation137_spill] sm:$0xff]  ;;  %v14230_v63 = vld [vmem:[#allocation136_spill] sm:$0xff] }
0x1556   :  { %2618 = vrot.lane.b32.xlu2 %v2605_v30, %s13904_s29  ;;  %v1332_v0 = vsel %vm280_vm6, %v14223_v28, %v14222_v13  ;;  %v683_v30 = vadd.f32 %v14221_v12, %v630_v43  ;;  %v1175_v47 = vsel %vm130_vm2, %v14228_v9, %v14227_v40  ;;  %v1385_v58 = vsel %vm330_vm5, %v14230_v63, %v14229_v41  ;;  %v14240_v16 = vld [vmem:[#allocation156_spill] sm:$0xff]  ;;  %v14241_v28 = vld [vmem:[#allocation67_spill] sm:$0xff] }
0x1557   :  { %v2589_v51 = vadd.f32 %v2573_v22, %v2536_v23  ;;  %v2608_v22 = vmul.f32 %v2600_v55, %v2588_v2  ;;  %v1133_v55 = vmul.f32 %v9384_v18, %v14231_v48  ;;  %v1342_v11 = vadd.f32 %v1332_v0, %v1289_v26  ;;  %v14235_v23 = vld [vmem:[#allocation141_spill] sm:$0xff]  ;;  %v14246_v9 = vld [vmem:[#allocation139_spill] sm:$0xff] }
0x1558   :  { %2650 = vrot.lane.b32.xlu1 %v2247_v42, %s13902_s12  ;;  %v2250_v42 = vadd.f32 %v2239_v36, %v757_v31  ;;  %v736_v50 = vadd.f32 %v14226_v62, %v683_v30  ;;  %v750_v61 = vsel %vm13912_vm12, %v14207_v56, %v14232_v8  ;;  %v1228_v24 = vsel %vm180_vm3, %v14234_v15, %v14233_v49  ;;  %v14238_v56 = vld [vmem:[#allocation127_spill] sm:$0xff]  ;;  %v14242_v0 = vld [vmem:[#allocation133_spill] sm:$0xff] }
0x1559   :  { %v2609_v45 = vmul.f32 %v2598_v34, %v2589_v51  ;;  %v682_v34 = vadd.f32 %v672_v14, %v629_v29  ;;  %v1438_v3 = vsel %vm380_vm7, %v14236_v10, %v14235_v23  ;;  %v579_v6 = vadd.f32 %v568_v5, %v9704_v54  ;;  %v14239_v51 = vld [vmem:[#allocation125_spill] sm:$0xff]  ;;  %v14244_v30 = vld [vmem:[#allocation63_spill] sm:$0xff]  ;;  %v14251_v10 = vld [vmem:[#allocation148_spill] sm:$0xff] }
0x155a   :  { %v1186_v38 = vadd.f32 %v1175_v47, %v1133_v55  ;;  %v1395_v43 = vadd.f32 %v1385_v58, %v1342_v11  ;;  %v621_v52 = vsel %vm280_vm6, %v14198_v19, %v14237_v46  ;;  %v1281_v29 = vsel %vm230_vm4, %v14239_v51, %v14238_v56  ;;  %v14247_v47 = vld [vmem:[#allocation138_spill] sm:$0xff]  ;;  %v14248_v11 = vld [vmem:[#allocation149_spill] sm:$0xff] }
0x155b   :  { %v735_v1 = vadd.f32 %v725_v21, %v682_v34  ;;  %v756_v17 = vmul.f32 %v14232_v8, %v736_v50  ;;  %v2238_v2 = vsel %vm13909_vm11, %v9478_v7, %v14240_v16  ;;  %v633_v54 = vadd.f32 %v14237_v46, %v9739_v20  ;;  %v14245_v21 = vld [vmem:[#allocation116_spill] sm:$0xff]  ;;  %v14253_v51 = vld [vmem:[#allocation157_spill] sm:$0xff] }
0x155c   :  { %v1239_v5 = vadd.f32 %v1228_v24, %v1186_v38  ;;  %v1448_v12 = vadd.f32 %v1438_v3, %v1395_v43  ;;  %v674_v19 = vsel %vm330_vm5, %v14208_v37, %v14241_v28  ;;  %v1334_v36 = vsel %vm280_vm6, %v14243_v33, %v14242_v0  ;;  %v14250_v24 = vld [vmem:[#allocation142_spill] sm:$0xff]  ;;  %v14252_v43 = vld [vmem:[#allocation128_spill] sm:$0xff] }
0x155d   :  { %2626 = vrot.lane.b32.xlu0 %v2609_v45, %s13904_s29  ;;  %v755_v14 = vmul.f32 %v750_v61, %v735_v1  ;;  %v2249_v45 = vadd.f32 %v14240_v16, %v756_v17  ;;  %v632_v31 = vadd.f32 %v621_v52, %v579_v6  ;;  %v686_v26 = vadd.f32 %v14241_v28, %v633_v54  ;;  %v14254_v54 = vld [vmem:[#allocation134_spill] sm:$0xff] }
0x155e   :  { %2624 = vrot.lane.b32.xlu2 %v2608_v22, %s13904_s29  ;;  %v1292_v7 = vadd.f32 %v1281_v29, %v1239_v5  ;;  %v727_v20 = vsel %vm380_vm7, %v14215_v25, %v14244_v30  ;;  %v1132_v62 = vmul.f32 %v9452_v53, %v14213_v27  ;;  %v1174_v37 = vsel %vm130_vm2, %v14210_v35, %v14245_v21  ;;  %v14249_v35 = vld [vmem:[#allocation122_spill] sm:$0xff] }
0x155f   :  { %v2248_v22 = vadd.f32 %v2238_v2, %v755_v14  ;;  %v1387_v63 = vsel %vm330_vm5, %v14247_v47, %v14246_v9  ;;  %v685_v58 = vadd.f32 %v674_v19, %v632_v31  ;;  %v1131_v34 = vmul.f32 %v9449_v4, %v14213_v27 }
0x1560   :  { %2656 = vrot.lane.b32.xlu1 %v2250_v42, %s13902_s12  ;;  %v1345_v55 = vadd.f32 %v1334_v36, %v1292_v7  ;;  %v1468_v25 = vmul.f32 %v14248_v11, %v1448_v12  ;;  %v739_v42 = vadd.f32 %v14244_v30, %v686_v26  ;;  %v1185_v50 = vadd.f32 %v14245_v21, %v1132_v62 }
0x1561   :  { %v1227_v15 = vsel %vm180_vm3, %v14217_v59, %v14249_v35  ;;  %v1440_v3 = vsel %vm380_vm7, %v14251_v10, %v14250_v24  ;;  %v738_v6 = vadd.f32 %v727_v20, %v685_v58  ;;  %v1184_v1 = vadd.f32 %v1174_v37, %v1131_v34  ;;  %v14259_v20 = vld [vmem:[#allocation129_spill] sm:$0xff]  ;;  %v14260_v37 = vld [vmem:[#allocation144_spill] sm:$0xff]  ;;  %v14261_v58 = vld [vmem:[#allocation135_spill] sm:$0xff] }
0x1562   :  { %v1398_v27 = vadd.f32 %v1387_v63, %v1345_v55  ;;  %v1238_v38 = vadd.f32 %v14249_v35, %v1185_v50  ;;  %v1280_v46 = vsel %vm230_vm4, %v14219_v32, %v14252_v43  ;;  %v759_v52 = vmul.f32 %v14232_v8, %v739_v42  ;;  %v14255_v8 = vld [vmem:[#allocation117_spill] sm:$0xff]  ;;  %v14262_v50 = vld [vmem:[#allocation146_spill] sm:$0xff]  ;;  %v14263_v10 = vld [vmem:[#allocation143_spill] sm:$0xff] }
0x1563   :  { %v2240_v59 = vsel %vm13909_vm11, %v14224_v39, %v14253_v51  ;;  %v1237_v29 = vadd.f32 %v1227_v15, %v1184_v1  ;;  %v758_v16 = vmul.f32 %v750_v61, %v738_v6  ;;  %v1333_v5 = vsel %vm280_vm6, %v14222_v13, %v14254_v54  ;;  %v14256_v61 = vld [vmem:[#allocation145_spill] sm:$0xff] }
0x1564   :  { %v1451_v17 = vadd.f32 %v1440_v3, %v1398_v27  ;;  %v1291_v2 = vadd.f32 %v14252_v43, %v1238_v38  ;;  %v2252_v12 = vadd.f32 %v14253_v51, %v759_v52  ;;  %v1135_v32 = vmul.f32 %v9466_v60, %v14231_v48 }
0x1565   :  { %2654 = vrot.lane.b32.xlu0 %v2249_v45, %s13902_s12  ;;  %v1290_v14 = vadd.f32 %v1280_v46, %v1237_v29  ;;  %v2251_v28 = vadd.f32 %v2240_v59, %v758_v16  ;;  %v1176_v39 = vsel %vm130_vm2, %v14227_v40, %v14255_v8  ;;  %v1386_v33 = vsel %vm330_vm5, %v14229_v41, %v14256_v61  ;;  %v14257_v40 = vld [vmem:[#allocation123_spill] sm:$0xff]  ;;  %v14258_v41 = vld [vmem:[#allocation140_spill] sm:$0xff]  ;;  %v14264_v59 = vld [vmem:[#allocation73_spill] sm:$0xff] }
0x1566   :  { %2652 = vrot.lane.b32.xlu2 %v2248_v22, %s13902_s12  ;;  %v1344_v19 = vadd.f32 %v14254_v54, %v1291_v2  ;;  %v1134_v13 = vmul.f32 %v9390_v44, %v14231_v48  ;;  %v1471_v45 = vmul.f32 %v14248_v11, %v1451_v17  ;;  %v1188_v31 = vadd.f32 %v14255_v8, %v1135_v32  ;;  %v14265_v29 = vld [vmem:[#allocation72_spill] sm:$0xff]  ;;  %v14266_v16 = vld [vmem:[#allocation65_spill] sm:$0xff] }
0x1567   :  { %v1343_v36 = vadd.f32 %v1333_v5, %v1290_v14  ;;  %v1229_v26 = vsel %vm180_vm3, %v14233_v49, %v14257_v40  ;;  %v1439_v22 = vsel %vm380_vm7, %v14235_v23, %v14258_v41  ;;  %v1282_v62 = vsel %vm230_vm4, %v14238_v56, %v14259_v20  ;;  %v14267_v5 = vld [vmem:[#allocation80_spill] sm:$0xff]  ;;  %v14269_v32 = vld [vmem:[#allocation85_spill] sm:$0xff] }
0x1568   :  { %2681 = vrot.lane.b32.xlu1 %v1468_v25, %s13902_s12  ;;  %v1397_v7 = vadd.f32 %v14256_v61, %v1344_v19  ;;  %v1187_v30 = vadd.f32 %v1176_v39, %v1134_v13  ;;  %v1241_v48 = vadd.f32 %v14257_v40, %v1188_v31  ;;  %v1464_v49 = vsel %vm13914_vm13, %v14248_v11, %v14260_v37  ;;  %v14270_v8 = vld [vmem:[#allocation84_spill] sm:$0xff]  ;;  %v14272_v13 = vld [vmem:[#allocation90_spill] sm:$0xff]  ;;  %v14273_v31 = vld [vmem:[#allocation75_spill] sm:$0xff] }
0x1569   :  { %v1396_v44 = vadd.f32 %v1386_v33, %v1343_v36  ;;  %v1335_v34 = vsel %vm280_vm6, %v14242_v0, %v14261_v58  ;;  %v1388_v35 = vsel %vm330_vm5, %v14246_v9, %v14262_v50  ;;  %v1441_v0 = vsel %vm380_vm7, %v14250_v24, %v14263_v10  ;;  %v14271_v33 = vld [vmem:[#allocation91_spill] sm:$0xff]  ;;  %v14274_v40 = vld [vmem:[#allocation74_spill] sm:$0xff] }
0x156a   :  { %v1450_v21 = vadd.f32 %v14258_v41, %v1397_v7  ;;  %v1240_v47 = vadd.f32 %v1229_v26, %v1187_v30  ;;  %v1294_v23 = vadd.f32 %v14259_v20, %v1241_v48  ;;  %v816_v17 = vsel %vm130_vm2, %v14265_v29, %v14264_v59  ;;  %v14275_v7 = vld [vmem:[#allocation98_spill] sm:$0xff]  ;;  %v14276_v41 = vld [vmem:[#allocation96_spill] sm:$0xff]  ;;  %v14277_v30 = vld [vmem:[#allocation71_spill] sm:$0xff] }
0x156b   :  { %v1449_v63 = vadd.f32 %v1439_v22, %v1396_v44  ;;  %v773_v2 = vmul.f32 %v14214_v57, %v14266_v16  ;;  %v922_v39 = vsel %vm230_vm4, %v14270_v8, %v14269_v32  ;;  %v975_v36 = vsel %vm280_vm6, %v14272_v13, %v14271_v33 }
0x156c   :  { %v1470_v55 = vmul.f32 %v14260_v37, %v1450_v21  ;;  %v1293_v25 = vadd.f32 %v1282_v62, %v1240_v47  ;;  %v1347_v56 = vadd.f32 %v14261_v58, %v1294_v23  ;;  %v818_v26 = vsel %vm130_vm2, %v14274_v40, %v14273_v31  ;;  %v14278_v62 = vld [vmem:[#allocation81_spill] sm:$0xff]  ;;  %v14279_v21 = vld [vmem:[#allocation79_spill] sm:$0xff]  ;;  %v14281_v47 = vld [vmem:[#allocation108_spill] sm:$0xff] }
0x156d   :  { %2660 = vrot.lane.b32.xlu0 %v2252_v12, %s13902_s12  ;;  %v1469_v42 = vmul.f32 %v1464_v49, %v1449_v63  ;;  %v14268_v12 = vld [vmem:[#allocation78_spill] sm:$0xff]  ;;  %v1028_v22 = vsel %vm330_vm5, %v14276_v41, %v14275_v7  ;;  %v776_v44 = vmul.f32 %v9384_v18, %v14277_v30  ;;  %vm13916_vm12 = vcmask 130048  }
0x156e   :  { %2658 = vrot.lane.b32.xlu2 %v2251_v28, %s13902_s12  ;;  %v1346_v11 = vadd.f32 %v1335_v34, %v1293_v25  ;;  %v1400_v15 = vadd.f32 %v14262_v50, %v1347_v56  ;;  %v869_v14 = vsel %vm180_vm3, %v14268_v12, %v14267_v5  ;;  %v826_v28 = vadd.f32 %v816_v17, %v773_v2  ;;  %v14283_v25 = vld [vmem:[#allocation86_spill] sm:$0xff]  ;;  %v14289_v2 = vld [vmem:[#allocation99_spill] sm:$0xff]  ;;  %v14290_v12 = vld [vmem:[#allocation97_spill] sm:$0xff] }
0x156f   :  { %v829_v23 = vadd.f32 %v818_v26, %v776_v44  ;;  %v775_v34 = vmul.f32 %v9452_v53, %v14266_v16 }
0x1570   :  { %2687 = vrot.lane.b32.xlu1 %v1471_v45, %s13902_s12  ;;  %v1399_v3 = vadd.f32 %v1388_v35, %v1346_v11  ;;  %v1453_v6 = vadd.f32 %v14263_v10, %v1400_v15  ;;  %v879_v19 = vadd.f32 %v869_v14, %v826_v28  ;;  %v774_v11 = vmul.f32 %v9449_v4, %v14266_v16  ;;  %v14285_v10 = vld [vmem:[#allocation93_spill] sm:$0xff]  ;;  %v14291_v28 = vld [vmem:[#allocation88_spill] sm:$0xff] }
0x1571   :  { %v1030_v14 = vsel %vm330_vm5, %v14290_v12, %v14289_v2  ;;  %v14301_v12 = vld [vmem:[#allocation95_spill] sm:$0xff] }
0x1572   :  { %v1452_v1 = vadd.f32 %v1441_v0, %v1399_v3  ;;  %v1473_v27 = vmul.f32 %v14260_v37, %v1453_v6  ;;  %v932_v57 = vadd.f32 %v922_v39, %v879_v19  ;;  %v871_v37 = vsel %vm180_vm3, %v14279_v21, %v14278_v62  ;;  %v14286_v0 = vld [vmem:[#allocation92_spill] sm:$0xff]  ;;  %v10066_v21 = vld [vmem:[#allocation2 + $0x20] sm:$0xff] }
0x1573   :  { %v882_v50 = vadd.f32 %v871_v37, %v829_v23  ;;  %v977_v3 = vsel %vm280_vm6, %v14286_v0, %v14285_v10  ;;  %v778_v19 = vmul.f32 %v9466_v60, %v14277_v30  ;;  %v777_v60 = vmul.f32 %v10066_v21, %v14277_v30  ;;  %v14295_v37 = vld [vmem:[#allocation77_spill] sm:$0xff] }
0x1574   :  { %v1472_v38 = vmul.f32 %v1464_v49, %v1452_v1  ;;  %v985_v48 = vadd.f32 %v975_v36, %v932_v57  ;;  %v14280_v49 = vld [vmem:[#allocation100_spill] sm:$0xff]  ;;  %v14287_v1 = vld [vmem:[#allocation82_spill] sm:$0xff]  ;;  %v14292_v36 = vld [vmem:[#allocation101_spill] sm:$0xff]  ;;  %v819_v23 = vsel %vm130_vm2, %v14273_v31, %v14295_v37 }
0x1575   :  { %2685 = vrot.lane.b32.xlu0 %v1470_v55, %s13902_s12  ;;  %v1081_v63 = vsel %vm380_vm7, %v14281_v47, %v14280_v49  ;;  %v14282_v55 = vld [vmem:[#allocation87_spill] sm:$0xff]  ;;  %v14293_v57 = vld [vmem:[#allocation109_spill] sm:$0xff]  ;;  %v831_v47 = vadd.f32 %v14295_v37, %v778_v19  ;;  %v830_v0 = vadd.f32 %v819_v23, %v777_v60 }
0x1576   :  { %2683 = vrot.lane.b32.xlu2 %v1469_v42, %s13902_s12  ;;  %v1038_v58 = vadd.f32 %v1028_v22, %v985_v48  ;;  %v924_v18 = vsel %vm230_vm4, %v14283_v25, %v14282_v55  ;;  %v14284_v42 = vld [vmem:[#allocation76_spill] sm:$0xff]  ;;  %v1083_v40 = vsel %vm380_vm7, %v14293_v57, %v14292_v36  ;;  %v14294_v22 = vld [vmem:[#allocation94_spill] sm:$0xff] }
0x1577   :  { %v817_v56 = vsel %vm130_vm2, %v14264_v59, %v14284_v42  ;;  %v828_v15 = vadd.f32 %v14284_v42, %v775_v34  ;;  %v14288_v59 = vld [vmem:[#allocation110_spill] sm:$0xff] }
0x1578   :  { %v1091_v35 = vadd.f32 %v1081_v63, %v1038_v58  ;;  %v827_v4 = vadd.f32 %v817_v56, %v774_v11  ;;  %v14296_v34 = vld [vmem:[#allocation106_spill] sm:$0xff] }
0x1579   :  { %v881_v16 = vadd.f32 %v14287_v1, %v828_v15 }
0x157a   :  { %v1111_v29 = vmul.f32 %v14288_v59, %v1091_v35  ;;  %v14298_v35 = vld [vmem:[#allocation103_spill] sm:$0xff] }
0x157b   :  { %v934_v41 = vadd.f32 %v14291_v28, %v881_v16  ;;  %v1082_v11 = vsel %vm380_vm7, %v14280_v49, %v14298_v35 }
0x157d   :  { %2691 = vrot.lane.b32.xlu0 %v1473_v27, %s13902_s12  ;;  %v870_v27 = vsel %vm180_vm3, %v14267_v5, %v14287_v1  ;;  %v987_v58 = vadd.f32 %v14294_v22, %v934_v41 }
0x157e   :  { %2689 = vrot.lane.b32.xlu2 %v1472_v38, %s13902_s12  ;;  %v935_v38 = vadd.f32 %v924_v18, %v882_v50  ;;  %v880_v13 = vadd.f32 %v870_v27, %v827_v4  ;;  %v14297_v18 = vld [vmem:[#allocation83_spill] sm:$0xff] }
0x157f   :  { %v884_v42 = vadd.f32 %v14297_v18, %v831_v47  ;;  %v872_v31 = vsel %vm180_vm3, %v14278_v62, %v14297_v18 }
0x1580   :  { %v988_v8 = vadd.f32 %v977_v3, %v935_v38  ;;  %v14299_v3 = vld [vmem:[#allocation89_spill] sm:$0xff]  ;;  %v14300_v38 = vld [vmem:[#allocation102_spill] sm:$0xff]  ;;  %v883_v49 = vadd.f32 %v872_v31, %v830_v0 }
0x1581   :  { %v1107_v62 = vsel %vm13908_vm15, %v14288_v59, %v14300_v38  ;;  %v14305_v31 = vld [vmem:[#allocation25_spill] sm:$0xff]  ;;  %vm13910_vm15 = vcmask 1031168  }
0x1582   :  { %v1041_v44 = vadd.f32 %v1030_v14, %v988_v8  ;;  %v978_v8 = vsel %vm280_vm6, %v14285_v10, %v14301_v12  ;;  %v7901_v0 = vld [vmem:[#allocation2 + $0x18] sm:$0xff] }
0x1584   :  { %v1094_v25 = vadd.f32 %v1083_v40, %v1041_v44 }
0x1586   :  { %v1114_v15 = vmul.f32 %v14288_v59, %v1094_v25 }
0x15b0   :  { %v9978_v9 = vpop.permute.xlu2 %2618 }
0x15b8   :  { %v9980_v43 = vpop.permute.xlu2 %2624 }
0x15ba   :  { %v2617_v46 = vpop.permute.xlu1 %2616 }
0x15bb   :  { %v2628_v53 = vsel %vm13909_vm11, %v2617_v46, %v9978_v9  ;;  %v923_v46 = vsel %vm230_vm4, %v14269_v32, %v14291_v28  ;;  %v976_v32 = vsel %vm280_vm6, %v14271_v33, %v14294_v22  ;;  %v1029_v33 = vsel %vm330_vm5, %v14275_v7, %v14296_v34 }
0x15bc   :  { %v2638_v39 = vadd.f32 %v2628_v53, %v1111_v29  ;;  %v933_v63 = vadd.f32 %v923_v46, %v880_v13  ;;  %v1040_v7 = vadd.f32 %v14296_v34, %v987_v58  ;;  %v937_v53 = vadd.f32 %v14299_v3, %v884_v42  ;;  %v14302_v13 = vld [vmem:[#allocation107_spill] sm:$0xff]  ;;  %v2822_v42 = vld [vmem:[%s13799_s4 + $0x18] sm:$0xff] }
0x15bd   :  { %v1031_v40 = vsel %vm330_vm5, %v14289_v2, %v14302_v13  ;;  %v2819_v2 = vld [vmem:[%s13799_s4] sm:$0xff] }
0x15be   :  { %v986_v30 = vadd.f32 %v976_v32, %v933_v63  ;;  %v1093_v27 = vadd.f32 %v14298_v35, %v1040_v7  ;;  %v990_v14 = vadd.f32 %v14301_v12, %v937_v53  ;;  %v14303_v32 = vld [vmem:[#allocation104_spill] sm:$0xff]  ;;  %v14313_v12 = vld [vmem:[#allocation35_spill] sm:$0xff] }
0x15bf   :  { %v14306_v35 = vld [vmem:[#allocation24_spill] sm:$0xff] }
0x15c0   :  { %v9984_v51 = vpop.permute.xlu2 %2652  ;;  %v1039_v1 = vadd.f32 %v1029_v33, %v986_v30  ;;  %v1043_v57 = vadd.f32 %v14302_v13, %v990_v14  ;;  %v2823_v30 = vld [vmem:[%s13799_s4 + $0x20] sm:$0xff]  ;;  %v14318_v13 = vld [vmem:[#allocation20_spill] sm:$0xff] }
0x15c2   :  { %v9982_v52 = vpop.permute.xlu1 %2622  ;;  %v1092_v28 = vadd.f32 %v1082_v11, %v1039_v1  ;;  %v1096_v44 = vadd.f32 %v14303_v32, %v1043_v57  ;;  %v14307_v11 = vld [vmem:[#allocation8_spill] sm:$0xff]  ;;  %v7902_v1 = vld [vmem:[#allocation2] sm:$0xff] }
0x15c3   :  { %v2630_v56 = vsel %vm13909_vm11, %v9982_v52, %v9980_v43  ;;  %v925_v52 = vsel %vm230_vm4, %v14282_v55, %v14299_v3  ;;  %v1113_v55 = vmul.f32 %v14300_v38, %v1093_v27  ;;  %v14308_v3 = vld [vmem:[#allocation7_spill] sm:$0xff] }
0x15c4   :  { %v2641_v29 = vadd.f32 %v2630_v56, %v1114_v15  ;;  %v1112_v19 = vmul.f32 %v1107_v62, %v1092_v28  ;;  %v1116_v63 = vmul.f32 %v14300_v38, %v1096_v44  ;;  %v14304_v56 = vld [vmem:[#allocation23_spill] sm:$0xff]  ;;  %v133_v15 = vsel %vm130_vm2, %v14307_v11, %v14306_v35 }
0x15c5   :  { %v131_v7 = vsel %vm130_vm2, %v14305_v31, %v14304_v56  ;;  %v91_v53 = vmul.f32 %v7901_v0, %v14308_v3  ;;  %v14332_v31 = vld [vmem:[#allocation34_spill] sm:$0xff] }
0x15c7   :  { %v9986_v24 = vpop.permute.xlu0 %2620 }
0x15c8   :  { %v10001_v61 = vpop.permute.xlu2 %2658 }
0x15ca   :  { %v9993_v54 = vpop.permute.xlu1 %2650 }
0x15cf   :  { %v10006_v45 = vpop.permute.xlu0 %2626 }
0x15d0   :  { %v10046_v17 = vpop.permute.xlu2 %2683 }
0x15d2   :  { %v10016_v20 = vpop.permute.xlu1 %2656 }
0x15d7   :  { %v10040_v6 = vpop.permute.xlu0 %2654 }
0x15d8   :  { %v2690_v4 = vpop.permute.xlu2 %2689 }
0x15da   :  { %v2682_v5 = vpop.permute.xlu1 %2681 }
0x15db   :  { %v2693_v26 = vsel %vm13911_vm14, %v2682_v5, %v10046_v17  ;;  %v936_v5 = vadd.f32 %v925_v52, %v883_v49  ;;  %v14309_v52 = vld [vmem:[#allocation6_spill] sm:$0xff] }
0x15dc   :  { %v2703_v48 = vadd.f32 %v2693_v26, %v2638_v39  ;;  %v2629_v39 = vsel %vm13909_vm11, %v9978_v9, %v9986_v24  ;;  %v2640_v26 = vadd.f32 %v9986_v24, %v1113_v55  ;;  %v1084_v9 = vsel %vm380_vm7, %v14292_v36, %v14303_v32  ;;  %v14312_v49 = vld [vmem:[#allocation14_spill] sm:$0xff]  ;;  %v14315_v55 = vld [vmem:[#allocation19_spill] sm:$0xff] }
0x15dd   :  { %v989_v10 = vadd.f32 %v978_v8, %v936_v5  ;;  %v2639_v41 = vadd.f32 %v2629_v39, %v1112_v19  ;;  %v2631_v36 = vsel %vm13909_vm11, %v9980_v43, %v10006_v45  ;;  %v2821_v43 = vld [vmem:[%s13799_s4 + $0x10] sm:$0xff]  ;;  %v89_v27 = vmul.f32 %v7902_v1, %v14309_v52  ;;  %v14317_v19 = vld [vmem:[#allocation41_spill] sm:$0xff] }
0x15de   :  { %2715 = vrot.lane.b32.xlu1 %v2703_v48, %s13917_s17  ;;  %v183_v14 = vsel %vm180_vm3, %v14313_v12, %v14312_v49  ;;  %v14314_v8 = vld [vmem:[#allocation40_spill] sm:$0xff]  ;;  %v233_v57 = vsel %vm230_vm4, %v14318_v13, %v14317_v19  ;;  %v14339_v13 = vld [vmem:[#allocation150_spill] sm:$0xff] }
0x15df   :  { %v10083_v50 = vpop.permute.xlu0 %2660  ;;  %v1042_v37 = vadd.f32 %v1031_v40, %v989_v10  ;;  %v139_v38 = vadd.f32 %v131_v7, %v89_v27  ;;  %v231_v39 = vsel %vm230_vm4, %v14315_v55, %v14314_v8  ;;  %v14319_v40 = vld [vmem:[#allocation26_spill] sm:$0xff]  ;;  %v14336_v55 = vld [vmem:[#allocation36_spill] sm:$0xff] }
0x15e1   :  { %v1095_v24 = vadd.f32 %v1084_v9, %v1042_v37  ;;  %v7903_v9 = vld [vmem:[#allocation2 + $0x8] sm:$0xff]  ;;  %v14323_v37 = vld [vmem:[#allocation29_spill] sm:$0xff] }
0x15e2   :  { %v2688_v16 = vpop.permute.xlu1 %2687  ;;  %v90_v44 = vmul.f32 %v7903_v9, %v14309_v52  ;;  %v393_v52 = vld [vmem:[%s13797_s2] sm:$0x3] }
0x15e3   :  { %v2695_v46 = vsel %vm13911_vm14, %v2688_v16, %v2690_v4  ;;  %v1115_v23 = vmul.f32 %v1107_v62, %v1095_v24  ;;  %v141_v62 = vadd.f32 %v133_v15, %v91_v53  ;;  %v92_v24 = vmul.f32 %v10066_v21, %v14308_v3  ;;  %v14333_v53 = vld [vmem:[#allocation18_spill] sm:$0xff] }
0x15e4   :  { %v2706_v59 = vadd.f32 %v2695_v46, %v2641_v29  ;;  %v14310_v29 = vld [vmem:[#allocation13_spill] sm:$0xff]  ;;  %v7966_v3 = vmov 16.0   ;;  %v184_v1 = vsel %vm180_vm3, %v14312_v49, %v14333_v53  ;;  %v282_v49 = vsel %vm280_vm6, %v14319_v40, %v14336_v55 }
0x15e5   :  { %v2642_v58 = vadd.f32 %v2631_v36, %v1115_v23  ;;  %v191_v46 = vadd.f32 %v183_v14, %v141_v62  ;;  %v14324_v23 = vld [vmem:[#allocation17_spill] sm:$0xff]  ;;  %7800 = vrcp.f32 %v7966_v3  ;;  %v14335_v14 = vld [vmem:[#allocation10_spill] sm:$0xff] }
0x15e6   :  { %2721 = vrot.lane.b32.xlu1 %v2706_v59, %s13917_s17  ;;  %v14316_v59 = vld [vmem:[#allocation27_spill] sm:$0xff] }
0x15e7   :  { %v2686_v22 = vpop.permute.xlu0 %2685  ;;  %v132_v5 = vsel %vm130_vm2, %v14304_v56, %v14316_v59  ;;  %v14331_v56 = vld [vmem:[#allocation43_spill] sm:$0xff] }
0x15e8   :  { %v2694_v48 = vsel %vm13911_vm14, %v10046_v17, %v2686_v22  ;;  %v2705_v60 = vadd.f32 %v2686_v22, %v2640_v26  ;;  %v2643_v17 = vadd.f32 %v10006_v45, %v1116_v63  ;;  %v2820_v45 = vld [vmem:[%s13799_s4 + $0x8] sm:$0xff]  ;;  %v14322_v22 = vld [vmem:[#allocation12_spill] sm:$0xff]  ;;  %v383_v7 = vsel %vm380_vm7, %v14332_v31, %v14331_v56 }
0x15e9   :  { %v2704_v47 = vadd.f32 %v2694_v48, %v2639_v41  ;;  %v14320_v26 = vld [vmem:[#allocation11_spill] sm:$0xff]  ;;  %v14321_v41 = vld [vmem:[#allocation28_spill] sm:$0xff] }
0x15ea   :  { %2719 = vrot.lane.b32.xlu0 %v2705_v60, %s13917_s17  ;;  %v281_v10 = vsel %vm280_vm6, %v14320_v26, %v14319_v40  ;;  %v283_v32 = vsel %vm280_vm6, %v14322_v22, %v14321_v41  ;;  %v241_v60 = vadd.f32 %v233_v57, %v191_v46  ;;  %v14340_v26 = vld [vmem:[#allocation155_spill] sm:$0xff]  ;;  %v2663_v40 = vsel %vm13911_vm14, %v9993_v54, %v9984_v51  ;;  %v14343_v54 = vld [vmem:[#allocation22_spill] sm:$0xff] }
0x15eb   :  { %2717 = vrot.lane.b32.xlu2 %v2704_v47, %s13917_s17  ;;  %v134_v47 = vsel %vm130_vm2, %v14306_v35, %v14323_v37  ;;  %v7801_v22 = vpop.eup %7800 }
0x15ec   :  { %v291_v36 = vadd.f32 %v283_v32, %v241_v60 }
0x15ee   :  { %2827 = vperm.xlu1 %7799, %v2819_v2   ;;  %v140_v2 = vadd.f32 %v132_v5, %v90_v44  ;;  %v14338_v5 = vld [vmem:[#allocation154_spill] sm:$0xff] }
0x15ef   :  { %v2692_v34 = vpop.permute.xlu0 %2691  ;;  %v1850_v57 = vsel %vm13909_vm11, %v14339_v13, %v14338_v5 }
0x15f0   :  { %v2696_v33 = vsel %vm13911_vm14, %v2690_v4, %v2692_v34  ;;  %v2708_v25 = vadd.f32 %v2692_v34, %v2643_v17  ;;  %v14311_v4 = vld [vmem:[#allocation32_spill] sm:$0xff]  ;;  %v182_v17 = vsel %vm180_vm3, %v14310_v29, %v14324_v23  ;;  %v14325_v34 = vld [vmem:[#allocation15_spill] sm:$0xff] }
0x15f1   :  { %v2707_v18 = vadd.f32 %v2696_v33, %v2642_v58  ;;  %v181_v16 = vsel %vm180_vm3, %v14311_v4, %v14310_v29  ;;  %v142_v58 = vadd.f32 %v134_v47, %v92_v24  ;;  %v14326_v33 = vld [vmem:[#allocation38_spill] sm:$0xff]  ;;  %v190_v35 = vadd.f32 %v182_v17, %v140_v2  ;;  %v14342_v2 = vld [vmem:[#allocation21_spill] sm:$0xff] }
0x15f2   :  { %2725 = vrot.lane.b32.xlu0 %v2708_v25, %s13917_s17  ;;  %v189_v28 = vadd.f32 %v181_v16, %v139_v38  ;;  %v331_v25 = vsel %vm330_vm5, %v14326_v33, %v14325_v34  ;;  %v395_v38 = vperm.slane %v393_v52, 0  ;;  %v14334_v16 = vld [vmem:[#allocation9_spill] sm:$0xff]  ;;  %v2755_v24 = vmul.f32 16.0, %v7801_v22 }
0x15f3   :  { %2723 = vrot.lane.b32.xlu2 %v2707_v18, %s13917_s17  ;;  %v14327_v18 = vld [vmem:[#allocation16_spill] sm:$0xff]  ;;  %v192_v27 = vadd.f32 %v184_v1, %v142_v58  ;;  %v232_v12 = vsel %vm230_vm4, %v14314_v8, %v14334_v16  ;;  %s14541_s17 = smov 4  }
0x15f4   :  { %v239_v48 = vadd.f32 %v231_v39, %v189_v28  ;;  %v234_v28 = vsel %vm230_vm4, %v14317_v19, %v14335_v14  ;;  %v240_v46 = vadd.f32 %v232_v12, %v190_v35  ;;  %v14337_v39 = vld [vmem:[#allocation37_spill] sm:$0xff]  ;;  %v334_v33 = vsel %vm330_vm5, %v14327_v18, %v14343_v54 }
0x15f5   :  { %v284_v59 = vsel %vm280_vm6, %v14321_v41, %v14337_v39  ;;  %v242_v32 = vadd.f32 %v234_v28, %v192_v27  ;;  %v2665_v41 = vsel %vm13911_vm14, %v10016_v20, %v10001_v61  ;;  %v14344_v20 = vld [vmem:[#allocation30_spill] sm:$0xff]  ;;  %v2756_v35 = vsub.f32 1.0, %v2755_v24  ;;  %v14346_v27 = vld [vmem:[#allocation151_spill] sm:$0xff] }
0x15f6   :  { %2842 = vperm.xlu1 %7799, %v2822_v42   ;;  %v289_v63 = vadd.f32 %v281_v10, %v239_v48  ;;  %v14328_v42 = vld [vmem:[#allocation39_spill] sm:$0xff]  ;;  %v14341_v10 = vld [vmem:[#allocation152_spill] sm:$0xff]  ;;  %v290_v44 = vadd.f32 %v282_v49, %v240_v46  ;;  %v2666_v12 = vsel %vm13911_vm14, %v10001_v61, %v10083_v50 }
0x15f7   :  { %v1852_v8 = vsel %vm13909_vm11, %v14341_v10, %v14340_v26  ;;  %v292_v48 = vadd.f32 %v284_v59, %v242_v32 }
0x15f8   :  { %v339_v11 = vadd.f32 %v331_v25, %v289_v63  ;;  %v332_v63 = vsel %vm330_vm5, %v14325_v34, %v14342_v2 }
0x15f9   :  { %v342_v34 = vadd.f32 %v334_v33, %v292_v48 }
0x15fa   :  { %2837 = vperm.xlu0 %7798, %v2821_v43   ;;  %v333_v43 = vsel %vm330_vm5, %v14328_v42, %v14327_v18  ;;  %v14345_v42 = vld [vmem:[#allocation33_spill] sm:$0xff] }
0x15fb   :  { %2832 = vperm.xlu2 %7797, %v2820_v45   ;;  %v14329_v45 = vld [vmem:[#allocation42_spill] sm:$0xff]  ;;  %v341_v15 = vadd.f32 %v333_v43, %v291_v36  ;;  %v384_v43 = vsel %vm380_vm7, %v14331_v56, %v14345_v42 }
0x15fc   :  { %v382_v25 = vsel %vm380_vm7, %v14329_v45, %v14344_v20  ;;  %v392_v3 = vadd.f32 %v384_v43, %v342_v34 }
0x15fd   :  { %v391_v29 = vadd.f32 %v383_v7, %v341_v15 }
0x15ff   :  { %v401_v9 = vmul.f32 %v395_v38, %v391_v29 }
0x1601   :  { %v1860_v37 = vadd.f32 %v1852_v8, %v401_v9 }
0x1603   :  { %2847 = vperm.xlu2 %7797, %v2823_v30   ;;  %v14330_v30 = vld [vmem:[#allocation31_spill] sm:$0xff]  ;;  %v2673_v23 = vadd.f32 %v2665_v41, %v1860_v37 }
0x1604   :  { %v381_v21 = vsel %vm380_vm7, %v14330_v30, %v14329_v45  ;;  %v1851_v45 = vsel %vm13909_vm11, %v14338_v5, %v14346_v27 }
0x1605   :  { %v389_v62 = vadd.f32 %v381_v21, %v339_v11  ;;  %v340_v21 = vadd.f32 %v332_v63, %v290_v44  ;;  %v396_v11 = vperm.slane %v393_v52, 1  ;;  %v2664_v52 = vsel %vm13911_vm14, %v9984_v51, %v10040_v6 }
0x1607   :  { %v399_v19 = vmul.f32 %v395_v38, %v389_v62  ;;  %v390_v15 = vadd.f32 %v382_v25, %v340_v21  ;;  %v14347_v38 = vld [vmem:[#allocation153_spill] sm:$0xff]  ;;  %v2757_v62 = vmul.f32 %v7801_v22, %v2756_v35 }
0x1608   :  { %v1853_v56 = vsel %vm13909_vm11, %v14340_v26, %v14347_v38  ;;  %vm2759_vm11 = vweird.f32 %v7801_v22 }
0x1609   :  { %v1858_v60 = vadd.f32 %v1850_v57, %v399_v19  ;;  %v400_v29 = vmul.f32 %v396_v11, %v390_v15  ;;  %v2758_v49 = vadd.f32 %v7801_v22, %v2757_v62 }
0x160b   :  { %v2671_v36 = vadd.f32 %v2663_v40, %v1858_v60  ;;  %v1859_v14 = vadd.f32 %v1851_v45, %v400_v29  ;;  %v10255_v6 = vsel %vm2759_vm11, %v7801_v22, %v2758_v49 }
0x160c   :  { %14348 = vst [vmem:[#allocation45_spill] sm:$0xff] %v10255_v6 }
0x160d   :  { %v2672_v39 = vadd.f32 %v2664_v52, %v1859_v14 }
0x1645   :  { %v2718_v0 = vpop.permute.xlu2 %2717 }
0x164d   :  { %v2724_v17 = vpop.permute.xlu2 %2723 }
0x1650   :  { %v2716_v4 = vpop.permute.xlu1 %2715 }
0x1651   :  { %v2728_v47 = vsel %vm13910_vm15, %v2716_v4, %v2718_v0  ;;  %v402_v4 = vmul.f32 %v396_v11, %v392_v3 }
0x1652   :  { %v2736_v31 = vadd.f32 %v2728_v47, %v2671_v36 }
0x1653   :  { %v1861_v28 = vadd.f32 %v1853_v56, %v402_v4 }
0x1655   :  { %v2674_v59 = vadd.f32 %v2666_v12, %v1861_v28 }
0x1658   :  { %v2722_v58 = vpop.permute.xlu1 %2721 }
0x1659   :  { %v2730_v30 = vsel %vm13910_vm15, %v2722_v58, %v2724_v17 }
0x165a   :  { %v2738_v7 = vadd.f32 %v2730_v30, %v2673_v23 }
0x165c   :  { %v2740_v53 = vadd.f32 %v2738_v7, %v2736_v31  ;;  %v2720_v18 = vpop.permute.xlu0 %2719 }
0x165d   :  { %v2729_v55 = vsel %vm13910_vm15, %v2718_v0, %v2720_v18 }
0x165e   :  { %v2741_v1 = vrot.slane %v2740_v53, 4  ;;  %v2737_v26 = vadd.f32 %v2729_v55, %v2672_v39 }
0x1660   :  { %v2742_v16 = vadd.f32 %v2741_v1, %v2740_v53 }
0x1662   :  { %v2743_v46 = vrot.slane %v2742_v16, 2 }
0x1664   :  { %v2726_v5 = vpop.permute.xlu0 %2725  ;;  %v2744_v13 = vadd.f32 %v2743_v46, %v2742_v16  ;;  %v2813_v16 = vld [vmem:[%s13798_s3] sm:$0xff]  ;;  %v2814_v46 = vld [vmem:[%s13798_s3 + $0x8] sm:$0xff] }
0x1665   :  { %v2731_v57 = vsel %vm13910_vm15, %v2724_v17, %v2726_v5  ;;  %v2816_v5 = vld [vmem:[%s13798_s3 + $0x18] sm:$0xff] }
0x1666   :  { %v2739_v10 = vadd.f32 %v2731_v57, %v2674_v59  ;;  %v2745_v51 = vrot.slane %v2744_v13, 1  ;;  %v2815_v59 = vld [vmem:[%s13798_s3 + $0x10] sm:$0xff]  ;;  %v2828_v57 = vpop.permute.xlu1 %2827 }
0x1668   :  { %v2747_v8 = vadd.f32 %v2739_v10, %v2737_v26  ;;  %v2746_v61 = vadd.f32 %v2745_v51, %v2744_v13  ;;  %v2817_v13 = vld [vmem:[%s13798_s3 + $0x20] sm:$0xff] }
0x166a   :  { %v2748_v50 = vrot.slane %v2747_v8, 4  ;;  %v2761_v32 = vmul.f32 %v10255_v6, %v2746_v61 }
0x166c   :  { %v2749_v19 = vadd.f32 %v2748_v50, %v2747_v8  ;;  %v2763_v0 = vsub.f32 %v2736_v31, %v2761_v32  ;;  %v2765_v9 = vsub.f32 %v2738_v7, %v2761_v32  ;;  %v2833_v50 = vpop.permute.xlu2 %2832 }
0x166e   :  { %v2750_v40 = vrot.slane %v2749_v19, 2  ;;  %v2767_v41 = vmul.f32 %v2763_v0, %v2763_v0  ;;  %v2769_v44 = vmul.f32 %v2765_v9, %v2765_v9 }
0x1670   :  { %v2771_v48 = vadd.f32 %v2769_v44, %v2767_v41  ;;  %v2751_v60 = vadd.f32 %v2750_v40, %v2749_v19 }
0x1672   :  { %v2772_v37 = vrot.slane %v2771_v48, 4  ;;  %v2752_v47 = vrot.slane %v2751_v60, 1 }
0x1674   :  { %v2773_v24 = vadd.f32 %v2772_v37, %v2771_v48  ;;  %v2753_v2 = vadd.f32 %v2752_v47, %v2751_v60 }
0x1676   :  { %v2774_v63 = vrot.slane %v2773_v24, 2  ;;  %v2762_v22 = vmul.f32 %v10255_v6, %v2753_v2  ;;  %v10307_v2 = vpop.permute.xlu0 %2837 }
0x1678   :  { %v2775_v36 = vadd.f32 %v2774_v63, %v2773_v24  ;;  %v2764_v23 = vsub.f32 %v2737_v26, %v2762_v22  ;;  %v2766_v17 = vsub.f32 %v2739_v10, %v2762_v22 }
0x167a   :  { %v2776_v58 = vrot.slane %v2775_v36, 1  ;;  %v2768_v54 = vmul.f32 %v2764_v23, %v2764_v23  ;;  %v2770_v33 = vmul.f32 %v2766_v17, %v2766_v17 }
0x167c   :  { %v2777_v20 = vadd.f32 %v2776_v58, %v2775_v36  ;;  %v2778_v25 = vadd.f32 %v2770_v33, %v2768_v54 }
0x167e   :  { %v2785_v42 = vmul.f32 %v2777_v20, %v10255_v6  ;;  %v2779_v43 = vrot.slane %v2778_v25, 4 }
0x1680   :  { %v2787_v30 = vadd.f32 1e-05, %v2785_v42  ;;  %v2780_v21 = vadd.f32 %v2779_v43, %v2778_v25 }
0x1682   :  { %7802 = vrsqrt.f32 %v2787_v30  ;;  %v2781_v34 = vrot.slane %v2780_v21, 2  ;;  %vm2795_vm15 = vweird.f32 %v2787_v30 }
0x1684   :  { %v2782_v31 = vadd.f32 %v2781_v34, %v2780_v21 }
0x1686   :  { %v2783_v7 = vrot.slane %v2782_v31, 1 }
0x1688   :  { %v7803_v35 = vpop.eup %7802  ;;  %v2784_v11 = vadd.f32 %v2783_v7, %v2782_v31 }
0x1689   :  { %v2790_v15 = vmul.f32 %v7803_v35, %v2787_v30  ;;  %vm2796_vm11 = vweird.f32 %v7803_v35 }
0x168a   :  { %v2786_v3 = vmul.f32 %v2784_v11, %v10255_v6  ;;  %vm2797_vm14 = vmor %vm2795_vm15, %vm2796_vm11 }
0x168b   :  { %v2791_v53 = vmul.f32 %v7803_v35, %v2790_v15 }
0x168c   :  { %v2788_v18 = vadd.f32 1e-05, %v2786_v3 }
0x168d   :  { %v2792_v1 = vmul.f32 0.5, %v2791_v53 }
0x168e   :  { %7804 = vrsqrt.f32 %v2788_v18  ;;  %vm2805_vm15 = vweird.f32 %v2788_v18 }
0x168f   :  { %v2793_v27 = vsub.f32 1.5, %v2792_v1 }
0x1691   :  { %v2794_v45 = vmul.f32 %v7803_v35, %v2793_v27 }
0x1693   :  { %v2798_v38 = vsel %vm2797_vm14, %v7803_v35, %v2794_v45 }
0x1694   :  { %v7805_v56 = vpop.eup %7804  ;;  %v2811_v62 = vmul.f32 %v2798_v38, %v2765_v9  ;;  %v2809_v4 = vmul.f32 %v2798_v38, %v2763_v0 }
0x1695   :  { %v2800_v29 = vmul.f32 %v7805_v56, %v2788_v18  ;;  %vm2806_vm8 = vweird.f32 %v7805_v56 }
0x1696   :  { %2888 = vmatpush.msra.mxu0 %v2811_v62  ;;  %vm2807_vm14 = vmor %vm2805_vm15, %vm2806_vm8 }
0x1697   :  { %v2801_v52 = vmul.f32 %v7805_v56, %v2800_v29 }
0x1698   :  { %2889 = vmatpush.msra.mxu0 %v2809_v4 }
0x1699   :  { %7612 = vmatmul.msk.f32.vlgmr.msra.gmra.mxu0 %vm13916_vm12, %v2813_v16  ;;  %v2802_v12 = vmul.f32 0.5, %v2801_v52 }
0x169b   :  { %v2803_v14 = vsub.f32 1.5, %v2802_v12 }
0x169d   :  { %v2804_v28 = vmul.f32 %v7805_v56, %v2803_v14 }
0x169f   :  { %v2808_v55 = vsel %vm2807_vm14, %v7805_v56, %v2804_v28 }
0x16a0   :  { %v2812_v49 = vmul.f32 %v2808_v55, %v2766_v17  ;;  %v2810_v39 = vmul.f32 %v2808_v55, %v2764_v23 }
0x16a1   :  { %7613 = vmatmul.msk.f32.gmra.mxu0 %vm13916_vm12, %v2814_v46 }
0x16a2   :  { %2923 = vmatpush.msra.mxu1 %v2812_v49 }
0x16a4   :  { %2924 = vmatpush.msra.mxu1 %v2810_v39 }
0x16a5   :  { %7618 = vmatmul.msk.f32.vlgmr.msra.gmra.mxu1 %vm13916_vm12, %v2813_v16 }
0x16a9   :  { %7614 = vmatmul.msk.f32.gmra.mxu0 %vm13916_vm12, %v2815_v59 }
0x16ad   :  { %7619 = vmatmul.msk.f32.gmra.mxu1 %vm13916_vm12, %v2814_v46 }
0x16b1   :  { %7615 = vmatmul.msk.f32.gmra.mxu0 %vm13916_vm12, %v2816_v5 }
0x16b5   :  { %7620 = vmatmul.msk.f32.gmra.mxu1 %vm13916_vm12, %v2815_v59 }
0x16b9   :  { %7616 = vmatmul.msk.f32.gmra.mxu0 %vm13916_vm12, %v2817_v13 }
0x16bd   :  { %7621 = vmatmul.msk.f32.gmra.mxu1 %vm13916_vm12, %v2816_v5 }
0x16c5   :  { %7622 = vmatmul.msk.f32.gmra.mxu1 %vm13916_vm12, %v2817_v13 }
0x1716   :  { %v2891_v26 = vpop.f32.mrf.mxu0 }
0x1717   :  { %v10286_v10 = vadd.f32 %v2891_v26, %v2828_v57 }
0x1719   :  { %v10289_v51 = vmul.f32 0.70710677, %v10286_v10 }
0x171b   :  { %v2968_v8 = vmul.f32 %v10289_v51, %v10289_v51 }
0x171d   :  { %v10293_v61 = vmin.f32 %v2968_v8, 16.0 }
0x171e   :  { %v2894_v32 = vpop.f32.mrf.mxu0 }
0x171f   :  { %v2981_v19 = vmul.f32 3.8918573e-05, %v10293_v61  ;;  %v10296_v0 = vadd.f32 %v2894_v32, %v2833_v50  ;;  %v2970_v9 = vmul.f32 2.1237322e-06, %v10293_v61 }
0x1721   :  { %v2982_v40 = vadd.f32 0.001143296, %v2981_v19  ;;  %v10300_v41 = vmul.f32 0.70710677, %v10296_v0  ;;  %v2971_v37 = vadd.f32 0.00028619796, %v2970_v9 }
0x1722   :  { %v2926_v44 = vpop.f32.mrf.mxu1 }
0x1723   :  { %v2983_v48 = vmul.f32 %v2982_v40, %v10293_v61  ;;  %v10303_v60 = vadd.f32 %v2926_v44, %v2828_v57  ;;  %v3048_v47 = vmul.f32 %v10300_v41, %v10300_v41  ;;  %v2972_v58 = vmul.f32 %v2971_v37, %v10293_v61 }
0x1725   :  { %v2984_v24 = vadd.f32 0.014752088, %v2983_v48  ;;  %v10309_v63 = vmin.f32 %v3048_v47, 16.0  ;;  %v10312_v22 = vmul.f32 0.70710677, %v10303_v60 }
0x1726   :  { %v2897_v36 = vpop.f32.mrf.mxu0  ;;  %v2973_v7 = vadd.f32 0.0036580483, %v2972_v58 }
0x1727   :  { %v2985_v23 = vmul.f32 %v2984_v24, %v10293_v61  ;;  %v10316_v17 = vadd.f32 %v2897_v36, %v10307_v2  ;;  %v3050_v54 = vmul.f32 2.1237322e-06, %v10309_v63  ;;  %v3061_v33 = vmul.f32 3.8918573e-05, %v10309_v63 }
0x1728   :  { %v3008_v20 = vmul.f32 %v10312_v22, %v10312_v22  ;;  %v2974_v62 = vmul.f32 %v2973_v7, %v10293_v61 }
0x1729   :  { %v2986_v25 = vadd.f32 0.112945676, %v2985_v23  ;;  %v3051_v42 = vadd.f32 0.00028619796, %v3050_v54  ;;  %v3062_v43 = vadd.f32 0.001143296, %v3061_v33 }
0x172a   :  { %v10323_v30 = vmin.f32 %v3008_v20, 16.0  ;;  %v10327_v34 = vmul.f32 0.70710677, %v10316_v17  ;;  %v2929_v31 = vpop.f32.mrf.mxu1  ;;  %v2975_v55 = vadd.f32 0.05243302, %v2974_v62 }
0x172b   :  { %v2987_v21 = vmul.f32 %v2986_v25, %v10293_v61  ;;  %v3052_v35 = vmul.f32 %v3051_v42, %v10309_v63  ;;  %v3063_v11 = vmul.f32 %v3062_v43, %v10309_v63  ;;  %v10335_v27 = vadd.f32 %v2929_v31, %v2833_v50 }
0x172c   :  { %v3021_v15 = vmul.f32 3.8918573e-05, %v10323_v30  ;;  %v3010_v53 = vmul.f32 2.1237322e-06, %v10323_v30  ;;  %v3128_v18 = vmul.f32 %v10327_v34, %v10327_v34  ;;  %v2976_v32 = vmul.f32 %v2975_v55, %v10293_v61 }
0x172d   :  { %v2988_v3 = vadd.f32 0.4994258, %v2987_v21  ;;  %v3064_v1 = vadd.f32 0.014752088, %v3063_v11  ;;  %v3053_v29 = vadd.f32 0.0036580483, %v3052_v35 }
0x172e   :  { %v3022_v38 = vadd.f32 0.001143296, %v3021_v15  ;;  %v10338_v56 = vmin.f32 %v3128_v18, 16.0  ;;  %v3011_v52 = vadd.f32 0.00028619796, %v3010_v53 }
0x172f   :  { %v2989_v45 = vmul.f32 %v2988_v3, %v10293_v61  ;;  %v3065_v4 = vmul.f32 %v3064_v1, %v10309_v63  ;;  %v10346_v28 = vmul.f32 0.70710677, %v10335_v27  ;;  %v3054_v49 = vmul.f32 %v3053_v29, %v10309_v63 }
0x1730   :  { %v3023_v12 = vmul.f32 %v3022_v38, %v10323_v30  ;;  %v3130_v46 = vmul.f32 2.1237322e-06, %v10338_v56  ;;  %v3012_v59 = vmul.f32 %v3011_v52, %v10323_v30  ;;  %v3141_v50 = vmul.f32 3.8918573e-05, %v10338_v56 }
0x1731   :  { %v10342_v16 = vadd.f32 1.0, %v2989_v45  ;;  %v3066_v14 = vadd.f32 0.112945676, %v3065_v4  ;;  %v3088_v57 = vmul.f32 %v10346_v28, %v10346_v28  ;;  %v3055_v19 = vadd.f32 0.05243302, %v3054_v49  ;;  %v2900_v45 = vpop.f32.mrf.mxu0  ;;  %v10380_v4 = vpop.permute.xlu1 %2842 }
0x1732   :  { %v3024_v5 = vadd.f32 0.014752088, %v3023_v12  ;;  %v3131_v8 = vadd.f32 0.00028619796, %v3130_v46  ;;  %v3013_v40 = vadd.f32 0.0036580483, %v3012_v59  ;;  %v10390_v46 = vadd.f32 %v2900_v45, %v10380_v4 }
0x1733   :  { %7806 = vrcp.f32 %v10342_v16  ;;  %v3067_v39 = vmul.f32 %v3066_v14, %v10309_v63  ;;  %v3142_v48 = vadd.f32 0.001143296, %v3141_v50  ;;  %v10363_v24 = vmin.f32 %v3088_v57, 16.0 }
0x1734   :  { %v3025_v26 = vmul.f32 %v3024_v5, %v10323_v30  ;;  %v3132_v23 = vmul.f32 %v3131_v8, %v10338_v56  ;;  %v2977_v54 = vadd.f32 0.18741608, %v2976_v32  ;;  %v3056_v20 = vmul.f32 %v3055_v19, %v10309_v63 }
0x1735   :  { %v3068_v13 = vadd.f32 0.4994258, %v3067_v39  ;;  %v3143_v58 = vmul.f32 %v3142_v48, %v10338_v56  ;;  %v3014_v25 = vmul.f32 %v3013_v40, %v10323_v30  ;;  %v3090_v21 = vmul.f32 2.1237322e-06, %v10363_v24 }
0x1736   :  { %v3026_v44 = vadd.f32 0.112945676, %v3025_v26  ;;  %v3101_v31 = vmul.f32 3.8918573e-05, %v10363_v24  ;;  %v3133_v35 = vadd.f32 0.0036580483, %v3132_v23  ;;  %v2978_v11 = vmul.f32 %v2977_v54, %v10293_v61 }
0x1737   :  { %v3069_v9 = vmul.f32 %v3068_v13, %v10309_v63  ;;  %v3144_v43 = vadd.f32 0.014752088, %v3143_v58  ;;  %v3057_v53 = vadd.f32 0.18741608, %v3056_v20  ;;  %v3015_v18 = vadd.f32 0.05243302, %v3014_v25 }
0x1738   :  { %v3027_v36 = vmul.f32 %v3026_v44, %v10323_v30  ;;  %v3091_v62 = vadd.f32 0.00028619796, %v3090_v21  ;;  %v3102_v29 = vadd.f32 0.001143296, %v3101_v31  ;;  %v3134_v52 = vmul.f32 %v3133_v35, %v10338_v56 }
0x1739   :  { %v10359_v37 = vpop.eup %7806  ;;  %v10361_v47 = vadd.f32 1.0, %v3069_v9  ;;  %v3145_v15 = vmul.f32 %v3144_v43, %v10338_v56  ;;  %v10387_v61 = vmul.f32 0.5, %v10286_v10  ;;  %v2979_v14 = vadd.f32 1.1283791, %v2978_v11  ;;  %v2932_v9 = vpop.f32.mrf.mxu1 }
0x173a   :  { %v2992_v33 = vmul.f32 %v10359_v37, %v10342_v16  ;;  %v3028_v42 = vadd.f32 0.4994258, %v3027_v36  ;;  %v10394_v49 = vmul.f32 0.5, %v10296_v0  ;;  %v3058_v39 = vmul.f32 %v3057_v53, %v10309_v63 }
0x173b   :  { %7808 = vrcp.f32 %v10361_v47  ;;  %v3146_v38 = vadd.f32 0.112945676, %v3145_v15  ;;  %v10399_v5 = vmul.f32 0.5, %v10303_v60  ;;  %v3016_v13 = vmul.f32 %v3015_v18, %v10323_v30 }
0x173c   :  { %v3029_v7 = vmul.f32 %v3028_v42, %v10323_v30  ;;  %v2993_v3 = vsub.f32 1.0, %v2992_v33  ;;  %v3092_v10 = vmul.f32 %v3091_v62, %v10363_v24  ;;  %v3103_v57 = vmul.f32 %v3102_v29, %v10363_v24 }
0x173d   :  { %v3147_v59 = vmul.f32 %v3146_v38, %v10338_v56  ;;  %v3000_v26 = vand.u32 2147483647, %v10342_v16  ;;  %v3135_v0 = vadd.f32 0.05243302, %v3134_v52  ;;  %v10408_v50 = vmul.f32 0.5, %v10335_v27 }
0x173e   :  { %v10378_v1 = vadd.f32 1.0, %v3029_v7  ;;  %v2994_v55 = vmul.f32 %v10359_v37, %v2993_v3  ;;  %v2980_v63 = vmul.f32 %v2979_v14, %v10289_v51  ;;  %v3104_v60 = vadd.f32 0.014752088, %v3103_v57 }
0x173f   :  { %v3148_v32 = vadd.f32 0.4994258, %v3147_v59  ;;  %v10412_v19 = vmul.f32 0.70710677, %v10390_v46  ;;  %vm2997_vm8 = vweird.f32 %v10359_v37  ;;  %v3002_v48 = vand.u32 2147483648, %v10342_v16 }
0x1740   :  { %7810 = vrcp.f32 %v10378_v1  ;;  %v2995_v44 = vadd.f32 %v10359_v37, %v2994_v55  ;;  %v3059_v36 = vadd.f32 1.1283791, %v3058_v39  ;;  %v3017_v23 = vadd.f32 0.18741608, %v3016_v13 }
0x1741   :  { %v10384_v12 = vpop.eup %7808  ;;  %v3093_v51 = vadd.f32 0.0036580483, %v3092_v10  ;;  %v3105_v58 = vmul.f32 %v3104_v60, %v10363_v24  ;;  %vm2996_vm11 = vweird.f32 %v10342_v16  ;;  %v3208_v33 = vmul.f32 %v10412_v19, %v10412_v19 }
0x1742   :  { %v3072_v8 = vmul.f32 %v10384_v12, %v10361_v47  ;;  %v10426_v20 = vadd.f32 %v2932_v9, %v10307_v2  ;;  %vm10428_vm15 = vmor %vm2996_vm11, %vm2997_vm8  ;;  %vm10432_vm14 = vcmp.eq.f32.partialorder %v3000_v26, 8.507059e+37  ;;  %v3136_v43 = vmul.f32 %v3135_v0, %v10338_v56  ;;  %v2903_v9 = vpop.f32.mrf.mxu0 }
0x1743   :  { %v3149_v21 = vmul.f32 %v3148_v32, %v10338_v56  ;;  %v3106_v16 = vadd.f32 0.112945676, %v3105_v58  ;;  %v2999_v31 = vsel %vm10428_vm15, %v10359_v37, %v2995_v44  ;;  %v3003_v7 = vor.u32 1.1754944e-38, %v3002_v48 }
0x1744   :  { %v3073_v54 = vsub.f32 1.0, %v3072_v8  ;;  %v10442_v2 = vmul.f32 %v3059_v36, %v10300_v41  ;;  %v3080_v11 = vand.u32 2147483647, %v10361_v47  ;;  %v3018_v15 = vmul.f32 %v3017_v23, %v10323_v30  ;;  %v10481_v36 = vpop.permute.xlu2 %2847 }
0x1745   :  { %v3094_v3 = vmul.f32 %v3093_v51, %v10363_v24  ;;  %v3107_v53 = vmul.f32 %v3106_v16, %v10363_v24  ;;  %vm3076_vm8 = vweird.f32 %v10361_v47  ;;  %v10450_v45 = vmin.f32 %v3208_v33, 16.0 }
0x1746   :  { %v10414_v40 = vpop.eup %7810  ;;  %v3074_v18 = vmul.f32 %v10384_v12, %v3073_v54  ;;  %v10453_v37 = vmul.f32 0.70710677, %v10426_v20  ;;  %v3004_v41 = vsel %vm10432_vm14, %v3003_v7, %v2999_v31  ;;  %v3137_v38 = vadd.f32 0.18741608, %v3136_v43  ;;  %v2935_v7 = vpop.f32.mrf.mxu1 }
0x1747   :  { %v3032_v27 = vmul.f32 %v10414_v40, %v10378_v1  ;;  %v10457_v62 = vadd.f32 1.0, %v3149_v21  ;;  %v3108_v30 = vadd.f32 0.4994258, %v3107_v53  ;;  %v3082_v29 = vand.u32 2147483648, %v10361_v47 }
0x1748   :  { %v3221_v14 = vmul.f32 3.8918573e-05, %v10450_v45  ;;  %v3168_v55 = vmul.f32 %v10453_v37, %v10453_v37  ;;  %vm10464_vm11 = vcmp.eq.f32.partialorder %v3080_v11, 8.507059e+37  ;;  %v3019_v59 = vadd.f32 1.1283791, %v3018_v15 }
0x1749   :  { %v3033_v35 = vsub.f32 1.0, %v3032_v27  ;;  %v3095_v13 = vadd.f32 0.05243302, %v3094_v3  ;;  %v3109_v10 = vmul.f32 %v3108_v30, %v10363_v24  ;;  %v3005_v57 = vmul.f32 %v3004_v41, %v2980_v63 }
0x174a   :  { %v3075_v26 = vadd.f32 %v10384_v12, %v3074_v18  ;;  %vm3077_vm15 = vweird.f32 %v10384_v12  ;;  %v3222_v8 = vadd.f32 0.001143296, %v3221_v14  ;;  %v3042_v0 = vand.u32 2147483648, %v10378_v1 }
0x174b   :  { %v3034_v52 = vmul.f32 %v10414_v40, %v3033_v35  ;;  %v3138_v32 = vmul.f32 %v3137_v38, %v10338_v56  ;;  %7812 = vrcp.f32 %v10457_v62  ;;  %v10474_v60 = vadd.f32 1.0, %v3109_v10  ;;  %vm10485_vm13 = vmor %vm3076_vm8, %vm3077_vm15 }
0x174c   :  { %vm3037_vm14 = vweird.f32 %v10414_v40  ;;  %v3223_v63 = vmul.f32 %v3222_v8, %v10450_v45  ;;  %v10479_v48 = vmin.f32 %v3168_v55, 16.0  ;;  %v3083_v56 = vor.u32 1.1754944e-38, %v3082_v29 }
0x174d   :  { %v3035_v44 = vadd.f32 %v10414_v40, %v3034_v52  ;;  %vm3036_vm10 = vweird.f32 %v10378_v1  ;;  %v3096_v27 = vmul.f32 %v3095_v13, %v10363_v24  ;;  %7814 = vrcp.f32 %v10474_v60 }
0x174e   :  { %v7624_v51 = vclamps-f32 %v3005_v57, 1.0  ;;  %v3079_v58 = vsel %vm10485_vm13, %v10384_v12, %v3075_v26  ;;  %v3040_v54 = vand.u32 2147483647, %v10378_v1  ;;  %v10497_v47 = vadd.f32 %v2903_v9, %v10481_v36  ;;  %vm10500_vm8 = vmor %vm3036_vm10, %vm3037_vm14 }
0x174f   :  { %v3020_v33 = vmul.f32 %v3019_v59, %v10312_v22  ;;  %v3043_v42 = vor.u32 1.1754944e-38, %v3042_v0  ;;  %v3224_v43 = vadd.f32 0.014752088, %v3223_v63  ;;  %v3170_v21 = vmul.f32 2.1237322e-06, %v10479_v48 }
0x1750   :  { %v3039_v16 = vsel %vm10500_vm8, %v10414_v40, %v3035_v44  ;;  %v10508_v12 = vadd.f32 1.1283791, %v3138_v32  ;;  %v3210_v1 = vmul.f32 2.1237322e-06, %v10450_v45  ;;  %v3181_v31 = vmul.f32 3.8918573e-05, %v10479_v48 }
0x1751   :  { %v10512_v22 = vpop.eup %7812  ;;  %v3084_v35 = vsel %vm10464_vm11, %v3083_v56, %v3079_v58  ;;  %v3097_v11 = vadd.f32 0.18741608, %v3096_v27  ;;  %v3225_v15 = vmul.f32 %v3224_v43, %v10450_v45  ;;  %v3171_v3 = vadd.f32 0.00028619796, %v3170_v21 }
0x1752   :  { %v3448_v53 = vadd.f32 1.0, %v7624_v51  ;;  %vm3041_vm10 = vcmp.eq.f32.partialorder %v3040_v54, 8.507059e+37  ;;  %v3182_v18 = vadd.f32 0.001143296, %v3181_v31  ;;  %v10518_v40 = vmul.f32 0.70710677, %v10497_v47 }
0x1753   :  { %v10520_v41 = vpop.eup %7814  ;;  %v3044_v38 = vsel %vm3041_vm10, %v3043_v42, %v3039_v16  ;;  %v3226_v30 = vadd.f32 0.112945676, %v3225_v15  ;;  %v3172_v29 = vmul.f32 %v3171_v3, %v10479_v48  ;;  %v10524_v52 = vadd.f32 %v2935_v7, %v10380_v4 }
0x1754   :  { %v10527_v14 = vmul.f32 %v3084_v35, %v10442_v2  ;;  %v3152_v55 = vmul.f32 %v10512_v22, %v10457_v62  ;;  %v3112_v39 = vmul.f32 %v10520_v41, %v10474_v60  ;;  %v3211_v59 = vadd.f32 0.00028619796, %v3210_v1 }
0x1755   :  { %v3098_v13 = vmul.f32 %v3097_v11, %v10363_v24  ;;  %v3227_v10 = vmul.f32 %v3226_v30, %v10450_v45  ;;  %v3173_v57 = vadd.f32 0.0036580483, %v3172_v29  ;;  %v3183_v26 = vmul.f32 %v3182_v18, %v10479_v48 }
0x1756   :  { %v3045_v8 = vmul.f32 %v3044_v38, %v3020_v33  ;;  %v3160_v4 = vand.u32 2147483647, %v10457_v62  ;;  %v3113_v0 = vsub.f32 1.0, %v3112_v39  ;;  %v3288_v2 = vmul.f32 %v10518_v40, %v10518_v40 }
0x1757   :  { %v10540_v32 = vmul.f32 %v3448_v53, %v10387_v61  ;;  %v3228_v9 = vadd.f32 0.4994258, %v3227_v10  ;;  %v3184_v44 = vadd.f32 0.014752088, %v3183_v26  ;;  %v10543_v63 = vmul.f32 0.70710677, %v10524_v52 }
0x1758   :  { %v3153_v24 = vsub.f32 1.0, %v3152_v55  ;;  %v3114_v23 = vmul.f32 %v10520_v41, %v3113_v0  ;;  %v3212_v56 = vmul.f32 %v3211_v59, %v10450_v45  ;;  %v10547_v27 = vmin.f32 %v3288_v2, 16.0 }
0x1759   :  { %v3162_v51 = vand.u32 2147483648, %v10457_v62  ;;  %v3099_v58 = vadd.f32 1.1283791, %v3098_v13  ;;  %v3174_v54 = vmul.f32 %v3173_v57, %v10479_v48  ;;  %v3185_v61 = vmul.f32 %v3184_v44, %v10479_v48 }
0x175a   :  { %v7626_v33 = vclamps-f32 %v10527_v14, 1.0  ;;  %v7625_v25 = vclamps-f32 %v3045_v8, 1.0  ;;  %vm3156_vm13 = vweird.f32 %v10457_v62  ;;  %vm3117_vm11 = vweird.f32 %v10520_v41  ;;  %v2938_v14 = vpop.f32.mrf.mxu1 }
0x175b   :  { %v3301_v42 = vmul.f32 3.8918573e-05, %v10547_v27  ;;  %v3115_v43 = vadd.f32 %v10520_v41, %v3114_v23  ;;  %v3229_v21 = vmul.f32 %v3228_v9, %v10450_v45  ;;  %v3186_v16 = vadd.f32 0.112945676, %v3185_v61 }
0x175c   :  { %v3248_v1 = vmul.f32 %v10543_v63, %v10543_v63  ;;  %v3154_v31 = vmul.f32 %v10512_v22, %v3153_v24  ;;  %v3122_v7 = vand.u32 2147483648, %v10474_v60  ;;  %v3213_v35 = vadd.f32 0.0036580483, %v3212_v56 }
0x175d   :  { %v3302_v11 = vadd.f32 0.001143296, %v3301_v42  ;;  %v3100_v15 = vmul.f32 %v3099_v58, %v10346_v28  ;;  %vm3116_vm15 = vweird.f32 %v10474_v60  ;;  %v3120_v3 = vand.u32 2147483647, %v10474_v60 }
0x175e   :  { %v3175_v53 = vadd.f32 0.05243302, %v3174_v54  ;;  %v3449_v18 = vadd.f32 1.0, %v7625_v25  ;;  %vm3157_vm14 = vweird.f32 %v10512_v22  ;;  %vm10568_vm8 = vmor %vm3116_vm15, %vm3117_vm11  ;;  %v3187_v30 = vmul.f32 %v3186_v16, %v10479_v48 }
0x175f   :  { %v3290_v29 = vmul.f32 2.1237322e-06, %v10547_v27  ;;  %v3119_v28 = vsel %vm10568_vm8, %v10520_v41, %v3115_v43  ;;  %v10577_v60 = vadd.f32 1.0, %v3229_v21  ;;  %v3303_v55 = vmul.f32 %v3302_v11, %v10547_v27  ;;  %vm10598_vm11 = vmor %vm3156_vm13, %vm3157_vm14 }
0x1760   :  { %v10580_v39 = vmin.f32 %v3248_v1, 16.0  ;;  %v3155_v59 = vadd.f32 %v10512_v22, %v3154_v31  ;;  %v3123_v13 = vor.u32 1.1754944e-38, %v3122_v7  ;;  %v3214_v10 = vmul.f32 %v3213_v35, %v10450_v45 }
0x1761   :  { %v3188_v57 = vadd.f32 0.4994258, %v3187_v30  ;;  %vm3121_vm10 = vcmp.eq.f32.partialorder %v3120_v3, 8.507059e+37  ;;  %v3176_v26 = vmul.f32 %v3175_v53, %v10479_v48  ;;  %v3304_v8 = vadd.f32 0.014752088, %v3303_v55 }
0x1762   :  { %v10586_v0 = vadd.f32 %v2938_v14, %v10481_v36  ;;  %v3124_v41 = vsel %vm3121_vm10, %v3123_v13, %v3119_v28  ;;  %v3250_v9 = vmul.f32 2.1237322e-06, %v10580_v39  ;;  %v3261_v44 = vmul.f32 3.8918573e-05, %v10580_v39 }
0x1763   :  { %v3189_v2 = vmul.f32 %v3188_v57, %v10479_v48  ;;  %v10592_v24 = vmul.f32 %v3449_v18, %v10399_v5  ;;  %7816 = vrcp.f32 %v10577_v60  ;;  %v3291_v36 = vadd.f32 0.00028619796, %v3290_v29 }
0x1764   :  { %v3305_v56 = vmul.f32 %v3304_v8, %v10547_v27  ;;  %v3159_v58 = vsel %vm10598_vm11, %v10512_v22, %v3155_v59  ;;  %vm3161_vm15 = vcmp.eq.f32.partialorder %v3160_v4, 8.507059e+37  ;;  %v3163_v5 = vor.u32 1.1754944e-38, %v3162_v51 }
0x1765   :  { %v3215_v54 = vadd.f32 0.05243302, %v3214_v10  ;;  %v3125_v61 = vmul.f32 %v3124_v41, %v3100_v15  ;;  %v3177_v25 = vadd.f32 0.18741608, %v3176_v26  ;;  %v10607_v42 = vadd.f32 1.0, %v3189_v2 }
0x1766   :  { %v3306_v62 = vadd.f32 0.112945676, %v3305_v56  ;;  %v3251_v43 = vadd.f32 0.00028619796, %v3250_v9  ;;  %v3262_v21 = vadd.f32 0.001143296, %v3261_v44  ;;  %v3164_v1 = vsel %vm3161_vm15, %v3163_v5, %v3159_v58 }
0x1767   :  { %v10610_v16 = vmul.f32 0.70710677, %v10586_v0  ;;  %7818 = vrcp.f32 %v10607_v42  ;;  %v3292_v31 = vmul.f32 %v3291_v36, %v10547_v27  ;;  %v3473_v22 = vmul.f32 %v10592_v24, %v10592_v24 }
0x1768   :  { %v3450_v4 = vadd.f32 1.0, %v7626_v33  ;;  %v3140_v51 = vmul.f32 %v10508_v12, %v10327_v34  ;;  %v3216_v7 = vmul.f32 %v3215_v54, %v10450_v45  ;;  %v3307_v35 = vmul.f32 %v3306_v62, %v10547_v27 }
0x1769   :  { %v10620_v11 = vpop.eup %7816  ;;  %v7627_v15 = vclamps-f32 %v3125_v61, 1.0  ;;  %v3263_v3 = vmul.f32 %v3262_v21, %v10580_v39  ;;  %v3328_v53 = vmul.f32 %v10610_v16, %v10610_v16  ;;  %v3472_v18 = vmul.f32 %v10540_v32, %v10540_v32 }
0x176a   :  { %v3165_v38 = vmul.f32 %v3164_v1, %v3140_v51  ;;  %v3178_v33 = vmul.f32 %v3177_v25, %v10479_v48  ;;  %v3308_v30 = vadd.f32 0.4994258, %v3307_v35  ;;  %v3252_v34 = vmul.f32 %v3251_v43, %v10580_v39 }
0x176b   :  { %v3293_v12 = vadd.f32 0.0036580483, %v3292_v31  ;;  %v3264_v29 = vadd.f32 0.014752088, %v3263_v3  ;;  %v10629_v14 = vmin.f32 %v3328_v53, 16.0  ;;  %v3484_v28 = vadd.f32 %v3473_v22, %v3472_v18 }
0x176c   :  { %v10632_v55 = vmul.f32 %v3450_v4, %v10394_v49  ;;  %v3217_v59 = vadd.f32 0.18741608, %v3216_v7  ;;  %v3232_v13 = vmul.f32 %v10620_v11, %v10577_v60  ;;  %v3309_v10 = vmul.f32 %v3308_v30, %v10547_v27 }
0x176d   :  { %v7819_v57 = vpop.eup %7818  ;;  %v3451_v26 = vadd.f32 1.0, %v7627_v15  ;;  %v3265_v48 = vmul.f32 %v3264_v29, %v10580_v39  ;;  %v3330_v8 = vmul.f32 2.1237322e-06, %v10629_v14  ;;  %v3341_v41 = vmul.f32 3.8918573e-05, %v10629_v14  ;;  %3485 = vadd.xlane.f32.xlu1 %v3484_v28 }
0x176e   :  { %v7628_v2 = vclamps-f32 %v3165_v38, 1.0  ;;  %v3179_v9 = vadd.f32 1.1283791, %v3178_v33  ;;  %v3192_v49 = vmul.f32 %v7819_v57, %v10607_v42  ;;  %v3253_v44 = vadd.f32 0.0036580483, %v3252_v34 }
0x176f   :  { %v3294_v23 = vmul.f32 %v3293_v12, %v10547_v27  ;;  %v10642_v36 = vadd.f32 1.0, %v3309_v10  ;;  %v3266_v56 = vadd.f32 0.112945676, %v3265_v48  ;;  %v3331_v58 = vadd.f32 0.00028619796, %v3330_v8 }
0x1770   :  { %v3218_v5 = vmul.f32 %v3217_v59, %v10450_v45  ;;  %v3233_v54 = vsub.f32 1.0, %v3232_v13  ;;  %v3193_v61 = vsub.f32 1.0, %v3192_v49  ;;  %v3342_v25 = vadd.f32 0.001143296, %v3341_v41 }
0x1771   :  { %v10646_v62 = vmul.f32 %v3451_v26, %v10408_v50  ;;  %v3200_v43 = vand.u32 2147483647, %v10607_v42  ;;  %v3202_v21 = vand.u32 2147483648, %v10607_v42  ;;  %7820 = vrcp.f32 %v10642_v36 }
0x1772   :  { %v3194_v1 = vmul.f32 %v7819_v57, %v3193_v61  ;;  %vm3197_vm13 = vweird.f32 %v7819_v57  ;;  %v3254_v31 = vmul.f32 %v3253_v44, %v10580_v39  ;;  %v3267_v22 = vmul.f32 %v3266_v56, %v10580_v39  ;;  %v2818_v44 = vld [vmem:[%s13798_s3 + $0x28] sm:$0xff] }
0x1773   :  { %v3180_v45 = vmul.f32 %v3179_v9, %v10453_v37  ;;  %v3295_v4 = vadd.f32 0.05243302, %v3294_v23  ;;  %v3332_v51 = vmul.f32 %v3331_v58, %v10629_v14  ;;  %v3343_v50 = vmul.f32 %v3342_v25, %v10629_v14  ;;  %7617 = vmatmul.msk.f32.gmra.mxu0 %vm13916_vm12, %v2818_v44  ;;  %7623 = vmatmul.msk.f32.gmra.mxu1 %vm13916_vm12, %v2818_v44 }
0x1774   :  { %v3234_v7 = vmul.f32 %v10620_v11, %v3233_v54  ;;  %v3195_v35 = vadd.f32 %v7819_v57, %v3194_v1  ;;  %vm3196_vm14 = vweird.f32 %v10607_v42  ;;  %v3268_v15 = vadd.f32 0.4994258, %v3267_v22 }
0x1775   :  { %vm3198_vm8 = vmor %vm3196_vm14, %vm3197_vm13  ;;  %v3203_v3 = vor.u32 1.1754944e-38, %v3202_v21  ;;  %v3344_v53 = vadd.f32 0.014752088, %v3343_v50  ;;  %v3474_v18 = vmul.f32 %v10632_v55, %v10632_v55  ;;  %v3475_v37 = vmul.f32 %v10646_v62, %v10646_v62 }
0x1776   :  { %v3199_v38 = vsel %vm3198_vm8, %v7819_v57, %v3195_v35  ;;  %vm3201_vm10 = vcmp.eq.f32.partialorder %v3200_v43, 8.507059e+37  ;;  %v3255_v33 = vadd.f32 0.05243302, %v3254_v31  ;;  %v3269_v30 = vmul.f32 %v3268_v15, %v10580_v39 }
0x1777   :  { %v10663_v34 = vpop.eup %7820  ;;  %v3204_v12 = vsel %vm3201_vm10, %v3203_v3, %v3199_v38  ;;  %v3333_v29 = vadd.f32 0.0036580483, %v3332_v51  ;;  %v3345_v42 = vmul.f32 %v3344_v53, %v10629_v14  ;;  %v3487_v28 = vadd.f32 %v3475_v37, %v3474_v18 }
0x1778   :  { %v3452_v59 = vadd.f32 1.0, %v7628_v2  ;;  %v3242_v13 = vand.u32 2147483648, %v10577_v60  ;;  %v3205_v10 = vmul.f32 %v3204_v12, %v3180_v45  ;;  %v3312_v26 = vmul.f32 %v10663_v34, %v10642_v36 }
0x1779   :  { %v3235_v57 = vadd.f32 %v10620_v11, %v3234_v7  ;;  %vm3237_vm11 = vweird.f32 %v10620_v11  ;;  %v10671_v48 = vadd.f32 1.0, %v3269_v30  ;;  %v3346_v8 = vadd.f32 0.112945676, %v3345_v42  ;;  %3488 = vadd.xlane.f32.xlu2 %v3487_v28 }
0x177a   :  { %v2948_v41 = vmul.f32 0.5, %v10316_v17  ;;  %v7629_v9 = vclamps-f32 %v3205_v10, 1.0  ;;  %v3296_v49 = vmul.f32 %v3295_v4, %v10547_v27  ;;  %v3256_v2 = vmul.f32 %v3255_v33, %v10580_v39  ;;  %v7640_v10 = vld [vmem:[%s13795_s0 + $0x20] sm:$0xff] }
0x177b   :  { %vm3236_vm15 = vweird.f32 %v10577_v60  ;;  %v3240_v23 = vand.u32 2147483647, %v10577_v60  ;;  %7822 = vrcp.f32 %v10671_v48  ;;  %v3334_v56 = vmul.f32 %v3333_v29, %v10629_v14 }
0x177c   :  { %vm10687_vm13 = vmor %vm3236_vm15, %vm3237_vm11  ;;  %v2949_v58 = vmul.f32 0.5, %v10426_v20  ;;  %v3453_v54 = vadd.f32 1.0, %v7629_v9  ;;  %v3313_v61 = vsub.f32 1.0, %v3312_v26  ;;  %v3347_v60 = vmul.f32 %v3346_v8, %v10629_v14 }
0x177d   :  { %v10693_v25 = vmul.f32 %v3452_v59, %v2948_v41  ;;  %v3219_v43 = vadd.f32 1.1283791, %v3218_v5  ;;  %v3239_v21 = vsel %vm10687_vm13, %v10620_v11, %v3235_v57  ;;  %v3243_v1 = vor.u32 1.1754944e-38, %v3242_v13 }
0x177e   :  { %v10698_v31 = vmul.f32 %v3453_v54, %v2949_v58  ;;  %v3297_v22 = vadd.f32 0.18741608, %v3296_v49  ;;  %v3257_v45 = vadd.f32 0.18741608, %v3256_v2  ;;  %v3348_v4 = vadd.f32 0.4994258, %v3347_v60 }
0x177f   :  { %vm3241_vm14 = vcmp.eq.f32.partialorder %v3240_v23, 8.507059e+37  ;;  %v3335_v51 = vadd.f32 0.05243302, %v3334_v56  ;;  %v3314_v50 = vmul.f32 %v10663_v34, %v3313_v61  ;;  %v3220_v15 = vmul.f32 %v3219_v43, %v10412_v19 }
0x1780   :  { %v3244_v20 = vsel %vm3241_vm14, %v3243_v1, %v3239_v21  ;;  %v3349_v7 = vmul.f32 %v3348_v4, %v10629_v14  ;;  %v3477_v5 = vmul.f32 %v10698_v31, %v10698_v31  ;;  %v3476_v11 = vmul.f32 %v10693_v25, %v10693_v25 }
0x1781   :  { %v7823_v35 = vpop.eup %7822  ;;  %v3298_v3 = vmul.f32 %v3297_v22, %v10547_v27  ;;  %v3258_v53 = vmul.f32 %v3257_v45, %v10580_v39  ;;  %v3245_v37 = vmul.f32 %v3244_v20, %v3220_v15  ;;  %v3336_v38 = vmul.f32 %v3335_v51, %v10629_v14 }
0x1782   :  { %v3272_v18 = vmul.f32 %v7823_v35, %v10671_v48  ;;  %v3350_v33 = vadd.f32 1.0, %v3349_v7  ;;  %v3490_v30 = vadd.f32 %v3477_v5, %v3476_v11  ;;  %v3315_v12 = vadd.f32 %v10663_v34, %v3314_v50 }
0x1783   :  { %vm3316_vm8 = vweird.f32 %v10642_v36  ;;  %vm3317_vm10 = vweird.f32 %v10663_v34  ;;  %v3320_v29 = vand.u32 2147483647, %v10642_v36  ;;  %v3322_v27 = vand.u32 2147483648, %v10642_v36 }
0x1784   :  { %v3273_v19 = vsub.f32 1.0, %v3272_v18  ;;  %v3282_v39 = vand.u32 2147483648, %v10671_v48  ;;  %7824 = vrcp.f32 %v3350_v33  ;;  %3491 = vadd.xlane.f32.xlu0 %v3490_v30  ;;  %v3259_v42 = vadd.f32 1.1283791, %v3258_v53  ;;  %vm10718_vm15 = vmor %vm3316_vm8, %vm3317_vm10  ;;  %v2824_v18 = vld [vmem:[%s13799_s4 + $0x28] sm:$0xff] }
0x1785   :  { %vm3277_vm11 = vweird.f32 %v7823_v35  ;;  %v3280_v59 = vand.u32 2147483647, %v10671_v48  ;;  %v7630_v13 = vclamps-f32 %v3245_v37, 1.0  ;;  %v3337_v26 = vadd.f32 0.18741608, %v3336_v38 }
0x1786   :  { %v3274_v28 = vmul.f32 %v7823_v35, %v3273_v19  ;;  %v3299_v57 = vadd.f32 1.1283791, %v3298_v3  ;;  %v3319_v36 = vsel %vm10718_vm15, %v10663_v34, %v3315_v12  ;;  %vm3276_vm13 = vweird.f32 %v10671_v48 }
0x1787   :  { %v3323_v41 = vor.u32 1.1754944e-38, %v3322_v27  ;;  %vm3278_vm14 = vmor %vm3276_vm13, %vm3277_vm11  ;;  %v3283_v9 = vor.u32 1.1754944e-38, %v3282_v39  ;;  %vm3321_vm12 = vcmp.eq.f32.partialorder %v3320_v29, 8.507059e+37  ;;  %v3260_v49 = vmul.f32 %v3259_v42, %v10543_v63  ;;  %v3619_v39 = vld [vmem:[%s13800_s5 + $0x28] sm:$0xff]  ;;  %v3676_v42 = vld [vmem:[%s13801_s6 + $0x10] sm:$0xff] }
0x1788   :  { %v3275_v8 = vadd.f32 %v7823_v35, %v3274_v28  ;;  %vm3281_vm8 = vcmp.eq.f32.partialorder %v3280_v59, 8.507059e+37  ;;  %v3454_v23 = vadd.f32 1.0, %v7630_v13  ;;  %v3338_v58 = vmul.f32 %v3337_v26, %v10629_v14  ;;  %v3615_v28 = vld [vmem:[%s13800_s5 + $0x8] sm:$0xff]  ;;  %v3618_v13 = vld [vmem:[%s13800_s5 + $0x20] sm:$0xff] }
0x1789   :  { %v3324_v56 = vsel %vm3321_vm12, %v3323_v41, %v3319_v36  ;;  %v3300_v54 = vmul.f32 %v3299_v57, %v10518_v40  ;;  %v2950_v48 = vmul.f32 0.5, %v10390_v46  ;;  %v2951_v63 = vmul.f32 0.5, %v10524_v52  ;;  %v3679_v59 = vld [vmem:[%s13801_s6 + $0x28] sm:$0xff]  ;;  %v7643_v57 = vld [vmem:[%s13795_s0 + $0x38] sm:$0xff]  ;;  %v3678_v36 = vld [vmem:[%s13801_s6 + $0x20] sm:$0xff] }
0x178a   :  { %v3279_v2 = vsel %vm3278_vm14, %v7823_v35, %v3275_v8  ;;  %v7825_v44 = vpop.eup %7824  ;;  %v3339_v22 = vadd.f32 1.1283791, %v3338_v58  ;;  %v3362_v45 = vand.u32 2147483648, %v3350_v33  ;;  %v3360_v20 = vand.u32 2147483647, %v3350_v33  ;;  %v3675_v26 = vld [vmem:[%s13801_s6 + $0x8] sm:$0xff] }
0x178b   :  { %v3284_v17 = vsel %vm3281_vm8, %v3283_v9, %v3279_v2  ;;  %v3352_v61 = vmul.f32 %v7825_v44, %v3350_v33  ;;  %v3325_v60 = vmul.f32 %v3324_v56, %v3300_v54  ;;  %v10730_v1 = vmul.f32 %v3454_v23, %v2950_v48  ;;  %v7644_v8 = vld [vmem:[%s13796_s1 + $0x70] sm:$0xff]  ;;  %v3737_v41 = vld [vmem:[%s13803_s8 + $0x8] sm:$0xff] }
0x178c   :  { %v3285_v34 = vmul.f32 %v3284_v17, %v3260_v49  ;;  %vm3357_vm12 = vweird.f32 %v7825_v44  ;;  %vm3356_vm10 = vweird.f32 %v3350_v33  ;;  %v3363_v46 = vor.u32 1.1754944e-38, %v3362_v45  ;;  %v7642_v9 = vld [vmem:[%s13795_s0 + $0x30] sm:$0xff]  ;;  %v3849_v49 = vld [vmem:[%s13796_s1 + $0x8] sm:$0xff] }
0x178d   :  { %v3353_v21 = vsub.f32 1.0, %v3352_v61  ;;  %v7632_v14 = vclamps-f32 %v3325_v60, 1.0  ;;  %vm3358_vm11 = vmor %vm3356_vm10, %vm3357_vm12  ;;  %v3478_v7 = vmul.f32 %v10730_v1, %v10730_v1  ;;  %v3340_v5 = vmul.f32 %v3339_v22, %v10610_v16 }
0x178e   :  { %v7631_v43 = vclamps-f32 %v3285_v34, 1.0  ;;  %vm3361_vm15 = vcmp.eq.f32.partialorder %v3360_v20, 8.507059e+37  ;;  %v2952_v37 = vmul.f32 0.5, %v10497_v47  ;;  %v2953_v16 = vmul.f32 0.5, %v10586_v0  ;;  %v3614_v47 = vld [vmem:[%s13800_s5] sm:$0xff]  ;;  %v3617_v0 = vld [vmem:[%s13800_s5 + $0x18] sm:$0xff] }
0x178f   :  { %v3354_v51 = vmul.f32 %v7825_v44, %v3353_v21  ;;  %v3456_v11 = vadd.f32 1.0, %v7632_v14 }
0x1790   :  { %v3455_v4 = vadd.f32 1.0, %v7631_v43 }
0x1791   :  { %v3355_v40 = vadd.f32 %v7825_v44, %v3354_v51  ;;  %v10744_v33 = vmul.f32 %v3456_v11, %v2952_v37 }
0x1792   :  { %v10733_v50 = vmul.f32 %v3455_v4, %v2951_v63 }
0x1793   :  { %v3359_v35 = vsel %vm3358_vm11, %v7825_v44, %v3355_v40  ;;  %v3480_v19 = vmul.f32 %v10744_v33, %v10744_v33 }
0x1794   :  { %v3479_v52 = vmul.f32 %v10733_v50, %v10733_v50  ;;  %v3364_v15 = vsel %vm3361_vm15, %v3363_v46, %v3359_v35 }
0x1795   :  { %v3365_v3 = vmul.f32 %v3364_v15, %v3340_v5 }
0x1796   :  { %v3493_v53 = vadd.f32 %v3479_v52, %v3478_v7 }
0x1797   :  { %v7633_v38 = vclamps-f32 %v3365_v3, 1.0 }
0x1798   :  { %3494 = vadd.xlane.f32.xlu2 %v3493_v53  ;;  %2852 = vperm.xlu0 %7798, %v2824_v18  }
0x1799   :  { %v3457_v30 = vadd.f32 1.0, %v7633_v38 }
0x179b   :  { %v10747_v12 = vmul.f32 %v3457_v30, %v2953_v16 }
0x179d   :  { %v3481_v29 = vmul.f32 %v10747_v12, %v10747_v12 }
0x179f   :  { %v3496_v27 = vadd.f32 %v3481_v29, %v3480_v19 }
0x17a0   :  { %3634 = vperm.xlu0 %7798, %v3614_v47  }
0x17a1   :  { %3497 = vadd.xlane.f32.xlu1 %v3496_v27 }
0x17a8   :  { %3649 = vperm.xlu0 %7798, %v3617_v0  }
0x17b0   :  { %3659 = vperm.xlu0 %7798, %v3619_v39  }
0x17b8   :  { %3692 = vperm.xlu0 %7798, %v3676_v42  }
0x17ba   :  { %3639 = vperm.xlu1 %7799, %v3615_v28  }
0x17c0   :  { %3707 = vperm.xlu0 %7798, %v3679_v59  }
0x17c2   :  { %3654 = vperm.xlu1 %7799, %v3618_v13  }
0x17c8   :  { %3820 = vrot.lane.b32.xlu0 %v7640_v10, %s7949_s15 }
0x17ca   :  { %3687 = vperm.xlu1 %7799, %v3675_v26  }
0x17d0   :  { %3826 = vrot.lane.b32.xlu0 %v7643_v57, %s7949_s15 }
0x17d2   :  { %3702 = vperm.xlu1 %7799, %v3678_v36  }
0x17d8   :  { %3868 = vperm.xlu0 %7798, %v7644_v8  }
0x17da   :  { %3745 = vperm.xlu1 %7799, %v3737_v41  }
0x17e0   :  { %v10821_v37 = vpop.xlane.xlu1 %3485 }
0x17e2   :  { %3824 = vrot.lane.b32.xlu1 %v7642_v9, %s7949_s15 }
0x17ea   :  { %3857 = vperm.xlu1 %7799, %v3849_v49  }
0x17f0   :  { %v2906_v44 = vpop.f32.mrf.mxu0  ;;  %v2941_v23 = vpop.f32.mrf.mxu1 }
0x17f7   :  { %v10801_v2 = vpop.xlane.xlu0 %3491 }
0x180a   :  { %v2853_v56 = vpop.permute.xlu0 %2852 }
0x180b   :  { %v10803_v17 = vadd.f32 %v2906_v44, %v2853_v56  ;;  %v10805_v58 = vadd.f32 %v2941_v23, %v2853_v56 }
0x180d   :  { %v10808_v54 = vmul.f32 0.70710677, %v10803_v17  ;;  %v10811_v34 = vmul.f32 0.70710677, %v10805_v58 }
0x180f   :  { %v3368_v61 = vmul.f32 %v10808_v54, %v10808_v54  ;;  %v3408_v48 = vmul.f32 %v10811_v34, %v10811_v34 }
0x1811   :  { %v3369_v60 = vmin.f32 %v3368_v61, 16.0  ;;  %v3409_v43 = vmin.f32 %v3408_v48, 16.0 }
0x1812   :  { %v10817_v21 = vpop.permute.xlu0 %3634 }
0x1813   :  { %v3370_v63 = vmul.f32 2.1237322e-06, %v3369_v60  ;;  %v3381_v22 = vmul.f32 3.8918573e-05, %v3369_v60  ;;  %v3410_v45 = vmul.f32 2.1237322e-06, %v3409_v43 }
0x1814   :  { %v3421_v4 = vmul.f32 3.8918573e-05, %v3409_v43  ;;  %v10825_v10 = vpop.xlane.xlu1 %3497 }
0x1815   :  { %v3371_v51 = vadd.f32 0.00028619796, %v3370_v63  ;;  %v3382_v20 = vadd.f32 0.001143296, %v3381_v22  ;;  %v3411_v14 = vadd.f32 0.00028619796, %v3410_v45 }
0x1816   :  { %v3422_v40 = vadd.f32 0.001143296, %v3421_v4 }
0x1817   :  { %v3372_v46 = vmul.f32 %v3371_v51, %v3369_v60  ;;  %v3383_v7 = vmul.f32 %v3382_v20, %v3369_v60  ;;  %v3412_v5 = vmul.f32 %v3411_v14, %v3409_v43 }
0x1818   :  { %v3423_v35 = vmul.f32 %v3422_v40, %v3409_v43 }
0x1819   :  { %v3373_v52 = vadd.f32 0.0036580483, %v3372_v46  ;;  %v3384_v15 = vadd.f32 0.014752088, %v3383_v7  ;;  %v3413_v18 = vadd.f32 0.0036580483, %v3412_v5 }
0x181a   :  { %v3424_v11 = vadd.f32 0.014752088, %v3423_v35  ;;  %v10819_v3 = vpop.permute.xlu0 %3649 }
0x181b   :  { %v3385_v53 = vmul.f32 %v3384_v15, %v3369_v60  ;;  %v3374_v16 = vmul.f32 %v3373_v52, %v3369_v60  ;;  %v3414_v47 = vmul.f32 %v3413_v18, %v3409_v43 }
0x181c   :  { %v3425_v38 = vmul.f32 %v3424_v11, %v3409_v43 }
0x181d   :  { %v3386_v30 = vadd.f32 0.112945676, %v3385_v53  ;;  %v3375_v0 = vadd.f32 0.05243302, %v3374_v16  ;;  %v3415_v13 = vadd.f32 0.05243302, %v3414_v47 }
0x181e   :  { %v3426_v19 = vadd.f32 0.112945676, %v3425_v38 }
0x181f   :  { %v3387_v29 = vmul.f32 %v3386_v30, %v3369_v60  ;;  %v3376_v57 = vmul.f32 %v3375_v0, %v3369_v60  ;;  %v3416_v41 = vmul.f32 %v3415_v13, %v3409_v43 }
0x1820   :  { %v3427_v27 = vmul.f32 %v3426_v19, %v3409_v43 }
0x1821   :  { %v3388_v39 = vadd.f32 0.4994258, %v3387_v29  ;;  %v3377_v9 = vadd.f32 0.18741608, %v3376_v57  ;;  %v3417_v44 = vadd.f32 0.18741608, %v3416_v41 }
0x1822   :  { %v3428_v42 = vadd.f32 0.4994258, %v3427_v27  ;;  %v10823_v28 = vpop.permute.xlu0 %3659  ;;  %v2955_v57 = vmul.f32 0.5, %v10805_v58 }
0x1823   :  { %v3389_v59 = vmul.f32 %v3388_v39, %v3369_v60  ;;  %v3378_v61 = vmul.f32 %v3377_v9, %v3369_v60  ;;  %v3418_v22 = vmul.f32 %v3417_v44, %v3409_v43 }
0x1824   :  { %v3429_v26 = vmul.f32 %v3428_v42, %v3409_v43 }
0x1825   :  { %v3390_v36 = vadd.f32 1.0, %v3389_v59  ;;  %v3379_v51 = vadd.f32 1.1283791, %v3378_v61  ;;  %v3419_v35 = vadd.f32 1.1283791, %v3418_v22 }
0x1826   :  { %v3430_v8 = vadd.f32 1.0, %v3429_v26 }
0x1827   :  { %7826 = vrcp.f32 %v3390_v36  ;;  %v3402_v20 = vand.u32 2147483648, %v3390_v36  ;;  %v3400_v46 = vand.u32 2147483647, %v3390_v36  ;;  %vm3396_vm8 = vweird.f32 %v3390_v36 }
0x1828   :  { %7828 = vrcp.f32 %v3430_v8  ;;  %v3442_v7 = vand.u32 2147483648, %v3430_v8  ;;  %v3440_v15 = vand.u32 2147483647, %v3430_v8  ;;  %vm3436_vm10 = vweird.f32 %v3430_v8 }
0x1829   :  { %v3403_v43 = vor.u32 1.1754944e-38, %v3402_v20  ;;  %v3380_v18 = vmul.f32 %v3379_v51, %v10808_v54  ;;  %vm3401_vm11 = vcmp.eq.f32.partialorder %v3400_v46, 8.507059e+37  ;;  %v3420_v19 = vmul.f32 %v3419_v35, %v10811_v34  ;;  %v3674_v51 = vld [vmem:[%s13801_s6] sm:$0xff]  ;;  %v3677_v20 = vld [vmem:[%s13801_s6 + $0x18] sm:$0xff]  ;;  %v3489_v35 = vpop.xlane.xlu2 %3488 }
0x182a   :  { %v10827_v49 = vpop.permute.xlu0 %3692  ;;  %v3443_v16 = vor.u32 1.1754944e-38, %v3442_v7  ;;  %vm3441_vm9 = vcmp.eq.f32.partialorder %v3440_v15, 8.507059e+37  ;;  %v2954_v54 = vmul.f32 0.5, %v10803_v17  ;;  %v3848_v46 = vld [vmem:[%s13796_s1] sm:$0xff]  ;;  %v7645_v7 = vld [vmem:[%s13796_s1 + $0x78] sm:$0xff]  ;;  %7830 = vrsqrt.f32 %v3489_v35 }
0x182b   :  { %7832 = vrsqrt.f32 %v10821_v37 }
0x182c   :  { %v10829_v23 = vpop.permute.xlu1 %3639  ;;  %7834 = vrsqrt.f32 %v10801_v2 }
0x182d   :  { %v7827_v56 = vpop.eup %7826 }
0x182e   :  { %v7829_v48 = vpop.eup %7828  ;;  %v3392_v63 = vmul.f32 %v7827_v56, %v3390_v36  ;;  %vm3397_vm13 = vweird.f32 %v7827_v56 }
0x182f   :  { %v3432_v45 = vmul.f32 %v7829_v48, %v3430_v8  ;;  %vm3437_vm14 = vweird.f32 %v7829_v48  ;;  %vm3398_vm12 = vmor %vm3396_vm8, %vm3397_vm13  ;;  %vm3533_vm13 = vcmp.eq.f32.partialorder %v10801_v2, inf }
0x1830   :  { %v3393_v4 = vsub.f32 1.0, %v3392_v63  ;;  %vm3438_vm15 = vmor %vm3436_vm10, %vm3437_vm14  ;;  %v7831_v15 = vpop.eup %7830  ;;  %vm3509_vm14 = vcmp.eq.f32.partialorder %v10821_v37, inf  ;;  %vm3511_vm10 = vcmp.eq.f32.partialorder %v10821_v37, 0.0 }
0x1831   :  { %v3433_v14 = vsub.f32 1.0, %v3432_v45 }
0x1832   :  { %v3394_v40 = vmul.f32 %v7827_v56, %v3393_v4  ;;  %v10831_v5 = vpop.permute.xlu0 %3707  ;;  %v3616_v4 = vld [vmem:[%s13800_s5 + $0x10] sm:$0xff] }
0x1833   :  { %v3434_v52 = vmul.f32 %v7829_v48, %v3433_v14  ;;  %v3736_v14 = vld [vmem:[%s13803_s8] sm:$0xff] }
0x1834   :  { %v3395_v11 = vadd.f32 %v7827_v56, %v3394_v40  ;;  %v10833_v60 = vpop.permute.xlu1 %3654  ;;  %v7641_v40 = vld [vmem:[%s13795_s0 + $0x28] sm:$0xff]  ;;  %s7968_s0 = smov [#allocation3]  }
0x1835   :  { %v3435_v53 = vadd.f32 %v7829_v48, %v3434_v52  ;;  %v10893_v52 = vpop.xlane.xlu2 %3494 }
0x1836   :  { %v3399_v38 = vsel %vm3398_vm12, %v7827_v56, %v3395_v11  ;;  %7836 = vrsqrt.f32 %v10893_v52  ;;  %v7833_v11 = vpop.eup %7832  ;;  %vm3545_vm8 = vcmp.eq.f32.partialorder %v10893_v52, inf  ;;  %vm3535_vm12 = vcmp.eq.f32.partialorder %v10801_v2, 0.0 }
0x1837   :  { %v3404_v30 = vsel %vm3401_vm11, %v3403_v43, %v3399_v38  ;;  %v3439_v29 = vsel %vm3438_vm15, %v7829_v48, %v3435_v53  ;;  %7838 = vrsqrt.f32 %v10825_v10  ;;  %v7835_v43 = vpop.eup %7834  ;;  %v3515_v53 = vmul.f32 %v7831_v15, %v3489_v35 }
0x1838   :  { %v3405_v47 = vmul.f32 %v3404_v30, %v3380_v18  ;;  %v3444_v27 = vsel %vm3441_vm9, %v3443_v16, %v3439_v29  ;;  %v3503_v38 = vmul.f32 %v7833_v11, %v10821_v37  ;;  %v3527_v16 = vmul.f32 %v7835_v43, %v10801_v2 }
0x1839   :  { %v3445_v0 = vmul.f32 %v3444_v27, %v3420_v19  ;;  %v3516_v19 = vmul.f32 %v7831_v15, %v3515_v53  ;;  %vm3523_vm9 = vcmp.eq.f32.partialorder %v3489_v35, 0.0  ;;  %vm3557_vm11 = vcmp.eq.f32.partialorder %v10825_v10, inf }
0x183a   :  { %v7634_v39 = vclamps-f32 %v3405_v47, 1.0  ;;  %v10837_v42 = vpop.permute.xlu0 %3820  ;;  %v3504_v47 = vmul.f32 %v7833_v11, %v3503_v38  ;;  %vm3547_vm15 = vcmp.eq.f32.partialorder %v10893_v52, 0.0 }
0x183b   :  { %v7635_v59 = vclamps-f32 %v3445_v0, 1.0  ;;  %3836 = vst.msk [vmem:[#allocation2 + $0x30] sm:$0xff] %vm64_vm0, %v10837_v42  ;;  %v3528_v0 = vmul.f32 %v7835_v43, %v3527_v16 }
0x183c   :  { %v3458_v13 = vadd.f32 1.0, %v7634_v39  ;;  %v10842_v26 = vpop.permute.xlu1 %3687  ;;  %v7837_v18 = vpop.eup %7836  ;;  %v3517_v39 = vmul.f32 0.5, %v3516_v19 }
0x183d   :  { %v3459_v34 = vadd.f32 1.0, %v7635_v59  ;;  %v7839_v30 = vpop.eup %7838  ;;  %v3539_v29 = vmul.f32 %v7837_v18, %v10893_v52 }
0x183e   :  { %v10845_v36 = vmul.f32 %v3458_v13, %v2954_v54  ;;  %v3551_v27 = vmul.f32 %v7839_v30, %v10825_v10  ;;  %v3505_v54 = vmul.f32 0.5, %v3504_v47 }
0x183f   :  { %v10847_v8 = vmul.f32 %v3459_v34, %v2955_v57  ;;  %v3540_v59 = vmul.f32 %v7837_v18, %v3539_v29  ;;  %v3529_v57 = vmul.f32 0.5, %v3528_v0  ;;  %v3518_v34 = vsub.f32 1.5, %v3517_v39 }
0x1840   :  { %v3482_v41 = vmul.f32 %v10845_v36, %v10845_v36  ;;  %v3552_v13 = vmul.f32 %v7839_v30, %v3551_v27  ;;  %v7967_v27 = vmov 48.0  }
0x1841   :  { %v3483_v9 = vmul.f32 %v10847_v8, %v10847_v8 }
0x1842   :  { %v3827_v44 = vpop.permute.xlu0 %3826  ;;  %v10856_v61 = vld [vmem:[#allocation2 + $0x30] sm:$0xff] }
0x1843   :  { %3841 = vst.msk [vmem:[#allocation2 + $0x58] sm:$0xff] %vm55_vm1, %v3827_v44  ;;  %v3499_v17 = vadd.f32 %v3483_v9, %v3482_v41  ;;  %v3541_v41 = vmul.f32 0.5, %v3540_v59  ;;  %v3506_v9 = vsub.f32 1.5, %v3505_v54  ;;  %v3536_v59 = vand.u32 2147483648, %v10801_v2 }
0x1844   :  { %v10854_v56 = vpop.permute.xlu1 %3702  ;;  %v3512_v54 = vand.u32 2147483648, %v10821_v37 }
0x1845   :  { %3500 = vadd.xlane.f32.xlu2 %v3499_v17  ;;  %v3530_v17 = vsub.f32 1.5, %v3529_v57 }
0x184a   :  { %v10858_v58 = vpop.permute.xlu0 %3868 }
0x184b   :  { %v3876_v48 = vmul.f32 %v10858_v58, %v10856_v61 }
0x184c   :  { %v10862_v63 = vpop.permute.xlu1 %3745 }
0x184d   :  { %3888 = vrot.lane.b32.xlu1 %v3876_v48, %s7951_s24  ;;  %v3542_v48 = vsub.f32 1.5, %v3541_v41 }
0x1854   :  { %v3825_v22 = vpop.permute.xlu1 %3824 }
0x1855   :  { %v10866_v45 = vsel %vm55_vm1, %v3825_v22, %v3827_v44  ;;  %3839 = vst.msk [vmem:[#allocation2 + $0x48] sm:$0xff] %vm64_vm0, %v3825_v22  ;;  %v3553_v44 = vmul.f32 0.5, %v3552_v13  ;;  %vm3521_vm0 = vcmp.eq.f32.partialorder %v3489_v35, inf }
0x1856   :  { %3840 = vst [vmem:[#allocation2 + $0x50] sm:$0xff] %v10866_v45 }
0x185d   :  { %3644 = vperm.xlu2 %7797, %v3616_v4   ;;  %v3519_v4 = vmul.f32 %v7831_v15, %v3518_v34  ;;  %v3548_v34 = vand.u32 2147483648, %v10893_v52 }
0x1865   :  { %3682 = vperm.xlu2 %7797, %v3674_v51   ;;  %v3554_v51 = vsub.f32 1.5, %v3553_v44 }
0x186d   :  { %3697 = vperm.xlu2 %7797, %v3677_v20   ;;  %v3531_v20 = vmul.f32 %v7835_v43, %v3530_v17  ;;  %v3524_v43 = vand.u32 2147483648, %v3489_v35 }
0x186f   :  { %v3532_v53 = vmul.f32 %v3531_v20, %v10801_v2 }
0x1875   :  { %3740 = vperm.xlu2 %7797, %v3736_v14   ;;  %v3507_v14 = vmul.f32 %v7833_v11, %v3506_v9 }
0x1877   :  { %v3508_v38 = vmul.f32 %v3507_v14, %v10821_v37 }
0x1879   :  { %v3510_v0 = vsel %vm3509_vm14, %v10821_v37, %v3508_v38  ;;  %v3560_v37 = vand.u32 2147483648, %v10825_v10 }
0x187a   :  { %v10923_v41 = vsel %vm3511_vm10, %v3512_v54, %v3510_v0 }
0x187d   :  { %3822 = vrot.lane.b32.xlu2 %v7641_v40, %s7949_s15  ;;  %v3520_v40 = vmul.f32 %v3519_v4, %v3489_v35  ;;  %s7496_s15 = sshll.u32 %s7968_s0, 4  ;;  %s7497_s15 = int_to_ptr.vmem [resolvable:$true] %s7496_s15 }
0x187f   :  { %v3522_v29 = vsel %vm3521_vm0, %v3489_v35, %v3520_v40  ;;  %vm3559_vm0 = vcmp.eq.f32.partialorder %v10825_v10, 0.0 }
0x1880   :  { %v10912_v39 = vsel %vm3523_vm9, %v3524_v43, %v3522_v29 }
0x1885   :  { %3852 = vperm.xlu2 %7797, %v3848_v46   ;;  %v3543_v46 = vmul.f32 %v7837_v18, %v3542_v48 }
0x1887   :  { %v3544_v47 = vmul.f32 %v3543_v46, %v10893_v52 }
0x1889   :  { %v3546_v13 = vsel %vm3545_vm8, %v10893_v52, %v3544_v47 }
0x188a   :  { %v10930_v48 = vsel %vm3547_vm15, %v3548_v34, %v3546_v13  ;;  %vm14544_vm15 = vcmask 48128  }
0x188d   :  { %3873 = vperm.xlu2 %7797, %v7645_v7   ;;  %v3555_v7 = vmul.f32 %v7839_v30, %v3554_v51  ;;  %v3534_v30 = vsel %vm3533_vm13, %v10801_v2, %v3532_v53  ;;  %v3574_v2 = vadd.f32 %v10912_v39, %v10923_v41 }
0x188e   :  { %v10920_v57 = vsel %vm3535_vm12, %v3536_v59, %v3534_v30 }
0x188f   :  { %v3556_v11 = vmul.f32 %v3555_v7, %v10825_v10  ;;  %v3575_v51 = vadd.f32 %v3574_v2, %v10920_v57 }
0x1891   :  { %v3558_v17 = vsel %vm3557_vm11, %v10825_v10, %v3556_v11  ;;  %v3576_v52 = vadd.f32 %v3575_v51, %v10930_v48  ;;  %vm14543_vm11 = vcmask 39936  }
0x1892   :  { %v3561_v40 = vsel %vm3559_vm0, %v3560_v37, %v3558_v17  ;;  %vm14570_vm0 = vcmask 23552  }
0x1893   :  { %v3577_v38 = vadd.f32 %v3576_v52, %v3561_v40 }
0x18b8   :  { %v3501_v22 = vpop.xlane.xlu2 %3500 }
0x18b9   :  { %7840 = vrsqrt.f32 %v3501_v22  ;;  %vm3569_vm9 = vcmp.eq.f32.partialorder %v3501_v22, inf  ;;  %v3572_v7 = vand.u32 2147483648, %v3501_v22  ;;  %vm3571_vm13 = vcmp.eq.f32.partialorder %v3501_v22, 0.0 }
0x18ba   :  { %7842 = vrcp.f32 %v7967_v27 }
0x18bf   :  { %v7841_v16 = vpop.eup %7840 }
0x18c0   :  { %v3563_v19 = vmul.f32 %v7841_v16, %v3501_v22  ;;  %v10905_v15 = vpop.permute.xlu2 %3644  ;;  %v7843_v9 = vpop.eup %7842 }
0x18c1   :  { %v3586_v14 = vmul.f32 48.0, %v7843_v9  ;;  %vm3590_vm14 = vweird.f32 %v7843_v9 }
0x18c2   :  { %v3564_v18 = vmul.f32 %v7841_v16, %v3563_v19 }
0x18c3   :  { %v3587_v29 = vsub.f32 1.0, %v3586_v14 }
0x18c4   :  { %v3565_v35 = vmul.f32 0.5, %v3564_v18 }
0x18c5   :  { %v3588_v10 = vmul.f32 %v7843_v9, %v3587_v29  ;;  %v10961_v29 = vld [vmem:[#allocation2 + $0x58] sm:$0xff] }
0x18c6   :  { %v3566_v44 = vsub.f32 1.5, %v3565_v35 }
0x18c7   :  { %v3589_v18 = vadd.f32 %v7843_v9, %v3588_v10 }
0x18c8   :  { %v3567_v4 = vmul.f32 %v7841_v16, %v3566_v44  ;;  %v10935_v20 = vpop.permute.xlu2 %3682 }
0x18c9   :  { %v10942_v54 = vsel %vm3590_vm14, %v7843_v9, %v3589_v18  ;;  %vm14627_vm14 = vcmask 1014784  }
0x18ca   :  { %v3568_v46 = vmul.f32 %v3567_v4, %v3501_v22  ;;  %14367 = vst [vmem:[#allocation44_spill] sm:$0xff] %v10942_v54 }
0x18cc   :  { %v3570_v53 = vsel %vm3569_vm9, %v3501_v22, %v3568_v46  ;;  %vm14604_vm9 = vcmask 31744  }
0x18cd   :  { %v3573_v19 = vsel %vm3571_vm13, %v3572_v7, %v3570_v53  ;;  %vm14624_vm13 = vcmask 7168  }
0x18ce   :  { %v3578_v47 = vadd.f32 %v3577_v38, %v3573_v19 }
0x18d0   :  { %v3579_v16 = vrot.slane %v3578_v47, 4  ;;  %v10938_v27 = vpop.permute.xlu2 %3697 }
0x18d2   :  { %v3580_v43 = vadd.f32 %v3579_v16, %v3578_v47  ;;  %v10963_v47 = vld [vmem:[#allocation2 + $0x48] sm:$0xff] }
0x18d4   :  { %v3581_v11 = vrot.slane %v3580_v43, 2 }
0x18d6   :  { %v3582_v30 = vadd.f32 %v3581_v11, %v3580_v43 }
0x18d8   :  { %v3583_v0 = vrot.slane %v3582_v30, 1  ;;  %v10940_v59 = vpop.permute.xlu2 %3740 }
0x18da   :  { %v3584_v35 = vadd.f32 %v3583_v0, %v3582_v30 }
0x18dc   :  { %v3592_v22 = vmul.f32 %v10942_v54, %v3584_v35 }
0x18de   :  { %v3593_v13 = vadd.f32 1e-06, %v3592_v22 }
0x18e0   :  { %7844 = vrcp.f32 %v3593_v13  ;;  %v3823_v34 = vpop.permute.xlu2 %3822  ;;  %v3605_v14 = vand.u32 2147483648, %v3593_v13  ;;  %v3603_v52 = vand.u32 2147483647, %v3593_v13  ;;  %vm3599_vm8 = vweird.f32 %v3593_v13 }
0x18e1   :  { %v10947_v44 = vsel %vm55_vm1, %v10837_v42, %v3823_v34  ;;  %3838 = vst.msk [vmem:[#allocation2 + $0x40] sm:$0xff] %vm55_vm1, %v3823_v34 }
0x18e2   :  { %3837 = vst [vmem:[#allocation2 + $0x38] sm:$0xff] %v10947_v44  ;;  %v3877_v17 = vmul.f32 %v10858_v58, %v10947_v44  ;;  %v3606_v53 = vor.u32 1.1754944e-38, %v3605_v14  ;;  %vm3604_vm10 = vcmp.eq.f32.partialorder %v3603_v52, 8.507059e+37 }
0x18e4   :  { %3890 = vrot.lane.b32.xlu0 %v3877_v17, %s7951_s24 }
0x18e6   :  { %v7845_v9 = vpop.eup %7844 }
0x18e7   :  { %v3595_v2 = vmul.f32 %v7845_v9, %v3593_v13  ;;  %vm3600_vm1 = vweird.f32 %v7845_v9 }
0x18e8   :  { %v10954_v37 = vld [vmem:[#allocation2 + $0x40] sm:$0xff]  ;;  %v10956_v4 = vpop.permute.xlu2 %3852  ;;  %vm3601_vm12 = vmor %vm3599_vm8, %vm3600_vm1 }
0x18e9   :  { %14368 = vst [vmem:[#allocation47_spill] sm:$0xff] %v10956_v4  ;;  %v3596_v51 = vsub.f32 1.0, %v3595_v2  ;;  %v3878_v42 = vmul.f32 %v10858_v58, %v10954_v37  ;;  %vm14636_vm1 = vmmov %vm14627_vm14 }
0x18ea   :  { %vm14644_vm8 = vmmov %vm14636_vm1 }
0x18eb   :  { %v3597_v46 = vmul.f32 %v7845_v9, %v3596_v51  ;;  %3892 = vrot.lane.b32.xlu2 %v3878_v42, %s7951_s24 }
0x18ed   :  { %v3598_v7 = vadd.f32 %v7845_v9, %v3597_v46 }
0x18ef   :  { %v3602_v38 = vsel %vm3601_vm12, %v7845_v9, %v3598_v7  ;;  %vm14651_vm12 = vmmov %vm14636_vm1 }
0x18f0   :  { %v3607_v16 = vsel %vm3604_vm10, %v3606_v53, %v3602_v38  ;;  %v3874_v10 = vpop.permute.xlu2 %3873  ;;  %vm14673_vm10 = vcmask 15360  }
0x18f1   :  { %v3610_v58 = vmul.f32 %v3607_v16, %v10920_v57  ;;  %v3879_v43 = vmul.f32 %v3874_v10, %v10963_v47  ;;  %v3880_v11 = vmul.f32 %v3874_v10, %v10866_v45  ;;  %v3881_v18 = vmul.f32 %v3874_v10, %v10961_v29 }
0x18f2   :  { %v3613_v30 = vmul.f32 %v3607_v16, %v3573_v19  ;;  %v3612_v0 = vmul.f32 %v3607_v16, %v3561_v40  ;;  %v3611_v35 = vmul.f32 %v3607_v16, %v10930_v48  ;;  %v3609_v2 = vmul.f32 %v3607_v16, %v10912_v39 }
0x18f3   :  { %v3624_v22 = vmul.f32 %v3610_v58, %v10693_v25  ;;  %v3625_v13 = vmul.f32 %v3610_v58, %v10698_v31  ;;  %3898 = vrot.lane.b32.xlu2 %v3881_v18, %s7951_s24  ;;  %3894 = vrot.lane.b32.xlu1 %v3879_v43, %s7951_s24  ;;  %v3608_v38 = vmul.f32 %v3607_v16, %v10923_v41  ;;  %v7647_v41 = vld [vmem:[%s13796_s1 + $0xe8] sm:$0xff] }
0x18f4   :  { %3896 = vrot.lane.b32.xlu0 %v3880_v11, %s7951_s24  ;;  %v3630_v57 = vmul.f32 %v3613_v30, %v10845_v36  ;;  %v3631_v34 = vmul.f32 %v3613_v30, %v10847_v8  ;;  %v3628_v17 = vmul.f32 %v3612_v0, %v10744_v33  ;;  %v3629_v40 = vmul.f32 %v3612_v0, %v10747_v12 }
0x18f5   :  { %v3666_v48 = vmul.f32 %v10905_v15, %v3624_v22  ;;  %v3626_v19 = vmul.f32 %v3611_v35, %v10730_v1  ;;  %v3627_v9 = vmul.f32 %v3611_v35, %v10733_v50  ;;  %v3667_v52 = vmul.f32 %v10905_v15, %v3625_v13 }
0x18f6   :  { %v3672_v51 = vmul.f32 %v10823_v28, %v3630_v57  ;;  %v3673_v42 = vmul.f32 %v10823_v28, %v3631_v34  ;;  %v3670_v14 = vmul.f32 %v10833_v60, %v3628_v17  ;;  %v3671_v46 = vmul.f32 %v10833_v60, %v3629_v40  ;;  %v7646_v28 = vld [vmem:[%s13796_s1 + $0xe0] sm:$0xff] }
0x18f7   :  { %v3668_v7 = vmul.f32 %v10819_v3, %v3626_v19  ;;  %v3669_v53 = vmul.f32 %v10819_v3, %v3627_v9  ;;  %v3714_v16 = vadd.f32 %v10827_v49, %v3666_v48  ;;  %v3715_v18 = vadd.f32 %v10827_v49, %v3667_v52  ;;  %v7649_v52 = vld [vmem:[%s13796_s1 + $0x158] sm:$0xff] }
0x18f8   :  { %v3720_v10 = vadd.f32 %v10831_v5, %v3672_v51  ;;  %v3721_v39 = vadd.f32 %v10831_v5, %v3673_v42  ;;  %v3718_v58 = vadd.f32 %v10854_v56, %v3670_v14  ;;  %v3719_v60 = vadd.f32 %v10854_v56, %v3671_v46 }
0x18f9   :  { %v3716_v15 = vadd.f32 %v10938_v27, %v3668_v7  ;;  %v3717_v5 = vadd.f32 %v10938_v27, %v3669_v53  ;;  %v3622_v56 = vmul.f32 %v3609_v2, %v10632_v55  ;;  %v3623_v30 = vmul.f32 %v3609_v2, %v10646_v62  ;;  %v7648_v7 = vld [vmem:[%s13796_s1 + $0x150] sm:$0xff] }
0x18fa   :  { %v3732_v43 = vadd.f32 %v3720_v10, %v10845_v36  ;;  %v3733_v3 = vadd.f32 %v3721_v39, %v10847_v8  ;;  %v3730_v11 = vadd.f32 %v3718_v58, %v10744_v33  ;;  %v3731_v36 = vadd.f32 %v3719_v60, %v10747_v12 }
0x18fb   :  { %3916 = vperm.xlu1 %7799, %v7646_v28   ;;  %v3620_v8 = vmul.f32 %v3608_v38, %v10540_v32  ;;  %v3621_v0 = vmul.f32 %v3608_v38, %v10592_v24  ;;  %v3728_v27 = vadd.f32 %v3716_v15, %v10730_v1  ;;  %v3664_v35 = vmul.f32 %v10829_v23, %v3622_v56 }
0x18fc   :  { %3764 = vmatpush.msra.mxu2 %v3732_v43  ;;  %3787 = vmatpush.msra.mxu3 %v3733_v3  ;;  %v3665_v33 = vmul.f32 %v10829_v23, %v3623_v30  ;;  %v3729_v49 = vadd.f32 %v3717_v5, %v10733_v50  ;;  %v3726_v12 = vadd.f32 %v3714_v16, %v10693_v25 }
0x18fd   :  { %3921 = vperm.xlu0 %7798, %v7647_v41   ;;  %v3662_v22 = vmul.f32 %v10817_v21, %v3620_v8  ;;  %v3663_v13 = vmul.f32 %v10817_v21, %v3621_v0  ;;  %v3712_v57 = vadd.f32 %v10842_v26, %v3664_v35  ;;  %v3727_v1 = vadd.f32 %v3715_v18, %v10698_v31  ;;  %v3734_v31 = vld [vmem:[%s13802_s7] sm:$0xff] }
0x18fe   :  { %3765 = vmatpush.msra.mxu2 %v3730_v11  ;;  %3788 = vmatpush.msra.mxu3 %v3731_v36  ;;  %v3713_v34 = vadd.f32 %v10842_v26, %v3665_v33  ;;  %v7650_v35 = vld [vmem:[%s13796_s1 + $0x1c0] sm:$0xff] }
0x18ff   :  { %v3710_v23 = vadd.f32 %v10935_v20, %v3662_v22  ;;  %v3711_v17 = vadd.f32 %v10935_v20, %v3663_v13  ;;  %v3724_v50 = vadd.f32 %v3712_v57, %v10632_v55  ;;  %v3735_v55 = vld [vmem:[%s13802_s7 + $0x8] sm:$0xff] }
0x1900   :  { %3766 = vmatpush.msra.mxu2 %v3728_v27  ;;  %3789 = vmatpush.msra.mxu3 %v3729_v49  ;;  %v3725_v21 = vadd.f32 %v3713_v34, %v10646_v62  ;;  %v7651_v27 = vld [vmem:[%s13796_s1 + $0x1c8] sm:$0xff] }
0x1901   :  { %v3722_v25 = vadd.f32 %v3710_v23, %v10540_v32  ;;  %v3723_v26 = vadd.f32 %v3711_v17, %v10592_v24  ;;  %v11039_v32 = vpop.permute.xlu1 %3857 }
0x1902   :  { %3767 = vmatpush.msra.mxu2 %v3726_v12  ;;  %3790 = vmatpush.msra.mxu3 %v3727_v1  ;;  %14369 = vst [vmem:[#allocation46_spill] sm:$0xff] %v11039_v32 }
0x1904   :  { %3768 = vmatpush.msra.mxu2 %v3724_v50  ;;  %3791 = vmatpush.msra.mxu3 %v3725_v21 }
0x1906   :  { %3769 = vmatpush.msra.mxu2 %v3722_v25  ;;  %3792 = vmatpush.msra.mxu3 %v3723_v26 }
0x1907   :  { %7636 = vmatmul.msk.f32.vlgmr.msra.gmra.mxu2 %vm330_vm5, %v3734_v31  ;;  %7638 = vmatmul.msk.f32.vlgmr.msra.gmra.mxu3 %vm330_vm5, %v3734_v31  ;;  %v7653_v31 = vld [vmem:[%s13796_s1 + $0x238] sm:$0xff] }
0x1909   :  { %v11041_v24 = vpop.permute.xlu1 %3888 }
0x190a   :  { %14370 = vst [vmem:[#allocation48_spill] sm:$0xff] %v11041_v24 }
0x190f   :  { %7637 = vmatmul.msk.f32.gmra.mxu2 %vm330_vm5, %v3735_v55  ;;  %7639 = vmatmul.msk.f32.gmra.mxu3 %vm330_vm5, %v3735_v55  ;;  %v7652_v55 = vld [vmem:[%s13796_s1 + $0x230] sm:$0xff] }
0x1945   :  { %v11071_v43 = vpop.permute.xlu2 %3892 }
0x1946   :  { %14374 = vst [vmem:[#allocation53_spill] sm:$0xff] %v11071_v43 }
0x194d   :  { %v11073_v3 = vpop.permute.xlu2 %3898 }
0x194e   :  { %14375 = vst [vmem:[#allocation51_spill] sm:$0xff] %v11073_v3 }
0x1956   :  { %v11043_v62 = vpop.permute.xlu0 %3890 }
0x1957   :  { %14371 = vst [vmem:[#allocation52_spill] sm:$0xff] %v11043_v62 }
0x1965   :  { %v11045_v20 = vpop.permute.xlu1 %3894 }
0x1966   :  { %14372 = vst [vmem:[#allocation50_spill] sm:$0xff] %v11045_v20  ;;  %v11047_v40 = vpop.permute.xlu0 %3896 }
0x1967   :  { %14373 = vst [vmem:[#allocation49_spill] sm:$0xff] %v11047_v40 }
0x196d   :  { %v3917_v48 = vpop.permute.xlu1 %3916 }
0x196e   :  { %v3924_v19 = vmul.f32 %v3917_v48, %v10856_v61  ;;  %v3925_v9 = vmul.f32 %v3917_v48, %v10947_v44  ;;  %v3926_v2 = vmul.f32 %v3917_v48, %v10954_v37 }
0x196f   :  { %v3922_v51 = vpop.permute.xlu0 %3921 }
0x1970   :  { %3940 = vrot.lane.b32.xlu0 %v3926_v2, %s7953_s26  ;;  %3938 = vrot.lane.b32.xlu1 %v3925_v9, %s7953_s26  ;;  %v3928_v42 = vmul.f32 %v3922_v51, %v10866_v45  ;;  %v3929_v14 = vmul.f32 %v3922_v51, %v10961_v29  ;;  %v3927_v46 = vmul.f32 %v3922_v51, %v10963_v47 }
0x1971   :  { %3936 = vrot.lane.b32.xlu2 %v3924_v19, %s7953_s26 }
0x1978   :  { %3946 = vrot.lane.b32.xlu0 %v3929_v14, %s7953_s26  ;;  %3944 = vrot.lane.b32.xlu1 %v3928_v42, %s7953_s26 }
0x1979   :  { %3942 = vrot.lane.b32.xlu2 %v3927_v46, %s7953_s26 }
0x1980   :  { %3969 = vperm.xlu1 %7799, %v7649_v52  }
0x1981   :  { %3964 = vperm.xlu2 %7797, %v7648_v7  }
0x198a   :  { %v3771_v53 = vpop.f32.mrf.mxu2  ;;  %v3794_v38 = vpop.f32.mrf.mxu3 }
0x198b   :  { %v3772_v10 = vadd.f32 %v3771_v53, %v10940_v59  ;;  %v3795_v39 = vadd.f32 %v3794_v38, %v10940_v59 }
0x198d   :  { %3800 = vst [vmem:[#allocation3] sm:$0xff] %v3772_v10 }
0x198e   :  { %3801 = vst [vmem:[#allocation3 + $0x8] sm:$0xff] %v3795_v39 }
0x1992   :  { %v3774_v28 = vpop.f32.mrf.mxu2  ;;  %v3797_v58 = vpop.f32.mrf.mxu3 }
0x1993   :  { %v3775_v60 = vadd.f32 %v3774_v28, %v10862_v63  ;;  %v3798_v15 = vadd.f32 %v3797_v58, %v10862_v63  ;;  %v7655_v28 = vld [vmem:[%s13796_s1 + $0x2a8] sm:$0xff]  ;;  %v7654_v58 = vld [vmem:[%s13796_s1 + $0x2a0] sm:$0xff] }
0x1995   :  { %3802 = vst [vmem:[#allocation3 + $0x10] sm:$0xff] %v3775_v60 }
0x1996   :  { %3803 = vst [vmem:[#allocation3 + $0x18] sm:$0xff] %v3798_v15 }
0x19cb   :  { %v11075_v41 = vpop.permute.xlu2 %3936 }
0x19cc   :  { %14376 = vst [vmem:[#allocation57_spill] sm:$0xff] %v11075_v41 }
0x19d3   :  { %v11077_v5 = vpop.permute.xlu2 %3942 }
0x19d4   :  { %14377 = vst [vmem:[#allocation56_spill] sm:$0xff] %v11077_v5 }
0x19db   :  { %v3965_v16 = vpop.permute.xlu2 %3964 }
0x19dc   :  { %v3972_v59 = vmul.f32 %v3965_v16, %v10856_v61  ;;  %v3973_v11 = vmul.f32 %v3965_v16, %v10947_v44  ;;  %v3974_v18 = vmul.f32 %v3965_v16, %v10954_v37 }
0x19de   :  { %3988 = vrot.lane.b32.xlu1 %v3974_v18, %s7952_s25  ;;  %3986 = vrot.lane.b32.xlu2 %v3973_v11, %s7952_s25 }
0x19df   :  { %3984 = vrot.lane.b32.xlu0 %v3972_v59, %s7952_s25 }
0x19e2   :  { %v11085_v63 = vpop.permute.xlu1 %3938  ;;  %v11101_v33 = vpop.permute.xlu0 %3940 }
0x19e3   :  { %14378 = vst [vmem:[#allocation61_spill] sm:$0xff] %v11085_v63 }
0x19e4   :  { %14380 = vst [vmem:[#allocation159_spill] sm:$0xff] %v11101_v33 }
0x19ea   :  { %v11087_v56 = vpop.permute.xlu1 %3944  ;;  %v11103_v49 = vpop.permute.xlu0 %3946 }
0x19eb   :  { %14379 = vst [vmem:[#allocation68_spill] sm:$0xff] %v11087_v56 }
0x19ec   :  { %14381 = vst [vmem:[#allocation162_spill] sm:$0xff] %v11103_v49 }
0x19f2   :  { %v3970_v30 = vpop.permute.xlu1 %3969 }
0x19f3   :  { %v3975_v36 = vmul.f32 %v3970_v30, %v10963_v47  ;;  %v3976_v8 = vmul.f32 %v3970_v30, %v10866_v45  ;;  %v3977_v0 = vmul.f32 %v3970_v30, %v10961_v29 }
0x19f5   :  { %3994 = vrot.lane.b32.xlu1 %v3977_v0, %s7952_s25  ;;  %3992 = vrot.lane.b32.xlu2 %v3976_v8, %s7952_s25 }
0x19f6   :  { %3990 = vrot.lane.b32.xlu0 %v3975_v36, %s7952_s25 }
0x19fd   :  { %4017 = vperm.xlu2 %7797, %v7651_v27  }
0x19fe   :  { %4012 = vperm.xlu0 %7798, %v7650_v35  }
0x1a38   :  { %v11107_v13 = vpop.permute.xlu2 %3986 }
0x1a39   :  { %14383 = vst [vmem:[#allocation70_spill] sm:$0xff] %v11107_v13 }
0x1a4f   :  { %v11111_v57 = vpop.permute.xlu2 %3992 }
0x1a50   :  { %14385 = vst [vmem:[#allocation58_spill] sm:$0xff] %v11111_v57  ;;  %v11131_v48 = vpop.permute.xlu1 %3988 }
0x1a51   :  { %v11105_v22 = vpop.permute.xlu0 %3984  ;;  %14386 = vst [vmem:[#allocation113_spill] sm:$0xff] %v11131_v48 }
0x1a52   :  { %14382 = vst [vmem:[#allocation54_spill] sm:$0xff] %v11105_v22 }
0x1a57   :  { %v4018_v50 = vpop.permute.xlu2 %4017 }
0x1a58   :  { %v4024_v21 = vmul.f32 %v4018_v50, %v10866_v45  ;;  %v4025_v25 = vmul.f32 %v4018_v50, %v10961_v29  ;;  %v4023_v26 = vmul.f32 %v4018_v50, %v10963_v47  ;;  %v7656_v50 = vld [vmem:[%s13796_s1 + $0x10] sm:$0xff] }
0x1a67   :  { %v11133_v19 = vpop.permute.xlu1 %3994 }
0x1a68   :  { %v11109_v12 = vpop.permute.xlu0 %3990  ;;  %14387 = vst [vmem:[#allocation112_spill] sm:$0xff] %v11133_v19 }
0x1a69   :  { %14384 = vst [vmem:[#allocation59_spill] sm:$0xff] %v11109_v12 }
0x1a70   :  { %v4013_v34 = vpop.permute.xlu0 %4012 }
0x1a71   :  { %v4020_v1 = vmul.f32 %v4013_v34, %v10856_v61  ;;  %v4021_v23 = vmul.f32 %v4013_v34, %v10947_v44  ;;  %v4022_v17 = vmul.f32 %v4013_v34, %v10954_v37 }
0x1a73   :  { %4036 = vrot.lane.b32.xlu2 %v4022_v17, %s7954_s27  ;;  %4034 = vrot.lane.b32.xlu0 %v4021_v23, %s7954_s27  ;;  %v7658_v23 = vld [vmem:[%s13796_s1 + $0x80] sm:$0xff]  ;;  %v7657_v17 = vld [vmem:[%s13796_s1 + $0x18] sm:$0xff] }
0x1a74   :  { %4032 = vrot.lane.b32.xlu1 %v4020_v1, %s7954_s27 }
0x1a7b   :  { %4042 = vrot.lane.b32.xlu2 %v4025_v25, %s7954_s27  ;;  %4040 = vrot.lane.b32.xlu0 %v4024_v21, %s7954_s27  ;;  %v7659_v21 = vld [vmem:[%s13796_s1 + $0x88] sm:$0xff] }
0x1a7c   :  { %4038 = vrot.lane.b32.xlu1 %v4023_v26, %s7954_s27 }
0x1a83   :  { %4065 = vperm.xlu0 %7798, %v7653_v31  }
0x1a84   :  { %4060 = vperm.xlu1 %7799, %v7652_v55  }
0x1acd   :  { %v11161_v60 = vpop.permute.xlu2 %4036 }
0x1ace   :  { %14392 = vst [vmem:[#allocation69_spill] sm:$0xff] %v11161_v60 }
0x1ad5   :  { %v11163_v15 = vpop.permute.xlu2 %4042 }
0x1ad6   :  { %14393 = vst [vmem:[#allocation119_spill] sm:$0xff] %v11163_v15 }
0x1ae5   :  { %v11137_v2 = vpop.permute.xlu0 %4034 }
0x1ae6   :  { %v11135_v9 = vpop.permute.xlu1 %4032  ;;  %14389 = vst [vmem:[#allocation105_spill] sm:$0xff] %v11137_v2 }
0x1ae7   :  { %14388 = vst [vmem:[#allocation163_spill] sm:$0xff] %v11135_v9 }
0x1aed   :  { %v11141_v42 = vpop.permute.xlu0 %4040 }
0x1aee   :  { %v11139_v51 = vpop.permute.xlu1 %4038  ;;  %14391 = vst [vmem:[#allocation62_spill] sm:$0xff] %v11141_v42  ;;  %v11412_v42 = vld [vmem:[#allocation2 + $0x50] sm:$0xff] }
0x1aef   :  { %14390 = vst [vmem:[#allocation158_spill] sm:$0xff] %v11139_v51 }
0x1af5   :  { %v4066_v53 = vpop.permute.xlu0 %4065 }
0x1af6   :  { %v4061_v14 = vpop.permute.xlu1 %4060  ;;  %v4072_v38 = vmul.f32 %v4066_v53, %v10866_v45  ;;  %v4073_v10 = vmul.f32 %v4066_v53, %v10961_v29  ;;  %v4071_v39 = vmul.f32 %v4066_v53, %v10963_v47 }
0x1af7   :  { %v4068_v46 = vmul.f32 %v4061_v14, %v10856_v61  ;;  %v4069_v52 = vmul.f32 %v4061_v14, %v10947_v44  ;;  %v4070_v7 = vmul.f32 %v4061_v14, %v10954_v37 }
0x1af9   :  { %4084 = vrot.lane.b32.xlu0 %v4070_v7, %s7955_s28  ;;  %4082 = vrot.lane.b32.xlu1 %v4069_v52, %s7955_s28 }
0x1afa   :  { %4080 = vrot.lane.b32.xlu2 %v4068_v46, %s7955_s28 }
0x1b01   :  { %4090 = vrot.lane.b32.xlu0 %v4073_v10, %s7955_s28  ;;  %4088 = vrot.lane.b32.xlu1 %v4072_v38, %s7955_s28 }
0x1b02   :  { %4086 = vrot.lane.b32.xlu2 %v4071_v39, %s7955_s28 }
0x1b09   :  { %4113 = vperm.xlu1 %7799, %v7655_v28  }
0x1b0a   :  { %4108 = vperm.xlu2 %7797, %v7654_v58  }
0x1b54   :  { %v11165_v16 = vpop.permute.xlu2 %4080 }
0x1b55   :  { %14394 = vst [vmem:[#allocation118_spill] sm:$0xff] %v11165_v16 }
0x1b5c   :  { %v11167_v59 = vpop.permute.xlu2 %4086 }
0x1b5d   :  { %14395 = vst [vmem:[#allocation126_spill] sm:$0xff] %v11167_v59 }
0x1b64   :  { %v4109_v11 = vpop.permute.xlu2 %4108 }
0x1b65   :  { %v4116_v18 = vmul.f32 %v4109_v11, %v10856_v61  ;;  %v4117_v30 = vmul.f32 %v4109_v11, %v10947_v44  ;;  %v4118_v36 = vmul.f32 %v4109_v11, %v10954_v37 }
0x1b67   :  { %4132 = vrot.lane.b32.xlu1 %v4118_v36, %s7956_s10  ;;  %4130 = vrot.lane.b32.xlu2 %v4117_v30, %s7956_s10  ;;  %v7660_v30 = vld [vmem:[%s13796_s1 + $0xf0] sm:$0xff] }
0x1b68   :  { %4128 = vrot.lane.b32.xlu0 %v4116_v18, %s7956_s10  ;;  %v7661_v18 = vld [vmem:[%s13796_s1 + $0xf8] sm:$0xff] }
0x1b6b   :  { %v11175_v8 = vpop.permute.xlu1 %4082  ;;  %v11197_v25 = vpop.permute.xlu0 %4084 }
0x1b6c   :  { %14396 = vst [vmem:[#allocation124_spill] sm:$0xff] %v11175_v8  ;;  %v11404_v8 = vld [vmem:[#allocation2 + $0x30] sm:$0xff] }
0x1b6d   :  { %14398 = vst [vmem:[#allocation131_spill] sm:$0xff] %v11197_v25 }
0x1b73   :  { %v11177_v0 = vpop.permute.xlu1 %4088  ;;  %v11199_v26 = vpop.permute.xlu0 %4090 }
0x1b74   :  { %14397 = vst [vmem:[#allocation66_spill] sm:$0xff] %v11177_v0 }
0x1b75   :  { %14399 = vst [vmem:[#allocation130_spill] sm:$0xff] %v11199_v26 }
0x1b7b   :  { %v4114_v27 = vpop.permute.xlu1 %4113 }
0x1b7c   :  { %v4119_v35 = vmul.f32 %v4114_v27, %v10963_v47  ;;  %v4120_v34 = vmul.f32 %v4114_v27, %v10866_v45  ;;  %v4121_v1 = vmul.f32 %v4114_v27, %v10961_v29 }
0x1b7e   :  { %4138 = vrot.lane.b32.xlu1 %v4121_v1, %s7956_s10  ;;  %4136 = vrot.lane.b32.xlu2 %v4120_v34, %s7956_s10 }
0x1b7f   :  { %4134 = vrot.lane.b32.xlu0 %v4119_v35, %s7956_s10 }
0x1b86   :  { %4184 = vperm.xlu1 %7799, %v7658_v23   ;;  %4171 = vperm.xlu2 %7797, %v7657_v17  }
0x1b87   :  { %4166 = vperm.xlu0 %7798, %v7656_v50  }
0x1b8f   :  { %4189 = vperm.xlu0 %7798, %v7659_v21  }
0x1bc1   :  { %v11229_v36 = vpop.permute.xlu2 %4130 }
0x1bc2   :  { %14405 = vst [vmem:[#allocation137_spill] sm:$0xff] %v11229_v36 }
0x1bd8   :  { %v11231_v27 = vpop.permute.xlu2 %4136 }
0x1bd9   :  { %v11201_v31 = vpop.permute.xlu1 %4132  ;;  %14406 = vst [vmem:[#allocation136_spill] sm:$0xff] %v11231_v27 }
0x1bda   :  { %14400 = vst [vmem:[#allocation161_spill] sm:$0xff] %v11201_v31  ;;  %v11203_v55 = vpop.permute.xlu0 %4128 }
0x1bdb   :  { %14401 = vst [vmem:[#allocation160_spill] sm:$0xff] %v11203_v55 }
0x1be0   :  { %v11233_v35 = vpop.permute.xlu2 %4171 }
0x1be1   :  { %14407 = vst [vmem:[#allocation111_spill] sm:$0xff] %v11233_v35 }
0x1bf0   :  { %v11205_v14 = vpop.permute.xlu1 %4138 }
0x1bf1   :  { %14402 = vst [vmem:[#allocation60_spill] sm:$0xff] %v11205_v14  ;;  %v11207_v46 = vpop.permute.xlu0 %4134 }
0x1bf2   :  { %14403 = vst [vmem:[#allocation115_spill] sm:$0xff] %v11207_v46 }
0x1bf8   :  { %v4185_v52 = vpop.permute.xlu1 %4184 }
0x1bf9   :  { %v4192_v7 = vmul.f32 %v4185_v52, %v10856_v61  ;;  %v4193_v53 = vmul.f32 %v4185_v52, %v10947_v44  ;;  %v4194_v38 = vmul.f32 %v4185_v52, %v10954_v37  ;;  %v11212_v10 = vpop.permute.xlu0 %4166 }
0x1bfa   :  { %14404 = vst [vmem:[#allocation114_spill] sm:$0xff] %v11212_v10 }
0x1bfb   :  { %4206 = vrot.lane.b32.xlu1 %v4193_v53, %s7951_s24  ;;  %4204 = vrot.lane.b32.xlu2 %v4192_v7, %s7951_s24 }
0x1bfc   :  { %4208 = vrot.lane.b32.xlu0 %v4194_v38, %s7951_s24 }
0x1c01   :  { %v4190_v39 = vpop.permute.xlu0 %4189 }
0x1c02   :  { %v4195_v28 = vmul.f32 %v4190_v39, %v10963_v47  ;;  %v4196_v58 = vmul.f32 %v4190_v39, %v10866_v45  ;;  %v4197_v11 = vmul.f32 %v4190_v39, %v10961_v29 }
0x1c04   :  { %4214 = vrot.lane.b32.xlu0 %v4197_v11, %s7951_s24  ;;  %4212 = vrot.lane.b32.xlu1 %v4196_v58, %s7951_s24  ;;  %v7663_v58 = vld [vmem:[%s13796_s1 + $0x168] sm:$0xff]  ;;  %v7662_v11 = vld [vmem:[%s13796_s1 + $0x160] sm:$0xff] }
0x1c05   :  { %4210 = vrot.lane.b32.xlu2 %v4195_v28, %s7951_s24 }
0x1c0c   :  { %4241 = vperm.xlu1 %7799, %v7661_v18  }
0x1c0d   :  { %4236 = vperm.xlu2 %7797, %v7660_v30  }
0x1c55   :  { %v11235_v34 = vpop.permute.xlu2 %4204 }
0x1c56   :  { %14408 = vst [vmem:[#allocation64_spill] sm:$0xff] %v11235_v34 }
0x1c5f   :  { %v11237_v1 = vpop.permute.xlu2 %4210 }
0x1c60   :  { %14409 = vst [vmem:[#allocation121_spill] sm:$0xff] %v11237_v1 }
0x1c67   :  { %v4237_v23 = vpop.permute.xlu2 %4236 }
0x1c68   :  { %v4244_v17 = vmul.f32 %v4237_v23, %v10856_v61  ;;  %v4245_v50 = vmul.f32 %v4237_v23, %v10947_v44  ;;  %v4246_v21 = vmul.f32 %v4237_v23, %v10954_v37 }
0x1c6a   :  { %4260 = vrot.lane.b32.xlu1 %v4246_v21, %s7953_s26  ;;  %4258 = vrot.lane.b32.xlu2 %v4245_v50, %s7953_s26 }
0x1c6b   :  { %4256 = vrot.lane.b32.xlu0 %v4244_v17, %s7953_s26 }
0x1c6d   :  { %v11245_v52 = vpop.permute.xlu1 %4206 }
0x1c6e   :  { %14410 = vst [vmem:[#allocation120_spill] sm:$0xff] %v11245_v52  ;;  %v11261_v18 = vpop.permute.xlu0 %4208 }
0x1c6f   :  { %14412 = vst [vmem:[#allocation147_spill] sm:$0xff] %v11261_v18 }
0x1c76   :  { %v11247_v7 = vpop.permute.xlu1 %4212  ;;  %v11263_v30 = vpop.permute.xlu0 %4214 }
0x1c77   :  { %14411 = vst [vmem:[#allocation141_spill] sm:$0xff] %v11247_v7 }
0x1c78   :  { %14413 = vst [vmem:[#allocation55_spill] sm:$0xff] %v11263_v30 }
0x1c7e   :  { %v4242_v53 = vpop.permute.xlu1 %4241 }
0x1c7f   :  { %v4247_v38 = vmul.f32 %v4242_v53, %v10963_v47  ;;  %v4248_v39 = vmul.f32 %v4242_v53, %v10866_v45  ;;  %v4249_v28 = vmul.f32 %v4242_v53, %v10961_v29 }
0x1c81   :  { %4266 = vrot.lane.b32.xlu1 %v4249_v28, %s7953_s26  ;;  %4264 = vrot.lane.b32.xlu2 %v4248_v39, %s7953_s26 }
0x1c82   :  { %4262 = vrot.lane.b32.xlu0 %v4247_v38, %s7953_s26 }
0x1c89   :  { %4293 = vperm.xlu2 %7797, %v7663_v58  }
0x1c8a   :  { %4288 = vperm.xlu0 %7798, %v7662_v11  }
0x1cc4   :  { %v11267_v17 = vpop.permute.xlu2 %4258 }
0x1cc5   :  { %14415 = vst [vmem:[#allocation125_spill] sm:$0xff] %v11267_v17 }
0x1cdb   :  { %v11271_v21 = vpop.permute.xlu2 %4264 }
0x1cdc   :  { %14417 = vst [vmem:[#allocation67_spill] sm:$0xff] %v11271_v21 }
0x1cdd   :  { %v11265_v23 = vpop.permute.xlu0 %4256 }
0x1cde   :  { %14414 = vst [vmem:[#allocation127_spill] sm:$0xff] %v11265_v23 }
0x1ce3   :  { %v4294_v58 = vpop.permute.xlu2 %4293 }
0x1ce4   :  { %v4300_v11 = vmul.f32 %v4294_v58, %v10866_v45  ;;  %v4301_v54 = vmul.f32 %v4294_v58, %v10961_v29  ;;  %v4299_v6 = vmul.f32 %v4294_v58, %v10963_v47 }
0x1cf4   :  { %v11269_v50 = vpop.permute.xlu0 %4262 }
0x1cf5   :  { %14416 = vst [vmem:[#allocation156_spill] sm:$0xff] %v11269_v50 }
0x1cfc   :  { %v4289_v53 = vpop.permute.xlu0 %4288 }
0x1cfd   :  { %v4296_v38 = vmul.f32 %v4289_v53, %v10856_v61  ;;  %v4297_v39 = vmul.f32 %v4289_v53, %v10947_v44  ;;  %v4298_v28 = vmul.f32 %v4289_v53, %v10954_v37  ;;  %v7665_v53 = vld [vmem:[%s13796_s1 + $0x1d8] sm:$0xff] }
0x1cff   :  { %4312 = vrot.lane.b32.xlu2 %v4298_v28, %s7952_s25  ;;  %4310 = vrot.lane.b32.xlu0 %v4297_v39, %s7952_s25  ;;  %v11291_v39 = vpop.permute.xlu1 %4260 }
0x1d00   :  { %4308 = vrot.lane.b32.xlu1 %v4296_v38, %s7952_s25  ;;  %v7664_v38 = vld [vmem:[%s13796_s1 + $0x1d0] sm:$0xff]  ;;  %14418 = vst [vmem:[#allocation133_spill] sm:$0xff] %v11291_v39 }
0x1d07   :  { %4318 = vrot.lane.b32.xlu2 %v4301_v54, %s7952_s25  ;;  %4316 = vrot.lane.b32.xlu0 %v4300_v11, %s7952_s25  ;;  %v11293_v28 = vpop.permute.xlu1 %4266 }
0x1d08   :  { %4314 = vrot.lane.b32.xlu1 %v4299_v6, %s7952_s25  ;;  %14419 = vst [vmem:[#allocation132_spill] sm:$0xff] %v11293_v28 }
0x1d0f   :  { %4345 = vperm.xlu0 %7798, %v7665_v53  }
0x1d10   :  { %4340 = vperm.xlu1 %7799, %v7664_v38  }
0x1d71   :  { %v11297_v54 = vpop.permute.xlu0 %4310 }
0x1d72   :  { %v11295_v58 = vpop.permute.xlu1 %4308  ;;  %14421 = vst [vmem:[#allocation116_spill] sm:$0xff] %v11297_v54 }
0x1d73   :  { %14420 = vst [vmem:[#allocation63_spill] sm:$0xff] %v11295_v58 }
0x1d79   :  { %v11301_v6 = vpop.permute.xlu0 %4316 }
0x1d7a   :  { %v11299_v11 = vpop.permute.xlu1 %4314  ;;  %14423 = vst [vmem:[#allocation138_spill] sm:$0xff] %v11301_v6 }
0x1d7b   :  { %14422 = vst [vmem:[#allocation139_spill] sm:$0xff] %v11299_v11 }
0x1d81   :  { %v4346_v38 = vpop.permute.xlu0 %4345 }
0x1d82   :  { %v4341_v46 = vpop.permute.xlu1 %4340  ;;  %v4352_v16 = vmul.f32 %v4346_v38, %v10866_v45  ;;  %v4353_v51 = vmul.f32 %v4346_v38, %v10961_v29  ;;  %v4351_v9 = vmul.f32 %v4346_v38, %v10963_v47 }
0x1d83   :  { %v4348_v55 = vmul.f32 %v4341_v46, %v10856_v61  ;;  %v4349_v59 = vmul.f32 %v4341_v46, %v10947_v44  ;;  %v4350_v53 = vmul.f32 %v4341_v46, %v10954_v37  ;;  %v7667_v46 = vld [vmem:[%s13796_s1 + $0x248] sm:$0xff] }
0x1d85   :  { %4364 = vrot.lane.b32.xlu0 %v4350_v53, %s7954_s27  ;;  %4362 = vrot.lane.b32.xlu1 %v4349_v59, %s7954_s27  ;;  %v7666_v59 = vld [vmem:[%s13796_s1 + $0x240] sm:$0xff] }
0x1d86   :  { %4360 = vrot.lane.b32.xlu2 %v4348_v55, %s7954_s27  ;;  %v11321_v55 = vpop.permute.xlu2 %4312 }
0x1d87   :  { %14424 = vst [vmem:[#allocation149_spill] sm:$0xff] %v11321_v55 }
0x1d8d   :  { %4370 = vrot.lane.b32.xlu0 %v4353_v51, %s7954_s27  ;;  %4368 = vrot.lane.b32.xlu1 %v4352_v16, %s7954_s27 }
0x1d8e   :  { %4366 = vrot.lane.b32.xlu2 %v4351_v9, %s7954_s27  ;;  %v11323_v53 = vpop.permute.xlu2 %4318 }
0x1d8f   :  { %14425 = vst [vmem:[#allocation122_spill] sm:$0xff] %v11323_v53 }
0x1d95   :  { %4397 = vperm.xlu1 %7799, %v7667_v46  }
0x1d96   :  { %4392 = vperm.xlu2 %7797, %v7666_v59  }
0x1de0   :  { %v11325_v38 = vpop.permute.xlu2 %4360 }
0x1de1   :  { %14426 = vst [vmem:[#allocation142_spill] sm:$0xff] %v11325_v38 }
0x1de8   :  { %v11327_v51 = vpop.permute.xlu2 %4366 }
0x1de9   :  { %14427 = vst [vmem:[#allocation148_spill] sm:$0xff] %v11327_v51 }
0x1df0   :  { %v4393_v16 = vpop.permute.xlu2 %4392 }
0x1df1   :  { %v4400_v9 = vmul.f32 %v4393_v16, %v10856_v61  ;;  %v4401_v12 = vmul.f32 %v4393_v16, %v10947_v44  ;;  %v4402_v22 = vmul.f32 %v4393_v16, %v10954_v37 }
0x1df3   :  { %4416 = vrot.lane.b32.xlu1 %v4402_v22, %s7955_s28  ;;  %4414 = vrot.lane.b32.xlu2 %v4401_v12, %s7955_s28  ;;  %v7669_v22 = vld [vmem:[%s13796_s1 + $0x2b8] sm:$0xff]  ;;  %v7668_v12 = vld [vmem:[%s13796_s1 + $0x2b0] sm:$0xff] }
0x1df4   :  { %4412 = vrot.lane.b32.xlu0 %v4400_v9, %s7955_s28 }
0x1df7   :  { %v11335_v46 = vpop.permute.xlu1 %4362  ;;  %v11351_v16 = vpop.permute.xlu0 %4364 }
0x1df8   :  { %14428 = vst [vmem:[#allocation128_spill] sm:$0xff] %v11335_v46 }
0x1df9   :  { %14430 = vst [vmem:[#allocation134_spill] sm:$0xff] %v11351_v16 }
0x1dff   :  { %v11337_v59 = vpop.permute.xlu1 %4368  ;;  %v11353_v9 = vpop.permute.xlu0 %4370 }
0x1e00   :  { %14429 = vst [vmem:[#allocation157_spill] sm:$0xff] %v11337_v59 }
0x1e01   :  { %14431 = vst [vmem:[#allocation117_spill] sm:$0xff] %v11353_v9 }
0x1e07   :  { %v4398_v5 = vpop.permute.xlu1 %4397 }
0x1e08   :  { %v4403_v41 = vmul.f32 %v4398_v5, %v10963_v47  ;;  %v4404_v27 = vmul.f32 %v4398_v5, %v10866_v45  ;;  %v4405_v14 = vmul.f32 %v4398_v5, %v10961_v29 }
0x1e0a   :  { %4422 = vrot.lane.b32.xlu1 %v4405_v14, %s7955_s28  ;;  %4420 = vrot.lane.b32.xlu2 %v4404_v27, %s7955_s28 }
0x1e0b   :  { %4418 = vrot.lane.b32.xlu0 %v4403_v41, %s7955_s28 }
0x1e12   :  { %4449 = vperm.xlu2 %7797, %v7669_v22  }
0x1e13   :  { %4444 = vperm.xlu0 %7798, %v7668_v12  }
0x1e4d   :  { %v11357_v14 = vpop.permute.xlu2 %4414 }
0x1e4e   :  { %14433 = vst [vmem:[#allocation123_spill] sm:$0xff] %v11357_v14 }
0x1e64   :  { %v11361_v41 = vpop.permute.xlu2 %4420 }
0x1e65   :  { %14435 = vst [vmem:[#allocation129_spill] sm:$0xff] %v11361_v41 }
0x1e66   :  { %v11355_v5 = vpop.permute.xlu0 %4412 }
0x1e67   :  { %14432 = vst [vmem:[#allocation145_spill] sm:$0xff] %v11355_v5 }
0x1e6c   :  { %v4450_v12 = vpop.permute.xlu2 %4449 }
0x1e6d   :  { %v4456_v24 = vmul.f32 %v4450_v12, %v10866_v45  ;;  %v4457_v0 = vmul.f32 %v4450_v12, %v10961_v29  ;;  %v4455_v26 = vmul.f32 %v4450_v12, %v10963_v47 }
0x1e7d   :  { %v11359_v27 = vpop.permute.xlu0 %4418 }
0x1e7e   :  { %14434 = vst [vmem:[#allocation140_spill] sm:$0xff] %v11359_v27 }
0x1e85   :  { %v4445_v36 = vpop.permute.xlu0 %4444 }
0x1e86   :  { %v4452_v31 = vmul.f32 %v4445_v36, %v10856_v61  ;;  %v4453_v20 = vmul.f32 %v4445_v36, %v10947_v44  ;;  %v4454_v22 = vmul.f32 %v4445_v36, %v10954_v37  ;;  %v7670_v61 = vld [vmem:[%s13797_s2 + $0x2] sm:$0x3] }
0x1e87   :  { %v4494_v45 = vperm.slane %v7670_v61, 0 }
0x1e88   :  { %4468 = vrot.lane.b32.xlu2 %v4454_v22, %s7956_s10  ;;  %4466 = vrot.lane.b32.xlu0 %v4453_v20, %s7956_s10  ;;  %v4495_v20 = vperm.slane %v7670_v61, 1 }
0x1e89   :  { %4464 = vrot.lane.b32.xlu1 %v4452_v31, %s7956_s10  ;;  %v7671_v31 = vld [vmem:[%s13796_s1 + $0x20] sm:$0xff] }
0x1e90   :  { %4474 = vrot.lane.b32.xlu2 %v4457_v0, %s7956_s10  ;;  %4472 = vrot.lane.b32.xlu0 %v4456_v24, %s7956_s10  ;;  %v7674_v24 = vld [vmem:[%s13796_s1 + $0x98] sm:$0xff]  ;;  %v7673_v0 = vld [vmem:[%s13796_s1 + $0x90] sm:$0xff] }
0x1e91   :  { %4470 = vrot.lane.b32.xlu1 %v4455_v26, %s7956_s10  ;;  %v7672_v26 = vld [vmem:[%s13796_s1 + $0x28] sm:$0xff] }
0x1e98   :  { %4514 = vperm.xlu2 %7797, %v7671_v31   ;;  %4498 = vrot.lane.b32.xlu0 %v4495_v20, %s7957_s16 }
0x1e99   :  { %4496 = vrot.lane.b32.xlu1 %v4494_v45, %s7957_s16 }
0x1ea0   :  { %4537 = vperm.xlu2 %7797, %v7674_v24   ;;  %4532 = vperm.xlu0 %7798, %v7673_v0  }
0x1ea1   :  { %4519 = vperm.xlu1 %7799, %v7672_v26  }
0x1ee2   :  { %v11392_v36 = vpop.permute.xlu2 %4468 }
0x1ee3   :  { %14436 = vst [vmem:[#allocation144_spill] sm:$0xff] %v11392_v36 }
0x1eea   :  { %v11398_v61 = vpop.permute.xlu2 %4474 }
0x1eeb   :  { %14439 = vst [vmem:[#allocation143_spill] sm:$0xff] %v11398_v61 }
0x1ef2   :  { %v11402_v31 = vpop.permute.xlu2 %4514 }
0x1ef3   :  { %14441 = vst [vmem:[#allocation72_spill] sm:$0xff] %v11402_v31 }
0x1efa   :  { %v11394_v22 = vpop.permute.xlu0 %4466  ;;  %v4538_v26 = vpop.permute.xlu2 %4537 }
0x1efb   :  { %14437 = vst [vmem:[#allocation135_spill] sm:$0xff] %v11394_v22  ;;  %v4544_v15 = vmul.f32 %v11412_v42, %v4538_v26  ;;  %v4545_v2 = vmul.f32 %v4538_v26, %v10961_v29  ;;  %v4543_v60 = vmul.f32 %v4538_v26, %v10963_v47 }
0x1f02   :  { %v11396_v12 = vpop.permute.xlu0 %4472 }
0x1f03   :  { %14438 = vst [vmem:[#allocation146_spill] sm:$0xff] %v11396_v12 }
0x1f0a   :  { %v11400_v20 = vpop.permute.xlu0 %4498 }
0x1f0b   :  { %14440 = vst [vmem:[#allocation73_spill] sm:$0xff] %v11400_v20 }
0x1f12   :  { %v4533_v45 = vpop.permute.xlu0 %4532 }
0x1f13   :  { %v4540_v25 = vmul.f32 %v11404_v8, %v4533_v45  ;;  %v4541_v24 = vmul.f32 %v4533_v45, %v10947_v44  ;;  %v4542_v0 = vmul.f32 %v4533_v45, %v10954_v37  ;;  %v7676_v45 = vld [vmem:[%s13796_s1 + $0x108] sm:$0xff] }
0x1f15   :  { %4556 = vrot.lane.b32.xlu2 %v4542_v0, %s7951_s24  ;;  %4554 = vrot.lane.b32.xlu0 %v4541_v24, %s7951_s24  ;;  %v11426_v24 = vpop.permute.xlu1 %4416 }
0x1f16   :  { %4552 = vrot.lane.b32.xlu1 %v4540_v25, %s7951_s24  ;;  %v7675_v25 = vld [vmem:[%s13796_s1 + $0x100] sm:$0xff]  ;;  %14442 = vst [vmem:[#allocation65_spill] sm:$0xff] %v11426_v24 }
0x1f1d   :  { %4562 = vrot.lane.b32.xlu2 %v4545_v2, %s7951_s24  ;;  %4560 = vrot.lane.b32.xlu0 %v4544_v15, %s7951_s24  ;;  %v11428_v0 = vpop.permute.xlu1 %4422 }
0x1f1e   :  { %4558 = vrot.lane.b32.xlu1 %v4543_v60, %s7951_s24  ;;  %14443 = vst [vmem:[#allocation80_spill] sm:$0xff] %v11428_v0 }
0x1f25   :  { %4589 = vperm.xlu0 %7798, %v7676_v45   ;;  %v11430_v26 = vpop.permute.xlu1 %4464 }
0x1f26   :  { %4584 = vperm.xlu1 %7799, %v7675_v25   ;;  %14444 = vst [vmem:[#allocation78_spill] sm:$0xff] %v11430_v26 }
0x1f2d   :  { %v11432_v2 = vpop.permute.xlu1 %4470 }
0x1f2e   :  { %14445 = vst [vmem:[#allocation85_spill] sm:$0xff] %v11432_v2 }
0x1f35   :  { %v11434_v15 = vpop.permute.xlu1 %4496 }
0x1f36   :  { %14446 = vst [vmem:[#allocation84_spill] sm:$0xff] %v11434_v15 }
0x1f3d   :  { %v11436_v60 = vpop.permute.xlu1 %4519 }
0x1f3e   :  { %14447 = vst [vmem:[#allocation91_spill] sm:$0xff] %v11436_v60 }
0x1f87   :  { %v11440_v19 = vpop.permute.xlu0 %4554 }
0x1f88   :  { %v11438_v57 = vpop.permute.xlu1 %4552  ;;  %14449 = vst [vmem:[#allocation75_spill] sm:$0xff] %v11440_v19 }
0x1f89   :  { %14448 = vst [vmem:[#allocation90_spill] sm:$0xff] %v11438_v57 }
0x1f8f   :  { %v11444_v45 = vpop.permute.xlu0 %4560 }
0x1f90   :  { %v11442_v13 = vpop.permute.xlu1 %4558  ;;  %14451 = vst [vmem:[#allocation98_spill] sm:$0xff] %v11444_v45 }
0x1f91   :  { %14450 = vst [vmem:[#allocation74_spill] sm:$0xff] %v11442_v13 }
0x1f97   :  { %v4590_v63 = vpop.permute.xlu0 %4589 }
0x1f98   :  { %v4585_v25 = vpop.permute.xlu1 %4584  ;;  %v4596_v33 = vmul.f32 %v11412_v42, %v4590_v63  ;;  %v4597_v4 = vmul.f32 %v4590_v63, %v10961_v29  ;;  %v4595_v32 = vmul.f32 %v4590_v63, %v10963_v47 }
0x1f99   :  { %v4592_v48 = vmul.f32 %v11404_v8, %v4585_v25  ;;  %v4593_v56 = vmul.f32 %v4585_v25, %v10947_v44  ;;  %v4594_v49 = vmul.f32 %v4585_v25, %v10954_v37 }
0x1f9b   :  { %4608 = vrot.lane.b32.xlu0 %v4594_v49, %s7953_s26  ;;  %4606 = vrot.lane.b32.xlu1 %v4593_v56, %s7953_s26  ;;  %v7678_v49 = vld [vmem:[%s13796_s1 + $0x178] sm:$0xff]  ;;  %v7677_v56 = vld [vmem:[%s13796_s1 + $0x170] sm:$0xff] }
0x1f9c   :  { %4604 = vrot.lane.b32.xlu2 %v4592_v48, %s7953_s26  ;;  %v11464_v48 = vpop.permute.xlu2 %4556 }
0x1f9d   :  { %14452 = vst [vmem:[#allocation96_spill] sm:$0xff] %v11464_v48 }
0x1fa3   :  { %4614 = vrot.lane.b32.xlu0 %v4597_v4, %s7953_s26  ;;  %4612 = vrot.lane.b32.xlu1 %v4596_v33, %s7953_s26 }
0x1fa4   :  { %4610 = vrot.lane.b32.xlu2 %v4595_v32, %s7953_s26  ;;  %v11466_v25 = vpop.permute.xlu2 %4562 }
0x1fa5   :  { %14453 = vst [vmem:[#allocation71_spill] sm:$0xff] %v11466_v25 }
0x1fab   :  { %4641 = vperm.xlu1 %7799, %v7678_v49  }
0x1fac   :  { %4636 = vperm.xlu2 %7797, %v7677_v56  }
0x1ff6   :  { %v11468_v63 = vpop.permute.xlu2 %4604 }
0x1ff7   :  { %14454 = vst [vmem:[#allocation81_spill] sm:$0xff] %v11468_v63 }
0x1ffe   :  { %v11470_v4 = vpop.permute.xlu2 %4610 }
0x1fff   :  { %14455 = vst [vmem:[#allocation79_spill] sm:$0xff] %v11470_v4 }
0x2006   :  { %v4637_v33 = vpop.permute.xlu2 %4636 }
0x2007   :  { %v4644_v32 = vmul.f32 %v11404_v8, %v4637_v33  ;;  %v4645_v40 = vmul.f32 %v4637_v33, %v10947_v44  ;;  %v4646_v3 = vmul.f32 %v4637_v33, %v10954_v37 }
0x2009   :  { %4660 = vrot.lane.b32.xlu1 %v4646_v3, %s7952_s25  ;;  %4658 = vrot.lane.b32.xlu2 %v4645_v40, %s7952_s25  ;;  %v7680_v40 = vld [vmem:[%s13796_s1 + $0x1e8] sm:$0xff]  ;;  %v7679_v3 = vld [vmem:[%s13796_s1 + $0x1e0] sm:$0xff] }
0x200a   :  { %4656 = vrot.lane.b32.xlu0 %v4644_v32, %s7952_s25 }
0x200d   :  { %v11478_v49 = vpop.permute.xlu1 %4606  ;;  %v11494_v33 = vpop.permute.xlu0 %4608 }
0x200e   :  { %14456 = vst [vmem:[#allocation100_spill] sm:$0xff] %v11478_v49 }
0x200f   :  { %14458 = vst [vmem:[#allocation87_spill] sm:$0xff] %v11494_v33 }
0x2015   :  { %v11480_v56 = vpop.permute.xlu1 %4612  ;;  %v11496_v32 = vpop.permute.xlu0 %4614 }
0x2016   :  { %14457 = vst [vmem:[#allocation108_spill] sm:$0xff] %v11480_v56 }
0x2017   :  { %14459 = vst [vmem:[#allocation86_spill] sm:$0xff] %v11496_v32 }
0x201d   :  { %v4642_v62 = vpop.permute.xlu1 %4641 }
0x201e   :  { %v4647_v43 = vmul.f32 %v4642_v62, %v10963_v47  ;;  %v4648_v4 = vmul.f32 %v11412_v42, %v4642_v62  ;;  %v4649_v13 = vmul.f32 %v4642_v62, %v10961_v29 }
0x2020   :  { %4666 = vrot.lane.b32.xlu1 %v4649_v13, %s7952_s25  ;;  %4664 = vrot.lane.b32.xlu2 %v4648_v4, %s7952_s25 }
0x2021   :  { %4662 = vrot.lane.b32.xlu0 %v4647_v43, %s7952_s25 }
0x2028   :  { %4693 = vperm.xlu2 %7797, %v7680_v40  }
0x2029   :  { %4688 = vperm.xlu0 %7798, %v7679_v3  }
0x2063   :  { %v11500_v13 = vpop.permute.xlu2 %4658 }
0x2064   :  { %14461 = vst [vmem:[#allocation93_spill] sm:$0xff] %v11500_v13 }
0x207a   :  { %v11504_v43 = vpop.permute.xlu2 %4664 }
0x207b   :  { %14463 = vst [vmem:[#allocation82_spill] sm:$0xff] %v11504_v43 }
0x207c   :  { %v11498_v62 = vpop.permute.xlu0 %4656 }
0x207d   :  { %14460 = vst [vmem:[#allocation76_spill] sm:$0xff] %v11498_v62 }
0x2082   :  { %v4694_v3 = vpop.permute.xlu2 %4693 }
0x2083   :  { %v4700_v62 = vmul.f32 %v11412_v42, %v4694_v3  ;;  %v4699_v43 = vmul.f32 %v4694_v3, %v10963_v47 }
0x2093   :  { %v11502_v4 = vpop.permute.xlu0 %4662 }
0x2094   :  { %14462 = vst [vmem:[#allocation92_spill] sm:$0xff] %v11502_v4  ;;  %v4701_v4 = vmul.f32 %v4694_v3, %v10961_v29 }
0x209b   :  { %v4689_v56 = vpop.permute.xlu0 %4688 }
0x209c   :  { %v4696_v63 = vmul.f32 %v11404_v8, %v4689_v56  ;;  %v4697_v45 = vmul.f32 %v4689_v56, %v10947_v44  ;;  %v4698_v40 = vmul.f32 %v4689_v56, %v10954_v37  ;;  %v7682_v56 = vld [vmem:[%s13796_s1 + $0x258] sm:$0xff] }
0x209e   :  { %4712 = vrot.lane.b32.xlu2 %v4698_v40, %s7954_s27  ;;  %4710 = vrot.lane.b32.xlu0 %v4697_v45, %s7954_s27  ;;  %v7681_v45 = vld [vmem:[%s13796_s1 + $0x250] sm:$0xff] }
0x209f   :  { %4708 = vrot.lane.b32.xlu1 %v4696_v63, %s7954_s27  ;;  %v11524_v63 = vpop.permute.xlu1 %4660 }
0x20a0   :  { %14464 = vst [vmem:[#allocation110_spill] sm:$0xff] %v11524_v63 }
0x20a6   :  { %4718 = vrot.lane.b32.xlu2 %v4701_v4, %s7954_s27  ;;  %4716 = vrot.lane.b32.xlu0 %v4700_v62, %s7954_s27 }
0x20a7   :  { %4714 = vrot.lane.b32.xlu1 %v4699_v43, %s7954_s27  ;;  %v11526_v40 = vpop.permute.xlu1 %4666 }
0x20a8   :  { %14465 = vst [vmem:[#allocation99_spill] sm:$0xff] %v11526_v40 }
0x20ae   :  { %4745 = vperm.xlu0 %7798, %v7682_v56  }
0x20af   :  { %4740 = vperm.xlu1 %7799, %v7681_v45  }
0x2110   :  { %v11530_v4 = vpop.permute.xlu0 %4710 }
0x2111   :  { %v11528_v3 = vpop.permute.xlu1 %4708  ;;  %14467 = vst [vmem:[#allocation88_spill] sm:$0xff] %v11530_v4  ;;  %v11580_v4 = vld [vmem:[#allocation2 + $0x58] sm:$0xff] }
0x2112   :  { %14466 = vst [vmem:[#allocation97_spill] sm:$0xff] %v11528_v3 }
0x2118   :  { %v11534_v43 = vpop.permute.xlu0 %4716 }
0x2119   :  { %v11532_v62 = vpop.permute.xlu1 %4714  ;;  %14469 = vst [vmem:[#allocation109_spill] sm:$0xff] %v11534_v43 }
0x211a   :  { %14468 = vst [vmem:[#allocation101_spill] sm:$0xff] %v11532_v62 }
0x2120   :  { %v4746_v45 = vpop.permute.xlu0 %4745 }
0x2121   :  { %v4741_v32 = vpop.permute.xlu1 %4740  ;;  %v4752_v3 = vmul.f32 %v11412_v42, %v4746_v45  ;;  %v4753_v62 = vmul.f32 %v4746_v45, %v10961_v29  ;;  %v4751_v43 = vmul.f32 %v4746_v45, %v10963_v47 }
0x2122   :  { %v4748_v25 = vmul.f32 %v11404_v8, %v4741_v32  ;;  %v4749_v57 = vmul.f32 %v4741_v32, %v10947_v44  ;;  %v4750_v56 = vmul.f32 %v4741_v32, %v10954_v37  ;;  %v7684_v44 = vld [vmem:[%s13796_s1 + $0x2c8] sm:$0xff]  ;;  %v7683_v37 = vld [vmem:[%s13796_s1 + $0x2c0] sm:$0xff] }
0x2124   :  { %4764 = vrot.lane.b32.xlu0 %v4750_v56, %s7955_s28  ;;  %4762 = vrot.lane.b32.xlu1 %v4749_v57, %s7955_s28  ;;  %v11554_v57 = vpop.permute.xlu2 %4712  ;;  %v11566_v56 = vld [vmem:[#allocation2 + $0x40] sm:$0xff] }
0x2125   :  { %4760 = vrot.lane.b32.xlu2 %v4748_v25, %s7955_s28  ;;  %14470 = vst [vmem:[#allocation94_spill] sm:$0xff] %v11554_v57 }
0x212c   :  { %4770 = vrot.lane.b32.xlu0 %v4753_v62, %s7955_s28  ;;  %4768 = vrot.lane.b32.xlu1 %v4752_v3, %s7955_s28  ;;  %v11556_v29 = vpop.permute.xlu2 %4718  ;;  %v11563_v62 = vld [vmem:[#allocation2 + $0x38] sm:$0xff] }
0x212d   :  { %4766 = vrot.lane.b32.xlu2 %v4751_v43, %s7955_s28  ;;  %14471 = vst [vmem:[#allocation77_spill] sm:$0xff] %v11556_v29 }
0x2134   :  { %4797 = vperm.xlu1 %7799, %v7684_v44  }
0x2135   :  { %4792 = vperm.xlu2 %7797, %v7683_v37  }
0x217f   :  { %v11558_v47 = vpop.permute.xlu2 %4760 }
0x2180   :  { %14472 = vst [vmem:[#allocation106_spill] sm:$0xff] %v11558_v47  ;;  %v11576_v47 = vld [vmem:[#allocation2 + $0x48] sm:$0xff] }
0x2187   :  { %v11560_v25 = vpop.permute.xlu2 %4766 }
0x2188   :  { %14473 = vst [vmem:[#allocation83_spill] sm:$0xff] %v11560_v25 }
0x218f   :  { %v4793_v32 = vpop.permute.xlu2 %4792 }
0x2190   :  { %v4800_v3 = vmul.f32 %v11404_v8, %v4793_v32  ;;  %v4801_v43 = vmul.f32 %v11563_v62, %v4793_v32  ;;  %v4802_v45 = vmul.f32 %v11566_v56, %v4793_v32 }
0x2192   :  { %4816 = vrot.lane.b32.xlu1 %v4802_v45, %s7956_s10  ;;  %4814 = vrot.lane.b32.xlu2 %v4801_v43, %s7956_s10  ;;  %v7686_v45 = vld [vmem:[%s13796_s1 + $0x30] sm:$0xff] }
0x2193   :  { %4812 = vrot.lane.b32.xlu0 %v4800_v3, %s7956_s10  ;;  %v7685_v3 = vld [vmem:[%s13797_s2 + $0x4] sm:$0x3] }
0x2194   :  { %v4843_v43 = vperm.slane %v7685_v3, 1 }
0x2196   :  { %v11572_v44 = vpop.permute.xlu1 %4762 }
0x2197   :  { %14474 = vst [vmem:[#allocation103_spill] sm:$0xff] %v11572_v44 }
0x219e   :  { %v11574_v37 = vpop.permute.xlu1 %4768 }
0x219f   :  { %14475 = vst [vmem:[#allocation89_spill] sm:$0xff] %v11574_v37  ;;  %v4842_v37 = vperm.slane %v7685_v3, 0 }
0x21a6   :  { %v4798_v25 = vpop.permute.xlu1 %4797 }
0x21a7   :  { %v4803_v29 = vmul.f32 %v11576_v47, %v4798_v25  ;;  %v4804_v40 = vmul.f32 %v11412_v42, %v4798_v25  ;;  %v4805_v32 = vmul.f32 %v11580_v4, %v4798_v25  ;;  %v7687_v25 = vld [vmem:[%s13796_s1 + $0x38] sm:$0xff] }
0x21a9   :  { %4822 = vrot.lane.b32.xlu1 %v4805_v32, %s7956_s10  ;;  %4820 = vrot.lane.b32.xlu2 %v4804_v40, %s7956_s10  ;;  %v7689_v40 = vld [vmem:[%s13796_s1 + $0xa8] sm:$0xff] }
0x21aa   :  { %4818 = vrot.lane.b32.xlu0 %v4803_v29, %s7956_s10  ;;  %v7688_v29 = vld [vmem:[%s13796_s1 + $0xa0] sm:$0xff] }
0x21b1   :  { %4862 = vperm.xlu1 %7799, %v7686_v45   ;;  %4846 = vrot.lane.b32.xlu2 %v4843_v43, %s7958_s21 }
0x21b2   :  { %4844 = vrot.lane.b32.xlu0 %v4842_v37, %s7958_s21 }
0x21b9   :  { %4885 = vperm.xlu1 %7799, %v7689_v40   ;;  %4880 = vperm.xlu2 %7797, %v7688_v29  }
0x21ba   :  { %4867 = vperm.xlu0 %7798, %v7687_v25  }
0x21ec   :  { %v11603_v32 = vpop.permute.xlu2 %4814 }
0x21ed   :  { %14476 = vst [vmem:[#allocation102_spill] sm:$0xff] %v11603_v32 }
0x2203   :  { %v11605_v3 = vpop.permute.xlu2 %4820 }
0x2204   :  { %14477 = vst [vmem:[#allocation95_spill] sm:$0xff] %v11605_v3  ;;  %v11609_v43 = vpop.permute.xlu1 %4816 }
0x2205   :  { %14479 = vst [vmem:[#allocation104_spill] sm:$0xff] %v11609_v43 }
0x220b   :  { %v11607_v37 = vpop.permute.xlu2 %4846 }
0x220c   :  { %14478 = vst [vmem:[#allocation107_spill] sm:$0xff] %v11607_v37 }
0x2213   :  { %v4881_v45 = vpop.permute.xlu2 %4880 }
0x2214   :  { %v4888_v44 = vmul.f32 %v11404_v8, %v4881_v45  ;;  %v4889_v57 = vmul.f32 %v11563_v62, %v4881_v45  ;;  %v4890_v60 = vmul.f32 %v11566_v56, %v4881_v45 }
0x2216   :  { %4904 = vrot.lane.b32.xlu1 %v4890_v60, %s7951_s24  ;;  %4902 = vrot.lane.b32.xlu2 %v4889_v57, %s7951_s24  ;;  %v7691_v60 = vld [vmem:[%s13796_s1 + $0x118] sm:$0xff]  ;;  %v7690_v57 = vld [vmem:[%s13796_s1 + $0x110] sm:$0xff] }
0x2217   :  { %4900 = vrot.lane.b32.xlu0 %v4888_v44, %s7951_s24  ;;  %v11633_v44 = vpop.permute.xlu0 %4764 }
0x2218   :  { %14481 = vst [vmem:[#allocation25_spill] sm:$0xff] %v11633_v44 }
0x221b   :  { %v11617_v40 = vpop.permute.xlu1 %4822 }
0x221c   :  { %14480 = vst [vmem:[#allocation23_spill] sm:$0xff] %v11617_v40 }
0x221f   :  { %v11635_v45 = vpop.permute.xlu0 %4770 }
0x2220   :  { %14482 = vst [vmem:[#allocation24_spill] sm:$0xff] %v11635_v45 }
0x2223   :  { %v11619_v29 = vpop.permute.xlu1 %4862 }
0x222b   :  { %v4886_v25 = vpop.permute.xlu1 %4885 }
0x222c   :  { %v4891_v3 = vmul.f32 %v11576_v47, %v4886_v25  ;;  %v4892_v37 = vmul.f32 %v11412_v42, %v4886_v25  ;;  %v4893_v32 = vmul.f32 %v11580_v4, %v4886_v25  ;;  %v11637_v25 = vpop.permute.xlu0 %4812 }
0x222d   :  { %14483 = vst [vmem:[#allocation8_spill] sm:$0xff] %v11637_v25 }
0x222e   :  { %4910 = vrot.lane.b32.xlu1 %v4893_v32, %s7951_s24  ;;  %4908 = vrot.lane.b32.xlu2 %v4892_v37, %s7951_s24 }
0x222f   :  { %4906 = vrot.lane.b32.xlu0 %v4891_v3, %s7951_s24 }
0x2234   :  { %v11639_v32 = vpop.permute.xlu0 %4818 }
0x2235   :  { %14484 = vst [vmem:[#allocation7_spill] sm:$0xff] %v11639_v32 }
0x2236   :  { %4937 = vperm.xlu2 %7797, %v7691_v60  }
0x2237   :  { %4932 = vperm.xlu0 %7798, %v7690_v57  }
0x223c   :  { %v11641_v37 = vpop.permute.xlu0 %4844 }
0x223d   :  { %14485 = vst [vmem:[#allocation6_spill] sm:$0xff] %v11641_v37 }
0x2244   :  { %v11643_v3 = vpop.permute.xlu0 %4867 }
0x2270   :  { %v11647_v43 = vpop.permute.xlu2 %4902 }
0x2288   :  { %v11651_v60 = vpop.permute.xlu2 %4908 }
0x2289   :  { %v11645_v40 = vpop.permute.xlu0 %4900 }
0x2290   :  { %v4938_v32 = vpop.permute.xlu2 %4937 }
0x2291   :  { %v4944_v37 = vmul.f32 %v11412_v42, %v4938_v32  ;;  %v4945_v63 = vmul.f32 %v11580_v4, %v4938_v32  ;;  %v4943_v49 = vmul.f32 %v11576_v47, %v4938_v32 }
0x22a1   :  { %v11649_v13 = vpop.permute.xlu0 %4906 }
0x22a9   :  { %v4933_v57 = vpop.permute.xlu0 %4932 }
0x22aa   :  { %v4940_v44 = vmul.f32 %v11404_v8, %v4933_v57  ;;  %v4941_v45 = vmul.f32 %v11563_v62, %v4933_v57  ;;  %v4942_v25 = vmul.f32 %v11566_v56, %v4933_v57 }
0x22ac   :  { %4956 = vrot.lane.b32.xlu2 %v4942_v25, %s7953_s26  ;;  %4954 = vrot.lane.b32.xlu0 %v4941_v45, %s7953_s26  ;;  %v7693_v25 = vld [vmem:[%s13796_s1 + $0x188] sm:$0xff]  ;;  %v11671_v45 = vpop.permute.xlu1 %4904 }
0x22ad   :  { %4952 = vrot.lane.b32.xlu1 %v4940_v44, %s7953_s26  ;;  %v7692_v44 = vld [vmem:[%s13796_s1 + $0x180] sm:$0xff] }
0x22b4   :  { %4962 = vrot.lane.b32.xlu2 %v4945_v63, %s7953_s26  ;;  %4960 = vrot.lane.b32.xlu0 %v4944_v37, %s7953_s26  ;;  %v11673_v57 = vpop.permute.xlu1 %4910 }
0x22b5   :  { %4958 = vrot.lane.b32.xlu1 %v4943_v49, %s7953_s26  ;;  %14486 = vst [vmem:[#allocation13_spill] sm:$0xff] %v11673_v57 }
0x22bc   :  { %4989 = vperm.xlu0 %7798, %v7693_v25  }
0x22bd   :  { %4984 = vperm.xlu1 %7799, %v7692_v44  }
0x231e   :  { %v11677_v63 = vpop.permute.xlu0 %4954 }
0x231f   :  { %v11675_v32 = vpop.permute.xlu1 %4952 }
0x2326   :  { %v11681_v49 = vpop.permute.xlu0 %4960 }
0x2327   :  { %v11679_v37 = vpop.permute.xlu1 %4958  ;;  %14488 = vst [vmem:[#allocation14_spill] sm:$0xff] %v11681_v49 }
0x2328   :  { %14487 = vst [vmem:[#allocation32_spill] sm:$0xff] %v11679_v37 }
0x232e   :  { %v4990_v44 = vpop.permute.xlu0 %4989 }
0x232f   :  { %v4985_v33 = vpop.permute.xlu1 %4984  ;;  %v4996_v31 = vmul.f32 %v11412_v42, %v4990_v44  ;;  %v4997_v2 = vmul.f32 %v11580_v4, %v4990_v44  ;;  %v4995_v27 = vmul.f32 %v11576_v47, %v4990_v44 }
0x2330   :  { %v4992_v19 = vmul.f32 %v11404_v8, %v4985_v33  ;;  %v4993_v48 = vmul.f32 %v11563_v62, %v4985_v33  ;;  %v4994_v25 = vmul.f32 %v11566_v56, %v4985_v33  ;;  %v7695_v33 = vld [vmem:[%s13796_s1 + $0x1f8] sm:$0xff] }
0x2332   :  { %5008 = vrot.lane.b32.xlu0 %v4994_v25, %s7952_s25  ;;  %5006 = vrot.lane.b32.xlu1 %v4993_v48, %s7952_s25  ;;  %v11701_v48 = vpop.permute.xlu2 %4956 }
0x2333   :  { %5004 = vrot.lane.b32.xlu2 %v4992_v19, %s7952_s25  ;;  %v7694_v19 = vld [vmem:[%s13796_s1 + $0x1f0] sm:$0xff] }
0x233a   :  { %5014 = vrot.lane.b32.xlu0 %v4997_v2, %s7952_s25  ;;  %5012 = vrot.lane.b32.xlu1 %v4996_v31, %s7952_s25  ;;  %v11703_v25 = vpop.permute.xlu2 %4962 }
0x233b   :  { %5010 = vrot.lane.b32.xlu2 %v4995_v27, %s7952_s25  ;;  %14489 = vst [vmem:[#allocation35_spill] sm:$0xff] %v11703_v25 }
0x2342   :  { %5041 = vperm.xlu1 %7799, %v7695_v33  }
0x2343   :  { %5036 = vperm.xlu2 %7797, %v7694_v19  }
0x238d   :  { %v11705_v44 = vpop.permute.xlu2 %5004 }
0x238e   :  { %14490 = vst [vmem:[#allocation40_spill] sm:$0xff] %v11705_v44 }
0x2395   :  { %v11707_v2 = vpop.permute.xlu2 %5010 }
0x2396   :  { %14491 = vst [vmem:[#allocation19_spill] sm:$0xff] %v11707_v2 }
0x239d   :  { %v5037_v31 = vpop.permute.xlu2 %5036 }
0x239e   :  { %v5044_v27 = vmul.f32 %v11404_v8, %v5037_v31  ;;  %v5045_v51 = vmul.f32 %v11563_v62, %v5037_v31  ;;  %v5046_v11 = vmul.f32 %v11566_v56, %v5037_v31 }
0x23a0   :  { %5060 = vrot.lane.b32.xlu1 %v5046_v11, %s7954_s27  ;;  %5058 = vrot.lane.b32.xlu2 %v5045_v51, %s7954_s27  ;;  %v7697_v11 = vld [vmem:[%s13796_s1 + $0x268] sm:$0xff]  ;;  %v7696_v51 = vld [vmem:[%s13796_s1 + $0x260] sm:$0xff] }
0x23a1   :  { %5056 = vrot.lane.b32.xlu0 %v5044_v27, %s7954_s27 }
0x23a4   :  { %v11715_v33 = vpop.permute.xlu1 %5006  ;;  %v11731_v31 = vpop.permute.xlu0 %5008 }
0x23a5   :  { %14492 = vst [vmem:[#allocation27_spill] sm:$0xff] %v11715_v33 }
0x23ac   :  { %v11717_v19 = vpop.permute.xlu1 %5012  ;;  %v11733_v27 = vpop.permute.xlu0 %5014 }
0x23ad   :  { %14493 = vst [vmem:[#allocation41_spill] sm:$0xff] %v11717_v19 }
0x23ae   :  { %14494 = vst [vmem:[#allocation20_spill] sm:$0xff] %v11733_v27 }
0x23b4   :  { %v5042_v26 = vpop.permute.xlu1 %5041 }
0x23b5   :  { %v5047_v50 = vmul.f32 %v11576_v47, %v5042_v26  ;;  %v5048_v5 = vmul.f32 %v11412_v42, %v5042_v26  ;;  %v5049_v1 = vmul.f32 %v11580_v4, %v5042_v26 }
0x23b7   :  { %5066 = vrot.lane.b32.xlu1 %v5049_v1, %s7954_s27  ;;  %5064 = vrot.lane.b32.xlu2 %v5048_v5, %s7954_s27 }
0x23b8   :  { %5062 = vrot.lane.b32.xlu0 %v5047_v50, %s7954_s27 }
0x23bf   :  { %5093 = vperm.xlu2 %7797, %v7697_v11  }
0x23c0   :  { %5088 = vperm.xlu0 %7798, %v7696_v51  }
0x23fa   :  { %v11737_v1 = vpop.permute.xlu2 %5058 }
0x23fb   :  { %14496 = vst [vmem:[#allocation11_spill] sm:$0xff] %v11737_v1 }
0x2411   :  { %v11741_v50 = vpop.permute.xlu2 %5064 }
0x2412   :  { %14498 = vst [vmem:[#allocation12_spill] sm:$0xff] %v11741_v50 }
0x2413   :  { %v11735_v26 = vpop.permute.xlu0 %5056 }
0x2414   :  { %14495 = vst [vmem:[#allocation26_spill] sm:$0xff] %v11735_v26 }
0x2419   :  { %v5094_v51 = vpop.permute.xlu2 %5093 }
0x241a   :  { %v5100_v61 = vmul.f32 %v11412_v42, %v5094_v51  ;;  %v5101_v23 = vmul.f32 %v11580_v4, %v5094_v51  ;;  %v5099_v41 = vmul.f32 %v11576_v47, %v5094_v51 }
0x242a   :  { %v11739_v5 = vpop.permute.xlu0 %5062 }
0x242b   :  { %14497 = vst [vmem:[#allocation28_spill] sm:$0xff] %v11739_v5 }
0x2432   :  { %v5089_v38 = vpop.permute.xlu0 %5088 }
0x2433   :  { %v5096_v58 = vmul.f32 %v11404_v8, %v5089_v38  ;;  %v5097_v12 = vmul.f32 %v11563_v62, %v5089_v38  ;;  %v5098_v11 = vmul.f32 %v11566_v56, %v5089_v38  ;;  %v7699_v38 = vld [vmem:[%s13796_s1 + $0x2d8] sm:$0xff] }
0x2435   :  { %5112 = vrot.lane.b32.xlu2 %v5098_v11, %s7955_s28  ;;  %5110 = vrot.lane.b32.xlu0 %v5097_v12, %s7955_s28  ;;  %v11761_v12 = vpop.permute.xlu1 %5060 }
0x2436   :  { %5108 = vrot.lane.b32.xlu1 %v5096_v58, %s7955_s28  ;;  %v7698_v58 = vld [vmem:[%s13796_s1 + $0x2d0] sm:$0xff] }
0x243d   :  { %5118 = vrot.lane.b32.xlu2 %v5101_v23, %s7955_s28  ;;  %5116 = vrot.lane.b32.xlu0 %v5100_v61, %s7955_s28  ;;  %v11763_v11 = vpop.permute.xlu1 %5066 }
0x243e   :  { %5114 = vrot.lane.b32.xlu1 %v5099_v41, %s7955_s28  ;;  %14499 = vst [vmem:[#allocation29_spill] sm:$0xff] %v11763_v11 }
0x2445   :  { %5145 = vperm.xlu0 %7798, %v7699_v38  }
0x2446   :  { %5140 = vperm.xlu1 %7799, %v7698_v58  }
0x24a7   :  { %v11767_v23 = vpop.permute.xlu0 %5110 }
0x24a8   :  { %v11765_v51 = vpop.permute.xlu1 %5108  ;;  %14501 = vst [vmem:[#allocation15_spill] sm:$0xff] %v11767_v23 }
0x24a9   :  { %14500 = vst [vmem:[#allocation17_spill] sm:$0xff] %v11765_v51 }
0x24af   :  { %v11771_v41 = vpop.permute.xlu0 %5116 }
0x24b0   :  { %v11769_v61 = vpop.permute.xlu1 %5114  ;;  %14503 = vst [vmem:[#allocation16_spill] sm:$0xff] %v11771_v41 }
0x24b1   :  { %14502 = vst [vmem:[#allocation38_spill] sm:$0xff] %v11769_v61 }
0x24b7   :  { %v5146_v58 = vpop.permute.xlu0 %5145 }
0x24b8   :  { %v5141_v0 = vpop.permute.xlu1 %5140  ;;  %v5152_v9 = vmul.f32 %v11412_v42, %v5146_v58  ;;  %v5153_v15 = vmul.f32 %v11580_v4, %v5146_v58  ;;  %v5151_v20 = vmul.f32 %v11576_v47, %v5146_v58 }
0x24b9   :  { %v5148_v34 = vmul.f32 %v11404_v8, %v5141_v0  ;;  %v5149_v59 = vmul.f32 %v11563_v62, %v5141_v0  ;;  %v5150_v38 = vmul.f32 %v11566_v56, %v5141_v0  ;;  %v7700_v0 = vld [vmem:[%s13797_s2 + $0x6] sm:$0x3] }
0x24bb   :  { %5164 = vrot.lane.b32.xlu0 %v5150_v38, %s7956_s10  ;;  %5162 = vrot.lane.b32.xlu1 %v5149_v59, %s7956_s10  ;;  %v5191_v59 = vperm.slane %v7700_v0, 1  ;;  %v5190_v38 = vperm.slane %v7700_v0, 0 }
0x24bc   :  { %5160 = vrot.lane.b32.xlu2 %v5148_v34, %s7956_s10  ;;  %v7701_v34 = vld [vmem:[%s13796_s1 + $0x40] sm:$0xff] }
0x24c3   :  { %5170 = vrot.lane.b32.xlu0 %v5153_v15, %s7956_s10  ;;  %5168 = vrot.lane.b32.xlu1 %v5152_v9, %s7956_s10  ;;  %v7704_v9 = vld [vmem:[%s13796_s1 + $0xb8] sm:$0xff]  ;;  %v7702_v15 = vld [vmem:[%s13796_s1 + $0x48] sm:$0xff] }
0x24c4   :  { %5166 = vrot.lane.b32.xlu2 %v5151_v20, %s7956_s10  ;;  %v7703_v20 = vld [vmem:[%s13796_s1 + $0xb0] sm:$0xff] }
0x24cb   :  { %5210 = vperm.xlu0 %7798, %v7701_v34   ;;  %5194 = vrot.lane.b32.xlu1 %v5191_v59, %s7959_s13 }
0x24cc   :  { %5192 = vrot.lane.b32.xlu2 %v5190_v38, %s7959_s13  ;;  %s14540_s13 = smov 6  }
0x24d3   :  { %5233 = vperm.xlu0 %7798, %v7704_v9   ;;  %5228 = vperm.xlu1 %7799, %v7703_v20  }
0x24d4   :  { %5215 = vperm.xlu2 %7797, %v7702_v15  }
0x252d   :  { %v11802_v58 = vpop.permute.xlu0 %5164  ;;  %v11804_v0 = vpop.permute.xlu1 %5162 }
0x252e   :  { %14504 = vst [vmem:[#allocation39_spill] sm:$0xff] %v11802_v58 }
0x252f   :  { %14505 = vst [vmem:[#allocation42_spill] sm:$0xff] %v11804_v0 }
0x2535   :  { %v11806_v59 = vpop.permute.xlu1 %5168  ;;  %v11808_v34 = vpop.permute.xlu0 %5170 }
0x2536   :  { %14506 = vst [vmem:[#allocation31_spill] sm:$0xff] %v11806_v59 }
0x2537   :  { %14507 = vst [vmem:[#allocation43_spill] sm:$0xff] %v11808_v34 }
0x253d   :  { %v11810_v38 = vpop.permute.xlu1 %5194  ;;  %v11812_v6 = vpop.permute.xlu0 %5210 }
0x253e   :  { %14508 = vst [vmem:[#allocation34_spill] sm:$0xff] %v11810_v38  ;;  %v12249_v38 = vld [vmem:[#allocation2 + $0x38] sm:$0xff] }
0x253f   :  { %14509 = vst [vmem:[#allocation18_spill] sm:$0xff] %v11812_v6 }
0x2545   :  { %v5229_v53 = vpop.permute.xlu1 %5228  ;;  %v5234_v20 = vpop.permute.xlu0 %5233 }
0x2546   :  { %v5236_v22 = vmul.f32 %v11404_v8, %v5229_v53  ;;  %v5237_v36 = vmul.f32 %v11563_v62, %v5229_v53  ;;  %v5238_v9 = vmul.f32 %v11566_v56, %v5229_v53  ;;  %v5239_v15 = vmul.f32 %v11576_v47, %v5234_v20  ;;  %v7705_v53 = vld [vmem:[%s13796_s1 + $0x120] sm:$0xff] }
0x2547   :  { %v5240_v21 = vmul.f32 %v11412_v42, %v5234_v20  ;;  %v5241_v28 = vmul.f32 %v11580_v4, %v5234_v20 }
0x2548   :  { %5248 = vrot.lane.b32.xlu2 %v5236_v22, %s7951_s24  ;;  %5252 = vrot.lane.b32.xlu0 %v5238_v9, %s7951_s24  ;;  %v11832_v22 = vpop.permute.xlu2 %5112 }
0x2549   :  { %5250 = vrot.lane.b32.xlu1 %v5237_v36, %s7951_s24  ;;  %v7706_v36 = vld [vmem:[%s13796_s1 + $0x128] sm:$0xff]  ;;  %14510 = vst [vmem:[#allocation9_spill] sm:$0xff] %v11832_v22 }
0x2550   :  { %5254 = vrot.lane.b32.xlu2 %v5239_v15, %s7951_s24  ;;  %5258 = vrot.lane.b32.xlu0 %v5241_v28, %s7951_s24  ;;  %v11834_v9 = vpop.permute.xlu2 %5118 }
0x2551   :  { %5256 = vrot.lane.b32.xlu1 %v5240_v21, %s7951_s24  ;;  %14511 = vst [vmem:[#allocation10_spill] sm:$0xff] %v11834_v9 }
0x2558   :  { %5280 = vperm.xlu2 %7797, %v7705_v53   ;;  %v11836_v20 = vpop.permute.xlu2 %5160 }
0x2559   :  { %5285 = vperm.xlu1 %7799, %v7706_v36   ;;  %14512 = vst [vmem:[#allocation36_spill] sm:$0xff] %v11836_v20 }
0x2560   :  { %v11838_v15 = vpop.permute.xlu2 %5166 }
0x2561   :  { %14513 = vst [vmem:[#allocation37_spill] sm:$0xff] %v11838_v15 }
0x2568   :  { %v11840_v28 = vpop.permute.xlu2 %5192 }
0x2569   :  { %14514 = vst [vmem:[#allocation154_spill] sm:$0xff] %v11840_v28 }
0x2570   :  { %v11842_v21 = vpop.permute.xlu2 %5215 }
0x2571   :  { %14515 = vst [vmem:[#allocation150_spill] sm:$0xff] %v11842_v21 }
0x25a2   :  { %v11844_v14 = vpop.permute.xlu2 %5248 }
0x25a3   :  { %14516 = vst [vmem:[#allocation155_spill] sm:$0xff] %v11844_v14 }
0x25aa   :  { %v11846_v24 = vpop.permute.xlu2 %5254 }
0x25ab   :  { %14517 = vst [vmem:[#allocation152_spill] sm:$0xff] %v11846_v24 }
0x25b2   :  { %v5281_v7 = vpop.permute.xlu2 %5280 }
0x25b3   :  { %v5288_v53 = vmul.f32 %v11404_v8, %v5281_v7  ;;  %v5289_v36 = vmul.f32 %v11563_v62, %v5281_v7  ;;  %v5290_v30 = vmul.f32 %v11566_v56, %v5281_v7  ;;  %v7708_v7 = vld [vmem:[%s13796_s1 + $0x198] sm:$0xff] }
0x25b5   :  { %5304 = vrot.lane.b32.xlu1 %v5290_v30, %s7953_s26  ;;  %5302 = vrot.lane.b32.xlu2 %v5289_v36, %s7953_s26  ;;  %v7707_v30 = vld [vmem:[%s13796_s1 + $0x190] sm:$0xff] }
0x25b6   :  { %5300 = vrot.lane.b32.xlu0 %v5288_v53, %s7953_s26 }
0x25ba   :  { %v11870_v53 = vpop.permute.xlu0 %5252 }
0x25bb   :  { %v11854_v35 = vpop.permute.xlu1 %5250  ;;  %14520 = vst [vmem:[#allocation30_spill] sm:$0xff] %v11870_v53 }
0x25bc   :  { %14518 = vst [vmem:[#allocation21_spill] sm:$0xff] %v11854_v35 }
0x25c2   :  { %v11872_v36 = vpop.permute.xlu0 %5258 }
0x25c3   :  { %v11856_v46 = vpop.permute.xlu1 %5256  ;;  %14521 = vst [vmem:[#allocation33_spill] sm:$0xff] %v11872_v36 }
0x25c4   :  { %14519 = vst [vmem:[#allocation22_spill] sm:$0xff] %v11856_v46 }
0x25cb   :  { %v5286_v16 = vpop.permute.xlu1 %5285 }
0x25cc   :  { %v5291_v54 = vmul.f32 %v11576_v47, %v5286_v16  ;;  %v5292_v55 = vmul.f32 %v11412_v42, %v5286_v16  ;;  %v5293_v17 = vmul.f32 %v11580_v4, %v5286_v16 }
0x25ce   :  { %5310 = vrot.lane.b32.xlu1 %v5293_v17, %s7953_s26  ;;  %5308 = vrot.lane.b32.xlu2 %v5292_v55, %s7953_s26 }
0x25cf   :  { %5306 = vrot.lane.b32.xlu0 %v5291_v54, %s7953_s26 }
0x25d6   :  { %5337 = vperm.xlu2 %7797, %v7708_v7  }
0x25d7   :  { %5332 = vperm.xlu0 %7798, %v7707_v30  }
0x260f   :  { %v11876_v17 = vpop.permute.xlu2 %5302 }
0x2610   :  { %14523 = vst [vmem:[#allocation153_spill] sm:$0xff] %v11876_v17 }
0x2628   :  { %v11874_v16 = vpop.permute.xlu0 %5300  ;;  %v11880_v54 = vpop.permute.xlu2 %5308 }
0x2629   :  { %14522 = vst [vmem:[#allocation151_spill] sm:$0xff] %v11874_v16 }
0x262a   :  { %14525 = vst [vmem:[#allocation165_spill] sm:$0xff] %v11880_v54 }
0x2630   :  { %v5338_v30 = vpop.permute.xlu2 %5337 }
0x2631   :  { %v5344_v10 = vmul.f32 %v11412_v42, %v5338_v30  ;;  %v5345_v36 = vmul.f32 %v11580_v4, %v5338_v30  ;;  %v5343_v53 = vmul.f32 %v11576_v47, %v5338_v30 }
0x2641   :  { %v11878_v55 = vpop.permute.xlu0 %5306 }
0x2642   :  { %14524 = vst [vmem:[#allocation164_spill] sm:$0xff] %v11878_v55 }
0x2649   :  { %v5333_v39 = vpop.permute.xlu0 %5332 }
0x264a   :  { %v5340_v52 = vmul.f32 %v11404_v8, %v5333_v39  ;;  %v5341_v18 = vmul.f32 %v11563_v62, %v5333_v39  ;;  %v5342_v7 = vmul.f32 %v11566_v56, %v5333_v39  ;;  %v7710_v39 = vld [vmem:[%s13796_s1 + $0x208] sm:$0xff] }
0x264c   :  { %5356 = vrot.lane.b32.xlu2 %v5342_v7, %s7952_s25  ;;  %5354 = vrot.lane.b32.xlu0 %v5341_v18, %s7952_s25  ;;  %v11900_v18 = vpop.permute.xlu1 %5304 }
0x264d   :  { %5352 = vrot.lane.b32.xlu1 %v5340_v52, %s7952_s25  ;;  %v7709_v52 = vld [vmem:[%s13796_s1 + $0x200] sm:$0xff]  ;;  %14526 = vst [vmem:[#allocation166_spill] sm:$0xff] %v11900_v18 }
0x2654   :  { %5362 = vrot.lane.b32.xlu2 %v5345_v36, %s7952_s25  ;;  %5360 = vrot.lane.b32.xlu0 %v5344_v10, %s7952_s25  ;;  %v11902_v7 = vpop.permute.xlu1 %5310 }
0x2655   :  { %5358 = vrot.lane.b32.xlu1 %v5343_v53, %s7952_s25  ;;  %14527 = vst [vmem:[#allocation167_spill] sm:$0xff] %v11902_v7 }
0x265c   :  { %5389 = vperm.xlu0 %7798, %v7710_v39  }
0x265d   :  { %5384 = vperm.xlu1 %7799, %v7709_v52  }
0x26be   :  { %v11906_v36 = vpop.permute.xlu0 %5354 }
0x26bf   :  { %v11904_v30 = vpop.permute.xlu1 %5352  ;;  %14529 = vst [vmem:[#allocation169_spill] sm:$0xff] %v11906_v36 }
0x26c0   :  { %14528 = vst [vmem:[#allocation168_spill] sm:$0xff] %v11904_v30 }
0x26c6   :  { %v11910_v53 = vpop.permute.xlu0 %5360 }
0x26c7   :  { %v11908_v10 = vpop.permute.xlu1 %5358  ;;  %14531 = vst [vmem:[#allocation171_spill] sm:$0xff] %v11910_v53 }
0x26c8   :  { %14530 = vst [vmem:[#allocation170_spill] sm:$0xff] %v11908_v10 }
0x26ce   :  { %v5390_v52 = vpop.permute.xlu0 %5389 }
0x26cf   :  { %v5385_v55 = vpop.permute.xlu1 %5384  ;;  %v5396_v7 = vmul.f32 %v11412_v42, %v5390_v52  ;;  %v5397_v18 = vmul.f32 %v11580_v4, %v5390_v52  ;;  %v5395_v10 = vmul.f32 %v11576_v47, %v5390_v52  ;;  %v7735_v52 = vld [vmem:[%s13796_s1 + $0x140] sm:$0xff] }
0x26d0   :  { %v5392_v54 = vmul.f32 %v11404_v8, %v5385_v55  ;;  %v5393_v21 = vmul.f32 %v11563_v62, %v5385_v55  ;;  %v5394_v39 = vmul.f32 %v11566_v56, %v5385_v55  ;;  %v7719_v55 = vld [vmem:[%s13796_s1 + $0xc8] sm:$0xff] }
0x26d2   :  { %5408 = vrot.lane.b32.xlu0 %v5394_v39, %s7954_s27  ;;  %5406 = vrot.lane.b32.xlu1 %v5393_v21, %s7954_s27  ;;  %v7718_v21 = vld [vmem:[%s13796_s1 + $0xc0] sm:$0xff]  ;;  %v7736_v39 = vld [vmem:[%s13796_s1 + $0x148] sm:$0xff] }
0x26d3   :  { %5404 = vrot.lane.b32.xlu2 %v5392_v54, %s7954_s27  ;;  %v7711_v54 = vld [vmem:[%s13796_s1 + $0x270] sm:$0xff] }
0x26da   :  { %5414 = vrot.lane.b32.xlu0 %v5397_v18, %s7954_s27  ;;  %5412 = vrot.lane.b32.xlu1 %v5396_v7, %s7954_s27  ;;  %v7720_v18 = vld [vmem:[%s13796_s1 + $0x130] sm:$0xff]  ;;  %v7734_v7 = vld [vmem:[%s13796_s1 + $0xd8] sm:$0xff] }
0x26db   :  { %5410 = vrot.lane.b32.xlu2 %v5395_v10, %s7954_s27  ;;  %v7733_v10 = vld [vmem:[%s13796_s1 + $0xd0] sm:$0xff] }
0x26e2   :  { %5611 = vperm.xlu0 %7798, %v7719_v55   ;;  %5606 = vperm.xlu1 %7799, %v7718_v21   ;;  %v7721_v55 = vld [vmem:[%s13796_s1 + $0x138] sm:$0xff]  ;;  %v7737_v21 = vld [vmem:[%s13796_s1 + $0x1b0] sm:$0xff] }
0x26e3   :  { %5436 = vperm.xlu2 %7797, %v7711_v54   ;;  %v7723_v54 = vld [vmem:[%s13796_s1 + $0x1a8] sm:$0xff] }
0x26ea   :  { %5658 = vperm.xlu0 %7798, %v7720_v18   ;;  %5993 = vperm.xlu1 %7799, %v7734_v7   ;;  %v7722_v18 = vld [vmem:[%s13796_s1 + $0x1a0] sm:$0xff]  ;;  %v7725_v7 = vld [vmem:[%s13796_s1 + $0x218] sm:$0xff] }
0x26eb   :  { %5988 = vperm.xlu2 %7797, %v7733_v10   ;;  %v7724_v10 = vld [vmem:[%s13796_s1 + $0x210] sm:$0xff] }
0x26f2   :  { %6045 = vperm.xlu0 %7798, %v7736_v39   ;;  %6040 = vperm.xlu1 %7799, %v7735_v52   ;;  %v7738_v39 = vld [vmem:[%s13796_s1 + $0x1b8] sm:$0xff]  ;;  %v7726_v52 = vld [vmem:[%s13796_s1 + $0x280] sm:$0xff] }
0x26f3   :  { %5663 = vperm.xlu2 %7797, %v7721_v55   ;;  %v7740_v55 = vld [vmem:[%s13796_s1 + $0x228] sm:$0xff] }
0x26fa   :  { %6092 = vperm.xlu0 %7798, %v7737_v21   ;;  %5715 = vperm.xlu1 %7799, %v7723_v54   ;;  %v7739_v21 = vld [vmem:[%s13796_s1 + $0x220] sm:$0xff]  ;;  %v7742_v54 = vld [vmem:[%s13796_s1 + $0x298] sm:$0xff] }
0x26fb   :  { %5710 = vperm.xlu2 %7797, %v7722_v18   ;;  %v7741_v18 = vld [vmem:[%s13796_s1 + $0x290] sm:$0xff] }
0x2702   :  { %5767 = vperm.xlu0 %7798, %v7725_v7   ;;  %5762 = vperm.xlu1 %7799, %v7724_v10   ;;  %v7727_v7 = vld [vmem:[%s13796_s1 + $0x288] sm:$0xff]  ;;  %v7743_v10 = vld [vmem:[%s13796_s1 + $0x300] sm:$0xff] }
0x2703   :  { %6097 = vperm.xlu2 %7797, %v7738_v39   ;;  %v7729_v39 = vld [vmem:[%s13796_s1 + $0x2f8] sm:$0xff] }
0x270a   :  { %5814 = vperm.xlu0 %7798, %v7726_v52   ;;  %6149 = vperm.xlu1 %7799, %v7740_v55   ;;  %v7728_v52 = vld [vmem:[%s13796_s1 + $0x2f0] sm:$0xff]  ;;  %v7717_v55 = vld [vmem:[%s13796_s1 + $0x58] sm:$0xff] }
0x270b   :  { %6144 = vperm.xlu2 %7797, %v7739_v21   ;;  %v7716_v21 = vld [vmem:[%s13796_s1 + $0x50] sm:$0xff] }
0x2712   :  { %6201 = vperm.xlu0 %7798, %v7742_v54   ;;  %6196 = vperm.xlu1 %7799, %v7741_v18   ;;  %v7744_v54 = vld [vmem:[%s13796_s1 + $0x308] sm:$0xff] }
0x2713   :  { %5819 = vperm.xlu2 %7797, %v7727_v7   ;;  %v7732_v18 = vld [vmem:[%s13796_s1 + $0x68] sm:$0xff]  ;;  %v7731_v7 = vld [vmem:[%s13796_s1 + $0x60] sm:$0xff] }
0x271a   :  { %6248 = vperm.xlu0 %7798, %v7743_v10   ;;  %5871 = vperm.xlu1 %7799, %v7729_v39   ;;  %v12011_v10 = vpop.permute.xlu2 %5356 }
0x271b   :  { %5866 = vperm.xlu2 %7797, %v7728_v52   ;;  %14532 = vst [vmem:[#allocation172_spill] sm:$0xff] %v12011_v10 }
0x2722   :  { %5593 = vperm.xlu0 %7798, %v7717_v55   ;;  %5588 = vperm.xlu1 %7799, %v7716_v21   ;;  %v12013_v39 = vpop.permute.xlu2 %5362 }
0x2723   :  { %6253 = vperm.xlu2 %7797, %v7744_v54   ;;  %14533 = vst [vmem:[#allocation173_spill] sm:$0xff] %v12013_v39 }
0x272a   :  { %5975 = vperm.xlu1 %7799, %v7732_v18  }
0x272b   :  { %5970 = vperm.xlu2 %7797, %v7731_v7  }
0x272d   :  { %v12015_v52 = vpop.permute.xlu2 %5404 }
0x272e   :  { %14534 = vst [vmem:[#allocation174_spill] sm:$0xff] %v12015_v52 }
0x2735   :  { %v12019_v55 = vpop.permute.xlu2 %5410 }
0x2736   :  { %14536 = vst [vmem:[#allocation176_spill] sm:$0xff] %v12019_v55 }
0x273d   :  { %v12025_v24 = vpop.permute.xlu2 %5436 }
0x2744   :  { %v12017_v53 = vpop.permute.xlu1 %5406  ;;  %v12021_v21 = vpop.permute.xlu0 %5408 }
0x2745   :  { %14535 = vst [vmem:[#allocation175_spill] sm:$0xff] %v12017_v53 }
0x2746   :  { %14537 = vst [vmem:[#allocation177_spill] sm:$0xff] %v12021_v21  ;;  %v5989_v21 = vpop.permute.xlu2 %5988 }
0x274c   :  { %v12023_v54 = vpop.permute.xlu1 %5412  ;;  %v12027_v46 = vpop.permute.xlu0 %5414 }
0x274d   :  { %14538 = vst [vmem:[#allocation178_spill] sm:$0xff] %v12023_v54 }
0x274e   :  { %14539 = vst [vmem:[#allocation179_spill] sm:$0xff] %v12027_v46 }
0x2754   :  { %v5607_v30 = vpop.permute.xlu1 %5606  ;;  %v5612_v10 = vpop.permute.xlu0 %5611 }
0x2755   :  { %v5614_v18 = vmul.f32 %v11404_v8, %v5607_v30  ;;  %v5615_v7 = vmul.f32 %v11563_v62, %v5607_v30  ;;  %v5616_v39 = vmul.f32 %v11566_v56, %v5607_v30  ;;  %v5617_v55 = vmul.f32 %v11576_v47, %v5612_v10  ;;  %v5664_v30 = vpop.permute.xlu2 %5663 }
0x2756   :  { %v5618_v54 = vmul.f32 %v11412_v42, %v5612_v10  ;;  %v5619_v46 = vmul.f32 %v11580_v4, %v5612_v10 }
0x2757   :  { %5626 = vrot.lane.b32.xlu0 %v5614_v18, %s7951_s24  ;;  %5630 = vrot.lane.b32.xlu1 %v5616_v39, %s7951_s24  ;;  %v5996_v18 = vmul.f32 %v11404_v8, %v5989_v21  ;;  %v5997_v39 = vmul.f32 %v11563_v62, %v5989_v21 }
0x2758   :  { %5628 = vrot.lane.b32.xlu2 %v5615_v7, %s7951_s24  ;;  %v5998_v7 = vmul.f32 %v11566_v56, %v5989_v21 }
0x275c   :  { %v5994_v10 = vpop.permute.xlu1 %5993  ;;  %v5659_v21 = vpop.permute.xlu0 %5658 }
0x275d   :  { %v5711_v52 = vpop.permute.xlu2 %5710 }
0x275f   :  { %5632 = vrot.lane.b32.xlu0 %v5617_v55, %s7951_s24  ;;  %5636 = vrot.lane.b32.xlu1 %v5619_v46, %s7951_s24  ;;  %v5999_v55 = vmul.f32 %v11576_v47, %v5994_v10  ;;  %v6000_v46 = vmul.f32 %v11412_v42, %v5994_v10 }
0x2760   :  { %5634 = vrot.lane.b32.xlu2 %v5618_v54, %s7951_s24  ;;  %v6001_v54 = vmul.f32 %v11580_v4, %v5994_v10 }
0x2764   :  { %v6041_v10 = vpop.permute.xlu1 %6040 }
0x2765   :  { %v6098_v53 = vpop.permute.xlu2 %6097  ;;  %v6050_v36 = vmul.f32 %v11566_v56, %v6041_v10 }
0x2766   :  { %v6105_v59 = vmul.f32 %v11580_v4, %v6098_v53 }
0x2767   :  { %6008 = vrot.lane.b32.xlu0 %v5996_v18, %s7951_s24  ;;  %6012 = vrot.lane.b32.xlu1 %v5998_v7, %s7951_s24  ;;  %v5666_v18 = vmul.f32 %v11404_v8, %v5659_v21  ;;  %v5667_v7 = vmul.f32 %v11563_v62, %v5659_v21 }
0x2768   :  { %6010 = vrot.lane.b32.xlu2 %v5997_v39, %s7951_s24  ;;  %v5668_v39 = vmul.f32 %v11566_v56, %v5659_v21  ;;  %v6046_v21 = vpop.permute.xlu0 %6045 }
0x2769   :  { %v6053_v16 = vmul.f32 %v11580_v4, %v6046_v21 }
0x276d   :  { %v12065_v8 = vpop.permute.xlu2 %6144 }
0x276e   :  { %v6153_v34 = vmul.f32 %v11563_v62, %v12065_v8 }
0x276f   :  { %6014 = vrot.lane.b32.xlu0 %v5999_v55, %s7951_s24  ;;  %6018 = vrot.lane.b32.xlu1 %v6001_v54, %s7951_s24  ;;  %v5669_v55 = vmul.f32 %v11576_v47, %v5664_v30  ;;  %v5670_v54 = vmul.f32 %v11412_v42, %v5664_v30  ;;  %v5716_v42 = vpop.permute.xlu1 %5715 }
0x2770   :  { %6016 = vrot.lane.b32.xlu2 %v6000_v46, %s7951_s24  ;;  %v5671_v46 = vmul.f32 %v11580_v4, %v5664_v30  ;;  %v6093_v17 = vpop.permute.xlu0 %6092  ;;  %v5723_v14 = vmul.f32 %v11580_v4, %v5716_v42 }
0x2771   :  { %v6102_v15 = vmul.f32 %v11566_v56, %v6093_v17 }
0x2775   :  { %v12075_v30 = vpop.permute.xlu2 %5819 }
0x2776   :  { %v5825_v11 = vmul.f32 %v11576_v47, %v12075_v30 }
0x2777   :  { %5678 = vrot.lane.b32.xlu0 %v5666_v18, %s7953_s26  ;;  %5682 = vrot.lane.b32.xlu1 %v5668_v39, %s7953_s26  ;;  %v12067_v18 = vld [vmem:[#allocation2 + $0x30] sm:$0xff]  ;;  %v6049_v39 = vmul.f32 %v11563_v62, %v6041_v10 }
0x2778   :  { %5680 = vrot.lane.b32.xlu2 %v5667_v7, %s7953_s26  ;;  %v6048_v7 = vmul.f32 %v12067_v18, %v6041_v10  ;;  %v5763_v10 = vpop.permute.xlu1 %5762 }
0x277d   :  { %v12088_v6 = vpop.permute.xlu2 %5866 }
0x277e   :  { %v5874_v44 = vmul.f32 %v12067_v18, %v12088_v6 }
0x277f   :  { %5684 = vrot.lane.b32.xlu0 %v5669_v55, %s7953_s26  ;;  %5688 = vrot.lane.b32.xlu1 %v5671_v46, %s7953_s26  ;;  %v6051_v55 = vmul.f32 %v11576_v47, %v6046_v21 }
0x2780   :  { %5686 = vrot.lane.b32.xlu2 %v5670_v54, %s7953_s26  ;;  %v12078_v54 = vld [vmem:[#allocation2 + $0x50] sm:$0xff] }
0x2781   :  { %v6052_v46 = vmul.f32 %v12078_v54, %v6046_v21  ;;  %v5768_v21 = vpop.permute.xlu0 %5767  ;;  %v5826_v20 = vmul.f32 %v12078_v54, %v12075_v30 }
0x2782   :  { %v5775_v28 = vmul.f32 %v11580_v4, %v5768_v21 }
0x2785   :  { %v12097_v35 = vpop.permute.xlu2 %6253 }
0x2787   :  { %6060 = vrot.lane.b32.xlu0 %v6048_v7, %s7953_s26  ;;  %6064 = vrot.lane.b32.xlu1 %v6050_v36, %s7953_s26  ;;  %v5718_v36 = vmul.f32 %v12067_v18, %v5711_v52  ;;  %v5719_v7 = vmul.f32 %v11563_v62, %v5711_v52 }
0x2788   :  { %6062 = vrot.lane.b32.xlu2 %v6049_v39, %s7953_s26  ;;  %v5720_v39 = vmul.f32 %v11566_v56, %v5711_v52 }
0x2789   :  { %v12101_v52 = vpop.permute.xlu0 %5814 }
0x278a   :  { %v5822_v2 = vmul.f32 %v12067_v18, %v12101_v52  ;;  %v5824_v19 = vmul.f32 %v11566_v56, %v12101_v52 }
0x278f   :  { %6066 = vrot.lane.b32.xlu0 %v6051_v55, %s7953_s26  ;;  %6070 = vrot.lane.b32.xlu1 %v6053_v16, %s7953_s26  ;;  %v6150_v55 = vpop.permute.xlu1 %6149  ;;  %v5721_v16 = vmul.f32 %v11576_v47, %v5716_v42 }
0x2790   :  { %6068 = vrot.lane.b32.xlu2 %v6052_v46, %s7953_s26  ;;  %v5722_v46 = vmul.f32 %v12078_v54, %v5716_v42  ;;  %v12111_v42 = vpop.permute.xlu2 %5970  ;;  %v6155_v5 = vmul.f32 %v11576_v47, %v6150_v55  ;;  %v6156_v50 = vmul.f32 %v12078_v54, %v6150_v55  ;;  %v6157_v9 = vmul.f32 %v11580_v4, %v6150_v55  ;;  %s7970_s26 = smov 16  }
0x2791   :  { %v5823_v55 = vmul.f32 %v11563_v62, %v12101_v52  ;;  %v5827_v52 = vmul.f32 %v11580_v4, %v12075_v30 }
0x2797   :  { %5730 = vrot.lane.b32.xlu0 %v5718_v36, %s7952_s25  ;;  %5734 = vrot.lane.b32.xlu1 %v5720_v39, %s7952_s25  ;;  %v12103_v36 = vpop.permute.xlu1 %6196  ;;  %v6101_v39 = vmul.f32 %v11563_v62, %v6093_v17 }
0x2798   :  { %5732 = vrot.lane.b32.xlu2 %v5719_v7, %s7952_s25  ;;  %v6100_v7 = vmul.f32 %v12067_v18, %v6093_v17  ;;  %v5770_v17 = vmul.f32 %v12067_v18, %v5763_v10  ;;  %v6204_v49 = vmul.f32 %v12067_v18, %v12103_v36 }
0x279f   :  { %5736 = vrot.lane.b32.xlu0 %v5721_v16, %s7952_s25  ;;  %5740 = vrot.lane.b32.xlu1 %v5723_v14, %s7952_s25  ;;  %v6103_v14 = vmul.f32 %v11576_v47, %v6098_v53  ;;  %v12114_v16 = vpop.permute.xlu0 %6201  ;;  %v12118_v61 = vpop.permute.xlu1 %5871 }
0x27a0   :  { %5738 = vrot.lane.b32.xlu2 %v5722_v46, %s7952_s25  ;;  %v6104_v46 = vmul.f32 %v12078_v54, %v6098_v53  ;;  %v6207_v30 = vmul.f32 %v11576_v47, %v12114_v16 }
0x27a7   :  { %6112 = vrot.lane.b32.xlu0 %v6100_v7, %s7952_s25  ;;  %6116 = vrot.lane.b32.xlu1 %v6102_v15, %s7952_s25  ;;  %v5771_v7 = vmul.f32 %v11563_v62, %v5763_v10  ;;  %v12128_v41 = vpop.permute.xlu0 %6248  ;;  %v12131_v53 = vpop.permute.xlu1 %5588 }
0x27a8   :  { %6114 = vrot.lane.b32.xlu2 %v6101_v39, %s7952_s25  ;;  %v5772_v39 = vmul.f32 %v11566_v56, %v5763_v10 }
0x27af   :  { %6118 = vrot.lane.b32.xlu0 %v6103_v14, %s7952_s25  ;;  %6122 = vrot.lane.b32.xlu1 %v6105_v59, %s7952_s25  ;;  %v5773_v14 = vmul.f32 %v11576_v47, %v5768_v21  ;;  %v12143_v10 = vpop.permute.xlu0 %5593 }
0x27b0   :  { %6120 = vrot.lane.b32.xlu2 %v6104_v46, %s7952_s25  ;;  %v5774_v46 = vmul.f32 %v12078_v54, %v5768_v21  ;;  %v6154_v21 = vmul.f32 %v11566_v56, %v12065_v8  ;;  %s7498_s25 = sshll.u32 %s13804_s9, 4  ;;  %s7499_s25 = int_to_ptr.hbm [resolvable:$true] %s7498_s25 }
0x27b2   :  { %v12123_v15 = vpop.permute.xlu2 %5628 }
0x27b7   :  { %5782 = vrot.lane.b32.xlu0 %v5770_v17, %s7954_s27  ;;  %5786 = vrot.lane.b32.xlu1 %v5772_v39, %s7954_s27  ;;  %v12145_v17 = vpop.permute.xlu1 %5975 }
0x27b8   :  { %5784 = vrot.lane.b32.xlu2 %v5771_v7, %s7954_s27  ;;  %v6152_v7 = vmul.f32 %v12067_v18, %v12065_v8 }
0x27ba   :  { %v12135_v59 = vpop.permute.xlu2 %5634 }
0x27bf   :  { %5788 = vrot.lane.b32.xlu0 %v5773_v14, %s7954_s27  ;;  %5792 = vrot.lane.b32.xlu1 %v5775_v28, %s7954_s27 }
0x27c0   :  { %5790 = vrot.lane.b32.xlu2 %v5774_v46, %s7954_s27 }
0x27c2   :  { %v12147_v39 = vpop.permute.xlu2 %6010 }
0x27c7   :  { %6164 = vrot.lane.b32.xlu0 %v6152_v7, %s7954_s27  ;;  %6168 = vrot.lane.b32.xlu1 %v6154_v21, %s7954_s27  ;;  %v7712_v21 = vld [vmem:[%s13796_s1 + $0x278] sm:$0xff] }
0x27c8   :  { %6166 = vrot.lane.b32.xlu2 %v6153_v34, %s7954_s27 }
0x27c9   :  { %v12158_v28 = vpop.permute.xlu0 %5626  ;;  %v12160_v14 = vpop.permute.xlu1 %5630 }
0x27ca   :  { %v6017_v46 = vpop.permute.xlu2 %6016 }
0x27cf   :  { %6170 = vrot.lane.b32.xlu0 %v6155_v5, %s7954_s27  ;;  %6174 = vrot.lane.b32.xlu1 %v6157_v9, %s7954_s27 }
0x27d0   :  { %6172 = vrot.lane.b32.xlu2 %v6156_v50, %s7954_s27 }
0x27d1   :  { %v12168_v8 = vpop.permute.xlu0 %5632  ;;  %v12170_v34 = vpop.permute.xlu1 %5636 }
0x27d2   :  { %v5681_v7 = vpop.permute.xlu2 %5680 }
0x27d7   :  { %5441 = vperm.xlu0 %7798, %v7712_v21   ;;  %5836 = vrot.lane.b32.xlu1 %v5823_v55, %s7955_s28 }
0x27d8   :  { %5834 = vrot.lane.b32.xlu2 %v5822_v2, %s7955_s28 }
0x27d9   :  { %v12181_v5 = vpop.permute.xlu0 %6008  ;;  %v6013_v50 = vpop.permute.xlu1 %6012 }
0x27da   :  { %v5687_v9 = vpop.permute.xlu2 %5686 }
0x27df   :  { %5838 = vrot.lane.b32.xlu0 %v5824_v19, %s7955_s28  ;;  %5842 = vrot.lane.b32.xlu1 %v5826_v20, %s7955_s28  ;;  %v6205_v19 = vmul.f32 %v11563_v62, %v12103_v36  ;;  %v6206_v62 = vmul.f32 %v11566_v56, %v12103_v36  ;;  %v12232_v56 = vld [vmem:[#allocation2 + $0x58] sm:$0xff] }
0x27e0   :  { %5840 = vrot.lane.b32.xlu2 %v5825_v11, %s7955_s28  ;;  %v6209_v36 = vmul.f32 %v12232_v56, %v12114_v16 }
0x27e1   :  { %v6015_v2 = vpop.permute.xlu0 %6014  ;;  %v6019_v21 = vpop.permute.xlu1 %6018 }
0x27e2   :  { %v6022_v55 = vsel %vm130_vm2, %v6015_v2, %v6017_v46  ;;  %v6063_v0 = vpop.permute.xlu2 %6062  ;;  %v6023_v37 = vsel %vm130_vm2, %v6017_v46, %v6019_v21 }
0x27e7   :  { %5844 = vrot.lane.b32.xlu0 %v5827_v52, %s7955_s28  ;;  %6218 = vrot.lane.b32.xlu1 %v6205_v19, %s7955_s28 }
0x27e8   :  { %6216 = vrot.lane.b32.xlu2 %v6204_v49, %s7955_s28  ;;  %v6208_v49 = vmul.f32 %v12078_v54, %v12114_v16  ;;  %v5979_v16 = vmul.f32 %v12249_v38, %v12111_v42 }
0x27e9   :  { %v5679_v11 = vpop.permute.xlu0 %5678  ;;  %v12203_v20 = vpop.permute.xlu1 %5682 }
0x27ea   :  { %v12206_v46 = vsel %vm180_vm3, %v5679_v11, %v5681_v7  ;;  %v6069_v2 = vpop.permute.xlu2 %6068  ;;  %v12210_v4 = vsel %vm180_vm3, %v5681_v7, %v12203_v20 }
0x27ef   :  { %6220 = vrot.lane.b32.xlu0 %v6206_v62, %s7955_s28  ;;  %6224 = vrot.lane.b32.xlu1 %v6208_v49, %s7955_s28  ;;  %v7714_v62 = vld [vmem:[%s13796_s1 + $0x2e8] sm:$0xff]  ;;  %v12242_v49 = vld [vmem:[#allocation2 + $0x40] sm:$0xff] }
0x27f0   :  { %6222 = vrot.lane.b32.xlu2 %v6207_v30, %s7955_s28  ;;  %v7713_v30 = vld [vmem:[%s13796_s1 + $0x2e0] sm:$0xff] }
0x27f1   :  { %v5685_v52 = vpop.permute.xlu0 %5684  ;;  %v12221_v19 = vpop.permute.xlu1 %5688 }
0x27f2   :  { %v12224_v7 = vsel %vm180_vm3, %v5685_v52, %v5687_v9  ;;  %v12226_v11 = vpop.permute.xlu2 %5732  ;;  %v12230_v47 = vsel %vm180_vm3, %v5687_v9, %v12221_v19  ;;  %v5980_v52 = vmul.f32 %v12242_v49, %v12111_v42  ;;  %v6021_v9 = vsel %vm130_vm2, %v12147_v39, %v6013_v50 }
0x27f3   :  { %v6031_v27 = vadd.f32 %v6021_v9, %v5979_v16 }
0x27f4   :  { %v6032_v51 = vadd.f32 %v6013_v50, %v5980_v52  ;;  %v5875_v50 = vmul.f32 %v12249_v38, %v12088_v6 }
0x27f7   :  { %6226 = vrot.lane.b32.xlu0 %v6209_v36, %s7955_s28  ;;  %5493 = vperm.xlu1 %7799, %v7714_v62   ;;  %v5876_v62 = vmul.f32 %v12242_v49, %v12088_v6 }
0x27f8   :  { %5488 = vperm.xlu2 %7797, %v7713_v30   ;;  %v12271_v30 = vld [vmem:[#allocation2 + $0x48] sm:$0xff] }
0x27f9   :  { %v6061_v23 = vpop.permute.xlu0 %6060  ;;  %v6065_v58 = vpop.permute.xlu1 %6064 }
0x27fa   :  { %v12254_v26 = vsel %vm180_vm3, %v6061_v23, %v6063_v0  ;;  %v12256_v1 = vpop.permute.xlu2 %5738  ;;  %v6073_v25 = vsel %vm180_vm3, %v6063_v0, %v6065_v58  ;;  %v12259_v22 = vadd.f32 %v6065_v58, %v6032_v51  ;;  %v5983_v23 = vmul.f32 %v12232_v56, %v12145_v17 }
0x27fb   :  { %v12261_v36 = vadd.f32 %v6073_v25, %v6031_v27  ;;  %v5981_v51 = vmul.f32 %v12271_v30, %v12145_v17  ;;  %v5982_v25 = vmul.f32 %v12078_v54, %v12145_v17  ;;  %v5638_v17 = vsel %vm130_vm2, %v12158_v28, %v12123_v15 }
0x27fc   :  { %v6035_v27 = vadd.f32 %v6019_v21, %v5983_v23  ;;  %v5596_v21 = vmul.f32 %v12067_v18, %v12131_v53  ;;  %v5597_v28 = vmul.f32 %v12249_v38, %v12131_v53 }
0x27fd   :  { %v6033_v58 = vadd.f32 %v6022_v55, %v5981_v51  ;;  %v6034_v0 = vadd.f32 %v6023_v37, %v5982_v25  ;;  %v5877_v37 = vmul.f32 %v12271_v30, %v12118_v61  ;;  %v5598_v55 = vmul.f32 %v12242_v49, %v12131_v53 }
0x27fe   :  { %v5648_v23 = vadd.f32 %v5638_v17, %v5596_v21  ;;  %v5599_v17 = vmul.f32 %v12271_v30, %v12143_v10  ;;  %v6257_v21 = vmul.f32 %v12249_v38, %v12128_v41 }
0x27ff   :  { %5886 = vrot.lane.b32.xlu0 %v5874_v44, %s7956_s10  ;;  %5890 = vrot.lane.b32.xlu1 %v5876_v62, %s7956_s10  ;;  %v5878_v62 = vmul.f32 %v12078_v54, %v12118_v61  ;;  %v5650_v51 = vadd.f32 %v12160_v14, %v5598_v55  ;;  %v5600_v55 = vmul.f32 %v12078_v54, %v12143_v10 }
0x2800   :  { %5888 = vrot.lane.b32.xlu2 %v5875_v50, %s7956_s10 }
0x2801   :  { %v6067_v6 = vpop.permute.xlu0 %6066  ;;  %v6071_v52 = vpop.permute.xlu1 %6070 }
0x2802   :  { %v6074_v9 = vsel %vm180_vm3, %v6067_v6, %v6069_v2  ;;  %v12281_v16 = vpop.permute.xlu2 %6114  ;;  %v6075_v33 = vsel %vm180_vm3, %v6069_v2, %v6071_v52  ;;  %v12284_v57 = vadd.f32 %v6071_v52, %v6035_v27  ;;  %v5639_v2 = vsel %vm130_vm2, %v12123_v15, %v12160_v14 }
0x2803   :  { %v12286_v44 = vadd.f32 %v6074_v9, %v6033_v58  ;;  %v12291_v50 = vadd.f32 %v6075_v33, %v6034_v0  ;;  %v5879_v33 = vmul.f32 %v12232_v56, %v12118_v61  ;;  %v5649_v25 = vadd.f32 %v5639_v2, %v5597_v28 }
0x2804   :  { %v5702_v15 = vadd.f32 %v12203_v20, %v5650_v51  ;;  %v5700_v27 = vadd.f32 %v12206_v46, %v5648_v23  ;;  %v5640_v20 = vsel %vm130_vm2, %v12168_v8, %v12135_v59  ;;  %v6258_v8 = vmul.f32 %v12242_v49, %v12128_v41 }
0x2805   :  { %v5701_v61 = vadd.f32 %v12210_v4, %v5649_v25  ;;  %v6256_v4 = vmul.f32 %v12067_v18, %v12128_v41  ;;  %v5651_v2 = vadd.f32 %v5640_v20, %v5599_v17 }
0x2807   :  { %5892 = vrot.lane.b32.xlu0 %v5877_v37, %s7956_s10  ;;  %5896 = vrot.lane.b32.xlu1 %v5879_v33, %s7956_s10  ;;  %v5601_v37 = vmul.f32 %v12232_v56, %v12143_v10  ;;  %v5703_v28 = vadd.f32 %v12224_v7, %v5651_v2  ;;  %v6259_v7 = vmul.f32 %v12271_v30, %v12097_v35 }
0x2808   :  { %5894 = vrot.lane.b32.xlu2 %v5878_v62, %s7956_s10 }
0x2809   :  { %v5731_v58 = vpop.permute.xlu0 %5730  ;;  %v5735_v6 = vpop.permute.xlu1 %5734  ;;  %v5653_v62 = vadd.f32 %v12170_v34, %v5601_v37 }
0x280a   :  { %v5742_v53 = vsel %vm230_vm4, %v5731_v58, %v12226_v11  ;;  %v6121_v0 = vpop.permute.xlu2 %6120  ;;  %v5743_v14 = vsel %vm230_vm4, %v12226_v11, %v5735_v6  ;;  %v12319_v52 = vadd.f32 %v5735_v6, %v5702_v15  ;;  %v5641_v11 = vsel %vm130_vm2, %v12135_v59, %v12170_v34 }
0x280b   :  { %v12321_v9 = vadd.f32 %v5742_v53, %v5700_v27  ;;  %v12326_v46 = vadd.f32 %v5743_v14, %v5701_v61  ;;  %v5652_v33 = vadd.f32 %v5641_v11, %v5600_v55  ;;  %v5705_v59 = vadd.f32 %v12221_v19, %v5653_v62  ;;  %v7745_v53 = vld [vmem:[%s13797_s2 + $0xc] sm:$0x3] }
0x280c   :  { %v6020_v58 = vsel %vm130_vm2, %v12181_v5, %v12147_v39  ;;  %v6260_v61 = vmul.f32 %v12078_v54, %v12097_v35  ;;  %v6261_v6 = vmul.f32 %v12232_v56, %v12097_v35  ;;  %v7730_v39 = vld [vmem:[%s13797_s2 + $0xa] sm:$0x3] }
0x280d   :  { %v5704_v41 = vadd.f32 %v12230_v47, %v5652_v33  ;;  %v5978_v47 = vmul.f32 %v12067_v18, %v12111_v42  ;;  %v5916_v11 = vperm.slane %v7730_v39, 0 }
0x280f   :  { %6268 = vrot.lane.b32.xlu0 %v6256_v4, %s7956_s10  ;;  %6272 = vrot.lane.b32.xlu1 %v6258_v8, %s7956_s10  ;;  %v5917_v8 = vperm.slane %v7730_v39, 1 }
0x2810   :  { %6270 = vrot.lane.b32.xlu2 %v6257_v21, %s7956_s10 }
0x2811   :  { %v5737_v23 = vpop.permute.xlu0 %5736  ;;  %v5741_v51 = vpop.permute.xlu1 %5740 }
0x2812   :  { %v5744_v10 = vsel %vm230_vm4, %v5737_v23, %v12256_v1  ;;  %v5785_v25 = vpop.permute.xlu2 %5784  ;;  %v5745_v34 = vsel %vm230_vm4, %v12256_v1, %v5741_v51  ;;  %v5757_v15 = vadd.f32 %v5741_v51, %v5705_v59  ;;  %v6030_v1 = vadd.f32 %v6020_v58, %v5978_v47 }
0x2813   :  { %v5755_v27 = vadd.f32 %v5744_v10, %v5703_v28  ;;  %v5756_v19 = vadd.f32 %v5745_v34, %v5704_v41  ;;  %v5444_v23 = vmul.f32 %v12067_v18, %v12025_v24  ;;  %v5445_v41 = vmul.f32 %v12249_v38, %v12025_v24 }
0x2814   :  { %v6082_v5 = vadd.f32 %v12254_v26, %v6030_v1  ;;  %v6298_v26 = vperm.slane %v7745_v53, 0 }
0x2817   :  { %6274 = vrot.lane.b32.xlu0 %v6259_v7, %s7956_s10  ;;  %6278 = vrot.lane.b32.xlu1 %v6261_v6, %s7956_s10  ;;  %v5446_v7 = vmul.f32 %v12242_v49, %v12025_v24 }
0x2818   :  { %6276 = vrot.lane.b32.xlu2 %v6260_v61, %s7956_s10 }
0x2819   :  { %v6113_v42 = vpop.permute.xlu0 %6112  ;;  %v6117_v14 = vpop.permute.xlu1 %6116 }
0x281a   :  { %v6124_v35 = vsel %vm230_vm4, %v6113_v42, %v12281_v16  ;;  %v5791_v20 = vpop.permute.xlu2 %5790  ;;  %v6125_v4 = vsel %vm230_vm4, %v12281_v16, %v6117_v14  ;;  %v6136_v17 = vadd.f32 %v6117_v14, %v12259_v22 }
0x281b   :  { %v6134_v37 = vadd.f32 %v6124_v35, %v6082_v5  ;;  %v6135_v21 = vadd.f32 %v6125_v4, %v12261_v36  ;;  %v6299_v36 = vperm.slane %v7745_v53, 1 }
0x281f   :  { %5918 = vrot.lane.b32.xlu0 %v5916_v11, %s7962_s14  ;;  %6300 = vrot.lane.b32.xlu1 %v6298_v26, %s14540_s13 }
0x2820   :  { %5920 = vrot.lane.b32.xlu2 %v5917_v8, %s7962_s14 }
0x2821   :  { %v6119_v55 = vpop.permute.xlu0 %6118  ;;  %v6123_v2 = vpop.permute.xlu1 %6122 }
0x2822   :  { %v6126_v62 = vsel %vm230_vm4, %v6119_v55, %v6121_v0  ;;  %v6167_v33 = vpop.permute.xlu2 %6166  ;;  %v6127_v16 = vsel %vm230_vm4, %v6121_v0, %v6123_v2  ;;  %v6139_v22 = vadd.f32 %v6123_v2, %v12284_v57 }
0x2823   :  { %v6137_v59 = vadd.f32 %v6126_v62, %v12286_v44  ;;  %v6138_v28 = vadd.f32 %v6127_v16, %v12291_v50 }
0x2827   :  { %6302 = vrot.lane.b32.xlu0 %v6299_v36, %s14540_s13  ;;  %5458 = vrot.lane.b32.xlu1 %v5445_v41, %s7955_s28 }
0x2828   :  { %5456 = vrot.lane.b32.xlu2 %v5444_v23, %s7955_s28 }
0x2829   :  { %v5783_v0 = vpop.permute.xlu0 %5782  ;;  %v5787_v51 = vpop.permute.xlu1 %5786 }
0x282a   :  { %v5794_v57 = vsel %vm280_vm6, %v5783_v0, %v5785_v25  ;;  %v6173_v44 = vpop.permute.xlu2 %6172  ;;  %v5795_v10 = vsel %vm280_vm6, %v5785_v25, %v5787_v51  ;;  %v12399_v50 = vadd.f32 %v5787_v51, %v12319_v52 }
0x282b   :  { %v5804_v34 = vadd.f32 %v5794_v57, %v12321_v9  ;;  %v5805_v58 = vadd.f32 %v5795_v10, %v12326_v46 }
0x282f   :  { %5460 = vrot.lane.b32.xlu0 %v5446_v7, %s7955_s28 }
0x2831   :  { %v5789_v47 = vpop.permute.xlu0 %5788  ;;  %v5793_v61 = vpop.permute.xlu1 %5792 }
0x2832   :  { %v5796_v6 = vsel %vm280_vm6, %v5789_v47, %v5791_v20  ;;  %v5835_v1 = vpop.permute.xlu2 %5834  ;;  %v5797_v39 = vsel %vm280_vm6, %v5791_v20, %v5793_v61  ;;  %v12408_v25 = vadd.f32 %v5793_v61, %v5757_v15 }
0x2833   :  { %v5807_v52 = vadd.f32 %v5796_v6, %v5755_v27  ;;  %v5808_v5 = vadd.f32 %v5797_v39, %v5756_v19 }
0x2839   :  { %v6165_v42 = vpop.permute.xlu0 %6164  ;;  %v6169_v9 = vpop.permute.xlu1 %6168 }
0x283a   :  { %v6176_v46 = vsel %vm280_vm6, %v6165_v42, %v6167_v33  ;;  %v5841_v53 = vpop.permute.xlu2 %5840  ;;  %v6177_v24 = vsel %vm280_vm6, %v6167_v33, %v6169_v9  ;;  %v12412_v14 = vadd.f32 %v6169_v9, %v6136_v17 }
0x283b   :  { %v6186_v35 = vadd.f32 %v6176_v46, %v6134_v37  ;;  %v6187_v4 = vadd.f32 %v6177_v24, %v6135_v21 }
0x2841   :  { %v6171_v11 = vpop.permute.xlu0 %6170  ;;  %v6175_v26 = vpop.permute.xlu1 %6174 }
0x2842   :  { %v6178_v8 = vsel %vm280_vm6, %v6171_v11, %v6173_v44  ;;  %v6217_v20 = vpop.permute.xlu2 %6216  ;;  %v6179_v15 = vsel %vm280_vm6, %v6173_v44, %v6175_v26  ;;  %v12416_v27 = vadd.f32 %v6175_v26, %v6139_v22 }
0x2843   :  { %v6189_v19 = vadd.f32 %v6178_v8, %v6137_v59  ;;  %v6190_v55 = vadd.f32 %v6179_v15, %v6138_v28 }
0x2849   :  { %v5442_v2 = vpop.permute.xlu0 %5441  ;;  %v5837_v62 = vpop.permute.xlu1 %5836 }
0x284a   :  { %v5447_v16 = vmul.f32 %v12271_v30, %v5442_v2  ;;  %v5448_v17 = vmul.f32 %v12078_v54, %v5442_v2  ;;  %v5449_v37 = vmul.f32 %v12232_v56, %v5442_v2  ;;  %v6223_v21 = vpop.permute.xlu2 %6222  ;;  %v5846_v33 = vsel %vm330_vm5, %v5835_v1, %v5837_v62 }
0x284b   :  { %v12422_v36 = vadd.f32 %v5846_v33, %v5804_v34 }
0x284c   :  { %5464 = vrot.lane.b32.xlu1 %v5448_v17, %s7955_s28  ;;  %5462 = vrot.lane.b32.xlu2 %v5447_v16, %s7955_s28 }
0x284d   :  { %5466 = vrot.lane.b32.xlu0 %v5449_v37, %s7955_s28 }
0x2851   :  { %v5839_v22 = vpop.permute.xlu0 %5838  ;;  %v5843_v28 = vpop.permute.xlu1 %5842 }
0x2852   :  { %v5847_v59 = vsel %vm330_vm5, %v5837_v62, %v5839_v22  ;;  %v5489_v23 = vpop.permute.xlu2 %5488  ;;  %v5848_v0 = vsel %vm330_vm5, %v5841_v53, %v5843_v28  ;;  %v5858_v37 = vadd.f32 %v5839_v22, %v12399_v50 }
0x2853   :  { %v5857_v41 = vadd.f32 %v5847_v59, %v5805_v58  ;;  %v5496_v51 = vmul.f32 %v12067_v18, %v5489_v23  ;;  %v5497_v57 = vmul.f32 %v12249_v38, %v5489_v23  ;;  %v12431_v44 = vadd.f32 %v5848_v0, %v5807_v52 }
0x2854   :  { %v5498_v10 = vmul.f32 %v12242_v49, %v5489_v23 }
0x2855   :  { %5510 = vrot.lane.b32.xlu1 %v5497_v57, %s7956_s10  ;;  %5508 = vrot.lane.b32.xlu2 %v5496_v51, %s7956_s10 }
0x2856   :  { %5512 = vrot.lane.b32.xlu0 %v5498_v10, %s7956_s10 }
0x2859   :  { %v5845_v34 = vpop.permute.xlu0 %5844  ;;  %v6219_v58 = vpop.permute.xlu1 %6218 }
0x285a   :  { %v5849_v7 = vsel %vm330_vm5, %v5843_v28, %v5845_v34  ;;  %v5889_v47 = vpop.permute.xlu2 %5888  ;;  %v6228_v6 = vsel %vm330_vm5, %v6217_v20, %v6219_v58  ;;  %v5861_v0 = vadd.f32 %v5845_v34, %v12408_v25 }
0x285b   :  { %v5860_v61 = vadd.f32 %v5849_v7, %v5808_v5  ;;  %v12439_v1 = vadd.f32 %v6228_v6, %v6186_v35 }
0x2861   :  { %v6221_v39 = vpop.permute.xlu0 %6220  ;;  %v6225_v42 = vpop.permute.xlu1 %6224 }
0x2862   :  { %v6229_v52 = vsel %vm330_vm5, %v6219_v58, %v6221_v39  ;;  %v5895_v9 = vpop.permute.xlu2 %5894  ;;  %v6230_v53 = vsel %vm330_vm5, %v6223_v21, %v6225_v42 }
0x2863   :  { %v12442_v46 = vadd.f32 %v6229_v52, %v6187_v4  ;;  %v12445_v24 = vadd.f32 %v6230_v53, %v6189_v19  ;;  %v7715_v4 = vld [vmem:[%s13797_s2 + $0x8] sm:$0x3] }
0x2864   :  { %v5539_v62 = vperm.slane %v7715_v4, 1  ;;  %v5538_v17 = vperm.slane %v7715_v4, 0 }
0x2869   :  { %v6227_v11 = vpop.permute.xlu0 %6226  ;;  %v5494_v8 = vpop.permute.xlu1 %5493 }
0x286a   :  { %v6231_v26 = vsel %vm330_vm5, %v6225_v42, %v6227_v11  ;;  %v6271_v5 = vpop.permute.xlu2 %6270  ;;  %v5499_v35 = vmul.f32 %v12271_v30, %v5494_v8  ;;  %v5500_v20 = vmul.f32 %v12078_v54, %v5494_v8  ;;  %v5501_v2 = vmul.f32 %v12232_v56, %v5494_v8 }
0x286b   :  { %v12448_v15 = vadd.f32 %v6231_v26, %v6190_v55 }
0x286c   :  { %5518 = vrot.lane.b32.xlu0 %v5501_v2, %s7956_s10  ;;  %5516 = vrot.lane.b32.xlu1 %v5500_v20, %s7956_s10 }
0x286d   :  { %5514 = vrot.lane.b32.xlu2 %v5499_v35, %s7956_s10  ;;  %s14542_s10 = smov 124   ;;  %v6240_v35 = vadd.f32 %v6221_v39, %v12412_v14 }
0x2871   :  { %v5887_v19 = vpop.permute.xlu0 %5886  ;;  %v5891_v55 = vpop.permute.xlu1 %5890 }
0x2872   :  { %v12459_v16 = vpop.permute.xlu2 %6276  ;;  %v5910_v21 = vadd.f32 %v5891_v55, %v5858_v37  ;;  %v5898_v6 = vsel %vm380_vm7, %v5887_v19, %v5889_v47  ;;  %v5899_v50 = vsel %vm380_vm7, %v5889_v47, %v5891_v55  ;;  %v4872_v55 = vmul.f32 %v12242_v49, %v11619_v29 }
0x2873   :  { %v5908_v22 = vadd.f32 %v5898_v6, %v12422_v36  ;;  %v5909_v52 = vadd.f32 %v5899_v50, %v5857_v41  ;;  %v14546_v50 = vld [vmem:[#allocation27_spill] sm:$0xff] }
0x2874   :  { %5542 = vrot.lane.b32.xlu1 %v5539_v62, %s14541_s17  ;;  %v4924_v14 = vadd.f32 %v11671_v45, %v4872_v55  ;;  %v14555_v55 = vld [vmem:[#allocation17_spill] sm:$0xff] }
0x2875   :  { %5540 = vrot.lane.b32.xlu2 %v5538_v17, %s14541_s17 }
0x2879   :  { %v5893_v33 = vpop.permute.xlu0 %5892  ;;  %v5897_v23 = vpop.permute.xlu1 %5896 }
0x287a   :  { %v5921_v59 = vpop.permute.xlu2 %5920  ;;  %v5913_v51 = vadd.f32 %v5897_v23, %v5861_v0  ;;  %v5900_v26 = vsel %vm380_vm7, %v5893_v33, %v5895_v9  ;;  %v5901_v20 = vsel %vm380_vm7, %v5895_v9, %v5897_v23  ;;  %v4976_v9 = vadd.f32 %v11701_v48, %v4924_v14 }
0x287b   :  { %v5928_v28 = vmul.f32 %v5921_v59, %v5910_v21  ;;  %v5911_v47 = vadd.f32 %v5900_v26, %v12431_v44  ;;  %v5912_v41 = vadd.f32 %v5901_v20, %v5860_v61  ;;  %v6243_v44 = vadd.f32 %v6227_v11, %v12416_v27  ;;  %v14549_v20 = vld [vmem:[#allocation35_spill] sm:$0xff] }
0x287c   :  { %v5931_v10 = vmul.f32 %v5921_v59, %v5913_v51  ;;  %v4912_v27 = vsel %vm130_vm2, %v11645_v40, %v11647_v43  ;;  %v4875_v51 = vmul.f32 %v12232_v56, %v11643_v3  ;;  %v4964_v40 = vsel %vm180_vm3, %v11675_v32, %v11677_v63 }
0x287d   :  { %5942 = vrot.lane.b32.xlu1 %v5928_v28, %s14542_s10  ;;  %v4870_v28 = vmul.f32 %v12067_v18, %v11619_v29 }
0x2881   :  { %v6269_v57 = vpop.permute.xlu0 %6268  ;;  %v6273_v58 = vpop.permute.xlu1 %6272 }
0x2882   :  { %v6292_v36 = vadd.f32 %v6273_v58, %v6240_v35  ;;  %v6280_v17 = vsel %vm380_vm7, %v6269_v57, %v6271_v5  ;;  %v6281_v61 = vsel %vm380_vm7, %v6271_v5, %v6273_v58  ;;  %v4913_v5 = vsel %vm130_vm2, %v11647_v43, %v11671_v45  ;;  %v14545_v58 = vld [vmem:[#allocation13_spill] sm:$0xff] }
0x2883   :  { %v6290_v37 = vadd.f32 %v6280_v17, %v12439_v1  ;;  %v6291_v11 = vadd.f32 %v6281_v61, %v12442_v46  ;;  %v5028_v1 = vadd.f32 %v11731_v31, %v4976_v9  ;;  %v4922_v46 = vadd.f32 %v4912_v27, %v4870_v28  ;;  %v14559_v27 = vld [vmem:[#allocation42_spill] sm:$0xff] }
0x2884   :  { %v4914_v43 = vsel %vm130_vm2, %v11649_v13, %v11651_v60  ;;  %v4927_v6 = vadd.f32 %v14545_v58, %v4875_v51  ;;  %v4965_v13 = vsel %vm180_vm3, %v11677_v63, %v11701_v48  ;;  %v4915_v26 = vsel %vm130_vm2, %v11651_v60, %v14545_v58  ;;  %v14554_v60 = vld [vmem:[#allocation15_spill] sm:$0xff] }
0x2885   :  { %5948 = vrot.lane.b32.xlu1 %v5931_v10, %s14542_s10  ;;  %v5080_v45 = vadd.f32 %v11761_v12, %v5028_v1  ;;  %v5017_v63 = vsel %vm230_vm4, %v14546_v50, %v11731_v31  ;;  %v5120_v17 = vsel %vm330_vm5, %v14555_v55, %v14554_v60  ;;  %v14556_v31 = vld [vmem:[#allocation34_spill] sm:$0xff] }
0x2889   :  { %v6275_v7 = vpop.permute.xlu0 %6274  ;;  %v6279_v8 = vpop.permute.xlu1 %6278 }
0x288a   :  { %v6295_v21 = vadd.f32 %v6279_v8, %v6243_v44  ;;  %v6282_v32 = vsel %vm380_vm7, %v6275_v7, %v12459_v16  ;;  %v14550_v7 = vld [vmem:[#allocation11_spill] sm:$0xff] }
0x288b   :  { %v5069_v44 = vsel %vm280_vm6, %v14550_v7, %v11761_v12 }
0x2891   :  { %v5919_v42 = vpop.permute.xlu0 %5918  ;;  %v6301_v39 = vpop.permute.xlu1 %6300 }
0x2892   :  { %v5922_v53 = vsel %vm14543_vm11, %v5919_v42, %v5921_v59  ;;  %v5926_v25 = vmul.f32 %v5919_v42, %v5908_v22  ;;  %v5929_v4 = vmul.f32 %v5919_v42, %v5911_v47  ;;  %v4871_v59 = vmul.f32 %v12249_v38, %v11619_v29  ;;  %v14547_v22 = vld [vmem:[#allocation40_spill] sm:$0xff]  ;;  %vm14677_vm11 = vmmov %vm14636_vm1 }
0x2893   :  { %v5927_v34 = vmul.f32 %v5922_v53, %v5909_v52  ;;  %v5930_v62 = vmul.f32 %v5922_v53, %v5912_v41  ;;  %v6308_v23 = vmul.f32 %v6301_v39, %v6290_v37  ;;  %v4873_v29 = vmul.f32 %v12271_v30, %v11643_v3  ;;  %v14548_v53 = vld [vmem:[#allocation9_spill] sm:$0xff] }
0x2894   :  { %5938 = vrot.lane.b32.xlu0 %v5926_v25, %s14542_s10  ;;  %v4923_v10 = vadd.f32 %v4913_v5, %v4871_v59  ;;  %v5016_v52 = vsel %vm230_vm4, %v14547_v22, %v14546_v50  ;;  %v4974_v42 = vadd.f32 %v4964_v40, %v4922_v46  ;;  %v5132_v25 = vadd.f32 %v14548_v53, %v5080_v45  ;;  %v14558_v59 = vld [vmem:[#allocation32_spill] sm:$0xff] }
0x2895   :  { %5940 = vrot.lane.b32.xlu2 %v5927_v34, %s14542_s10  ;;  %v6283_v34 = vsel %vm380_vm7, %v12459_v16, %v6279_v8  ;;  %v4925_v35 = vadd.f32 %v4914_v43, %v4873_v29  ;;  %v4979_v47 = vadd.f32 %v14549_v20, %v4927_v6  ;;  %v6293_v16 = vadd.f32 %v6282_v32, %v12445_v24  ;;  %v14563_v29 = vld [vmem:[#allocation41_spill] sm:$0xff]  ;;  %v14565_v43 = vld [vmem:[#allocation10_spill] sm:$0xff]  ;;  %v14566_v6 = vld [vmem:[#allocation12_spill] sm:$0xff] }
0x2896   :  { %v5026_v48 = vadd.f32 %v5016_v52, %v4974_v42  ;;  %v4975_v8 = vadd.f32 %v4965_v13, %v4923_v10  ;;  %v6294_v14 = vadd.f32 %v6283_v34, %v12448_v15  ;;  %v5121_v12 = vsel %vm330_vm5, %v14554_v60, %v14548_v53  ;;  %v14567_v50 = vld [vmem:[#allocation28_spill] sm:$0xff]  ;;  %v14568_v42 = vld [vmem:[#allocation43_spill] sm:$0xff] }
0x2897   :  { %v6311_v37 = vmul.f32 %v6301_v39, %v6293_v16  ;;  %v5070_v22 = vsel %vm280_vm6, %v14567_v50, %v14566_v6  ;;  %v14574_v16 = vld [vmem:[#allocation37_spill] sm:$0xff] }
0x2898   :  { %v5027_v28 = vadd.f32 %v5017_v63, %v4975_v8 }
0x2899   :  { %v6303_v2 = vpop.permute.xlu0 %6302 }
0x289a   :  { %v6310_v19 = vmul.f32 %v6303_v2, %v6292_v36  ;;  %v6304_v33 = vsel %vm14544_vm15, %v6301_v39, %v6303_v2  ;;  %v6313_v0 = vmul.f32 %v6303_v2, %v6295_v21  ;;  %v14551_v36 = vld [vmem:[#allocation26_spill] sm:$0xff]  ;;  %v14552_v2 = vld [vmem:[#allocation39_spill] sm:$0xff]  ;;  %v4874_v39 = vmul.f32 %v12078_v54, %v11643_v3  ;;  %v5457_v3 = vpop.permute.xlu2 %5456 }
0x289b   :  { %v6309_v57 = vmul.f32 %v6304_v33, %v6291_v11  ;;  %v5068_v41 = vsel %vm280_vm6, %v14551_v36, %v14550_v7  ;;  %v14557_v21 = vld [vmem:[#allocation14_spill] sm:$0xff]  ;;  %v14560_v11 = vld [vmem:[#allocation36_spill] sm:$0xff]  ;;  %v6312_v1 = vmul.f32 %v6304_v33, %v6294_v14  ;;  %v14564_v33 = vld [vmem:[#allocation19_spill] sm:$0xff]  ;;  %v5173_v10 = vsel %vm380_vm7, %v14559_v27, %v14552_v2 }
0x289c   :  { %5944 = vrot.lane.b32.xlu0 %v5929_v4, %s14542_s10  ;;  %6324 = vrot.lane.b32.xlu1 %v6310_v19, %s14542_s10  ;;  %v5184_v4 = vadd.f32 %v14552_v2, %v5132_v25  ;;  %v14553_v19 = vld [vmem:[#allocation20_spill] sm:$0xff]  ;;  %v5078_v61 = vadd.f32 %v5068_v41, %v5026_v48  ;;  %v4966_v24 = vsel %vm180_vm3, %v14558_v59, %v14557_v21  ;;  %v14569_v25 = vld [vmem:[#allocation154_spill] sm:$0xff]  ;;  %vm14685_vm15 = vcmask 1039360  }
0x289d   :  { %5946 = vrot.lane.b32.xlu2 %v5930_v62, %s14542_s10  ;;  %v5031_v62 = vadd.f32 %v14553_v19, %v4979_v47  ;;  %v5172_v5 = vsel %vm380_vm7, %v14560_v11, %v14559_v27  ;;  %v4967_v51 = vsel %vm180_vm3, %v14557_v21, %v14549_v20  ;;  %v5018_v40 = vsel %vm230_vm4, %v14564_v33, %v14563_v29  ;;  %v14571_v20 = vld [vmem:[#allocation16_spill] sm:$0xff]  ;;  %v14572_v47 = vld [vmem:[#allocation38_spill] sm:$0xff]  ;;  %v14576_v27 = vld [vmem:[#allocation155_spill] sm:$0xff] }
0x289e   :  { %v5202_v9 = vmul.f32 %v14556_v31, %v5184_v4  ;;  %v4977_v46 = vadd.f32 %v4966_v24, %v4925_v35  ;;  %v4926_v54 = vadd.f32 %v4915_v26, %v4874_v39  ;;  %v5019_v32 = vsel %vm230_vm4, %v14563_v29, %v14553_v19  ;;  %v14573_v4 = vld [vmem:[#allocation31_spill] sm:$0xff]  ;;  %v14580_v39 = vld [vmem:[#allocation169_spill] sm:$0xff] }
0x289f   :  { %v5196_v34 = vsel %vm14570_vm0, %v14569_v25, %v14556_v31  ;;  %v5122_v26 = vsel %vm330_vm5, %v14572_v47, %v14571_v20  ;;  %v5174_v8 = vsel %vm380_vm7, %v14574_v16, %v14573_v4  ;;  %v14592_v16 = vld [vmem:[#allocation178_spill] sm:$0xff]  ;;  %vm14689_vm0 = vmmov %vm14636_vm1 }
0x28a0   :  { %v5029_v13 = vadd.f32 %v5018_v40, %v4977_v46  ;;  %v4978_v35 = vadd.f32 %v4967_v51, %v4926_v54  ;;  %v14581_v51 = vld [vmem:[#allocation168_spill] sm:$0xff]  ;;  %v14582_v40 = vld [vmem:[#allocation175_spill] sm:$0xff] }
0x28a1   :  { %v5364_v29 = vsel %vm230_vm4, %v14581_v51, %v14580_v39  ;;  %v5461_v50 = vpop.permute.xlu0 %5460 }
0x28a2   :  { %v5081_v41 = vadd.f32 %v5070_v22, %v5029_v13  ;;  %v5030_v2 = vadd.f32 %v5019_v32, %v4978_v35  ;;  %v14584_v13 = vld [vmem:[#allocation22_spill] sm:$0xff]  ;;  %v14587_v35 = vld [vmem:[#allocation165_spill] sm:$0xff] }
0x28a4   :  { %6320 = vrot.lane.b32.xlu0 %v6308_v23, %s14542_s10  ;;  %6330 = vrot.lane.b32.xlu1 %v6313_v0, %s14542_s10  ;;  %v14561_v23 = vld [vmem:[#allocation29_spill] sm:$0xff]  ;;  %v5130_v0 = vadd.f32 %v5120_v17, %v5078_v61  ;;  %v5133_v60 = vadd.f32 %v5122_v26, %v5081_v41  ;;  %v5175_v17 = vsel %vm380_vm7, %v14573_v4, %v14568_v42 }
0x28a5   :  { %6322 = vrot.lane.b32.xlu2 %v6309_v57, %s14542_s10  ;;  %v5083_v15 = vadd.f32 %v14561_v23, %v5031_v62  ;;  %v5079_v57 = vadd.f32 %v5069_v44, %v5027_v28  ;;  %v5071_v36 = vsel %vm280_vm6, %v14566_v6, %v14561_v23  ;;  %v5123_v62 = vsel %vm330_vm5, %v14571_v20, %v14565_v43  ;;  %v14575_v28 = vld [vmem:[#allocation21_spill] sm:$0xff]  ;;  %v14588_v20 = vld [vmem:[#allocation164_spill] sm:$0xff] }
0x28a6   :  { %v5182_v58 = vadd.f32 %v5172_v5, %v5130_v0  ;;  %v5082_v55 = vadd.f32 %v5071_v36, %v5030_v2  ;;  %v5185_v14 = vadd.f32 %v5174_v8, %v5133_v60  ;;  %v5463_v44 = vpop.permute.xlu2 %5462  ;;  %v5260_v11 = vsel %vm130_vm2, %v14576_v27, %v14575_v28  ;;  %v14577_v5 = vld [vmem:[#allocation18_spill] sm:$0xff]  ;;  %v14578_v23 = vld [vmem:[#allocation153_spill] sm:$0xff]  ;;  %v14593_v8 = vld [vmem:[#allocation176_spill] sm:$0xff] }
0x28a7   :  { %v5135_v45 = vadd.f32 %v14565_v43, %v5083_v15  ;;  %v5131_v52 = vadd.f32 %v5121_v12, %v5079_v57  ;;  %v14579_v15 = vld [vmem:[#allocation151_spill] sm:$0xff]  ;;  %v14583_v57 = vld [vmem:[#allocation174_spill] sm:$0xff] }
0x28a8   :  { %v5200_v63 = vmul.f32 %v14569_v25, %v5182_v58  ;;  %v5134_v61 = vadd.f32 %v5123_v62, %v5082_v55  ;;  %v5312_v12 = vsel %vm180_vm3, %v14579_v15, %v14578_v23  ;;  %v5416_v46 = vsel %vm280_vm6, %v14583_v57, %v14582_v40  ;;  %v14590_v36 = vld [vmem:[#allocation170_spill] sm:$0xff]  ;;  %v14596_v15 = vld [vmem:[#allocation177_spill] sm:$0xff] }
0x28a9   :  { %v5187_v53 = vadd.f32 %v14568_v42, %v5135_v45  ;;  %v5183_v7 = vadd.f32 %v5173_v10, %v5131_v52  ;;  %v14585_v42 = vld [vmem:[#allocation152_spill] sm:$0xff]  ;;  %v14591_v2 = vld [vmem:[#allocation30_spill] sm:$0xff]  ;;  %v5219_v62 = vmul.f32 %v12249_v38, %v14577_v5 }
0x28aa   :  { %v5261_v4 = vsel %vm130_vm2, %v14575_v28, %v14591_v2 }
0x28ab   :  { %v5205_v48 = vmul.f32 %v14556_v31, %v5187_v53  ;;  %v5201_v19 = vmul.f32 %v5196_v34, %v5183_v7  ;;  %v5459_v31 = vpop.permute.xlu1 %5458  ;;  %v5262_v53 = vsel %vm130_vm2, %v14585_v42, %v14584_v13  ;;  %v14589_v7 = vld [vmem:[#allocation171_spill] sm:$0xff] }
0x28ac   :  { %6326 = vrot.lane.b32.xlu0 %v6311_v37, %s14542_s10  ;;  %6388 = vrot.lane.b32.xlu1 %v5202_v9, %s14562_s11  ;;  %v5186_v9 = vadd.f32 %v5175_v17, %v5134_v61  ;;  %v5203_v37 = vmul.f32 %v14569_v25, %v5185_v14  ;;  %v5468_v58 = vsel %vm330_vm5, %v5457_v3, %v5459_v31  ;;  %v14586_v25 = vld [vmem:[#allocation150_spill] sm:$0xff] }
0x28ad   :  { %6328 = vrot.lane.b32.xlu2 %v6312_v1, %s14542_s10  ;;  %v5218_v1 = vmul.f32 %v12067_v18, %v14577_v5  ;;  %v5314_v3 = vsel %vm180_vm3, %v14588_v20, %v14587_v35  ;;  %v5366_v41 = vsel %vm230_vm4, %v14590_v36, %v14589_v7  ;;  %v14594_v17 = vld [vmem:[#allocation166_spill] sm:$0xff]  ;;  %v14602_v36 = vld [vmem:[#allocation120_spill] sm:$0xff] }
0x28ae   :  { %v5204_v21 = vmul.f32 %v5196_v34, %v5186_v9  ;;  %v5221_v34 = vmul.f32 %v12271_v30, %v14586_v25  ;;  %v5313_v14 = vsel %vm180_vm3, %v14578_v23, %v14594_v17  ;;  %v5271_v9 = vadd.f32 %v5261_v4, %v5219_v62  ;;  %v14600_v20 = vld [vmem:[#allocation114_spill] sm:$0xff] }
0x28af   :  { %v5509_v24 = vpop.permute.xlu2 %5508  ;;  %v5270_v0 = vadd.f32 %v5260_v11, %v5218_v1  ;;  %v5417_v23 = vsel %vm280_vm6, %v14582_v40, %v14596_v15 }
0x28b0   :  { %v5273_v47 = vadd.f32 %v5262_v53, %v5221_v34  ;;  %v5323_v27 = vadd.f32 %v5313_v14, %v5271_v9  ;;  %v14599_v53 = vld [vmem:[#allocation173_spill] sm:$0xff] }
0x28b1   :  { %v5322_v33 = vadd.f32 %v5312_v12, %v5270_v0 }
0x28b3   :  { %v5374_v45 = vadd.f32 %v5364_v29, %v5322_v33  ;;  %v5223_v29 = vmul.f32 %v12232_v56, %v14586_v25  ;;  %v14597_v33 = vld [vmem:[#allocation33_spill] sm:$0xff] }
0x28b4   :  { %6384 = vrot.lane.b32.xlu0 %v5200_v63, %s14562_s11  ;;  %6394 = vrot.lane.b32.xlu1 %v5205_v48, %s14562_s11  ;;  %v5325_v63 = vadd.f32 %v5314_v3, %v5273_v47  ;;  %v5220_v48 = vmul.f32 %v12242_v49, %v14577_v5  ;;  %v4176_v3 = vmul.f32 %v12242_v49, %v14600_v20  ;;  %v14601_v47 = vld [vmem:[#allocation147_spill] sm:$0xff] }
0x28b5   :  { %6386 = vrot.lane.b32.xlu2 %v5201_v19, %s14562_s11  ;;  %v5426_v18 = vadd.f32 %v5416_v46, %v5374_v45  ;;  %v5418_v19 = vsel %vm280_vm6, %v14593_v8, %v14592_v16  ;;  %v5469_v46 = vsel %vm330_vm5, %v5459_v31, %v5461_v50  ;;  %v12670_v45 = vld [vmem:[#allocation2 + $0x50] sm:$0xff]  ;;  %v4175_v8 = vmul.f32 %v12249_v38, %v14600_v20 }
0x28b6   :  { %v5377_v60 = vadd.f32 %v5366_v41, %v5325_v63  ;;  %v5272_v55 = vadd.f32 %v14591_v2, %v5220_v48  ;;  %v5222_v40 = vmul.f32 %v12670_v45, %v14586_v25  ;;  %v5367_v25 = vsel %vm230_vm4, %v14589_v7, %v14599_v53  ;;  %v14603_v48 = vld [vmem:[#allocation179_spill] sm:$0xff] }
0x28b7   :  { %v5478_v6 = vadd.f32 %v5468_v58, %v5426_v18  ;;  %v5275_v18 = vadd.f32 %v14597_v33, %v5223_v29  ;;  %v5419_v2 = vsel %vm280_vm6, %v14592_v16, %v14603_v48 }
0x28bc   :  { %6390 = vrot.lane.b32.xlu0 %v5203_v37, %s14562_s11  ;;  %v5429_v37 = vadd.f32 %v5418_v19, %v5377_v60  ;;  %v4228_v60 = vadd.f32 %v14601_v47, %v4176_v3 }
0x28bd   :  { %6392 = vrot.lane.b32.xlu2 %v5204_v21, %s14562_s11  ;;  %v5324_v21 = vadd.f32 %v14594_v17, %v5272_v55  ;;  %v14605_v55 = vld [vmem:[#allocation133_spill] sm:$0xff] }
0x28be   :  { %v12606_v59 = vpop.permute.xlu1 %5464  ;;  %v14606_v17 = vld [vmem:[#allocation125_spill] sm:$0xff]  ;;  %v4280_v38 = vadd.f32 %v14605_v55, %v4228_v60 }
0x28bf   :  { %v12633_v26 = vpop.permute.xlu0 %5466  ;;  %v5470_v61 = vsel %vm330_vm5, %v5463_v44, %v12606_v59  ;;  %v4269_v14 = vsel %vm180_vm3, %v14606_v17, %v14605_v55  ;;  %v14626_v60 = vld [vmem:[#allocation157_spill] sm:$0xff] }
0x28c0   :  { %v5481_v11 = vadd.f32 %v5470_v61, %v5429_v37  ;;  %v5471_v16 = vsel %vm330_vm5, %v12606_v59, %v12633_v26  ;;  %v14607_v37 = vld [vmem:[#allocation149_spill] sm:$0xff] }
0x28c1   :  { %v4332_v59 = vadd.f32 %v14607_v37, %v4280_v38 }
0x28c7   :  { %v5515_v43 = vpop.permute.xlu2 %5514  ;;  %v5511_v10 = vpop.permute.xlu1 %5510 }
0x28c8   :  { %v5520_v54 = vsel %vm380_vm7, %v5509_v24, %v5511_v10  ;;  %v14595_v24 = vld [vmem:[#allocation172_spill] sm:$0xff]  ;;  %v5513_v0 = vpop.permute.xlu0 %5512 }
0x28c9   :  { %v5530_v22 = vadd.f32 %v5520_v54, %v5478_v6  ;;  %v5365_v28 = vsel %vm230_vm4, %v14580_v39, %v14595_v24  ;;  %v5376_v1 = vadd.f32 %v14595_v24, %v5324_v21  ;;  %v5263_v39 = vsel %vm130_vm2, %v14584_v13, %v14597_v33  ;;  %v14598_v54 = vld [vmem:[#allocation167_spill] sm:$0xff]  ;;  %v14608_v21 = vld [vmem:[#allocation116_spill] sm:$0xff] }
0x28ca   :  { %v5375_v44 = vadd.f32 %v5365_v28, %v5323_v27  ;;  %v5315_v6 = vsel %vm180_vm3, %v14587_v35, %v14598_v54  ;;  %v5274_v13 = vadd.f32 %v5263_v39, %v5222_v40  ;;  %v5327_v31 = vadd.f32 %v14598_v54, %v5275_v18  ;;  %v14612_v39 = vld [vmem:[#allocation55_spill] sm:$0xff] }
0x28cb   :  { %v5428_v57 = vadd.f32 %v14596_v15, %v5376_v1  ;;  %v4321_v24 = vsel %vm230_vm4, %v14608_v21, %v14607_v37  ;;  %v14609_v15 = vld [vmem:[#allocation134_spill] sm:$0xff]  ;;  %v14615_v40 = vld [vmem:[#allocation123_spill] sm:$0xff]  ;;  %v12757_v37 = vld [vmem:[#allocation2 + $0x30] sm:$0xff] }
0x28cc   :  { %v5326_v35 = vadd.f32 %v5315_v6, %v5274_v13  ;;  %v5379_v63 = vadd.f32 %v14599_v53, %v5327_v31  ;;  %v14616_v13 = vld [vmem:[#allocation132_spill] sm:$0xff] }
0x28ce   :  { %v5378_v49 = vadd.f32 %v5367_v25, %v5326_v35  ;;  %v5431_v61 = vadd.f32 %v14603_v48, %v5379_v63  ;;  %v14618_v25 = vld [vmem:[#allocation144_spill] sm:$0xff] }
0x28cf   :  { %v5541_v52 = vpop.permute.xlu2 %5540 }
0x28d0   :  { %v5548_v32 = vmul.f32 %v5541_v52, %v5530_v22  ;;  %v5480_v22 = vadd.f32 %v5461_v50, %v5428_v57  ;;  %v4217_v50 = vsel %vm130_vm2, %v14602_v36, %v14601_v47  ;;  %v5430_v9 = vadd.f32 %v5419_v2, %v5378_v49  ;;  %v14613_v57 = vld [vmem:[#allocation141_spill] sm:$0xff] }
0x28d1   :  { %v5483_v28 = vadd.f32 %v12633_v26, %v5431_v61  ;;  %v4219_v26 = vsel %vm130_vm2, %v14613_v57, %v14612_v39  ;;  %v14622_v2 = vld [vmem:[#allocation73_spill] sm:$0xff] }
0x28d2   :  { %5560 = vrot.lane.b32.xlu0 %v5548_v32, %s14542_s10  ;;  %v5521_v32 = vsel %vm380_vm7, %v5511_v10, %v5513_v0  ;;  %v5532_v34 = vadd.f32 %v5513_v0, %v5480_v22  ;;  %v5482_v1 = vadd.f32 %v5471_v16, %v5430_v9  ;;  %v14611_v0 = vld [vmem:[#allocation111_spill] sm:$0xff]  ;;  %v14628_v16 = vld [vmem:[#allocation64_spill] sm:$0xff] }
0x28d3   :  { %v4178_v18 = vmul.f32 %v12670_v45, %v14611_v0 }
0x28d5   :  { %v4230_v47 = vadd.f32 %v4219_v26, %v4178_v18  ;;  %v14634_v26 = vld [vmem:[#allocation63_spill] sm:$0xff] }
0x28de   :  { %v5517_v5 = vpop.permute.xlu1 %5516  ;;  %v5519_v19 = vpop.permute.xlu0 %5518 }
0x28df   :  { %v5522_v12 = vsel %vm380_vm7, %v5515_v43, %v5517_v5  ;;  %v5427_v43 = vadd.f32 %v5417_v23, %v5375_v44  ;;  %v5523_v27 = vsel %vm380_vm7, %v5517_v5, %v5519_v19  ;;  %v14610_v23 = vld [vmem:[#allocation128_spill] sm:$0xff]  ;;  %v5535_v44 = vadd.f32 %v5519_v19, %v5483_v28 }
0x28e0   :  { %v5533_v51 = vadd.f32 %v5522_v12, %v5481_v11  ;;  %v4373_v12 = vsel %vm280_vm6, %v14610_v23, %v14609_v15  ;;  %v5534_v33 = vadd.f32 %v5523_v27, %v5482_v1  ;;  %v4384_v5 = vadd.f32 %v14609_v15, %v4332_v59  ;;  %v14629_v27 = vld [vmem:[#allocation80_spill] sm:$0xff]  ;;  %v14631_v15 = vld [vmem:[#allocation127_spill] sm:$0xff] }
0x28e1   :  { %v5479_v42 = vadd.f32 %v5469_v46, %v5427_v43  ;;  %v14614_v46 = vld [vmem:[#allocation65_spill] sm:$0xff] }
0x28e2   :  { %v5551_v58 = vmul.f32 %v5541_v52, %v5533_v51  ;;  %v4179_v51 = vmul.f32 %v12232_v56, %v14611_v0  ;;  %v4425_v43 = vsel %vm330_vm5, %v14615_v40, %v14614_v46  ;;  %v4436_v53 = vadd.f32 %v14614_v46, %v4384_v5 }
0x28e3   :  { %v5531_v10 = vadd.f32 %v5521_v32, %v5479_v42  ;;  %v14617_v42 = vld [vmem:[#allocation67_spill] sm:$0xff]  ;;  %v4320_v5 = vsel %vm230_vm4, %v14634_v26, %v14608_v21  ;;  %v14637_v21 = vld [vmem:[#allocation121_spill] sm:$0xff] }
0x28e4   :  { %5566 = vrot.lane.b32.xlu0 %v5551_v58, %s14542_s10  ;;  %v4231_v32 = vadd.f32 %v14612_v39, %v4179_v51  ;;  %v4271_v31 = vsel %vm180_vm3, %v14617_v42, %v14616_v13  ;;  %v4488_v48 = vadd.f32 %v14618_v25, %v4436_v53  ;;  %v14633_v39 = vld [vmem:[#allocation146_spill] sm:$0xff]  ;;  %v4218_v53 = vsel %vm130_vm2, %v14637_v21, %v14613_v57 }
0x28e5   :  { %v14655_v21 = vld [vmem:[#allocation90_spill] sm:$0xff] }
0x28e6   :  { %v5543_v41 = vpop.permute.xlu1 %5542  ;;  %v4283_v35 = vadd.f32 %v14616_v13, %v4231_v32 }
0x28e7   :  { %v5544_v4 = vsel %vm14604_vm9, %v5541_v52, %v5543_v41  ;;  %v5550_v7 = vmul.f32 %v5543_v41, %v5532_v34  ;;  %v4227_v52 = vadd.f32 %v4217_v50, %v4175_v8  ;;  %v5553_v58 = vmul.f32 %v5543_v41, %v5535_v44  ;;  %v14619_v34 = vld [vmem:[#allocation135_spill] sm:$0xff]  ;;  %v14621_v41 = vld [vmem:[#allocation138_spill] sm:$0xff]  ;;  %vm14690_vm9 = vmmov %vm14689_vm0 }
0x28e8   :  { %v5549_v62 = vmul.f32 %v5544_v4, %v5531_v10  ;;  %v5552_v6 = vmul.f32 %v5544_v4, %v5534_v33  ;;  %v4477_v3 = vsel %vm380_vm7, %v14619_v34, %v14618_v25  ;;  %v14620_v10 = vld [vmem:[#allocation122_spill] sm:$0xff]  ;;  %v14623_v4 = vld [vmem:[#allocation84_spill] sm:$0xff]  ;;  %v4282_v8 = vadd.f32 %v4271_v31, %v4230_v47  ;;  %v14632_v33 = vld [vmem:[#allocation143_spill] sm:$0xff] }
0x28e9   :  { %5564 = vrot.lane.b32.xlu1 %v5550_v7, %s14542_s10  ;;  %v4279_v11 = vadd.f32 %v4269_v14, %v4227_v52  ;;  %v4323_v63 = vsel %vm230_vm4, %v14621_v41, %v14620_v10  ;;  %v4500_v7 = vsel %vm14624_vm13, %v14623_v4, %v14622_v2  ;;  %v4335_v19 = vadd.f32 %v14620_v10, %v4283_v35  ;;  %v14638_v25 = vld [vmem:[#allocation145_spill] sm:$0xff]  ;;  %v14639_v10 = vld [vmem:[#allocation156_spill] sm:$0xff]  ;;  %vm14693_vm13 = vmmov %vm14685_vm15 }
0x28ea   :  { %5562 = vrot.lane.b32.xlu2 %v5549_v62, %s14542_s10  ;;  %v14625_v62 = vld [vmem:[#allocation117_spill] sm:$0xff]  ;;  %v4506_v14 = vmul.f32 %v14622_v2, %v4488_v48  ;;  %v4216_v52 = vsel %vm130_vm2, %v14628_v16, %v14602_v36  ;;  %v4334_v9 = vadd.f32 %v4323_v63, %v4282_v8  ;;  %v4270_v63 = vsel %vm180_vm3, %v14639_v10, %v14617_v42  ;;  %v14640_v48 = vld [vmem:[#allocation78_spill] sm:$0xff] }
0x28eb   :  { %v4331_v29 = vadd.f32 %v4321_v24, %v4279_v11  ;;  %v4375_v55 = vsel %vm280_vm6, %v14626_v60, %v14625_v62  ;;  %v4174_v24 = vmul.f32 %v12757_v37, %v14600_v20  ;;  %v4387_v28 = vadd.f32 %v14625_v62, %v4335_v19  ;;  %v14630_v11 = vld [vmem:[#allocation129_spill] sm:$0xff]  ;;  %v14642_v19 = vld [vmem:[#allocation148_spill] sm:$0xff] }
0x28ec   :  { %v4427_v1 = vsel %vm330_vm5, %v14630_v11, %v14629_v27  ;;  %v4386_v44 = vadd.f32 %v4375_v55, %v4334_v9  ;;  %v4479_v20 = vsel %vm380_vm7, %v14633_v39, %v14632_v33  ;;  %v4374_v42 = vsel %vm280_vm6, %v14642_v19, %v14626_v60  ;;  %v14662_v19 = vld [vmem:[#allocation86_spill] sm:$0xff] }
0x28ed   :  { %v4383_v54 = vadd.f32 %v4373_v12, %v4331_v29  ;;  %v4268_v12 = vsel %vm180_vm3, %v14631_v15, %v14606_v17  ;;  %v4226_v51 = vadd.f32 %v4216_v52, %v4174_v24  ;;  %v4439_v29 = vadd.f32 %v14629_v27, %v4387_v28  ;;  %v7918_v27 = vld [vmem:[#allocation2 + $0x40] sm:$0xff]  ;;  %v14647_v15 = vld [vmem:[#allocation96_spill] sm:$0xff] }
0x28ee   :  { %v4438_v46 = vadd.f32 %v4427_v1, %v4386_v44  ;;  %v14646_v1 = vld [vmem:[#allocation72_spill] sm:$0xff]  ;;  %v12821_v44 = vld [vmem:[#allocation2 + $0x38] sm:$0xff] }
0x28ef   :  { %v5943_v22 = vpop.permute.xlu1 %5942  ;;  %v12727_v56 = vpop.permute.xlu2 %5940  ;;  %v4435_v50 = vadd.f32 %v4425_v43, %v4383_v54  ;;  %v4278_v17 = vadd.f32 %v4268_v12, %v4226_v51  ;;  %v4491_v18 = vadd.f32 %v14632_v33, %v4439_v29  ;;  %v14635_v54 = vld [vmem:[#allocation142_spill] sm:$0xff] }
0x28f0   :  { %v5951_v61 = vsel %vm14627_vm14, %v12727_v56, %v5943_v22  ;;  %v5962_v59 = vadd.f32 %v5943_v22, %v4506_v14  ;;  %v4490_v22 = vadd.f32 %v4479_v20, %v4438_v46  ;;  %v14643_v14 = vld [vmem:[#allocation140_spill] sm:$0xff]  ;;  %vm14694_vm14 = vmmov %vm14693_vm13 }
0x28f1   :  { %5570 = vrot.lane.b32.xlu1 %v5553_v58, %s14542_s10  ;;  %v4487_v49 = vadd.f32 %v4477_v3, %v4435_v50  ;;  %v4330_v32 = vadd.f32 %v4320_v5, %v4278_v17  ;;  %v4509_v13 = vmul.f32 %v14622_v2, %v4491_v18  ;;  %v4424_v3 = vsel %vm330_vm5, %v14638_v25, %v14615_v40  ;;  %v14641_v40 = vld [vmem:[#allocation139_spill] sm:$0xff]  ;;  %v14650_v20 = vld [vmem:[#allocation100_spill] sm:$0xff]  ;;  %v14652_v18 = vld [vmem:[#allocation110_spill] sm:$0xff] }
0x28f2   :  { %5568 = vrot.lane.b32.xlu2 %v5552_v6, %s14542_s10  ;;  %v4372_v6 = vsel %vm280_vm6, %v14635_v54, %v14610_v23  ;;  %v4508_v47 = vmul.f32 %v4500_v7, %v4490_v22  ;;  %v4177_v50 = vmul.f32 %v12271_v30, %v14611_v0  ;;  %v4476_v2 = vsel %vm380_vm7, %v14640_v48, %v14619_v34  ;;  %v14653_v54 = vld [vmem:[#allocation93_spill] sm:$0xff]  ;;  %v14656_v25 = vld [vmem:[#allocation94_spill] sm:$0xff] }
0x28f3   :  { %v4505_v38 = vmul.f32 %v4500_v7, %v4487_v49  ;;  %v4382_v35 = vadd.f32 %v4372_v6, %v4330_v32  ;;  %v4322_v7 = vsel %vm230_vm4, %v14641_v40, %v14621_v41  ;;  %v4669_v6 = vsel %vm230_vm4, %v14653_v54, %v14652_v18  ;;  %v14654_v32 = vld [vmem:[#allocation91_spill] sm:$0xff]  ;;  %v14659_v48 = vld [vmem:[#allocation98_spill] sm:$0xff] }
0x28f4   :  { %v4229_v57 = vadd.f32 %v4218_v53, %v4177_v50  ;;  %v14658_v50 = vld [vmem:[#allocation71_spill] sm:$0xff] }
0x28f5   :  { %v5961_v36 = vadd.f32 %v5951_v61, %v4505_v38  ;;  %v4434_v49 = vadd.f32 %v4424_v3, %v4382_v35  ;;  %v4426_v61 = vsel %vm330_vm5, %v14643_v14, %v14630_v11  ;;  %v14645_v38 = vld [vmem:[#allocation85_spill] sm:$0xff]  ;;  %v14648_v11 = vld [vmem:[#allocation75_spill] sm:$0xff]  ;;  %v14657_v3 = vld [vmem:[#allocation88_spill] sm:$0xff] }
0x28f6   :  { %v4281_v30 = vadd.f32 %v4270_v63, %v4229_v57  ;;  %v4478_v24 = vsel %vm380_vm7, %v14645_v38, %v14633_v39  ;;  %v4565_v12 = vsel %vm130_vm2, %v14648_v11, %v14647_v15  ;;  %v14649_v39 = vld [vmem:[#allocation87_spill] sm:$0xff]  ;;  %v4526_v63 = vmul.f32 %v12670_v45, %v14654_v32  ;;  %v14660_v57 = vld [vmem:[#allocation25_spill] sm:$0xff]  ;;  %v14665_v38 = vld [vmem:[#allocation104_spill] sm:$0xff] }
0x28f7   :  { %v5949_v43 = vpop.permute.xlu1 %5948  ;;  %v5947_v58 = vpop.permute.xlu2 %5946  ;;  %v4486_v0 = vadd.f32 %v4476_v2, %v4434_v49  ;;  %v4617_v26 = vsel %vm180_vm3, %v14650_v20, %v14649_v39  ;;  %v4567_v2 = vsel %vm130_vm2, %v14659_v48, %v14658_v50  ;;  %v14661_v49 = vld [vmem:[#allocation103_spill] sm:$0xff]  ;;  %v14663_v14 = vld [vmem:[#allocation81_spill] sm:$0xff] }
0x28f8   :  { %v5953_v31 = vsel %vm14636_vm1, %v5947_v58, %v5949_v43  ;;  %v5965_v23 = vadd.f32 %v5949_v43, %v4509_v13  ;;  %v4333_v62 = vadd.f32 %v4322_v7, %v4281_v30  ;;  %v4773_v40 = vsel %vm330_vm5, %v14661_v49, %v14660_v57  ;;  %v12858_v30 = vld [vmem:[#allocation2 + $0x48] sm:$0xff]  ;;  %vm14695_vm1 = vmmov %vm14689_vm0 }
0x28f9   :  { %6358 = vrot.lane.b32.xlu1 %v5962_v59, %s14562_s11  ;;  %v5964_v8 = vadd.f32 %v5953_v31, %v4508_v47  ;;  %v4504_v34 = vmul.f32 %v14623_v4, %v4486_v0  ;;  %v4524_v59 = vmul.f32 %v7918_v27, %v14646_v1  ;;  %v4721_v47 = vsel %vm280_vm6, %v14657_v3, %v14656_v25  ;;  %v14667_v27 = vld [vmem:[#allocation74_spill] sm:$0xff] }
0x28fa   :  { %6356 = vrot.lane.b32.xlu2 %v5961_v36, %s14562_s11  ;;  %v4385_v52 = vadd.f32 %v4374_v42, %v4333_v62  ;;  %v4525_v0 = vmul.f32 %v12858_v30, %v14654_v32 }
0x28fb   :  { %v4576_v33 = vadd.f32 %v14647_v15, %v4524_v59  ;;  %v14668_v59 = vld [vmem:[#allocation99_spill] sm:$0xff] }
0x28fc   :  { %v4437_v60 = vadd.f32 %v4426_v61, %v4385_v52  ;;  %v4616_v61 = vsel %vm180_vm3, %v14663_v14, %v14650_v20  ;;  %v14672_v20 = vld [vmem:[#allocation6_spill] sm:$0xff]  ;;  %v14683_v14 = vld [vmem:[#allocation23_spill] sm:$0xff] }
0x28fd   :  { %v4628_v17 = vadd.f32 %v14649_v39, %v4576_v33  ;;  %v14671_v39 = vld [vmem:[#allocation107_spill] sm:$0xff] }
0x28fe   :  { %v4489_v28 = vadd.f32 %v4478_v24, %v4437_v60  ;;  %v14666_v24 = vld [vmem:[#allocation102_spill] sm:$0xff] }
0x28ff   :  { %v12809_v16 = vpop.permute.xlu2 %6322  ;;  %v4680_v53 = vadd.f32 %v14652_v18, %v4628_v17  ;;  %v4825_v60 = vsel %vm380_vm7, %v14666_v24, %v14665_v38 }
0x2900   :  { %v4507_v36 = vmul.f32 %v14623_v4, %v4489_v28  ;;  %v7920_v4 = vld [vmem:[#allocation2 + $0x58] sm:$0xff]  ;;  %v4578_v28 = vadd.f32 %v4567_v2, %v4526_v63 }
0x2901   :  { %6364 = vrot.lane.b32.xlu1 %v5965_v23, %s14562_s11  ;;  %v4527_v13 = vmul.f32 %v7920_v4, %v14654_v32  ;;  %v4522_v23 = vmul.f32 %v12757_v37, %v14646_v1  ;;  %v14681_v63 = vld [vmem:[#allocation89_spill] sm:$0xff] }
0x2902   :  { %6362 = vrot.lane.b32.xlu2 %v5964_v8, %s14562_s11  ;;  %v4732_v8 = vadd.f32 %v14656_v25, %v4680_v53 }
0x2903   :  { %v4579_v35 = vadd.f32 %v14658_v50, %v4527_v13 }
0x2905   :  { %v4631_v42 = vadd.f32 %v14662_v19, %v4579_v35  ;;  %v14679_v35 = vld [vmem:[#allocation106_spill] sm:$0xff] }
0x2906   :  { %v5939_v55 = vpop.permute.xlu0 %5938 }
0x2907   :  { %v5950_v41 = vsel %vm14644_vm8, %v5939_v55, %v12727_v56  ;;  %v4523_v56 = vmul.f32 %v12821_v44, %v14646_v1  ;;  %v12835_v22 = vpop.permute.xlu2 %6328  ;;  %v4566_v1 = vsel %vm130_vm2, %v14667_v27, %v14659_v48  ;;  %v4683_v15 = vadd.f32 %v14668_v59, %v4631_v42  ;;  %v14686_v27 = vld [vmem:[#allocation92_spill] sm:$0xff]  ;;  %vm14696_vm8 = vmmov %vm14693_vm13 }
0x2908   :  { %v5960_v9 = vadd.f32 %v5950_v41, %v4504_v34  ;;  %v14664_v41 = vld [vmem:[#allocation108_spill] sm:$0xff] }
0x2909   :  { %v4575_v46 = vadd.f32 %v4565_v12, %v4523_v56  ;;  %v4619_v52 = vsel %vm180_vm3, %v14664_v41, %v14662_v19  ;;  %v14669_v12 = vld [vmem:[#allocation76_spill] sm:$0xff] }
0x290a   :  { %6354 = vrot.lane.b32.xlu0 %v5960_v9, %s14562_s11  ;;  %v4784_v9 = vadd.f32 %v14660_v57, %v4732_v8  ;;  %v4668_v56 = vsel %vm230_vm4, %v14669_v12, %v14653_v54  ;;  %v14676_v54 = vld [vmem:[#allocation109_spill] sm:$0xff] }
0x290b   :  { %v4627_v31 = vadd.f32 %v4617_v26, %v4575_v46  ;;  %v4848_v26 = vsel %vm14673_vm10, %v14672_v20, %v14671_v39  ;;  %v4630_v46 = vadd.f32 %v4619_v52, %v4578_v28  ;;  %v14688_v12 = vld [vmem:[#allocation101_spill] sm:$0xff] }
0x290c   :  { %v4836_v33 = vadd.f32 %v14665_v38, %v4784_v9  ;;  %v4577_v38 = vadd.f32 %v4566_v1, %v4525_v0 }
0x290d   :  { %v4679_v10 = vadd.f32 %v4669_v6, %v4627_v31  ;;  %v14675_v6 = vld [vmem:[#allocation97_spill] sm:$0xff] }
0x290e   :  { %v5945_v51 = vpop.permute.xlu0 %5944  ;;  %v6325_v29 = vpop.permute.xlu1 %6324  ;;  %v4720_v4 = vsel %vm280_vm6, %v14675_v6, %v14657_v3  ;;  %v4854_v13 = vmul.f32 %v14671_v39, %v4836_v33  ;;  %v4772_v3 = vsel %vm330_vm5, %v14679_v35, %v14661_v49 }
0x290f   :  { %v5952_v5 = vsel %vm14651_vm12, %v5945_v51, %v5947_v58  ;;  %v4564_v58 = vsel %vm130_vm2, %v14655_v21, %v14648_v11  ;;  %v4731_v62 = vadd.f32 %v4721_v47, %v4679_v10  ;;  %v6333_v31 = vsel %vm14677_vm11, %v12809_v16, %v6325_v29  ;;  %v6387_v21 = vpop.permute.xlu2 %6386  ;;  %vm14742_vm11 = vmmov %vm14689_vm0 }
0x2910   :  { %v5963_v43 = vadd.f32 %v5952_v5, %v4507_v36  ;;  %v4574_v7 = vadd.f32 %v4564_v58, %v4522_v23  ;;  %v14670_v36 = vld [vmem:[#allocation82_spill] sm:$0xff]  ;;  %v14678_v58 = vld [vmem:[#allocation79_spill] sm:$0xff]  ;;  %v14680_v23 = vld [vmem:[#allocation24_spill] sm:$0xff]  ;;  %v6344_v2 = vadd.f32 %v6325_v29, %v4854_v13  ;;  %vm14739_vm12 = vcmask 1031168  }
0x2911   :  { %v4783_v11 = vadd.f32 %v4773_v40, %v4731_v62  ;;  %v4671_v51 = vsel %vm230_vm4, %v14670_v36, %v14668_v59  ;;  %v4618_v53 = vsel %vm180_vm3, %v14678_v58, %v14664_v41  ;;  %v4775_v48 = vsel %vm330_vm5, %v14681_v63, %v14680_v23  ;;  %v14682_v40 = vld [vmem:[#allocation8_spill] sm:$0xff]  ;;  %vm14740_vm10 = vmmov %vm14739_vm12 }
0x2912   :  { %6360 = vrot.lane.b32.xlu0 %v5963_v43, %s14562_s11  ;;  %v4626_v5 = vadd.f32 %v4616_v61, %v4574_v7  ;;  %v14674_v43 = vld [vmem:[#allocation77_spill] sm:$0xff]  ;;  %v4682_v47 = vadd.f32 %v4671_v51, %v4630_v46  ;;  %v4824_v7 = vsel %vm380_vm7, %v14682_v40, %v14666_v24  ;;  %v14684_v61 = vld [vmem:[#allocation95_spill] sm:$0xff]  ;;  %v4670_v24 = vsel %vm230_vm4, %v14686_v27, %v14670_v36 }
0x2913   :  { %v4735_v17 = vadd.f32 %v14674_v43, %v4683_v15  ;;  %v4835_v18 = vadd.f32 %v4825_v60, %v4783_v11  ;;  %v4723_v32 = vsel %vm280_vm6, %v14676_v54, %v14674_v43  ;;  %v4827_v49 = vsel %vm380_vm7, %v14684_v61, %v14683_v14  ;;  %v14691_v46 = vld [vmem:[#allocation83_spill] sm:$0xff] }
0x2914   :  { %v4678_v25 = vadd.f32 %v4668_v56, %v4626_v5  ;;  %v4734_v57 = vadd.f32 %v4723_v32, %v4682_v47  ;;  %v4629_v59 = vadd.f32 %v4618_v53, %v4577_v38  ;;  %v4722_v56 = vsel %vm280_vm6, %v14688_v12, %v14676_v54  ;;  %v14706_v12 = vld [vmem:[#allocation68_spill] sm:$0xff] }
0x2915   :  { %v4853_v50 = vmul.f32 %v4848_v26, %v4835_v18  ;;  %v4787_v10 = vadd.f32 %v14680_v23, %v4735_v17  ;;  %v4774_v43 = vsel %vm330_vm5, %v14691_v46, %v14681_v63  ;;  %v14710_v46 = vld [vmem:[#allocation58_spill] sm:$0xff] }
0x2916   :  { %v6321_v34 = vpop.permute.xlu0 %6320  ;;  %v6331_v55 = vpop.permute.xlu1 %6330  ;;  %v4730_v8 = vadd.f32 %v4720_v4, %v4678_v25  ;;  %v4786_v60 = vadd.f32 %v4775_v48, %v4734_v57  ;;  %v4681_v36 = vadd.f32 %v4670_v24, %v4629_v59  ;;  %v6514_v48 = vld [vmem:[%s13799_s4] sm:$0xff]  ;;  %v14703_v24 = vld [vmem:[#allocation159_spill] sm:$0xff]  ;;  %v14704_v59 = vld [vmem:[#allocation61_spill] sm:$0xff] }
0x2917   :  { %v6343_v19 = vadd.f32 %v6333_v31, %v4853_v50  ;;  %v4839_v41 = vadd.f32 %v14683_v14, %v4787_v10  ;;  %v6332_v0 = vsel %vm14689_vm0, %v6321_v34, %v12809_v16  ;;  %v6335_v51 = vsel %vm14690_vm9, %v12835_v22, %v6331_v55  ;;  %v6393_v18 = vpop.permute.xlu2 %6392  ;;  %v14692_v34 = vld [vmem:[#allocation7_spill] sm:$0xff]  ;;  %vm14745_vm9 = vmmov %vm14740_vm10 }
0x2918   :  { %v4782_v29 = vadd.f32 %v4772_v3, %v4730_v8  ;;  %v4838_v11 = vadd.f32 %v4827_v49, %v4786_v60  ;;  %v4733_v6 = vadd.f32 %v4722_v56, %v4681_v36  ;;  %v6516_v3 = vld [vmem:[%s13799_s4 + $0x10] sm:$0xff]  ;;  %v6515_v10 = vld [vmem:[%s13799_s4 + $0x8] sm:$0xff]  ;;  %v14707_v36 = vld [vmem:[#allocation113_spill] sm:$0xff] }
0x2919   :  { %v4857_v1 = vmul.f32 %v14671_v39, %v4839_v41  ;;  %v4826_v39 = vsel %vm380_vm7, %v14692_v34, %v14684_v61  ;;  %v14697_v61 = vld [vmem:[#allocation53_spill] sm:$0xff]  ;;  %v14698_v49 = vld [vmem:[#allocation52_spill] sm:$0xff]  ;;  %v14714_v34 = vld [vmem:[#allocation62_spill] sm:$0xff] }
0x291a   :  { %v4834_v15 = vadd.f32 %v4824_v7, %v4782_v29  ;;  %v4856_v5 = vmul.f32 %v4848_v26, %v4838_v11  ;;  %v4785_v58 = vadd.f32 %v4774_v43, %v4733_v6  ;;  %v3901_v41 = vsel %vm130_vm2, %v14698_v49, %v14697_v61  ;;  %v14701_v29 = vld [vmem:[#allocation46_spill] sm:$0xff]  ;;  %v14723_v61 = vld [vmem:[#allocation60_spill] sm:$0xff] }
0x291b   :  { %v6347_v17 = vadd.f32 %v6331_v55, %v4857_v1  ;;  %v3863_v60 = vmul.f32 %v12670_v45, %v14701_v29  ;;  %v14705_v11 = vld [vmem:[#allocation162_spill] sm:$0xff]  ;;  %v14709_v45 = vld [vmem:[#allocation112_spill] sm:$0xff] }
0x291c   :  { %v4852_v33 = vmul.f32 %v14672_v20, %v4834_v15  ;;  %v6346_v54 = vadd.f32 %v6335_v51, %v4856_v5  ;;  %v4837_v55 = vadd.f32 %v4826_v39, %v4785_v58  ;;  %v3949_v15 = vsel %vm180_vm3, %v14704_v59, %v14703_v24  ;;  %v14716_v58 = vld [vmem:[#allocation124_spill] sm:$0xff] }
0x291d   :  { %v3951_v56 = vsel %vm180_vm3, %v14706_v12, %v14705_v11 }
0x291e   :  { %v6327_v42 = vpop.permute.xlu0 %6326  ;;  %v6389_v62 = vpop.permute.xlu1 %6388  ;;  %v6342_v4 = vadd.f32 %v6332_v0, %v4852_v33  ;;  %v4855_v50 = vmul.f32 %v14672_v20, %v4837_v55  ;;  %v6518_v20 = vld [vmem:[%s13799_s4 + $0x20] sm:$0xff] }
0x291f   :  { %v6397_v52 = vsel %vm14685_vm15, %v6387_v21, %v6389_v62  ;;  %v6408_v9 = vadd.f32 %v6389_v62, %v6344_v2  ;;  %v6334_v47 = vsel %vm14695_vm1, %v6327_v42, %v12835_v22  ;;  %v6519_v22 = vld [vmem:[%s13799_s4 + $0x28] sm:$0xff]  ;;  %v6517_v2 = vld [vmem:[%s13799_s4 + $0x18] sm:$0xff]  ;;  %v14708_v33 = vld [vmem:[#allocation70_spill] sm:$0xff] }
0x2920   :  { %v6407_v28 = vadd.f32 %v6397_v52, %v6343_v19  ;;  %v6345_v35 = vadd.f32 %v6334_v47, %v4855_v50  ;;  %v14699_v52 = vld [vmem:[#allocation51_spill] sm:$0xff]  ;;  %v3997_v5 = vsel %vm230_vm4, %v14708_v33, %v14707_v36  ;;  %v14718_v55 = vld [vmem:[#allocation66_spill] sm:$0xff]  ;;  %v14719_v50 = vld [vmem:[#allocation48_spill] sm:$0xff] }
0x2921   :  { %6422 = vrot.lane.b32.xlu1 %v6408_v9, %s14687_s23  ;;  %v14700_v9 = vld [vmem:[#allocation49_spill] sm:$0xff] }
0x2922   :  { %6420 = vrot.lane.b32.xlu2 %v6407_v28, %s14687_s23  ;;  %v3903_v38 = vsel %vm130_vm2, %v14700_v9, %v14699_v52  ;;  %v14702_v28 = vld [vmem:[#allocation47_spill] sm:$0xff]  ;;  %v4152_v52 = vld [vmem:[%s13797_s2] sm:$0x3] }
0x2923   :  { %v3861_v27 = vmul.f32 %v12821_v44, %v14702_v28  ;;  %v3911_v1 = vadd.f32 %v3903_v38, %v3863_v60  ;;  %v3999_v44 = vsel %vm230_vm4, %v14710_v46, %v14709_v45 }
0x2925   :  { %v3909_v0 = vadd.f32 %v3901_v41, %v3861_v27  ;;  %v14724_v41 = vld [vmem:[#allocation136_spill] sm:$0xff] }
0x2926   :  { %v6385_v32 = vpop.permute.xlu0 %6384  ;;  %v6395_v16 = vpop.permute.xlu1 %6394 }
0x2927   :  { %v6396_v13 = vsel %vm14693_vm13, %v6385_v32, %v6387_v21  ;;  %v6399_v31 = vsel %vm14694_vm14, %v6393_v18, %v6395_v16  ;;  %v6411_v26 = vadd.f32 %v6395_v16, %v6347_v17  ;;  %v3957_v17 = vadd.f32 %v3949_v15, %v3909_v0  ;;  %v14713_v16 = vld [vmem:[#allocation119_spill] sm:$0xff]  ;;  %v14727_v15 = vld [vmem:[#allocation54_spill] sm:$0xff]  ;;  %vm14746_vm13 = vmmov %vm14745_vm9 }
0x2928   :  { %v6406_v53 = vadd.f32 %v6396_v13, %v6342_v4  ;;  %v6410_v25 = vadd.f32 %v6399_v31, %v6346_v54  ;;  %v14711_v4 = vld [vmem:[#allocation69_spill] sm:$0xff]  ;;  %v4047_v39 = vsel %vm280_vm6, %v14714_v34, %v14713_v16  ;;  %v3996_v11 = vsel %vm230_vm4, %v14727_v15, %v14708_v33 }
0x2929   :  { %6428 = vrot.lane.b32.xlu1 %v6411_v26, %s14687_s23  ;;  %v14712_v54 = vld [vmem:[#allocation105_spill] sm:$0xff]  ;;  %v4005_v13 = vadd.f32 %v3997_v5, %v3957_v17  ;;  %v14715_v26 = vld [vmem:[#allocation131_spill] sm:$0xff] }
0x292a   :  { %6418 = vrot.lane.b32.xlu0 %v6406_v53, %s14687_s23  ;;  %6426 = vrot.lane.b32.xlu2 %v6410_v25, %s14687_s23  ;;  %v4045_v32 = vsel %vm280_vm6, %v14712_v54, %v14711_v4  ;;  %v4093_v53 = vsel %vm330_vm5, %v14716_v58, %v14715_v26  ;;  %v14717_v25 = vld [vmem:[#allocation130_spill] sm:$0xff]  ;;  %v14729_v17 = vld [vmem:[#allocation163_spill] sm:$0xff] }
0x292b   :  { %v4095_v47 = vsel %vm330_vm5, %v14718_v55, %v14717_v25  ;;  %v14730_v4 = vld [vmem:[#allocation158_spill] sm:$0xff] }
0x292c   :  { %v14734_v26 = vld [vmem:[#allocation126_spill] sm:$0xff] }
0x292e   :  { %v6391_v21 = vpop.permute.xlu0 %6390 }
0x292f   :  { %v6398_v23 = vsel %vm14696_vm8, %v6391_v21, %v6393_v18  ;;  %v3959_v18 = vadd.f32 %v3951_v56, %v3911_v1  ;;  %v14720_v21 = vld [vmem:[#allocation50_spill] sm:$0xff]  ;;  %v14728_v56 = vld [vmem:[#allocation59_spill] sm:$0xff] }
0x2930   :  { %v6409_v63 = vadd.f32 %v6398_v23, %v6345_v35  ;;  %v3900_v35 = vsel %vm130_vm2, %v14719_v50, %v14698_v49  ;;  %v4053_v23 = vadd.f32 %v4045_v32, %v4005_v13  ;;  %v4143_v49 = vsel %vm380_vm7, %v14724_v41, %v14723_v61  ;;  %v14733_v13 = vld [vmem:[#allocation118_spill] sm:$0xff] }
0x2931   :  { %6532 = vperm.xlu1 %7799, %v6516_v3   ;;  %v4007_v31 = vadd.f32 %v3999_v44, %v3959_v18  ;;  %v3902_v3 = vsel %vm130_vm2, %v14720_v21, %v14700_v9  ;;  %v14725_v9 = vld [vmem:[#allocation57_spill] sm:$0xff]  ;;  %v3998_v0 = vsel %vm230_vm4, %v14728_v56, %v14710_v46  ;;  %v4044_v18 = vsel %vm280_vm6, %v14729_v17, %v14712_v54  ;;  %vm14731_vm2 = vmmov %vm14689_vm0 }
0x2932   :  { %6527 = vperm.xlu2 %7797, %v6515_v10   ;;  %6424 = vrot.lane.b32.xlu0 %v6409_v63, %s14687_s23  ;;  %v3862_v63 = vmul.f32 %v12858_v30, %v14701_v29  ;;  %v3948_v38 = vsel %vm180_vm3, %v14725_v9, %v14704_v59  ;;  %v14726_v30 = vld [vmem:[#allocation56_spill] sm:$0xff]  ;;  %v4101_v29 = vadd.f32 %v4093_v53, %v4053_v23  ;;  %v4155_v59 = vperm.slane %v4152_v52, 1  ;;  %vm14735_vm4 = vmmov %vm14696_vm8 }
0x2933   :  { %v4055_v10 = vadd.f32 %v4047_v39, %v4007_v31  ;;  %v4046_v32 = vsel %vm280_vm6, %v14730_v4, %v14714_v34  ;;  %v4092_v31 = vsel %vm330_vm5, %v14733_v13, %v14716_v58  ;;  %v4094_v54 = vsel %vm330_vm5, %v14734_v26, %v14718_v55  ;;  %vm14736_vm6 = vmmov %vm14735_vm4  ;;  %v14738_v58 = vld [vmem:[#allocation115_spill] sm:$0xff] }
0x2934   :  { %v3910_v24 = vadd.f32 %v3902_v3, %v3862_v63  ;;  %v4142_v21 = vsel %vm380_vm7, %v14738_v58, %v14724_v41  ;;  %vm14743_vm15 = vmmov %vm14735_vm4 }
0x2935   :  { %v4103_v60 = vadd.f32 %v4095_v47, %v4055_v10 }
0x2937   :  { %v4151_v36 = vadd.f32 %v4143_v49, %v4103_v60  ;;  %v4154_v49 = vperm.slane %v4152_v52, 0 }
0x2939   :  { %6547 = vperm.xlu1 %7799, %v6519_v22   ;;  %v3860_v22 = vmul.f32 %v12757_v37, %v14702_v28  ;;  %v3950_v37 = vsel %vm180_vm3, %v14726_v30, %v14706_v12  ;;  %vm14732_vm3 = vmmov %vm14689_vm0  ;;  %v4161_v25 = vmul.f32 %v4155_v59, %v4151_v36 }
0x293a   :  { %6542 = vperm.xlu2 %7797, %v6518_v20   ;;  %6522 = vperm.xlu0 %7798, %v6514_v48   ;;  %v14721_v20 = vld [vmem:[#allocation161_spill] sm:$0xff]  ;;  %v3958_v44 = vadd.f32 %v3950_v37, %v3910_v24 }
0x293b   :  { %v14722_v48 = vld [vmem:[#allocation137_spill] sm:$0xff]  ;;  %v3908_v27 = vadd.f32 %v3900_v35, %v3860_v22 }
0x293c   :  { %v4006_v16 = vadd.f32 %v3998_v0, %v3958_v44 }
0x293d   :  { %v3956_v45 = vadd.f32 %v3948_v38, %v3908_v27 }
0x293e   :  { %v4054_v34 = vadd.f32 %v4046_v32, %v4006_v16 }
0x293f   :  { %v4004_v33 = vadd.f32 %v3996_v11, %v3956_v45 }
0x2940   :  { %v4102_v10 = vadd.f32 %v4094_v54, %v4054_v34 }
0x2941   :  { %v4052_v47 = vadd.f32 %v4044_v18, %v4004_v33 }
0x2942   :  { %6537 = vperm.xlu0 %7798, %v6517_v2   ;;  %v4141_v2 = vsel %vm380_vm7, %v14722_v48, %v14721_v20 }
0x2943   :  { %v4149_v1 = vadd.f32 %v4141_v2, %v4101_v29  ;;  %v4100_v23 = vadd.f32 %v4092_v31, %v4052_v47 }
0x2944   :  { %v12963_v8 = vpop.permute.xlu2 %5562  ;;  %v12967_v19 = vpop.permute.xlu0 %5560 }
0x2945   :  { %v4159_v53 = vmul.f32 %v4155_v59, %v4149_v1 }
0x294c   :  { %v12965_v40 = vpop.permute.xlu2 %5568 }
0x2954   :  { %v12969_v42 = vpop.permute.xlu2 %6356 }
0x2956   :  { %v12971_v14 = vpop.permute.xlu0 %5566 }
0x2957   :  { %v5574_v37 = vsel %vm14742_vm11, %v12971_v14, %v12965_v40 }
0x295b   :  { %v5565_v57 = vpop.permute.xlu1 %5564 }
0x295c   :  { %v12989_v51 = vpop.permute.xlu2 %6362  ;;  %v5573_v46 = vsel %vm14731_vm2, %v12963_v8, %v5565_v57 }
0x295d   :  { %v5581_v3 = vadd.f32 %v5573_v46, %v4159_v53 }
0x2963   :  { %v5571_v7 = vpop.permute.xlu1 %5570 }
0x2964   :  { %v5575_v39 = vsel %vm14732_vm3, %v12965_v40, %v5571_v7  ;;  %v14737_v7 = vld [vmem:[#allocation160_spill] sm:$0xff]  ;;  %vm14748_vm3 = vcmask 130048  }
0x2965   :  { %v4140_v35 = vsel %vm380_vm7, %v14737_v7, %v14722_v48  ;;  %v5583_v55 = vadd.f32 %v5575_v39, %v4161_v25  ;;  %vm14741_vm7 = vmmov %vm14689_vm0 }
0x2966   :  { %v4148_v61 = vadd.f32 %v4140_v35, %v4100_v23  ;;  %v5572_v41 = vsel %vm14741_vm7, %v12967_v19, %v12963_v8  ;;  %vm14744_vm0 = vmmov %vm14735_vm4 }
0x2967   :  { %vm14751_vm7 = vmmov %vm14748_vm3 }
0x2968   :  { %v4158_v60 = vmul.f32 %v4154_v49, %v4148_v61  ;;  %vm14752_vm11 = vmmov %vm14748_vm3 }
0x296a   :  { %v5580_v11 = vadd.f32 %v5572_v41, %v4158_v60 }
0x296b   :  { %v6359_v62 = vpop.permute.xlu1 %6358 }
0x296c   :  { %v6367_v50 = vsel %vm14735_vm4, %v12969_v42, %v6359_v62 }
0x296d   :  { %v6375_v22 = vadd.f32 %v6367_v50, %v5581_v3 }
0x2973   :  { %v6365_v6 = vpop.permute.xlu1 %6364 }
0x2974   :  { %v6369_v57 = vsel %vm14736_vm6, %v12989_v51, %v6365_v6  ;;  %v4150_v6 = vadd.f32 %v4142_v21, %v4102_v10 }
0x2975   :  { %v6377_v20 = vadd.f32 %v6369_v57, %v5583_v55 }
0x2976   :  { %v4160_v27 = vmul.f32 %v4154_v49, %v4150_v6 }
0x2978   :  { %v5582_v56 = vadd.f32 %v5574_v37, %v4160_v27 }
0x297c   :  { %v12997_v43 = vpop.permute.xlu0 %6354  ;;  %v6421_v28 = vpop.permute.xlu2 %6420 }
0x297d   :  { %v6366_v52 = vsel %vm14743_vm15, %v12997_v43, %v12969_v42  ;;  %vm14753_vm15 = vmmov %vm14748_vm3 }
0x297e   :  { %v6374_v19 = vadd.f32 %v6366_v52, %v5580_v11 }
0x2984   :  { %v6361_v12 = vpop.permute.xlu0 %6360  ;;  %v6427_v62 = vpop.permute.xlu2 %6426 }
0x2985   :  { %v6368_v24 = vsel %vm14744_vm0, %v6361_v12, %v12989_v51  ;;  %v14747_v12 = vld [vmem:[#allocation45_spill] sm:$0xff]  ;;  %vm14754_vm0 = vmmov %vm14748_vm3 }
0x2986   :  { %v6376_v1 = vadd.f32 %v6368_v24, %v5582_v56  ;;  %v6508_v24 = vld [vmem:[%s13798_s3] sm:$0xff] }
0x2993   :  { %v6423_v5 = vpop.permute.xlu1 %6422 }
0x2994   :  { %v6431_v63 = vsel %vm14739_vm12, %v6421_v28, %v6423_v5  ;;  %vm14749_vm12 = vmmov %vm14748_vm3 }
0x2995   :  { %v6439_v38 = vadd.f32 %v6431_v63, %v6375_v22 }
0x299b   :  { %v6429_v2 = vpop.permute.xlu1 %6428 }
0x299c   :  { %v6433_v9 = vsel %vm14740_vm10, %v6427_v62, %v6429_v2  ;;  %v6419_v48 = vpop.permute.xlu0 %6418  ;;  %vm14750_vm10 = vmmov %vm14748_vm3 }
0x299d   :  { %v6441_v30 = vadd.f32 %v6433_v9, %v6377_v20  ;;  %v6430_v8 = vsel %vm14745_vm9, %v6419_v48, %v6421_v28  ;;  %vm14755_vm9 = vmmov %vm14754_vm0 }
0x299e   :  { %v6438_v59 = vadd.f32 %v6430_v8, %v6374_v19  ;;  %v6509_v19 = vld [vmem:[%s13798_s3 + $0x8] sm:$0xff] }
0x299f   :  { %v6449_v29 = vadd.f32 %v6441_v30, %v6439_v38 }
0x29a1   :  { %v6450_v15 = vrot.slane %v6449_v29, 4 }
0x29a3   :  { %v6451_v0 = vadd.f32 %v6450_v15, %v6449_v29 }
0x29a4   :  { %v6425_v36 = vpop.permute.xlu0 %6424 }
0x29a5   :  { %v6452_v40 = vrot.slane %v6451_v0, 2  ;;  %v6432_v14 = vsel %vm14746_vm13, %v6425_v36, %v6427_v62  ;;  %v6510_v36 = vld [vmem:[%s13798_s3 + $0x10] sm:$0xff]  ;;  %vm14756_vm13 = vmmov %vm14754_vm0 }
0x29a6   :  { %v6440_v5 = vadd.f32 %v6432_v14, %v6376_v1  ;;  %v6512_v14 = vld [vmem:[%s13798_s3 + $0x20] sm:$0xff] }
0x29a7   :  { %v6453_v45 = vadd.f32 %v6452_v40, %v6451_v0  ;;  %v6511_v40 = vld [vmem:[%s13798_s3 + $0x18] sm:$0xff] }
0x29a8   :  { %v6442_v44 = vadd.f32 %v6440_v5, %v6438_v59 }
0x29a9   :  { %v6454_v42 = vrot.slane %v6453_v45, 1 }
0x29aa   :  { %v6443_v43 = vrot.slane %v6442_v44, 4 }
0x29ab   :  { %v6455_v17 = vadd.f32 %v6454_v42, %v6453_v45 }
0x29ac   :  { %v6444_v51 = vadd.f32 %v6443_v43, %v6442_v44 }
0x29ad   :  { %v6457_v18 = vmul.f32 %v6455_v17, %v14747_v12 }
0x29ae   :  { %v6445_v4 = vrot.slane %v6444_v51, 2 }
0x29af   :  { %v6459_v32 = vsub.f32 %v6439_v38, %v6457_v18  ;;  %v6461_v33 = vsub.f32 %v6441_v30, %v6457_v18 }
0x29b0   :  { %v6446_v28 = vadd.f32 %v6445_v4, %v6444_v51  ;;  %v6528_v51 = vpop.permute.xlu2 %6527 }
0x29b1   :  { %v6463_v16 = vmul.f32 %v6459_v32, %v6459_v32  ;;  %v6465_v46 = vmul.f32 %v6461_v33, %v6461_v33 }
0x29b2   :  { %v6447_v39 = vrot.slane %v6446_v28, 1 }
0x29b3   :  { %v6473_v13 = vadd.f32 %v6465_v46, %v6463_v16 }
0x29b4   :  { %v6448_v31 = vadd.f32 %v6447_v39, %v6446_v28 }
0x29b5   :  { %v6474_v26 = vrot.slane %v6473_v13, 4 }
0x29b6   :  { %v6456_v54 = vmul.f32 %v6448_v31, %v14747_v12 }
0x29b7   :  { %v6475_v53 = vadd.f32 %v6474_v26, %v6473_v13 }
0x29b8   :  { %v6458_v25 = vsub.f32 %v6438_v59, %v6456_v54  ;;  %v6460_v47 = vsub.f32 %v6440_v5, %v6456_v54  ;;  %v6513_v59 = vld [vmem:[%s13798_s3 + $0x28] sm:$0xff]  ;;  %v6523_v5 = vpop.permute.xlu0 %6522 }
0x29b9   :  { %v6476_v34 = vrot.slane %v6475_v53, 2 }
0x29ba   :  { %v6462_v50 = vmul.f32 %v6458_v25, %v6458_v25  ;;  %v6464_v57 = vmul.f32 %v6460_v47, %v6460_v47 }
0x29bb   :  { %v6477_v7 = vadd.f32 %v6476_v34, %v6475_v53 }
0x29bc   :  { %v6466_v35 = vadd.f32 %v6464_v57, %v6462_v50  ;;  %v13148_v57 = vpop.permute.xlu1 %6532 }
0x29bd   :  { %v6478_v58 = vrot.slane %v6477_v7, 1 }
0x29be   :  { %v6467_v21 = vrot.slane %v6466_v35, 4 }
0x29bf   :  { %v6479_v3 = vadd.f32 %v6478_v58, %v6477_v7 }
0x29c0   :  { %v6468_v55 = vadd.f32 %v6467_v21, %v6466_v35 }
0x29c1   :  { %v6481_v23 = vmul.f32 %v6479_v3, %v14747_v12 }
0x29c2   :  { %v6469_v10 = vrot.slane %v6468_v55, 2 }
0x29c3   :  { %v6483_v63 = vadd.f32 1e-05, %v6481_v23 }
0x29c4   :  { %v6470_v22 = vadd.f32 %v6469_v10, %v6468_v55 }
0x29c5   :  { %7846 = vrsqrt.f32 %v6483_v63  ;;  %vm6500_vm1 = vweird.f32 %v6483_v63 }
0x29c6   :  { %v6471_v20 = vrot.slane %v6470_v22, 1 }
0x29c8   :  { %v6472_v62 = vadd.f32 %v6471_v20, %v6470_v22 }
0x29ca   :  { %v6480_v2 = vmul.f32 %v6472_v62, %v14747_v12 }
0x29cb   :  { %v7847_v61 = vpop.eup %7846 }
0x29cc   :  { %v6495_v6 = vmul.f32 %v7847_v61, %v6483_v63  ;;  %v6482_v49 = vadd.f32 1e-05, %v6480_v2  ;;  %vm6501_vm14 = vweird.f32 %v7847_v61 }
0x29cd   :  { %vm6502_vm8 = vmor %vm6500_vm1, %vm6501_vm14 }
0x29ce   :  { %v6496_v9 = vmul.f32 %v7847_v61, %v6495_v6  ;;  %7848 = vrsqrt.f32 %v6482_v49  ;;  %vm6490_vm4 = vweird.f32 %v6482_v49  ;;  %vm14757_vm14 = vmmov %vm14754_vm0 }
0x29cf   :  { %vm14758_vm1 = vmmov %vm14754_vm0 }
0x29d0   :  { %v6497_v48 = vmul.f32 0.5, %v6496_v9 }
0x29d2   :  { %v6498_v38 = vsub.f32 1.5, %v6497_v48 }
0x29d4   :  { %v7849_v30 = vpop.eup %7848  ;;  %v6499_v41 = vmul.f32 %v7847_v61, %v6498_v38 }
0x29d5   :  { %v6485_v37 = vmul.f32 %v7849_v30, %v6482_v49  ;;  %vm6491_vm2 = vweird.f32 %v7849_v30 }
0x29d6   :  { %v6503_v29 = vsel %vm6502_vm8, %v7847_v61, %v6499_v41  ;;  %vm6492_vm6 = vmor %vm6490_vm4, %vm6491_vm2 }
0x29d7   :  { %v6507_v60 = vmul.f32 %v6503_v29, %v6461_v33  ;;  %v6486_v27 = vmul.f32 %v7849_v30, %v6485_v37  ;;  %v6505_v52 = vmul.f32 %v6503_v29, %v6459_v32  ;;  %vm14759_vm8 = vmmov %vm14754_vm0 }
0x29d9   :  { %6617 = vmatpush.msrb.mxu3 %v6507_v60  ;;  %v6487_v15 = vmul.f32 0.5, %v6486_v27 }
0x29db   :  { %6618 = vmatpush.msrb.mxu3 %v6505_v52  ;;  %v6488_v11 = vsub.f32 1.5, %v6487_v15 }
0x29dc   :  { %7752 = vmatmul.msk.f32.vlgmr.msrb.gmra.mxu3 %vm14748_vm3, %v6508_v24 }
0x29dd   :  { %v6489_v56 = vmul.f32 %v7849_v30, %v6488_v11 }
0x29df   :  { %v6493_v0 = vsel %vm6492_vm6, %v7849_v30, %v6489_v56 }
0x29e0   :  { %v6506_v8 = vmul.f32 %v6493_v0, %v6460_v47  ;;  %v6504_v1 = vmul.f32 %v6493_v0, %v6458_v25 }
0x29e2   :  { %6582 = vmatpush.msrb.mxu2 %v6506_v8 }
0x29e4   :  { %6583 = vmatpush.msrb.mxu2 %v6504_v1  ;;  %7753 = vmatmul.msk.f32.gmra.mxu3 %vm14749_vm12, %v6509_v19 }
0x29e5   :  { %7746 = vmatmul.msk.f32.vlgmr.msrb.gmra.mxu2 %vm14750_vm10, %v6508_v24 }
0x29ec   :  { %7754 = vmatmul.msk.f32.gmra.mxu3 %vm14751_vm7, %v6510_v36 }
0x29ed   :  { %7747 = vmatmul.msk.f32.gmra.mxu2 %vm14752_vm11, %v6509_v19 }
0x29f4   :  { %7755 = vmatmul.msk.f32.gmra.mxu3 %vm14753_vm15, %v6511_v40 }
0x29f5   :  { %7748 = vmatmul.msk.f32.gmra.mxu2 %vm14754_vm0, %v6510_v36 }
0x29fc   :  { %7756 = vmatmul.msk.f32.gmra.mxu3 %vm14755_vm9, %v6512_v14 }
0x29fd   :  { %7749 = vmatmul.msk.f32.gmra.mxu2 %vm14756_vm13, %v6511_v40 }
0x2a04   :  { %7757 = vmatmul.msk.f32.gmra.mxu3 %vm14757_vm14, %v6513_v59 }
0x2a05   :  { %7750 = vmatmul.msk.f32.gmra.mxu2 %vm14758_vm1, %v6512_v14 }
0x2a0d   :  { %7751 = vmatmul.msk.f32.gmra.mxu2 %vm14759_vm8, %v6513_v59 }
0x2a5f   :  { %v6620_v45 = vpop.f32.mrf.mxu3 }
0x2a60   :  { %v13117_v44 = vadd.f32 %v6620_v45, %v6523_v5 }
0x2a62   :  { %v13120_v42 = vmul.f32 0.70710677, %v13117_v44 }
0x2a64   :  { %v6702_v43 = vmul.f32 %v13120_v42, %v13120_v42 }
0x2a66   :  { %v13124_v17 = vmin.f32 %v6702_v43, 16.0 }
0x2a67   :  { %v6623_v12 = vpop.f32.mrf.mxu3 }
0x2a68   :  { %v6704_v18 = vmul.f32 2.1237322e-06, %v13124_v17  ;;  %v6715_v4 = vmul.f32 3.8918573e-05, %v13124_v17  ;;  %v13128_v32 = vadd.f32 %v6623_v12, %v6528_v51  ;;  %v6585_v33 = vpop.f32.mrf.mxu2 }
0x2a69   :  { %v13130_v28 = vadd.f32 %v6585_v33, %v6523_v5 }
0x2a6a   :  { %v6716_v16 = vadd.f32 0.001143296, %v6715_v4  ;;  %v6705_v46 = vadd.f32 0.00028619796, %v6704_v18  ;;  %v13133_v39 = vmul.f32 0.70710677, %v13128_v32 }
0x2a6b   :  { %v13136_v13 = vmul.f32 0.70710677, %v13130_v28 }
0x2a6c   :  { %v6717_v31 = vmul.f32 %v6716_v16, %v13124_v17  ;;  %v6782_v26 = vmul.f32 %v13133_v39, %v13133_v39  ;;  %v6706_v25 = vmul.f32 %v6705_v46, %v13124_v17 }
0x2a6d   :  { %v6662_v54 = vmul.f32 %v13136_v13, %v13136_v13 }
0x2a6e   :  { %v6718_v53 = vadd.f32 0.014752088, %v6717_v31  ;;  %v13144_v47 = vmin.f32 %v6782_v26, 16.0  ;;  %v6707_v10 = vadd.f32 0.0036580483, %v6706_v25 }
0x2a6f   :  { %v13146_v34 = vmin.f32 %v6662_v54, 16.0  ;;  %v6626_v50 = vpop.f32.mrf.mxu3 }
0x2a70   :  { %v6719_v7 = vmul.f32 %v6718_v53, %v13124_v17  ;;  %v6784_v35 = vmul.f32 2.1237322e-06, %v13144_v47  ;;  %v6795_v58 = vmul.f32 3.8918573e-05, %v13144_v47  ;;  %v13155_v3 = vadd.f32 %v6626_v50, %v13148_v57  ;;  %v6588_v20 = vpop.f32.mrf.mxu2 }
0x2a71   :  { %v6664_v21 = vmul.f32 2.1237322e-06, %v13146_v34  ;;  %v6675_v23 = vmul.f32 3.8918573e-05, %v13146_v34  ;;  %v13164_v38 = vadd.f32 %v6588_v20, %v6528_v51  ;;  %v6708_v30 = vmul.f32 %v6707_v10, %v13124_v17 }
0x2a72   :  { %v6720_v55 = vadd.f32 0.112945676, %v6719_v7  ;;  %v6785_v63 = vadd.f32 0.00028619796, %v6784_v35  ;;  %v6796_v22 = vadd.f32 0.001143296, %v6795_v58 }
0x2a73   :  { %v6676_v2 = vadd.f32 0.001143296, %v6675_v23  ;;  %v6665_v6 = vadd.f32 0.00028619796, %v6664_v21  ;;  %v13161_v49 = vmul.f32 0.70710677, %v13155_v3  ;;  %v13200_v21 = vpop.permute.xlu0 %6537 }
0x2a74   :  { %v6721_v62 = vmul.f32 %v6720_v55, %v13124_v17  ;;  %v6797_v61 = vmul.f32 %v6796_v22, %v13144_v47  ;;  %v6786_v41 = vmul.f32 %v6785_v63, %v13144_v47  ;;  %v13177_v56 = vmul.f32 0.70710677, %v13164_v38 }
0x2a75   :  { %v6677_v48 = vmul.f32 %v6676_v2, %v13146_v34  ;;  %v6862_v27 = vmul.f32 %v13161_v49, %v13161_v49  ;;  %v6666_v24 = vmul.f32 %v6665_v6, %v13146_v34  ;;  %v6709_v0 = vadd.f32 0.05243302, %v6708_v30 }
0x2a76   :  { %v6722_v9 = vadd.f32 0.4994258, %v6721_v62  ;;  %v6798_v37 = vadd.f32 0.014752088, %v6797_v61  ;;  %v6787_v8 = vadd.f32 0.0036580483, %v6786_v41  ;;  %v6742_v59 = vmul.f32 %v13177_v56, %v13177_v56 }
0x2a77   :  { %v6678_v60 = vadd.f32 0.014752088, %v6677_v48  ;;  %v13179_v1 = vmin.f32 %v6862_v27, 16.0  ;;  %v6667_v40 = vadd.f32 0.0036580483, %v6666_v24  ;;  %v6710_v5 = vmul.f32 %v6709_v0, %v13124_v17  ;;  %v6629_v25 = vpop.f32.mrf.mxu3 }
0x2a78   :  { %v6723_v29 = vmul.f32 %v6722_v9, %v13124_v17  ;;  %v6799_v52 = vmul.f32 %v6798_v37, %v13144_v47  ;;  %v6788_v45 = vmul.f32 %v6787_v8, %v13144_v47  ;;  %v13192_v31 = vmin.f32 %v6742_v59, 16.0 }
0x2a79   :  { %v6679_v11 = vmul.f32 %v6678_v60, %v13146_v34  ;;  %v6864_v12 = vmul.f32 2.1237322e-06, %v13179_v1  ;;  %v6875_v18 = vmul.f32 3.8918573e-05, %v13179_v1  ;;  %v6668_v33 = vmul.f32 %v6667_v40, %v13146_v34 }
0x2a7a   :  { %v13173_v15 = vadd.f32 1.0, %v6723_v29  ;;  %v6800_v19 = vadd.f32 0.112945676, %v6799_v52  ;;  %v6711_v54 = vadd.f32 0.18741608, %v6710_v5  ;;  %v13206_v63 = vadd.f32 %v6629_v25, %v13200_v21 }
0x2a7b   :  { %v6680_v14 = vadd.f32 0.112945676, %v6679_v11  ;;  %v6876_v46 = vadd.f32 0.001143296, %v6875_v18  ;;  %v6789_v53 = vadd.f32 0.05243302, %v6788_v45 }
0x2a7c   :  { %7850 = vrcp.f32 %v13173_v15  ;;  %v6801_v36 = vmul.f32 %v6800_v19, %v13144_v47  ;;  %v6865_v35 = vadd.f32 0.00028619796, %v6864_v12  ;;  %v6669_v55 = vadd.f32 0.05243302, %v6668_v33 }
0x2a7d   :  { %v6681_v51 = vmul.f32 %v6680_v14, %v13146_v34  ;;  %v6877_v58 = vmul.f32 %v6876_v46, %v13179_v1  ;;  %v6755_v10 = vmul.f32 3.8918573e-05, %v13192_v31  ;;  %v6790_v22 = vmul.f32 %v6789_v53, %v13144_v47 }
0x2a7e   :  { %v6802_v43 = vadd.f32 0.4994258, %v6801_v36  ;;  %v6712_v2 = vmul.f32 %v6711_v54, %v13124_v17  ;;  %v6866_v61 = vmul.f32 %v6865_v35, %v13179_v1  ;;  %v6670_v6 = vmul.f32 %v6669_v55, %v13146_v34  ;;  %v6591_v55 = vpop.f32.mrf.mxu2 }
0x2a7f   :  { %v6682_v16 = vadd.f32 0.4994258, %v6681_v51  ;;  %v6878_v62 = vadd.f32 0.014752088, %v6877_v58  ;;  %v6744_v9 = vmul.f32 2.1237322e-06, %v13192_v31  ;;  %vm6730_vm3 = vweird.f32 %v13173_v15 }
0x2a80   :  { %v6803_v4 = vmul.f32 %v6802_v43, %v13144_v47  ;;  %v6756_v41 = vadd.f32 0.001143296, %v6755_v10  ;;  %v13218_v37 = vmul.f32 0.70710677, %v13206_v63  ;;  %v13221_v29 = vmul.f32 0.5, %v13117_v44 }
0x2a81   :  { %v6683_v7 = vmul.f32 %v6682_v16, %v13146_v34  ;;  %v6879_v30 = vmul.f32 %v6878_v62, %v13179_v1  ;;  %v13224_v17 = vmul.f32 0.5, %v13128_v32  ;;  %v6791_v60 = vadd.f32 0.18741608, %v6790_v22 }
0x2a82   :  { %v13194_v26 = vpop.eup %7850  ;;  %v13196_v50 = vadd.f32 1.0, %v6803_v4  ;;  %v6713_v27 = vadd.f32 1.1283791, %v6712_v2  ;;  %v6867_v52 = vadd.f32 0.0036580483, %v6866_v61  ;;  %v13228_v11 = vmul.f32 0.5, %v13130_v28 }
0x2a83   :  { %v6726_v23 = vmul.f32 %v13194_v26, %v13173_v15  ;;  %v13209_v20 = vadd.f32 1.0, %v6683_v7  ;;  %v6880_v24 = vadd.f32 0.112945676, %v6879_v30  ;;  %v6671_v0 = vadd.f32 0.18741608, %v6670_v6 }
0x2a84   :  { %7852 = vrcp.f32 %v13196_v50  ;;  %v13231_v8 = vmul.f32 0.5, %v13155_v3  ;;  %v6757_v19 = vmul.f32 %v6756_v41, %v13192_v31  ;;  %v6745_v40 = vadd.f32 0.00028619796, %v6744_v9 }
0x2a85   :  { %v6727_v48 = vsub.f32 1.0, %v6726_v23  ;;  %7854 = vrcp.f32 %v13209_v20  ;;  %v6881_v36 = vmul.f32 %v6880_v24, %v13179_v1  ;;  %v6942_v14 = vmul.f32 %v13218_v37, %v13218_v37 }
0x2a86   :  { %v6734_v59 = vand.u32 2147483647, %v13173_v15  ;;  %v6736_v28 = vand.u32 2147483648, %v13173_v15  ;;  %v6792_v5 = vmul.f32 %v6791_v60, %v13144_v47  ;;  %v13244_v3 = vmul.f32 0.5, %v13164_v38  ;;  %v6594_v23 = vpop.f32.mrf.mxu2 }
0x2a87   :  { %v6728_v32 = vmul.f32 %v13194_v26, %v6727_v48  ;;  %v6714_v45 = vmul.f32 %v6713_v27, %v13120_v42  ;;  %v6868_v43 = vmul.f32 %v6867_v52, %v13179_v1  ;;  %v6882_v51 = vadd.f32 0.4994258, %v6881_v36 }
0x2a88   :  { %v6758_v12 = vadd.f32 0.014752088, %v6757_v19  ;;  %vm6731_vm2 = vweird.f32 %v13194_v26  ;;  %v6672_v33 = vmul.f32 %v6671_v0, %v13146_v34  ;;  %v13254_v16 = vmin.f32 %v6942_v14, 16.0  ;;  %v6632_v19 = vpop.f32.mrf.mxu3 }
0x2a89   :  { %v6729_v47 = vadd.f32 %v13194_v26, %v6728_v32  ;;  %v6883_v38 = vmul.f32 %v6882_v51, %v13179_v1  ;;  %v6746_v42 = vmul.f32 %v6745_v40, %v13192_v31  ;;  %vm13261_vm4 = vcmp.eq.f32.partialorder %v6734_v59, 8.507059e+37  ;;  %vm13271_vm6 = vmor %vm6730_vm3, %vm6731_vm2  ;;  %v13302_v40 = vpop.permute.xlu2 %6542 }
0x2a8a   :  { %v13234_v44 = vpop.eup %7852  ;;  %v6759_v46 = vmul.f32 %v6758_v12, %v13192_v31  ;;  %v6737_v53 = vor.u32 1.1754944e-38, %v6736_v28  ;;  %v6793_v25 = vadd.f32 1.1283791, %v6792_v5  ;;  %v6869_v7 = vadd.f32 0.05243302, %v6868_v43 }
0x2a8b   :  { %v13248_v18 = vpop.eup %7854  ;;  %v6806_v4 = vmul.f32 %v13234_v44, %v13196_v50  ;;  %v13267_v35 = vadd.f32 1.0, %v6883_v38  ;;  %v6816_v10 = vand.u32 2147483648, %v13196_v50  ;;  %v6673_v22 = vadd.f32 1.1283791, %v6672_v33 }
0x2a8c   :  { %v6686_v34 = vmul.f32 %v13248_v18, %v13209_v20  ;;  %v6760_v58 = vadd.f32 0.112945676, %v6759_v46  ;;  %v6944_v62 = vmul.f32 2.1237322e-06, %v13254_v16  ;;  %v6733_v2 = vsel %vm13271_vm6, %v13194_v26, %v6729_v47 }
0x2a8d   :  { %v6807_v15 = vsub.f32 1.0, %v6806_v4  ;;  %7856 = vrcp.f32 %v13267_v35  ;;  %v6747_v61 = vadd.f32 0.0036580483, %v6746_v42  ;;  %v6955_v6 = vmul.f32 3.8918573e-05, %v13254_v16 }
0x2a8e   :  { %v13283_v9 = vmul.f32 %v6793_v25, %v13133_v39  ;;  %v6761_v48 = vmul.f32 %v6760_v58, %v13192_v31  ;;  %v13287_v30 = vmul.f32 0.5, %v13206_v63  ;;  %v13290_v41 = vadd.f32 %v6591_v55, %v13148_v57 }
0x2a8f   :  { %vm6810_vm12 = vweird.f32 %v13196_v50  ;;  %v6814_v26 = vand.u32 2147483647, %v13196_v50  ;;  %v6687_v60 = vsub.f32 1.0, %v6686_v34  ;;  %v6870_v27 = vmul.f32 %v6869_v7, %v13179_v1 }
0x2a90   :  { %v6738_v52 = vsel %vm13261_vm4, %v6737_v53, %v6733_v2  ;;  %v6808_v39 = vmul.f32 %v13234_v44, %v6807_v15  ;;  %v6762_v24 = vadd.f32 0.4994258, %v6761_v48  ;;  %v6945_v0 = vadd.f32 0.00028619796, %v6944_v62 }
0x2a91   :  { %v6817_v63 = vor.u32 1.1754944e-38, %v6816_v10  ;;  %v13299_v32 = vmul.f32 %v6673_v22, %v13136_v13  ;;  %v6748_v57 = vmul.f32 %v6747_v61, %v13192_v31  ;;  %v6956_v36 = vadd.f32 0.001143296, %v6955_v6 }
0x2a92   :  { %v6694_v14 = vand.u32 2147483647, %v13209_v20  ;;  %v6696_v59 = vand.u32 2147483648, %v13209_v20  ;;  %v6763_v28 = vmul.f32 %v6762_v24, %v13192_v31  ;;  %v13308_v5 = vmul.f32 0.70710677, %v13290_v41 }
0x2a93   :  { %v13310_v43 = vpop.eup %7856  ;;  %v6739_v51 = vmul.f32 %v6738_v52, %v6714_v45  ;;  %v6688_v13 = vmul.f32 %v13248_v18, %v6687_v60  ;;  %v6957_v12 = vmul.f32 %v6956_v36, %v13254_v16  ;;  %v13315_v4 = vadd.f32 %v6632_v19, %v13302_v40 }
0x2a94   :  { %v6809_v33 = vadd.f32 %v13234_v44, %v6808_v39  ;;  %vm6811_vm10 = vweird.f32 %v13234_v44  ;;  %vm13319_vm7 = vcmp.eq.f32.partialorder %v6814_v26, 8.507059e+37  ;;  %v6871_v38 = vadd.f32 0.18741608, %v6870_v27 }
0x2a95   :  { %v6946_v42 = vmul.f32 %v6945_v0, %v13254_v16  ;;  %v6749_v46 = vadd.f32 0.05243302, %v6748_v57  ;;  %v13324_v45 = vadd.f32 1.0, %v6763_v28  ;;  %v6958_v54 = vadd.f32 0.014752088, %v6957_v12  ;;  %vm13345_vm9 = vmor %vm6810_vm12, %vm6811_vm10 }
0x2a96   :  { %v6822_v53 = vmul.f32 %v13308_v5, %v13308_v5  ;;  %vm6690_vm11 = vweird.f32 %v13209_v20  ;;  %vm13329_vm15 = vcmp.eq.f32.partialorder %v6694_v14, 8.507059e+37  ;;  %v6886_v34 = vmul.f32 %v13310_v43, %v13267_v35 }
0x2a97   :  { %v13336_v7 = vmul.f32 0.70710677, %v13315_v4  ;;  %v7759_v58 = vclamps-f32 %v6739_v51, 1.0  ;;  %v6689_v55 = vadd.f32 %v13248_v18, %v6688_v13  ;;  %vm6691_vm0 = vweird.f32 %v13248_v18 }
0x2a98   :  { %7858 = vrcp.f32 %v13324_v45  ;;  %v6872_v10 = vmul.f32 %v6871_v38, %v13179_v1  ;;  %v6947_v22 = vadd.f32 0.0036580483, %v6946_v42  ;;  %v6959_v62 = vmul.f32 %v6958_v54, %v13254_v16  ;;  %vm13361_vm13 = vmor %vm6690_vm11, %vm6691_vm0 }
0x2a99   :  { %v13351_v2 = vmin.f32 %v6822_v53, 16.0  ;;  %v6813_v61 = vsel %vm13345_vm9, %v13234_v44, %v6809_v33  ;;  %v6697_v6 = vor.u32 1.1754944e-38, %v6696_v59  ;;  %v6750_v48 = vmul.f32 %v6749_v46, %v13192_v31 }
0x2a9a   :  { %v7022_v50 = vmul.f32 %v13336_v7, %v13336_v7  ;;  %v6887_v1 = vsub.f32 1.0, %v6886_v34  ;;  %v6960_v60 = vadd.f32 0.112945676, %v6959_v62  ;;  %v13367_v52 = vadd.f32 %v6594_v23, %v13200_v21 }
0x2a9b   :  { %v6824_v27 = vmul.f32 2.1237322e-06, %v13351_v2  ;;  %v13369_v44 = vadd.f32 1.0, %v7759_v58  ;;  %v6693_v39 = vsel %vm13361_vm13, %v13248_v18, %v6689_v55  ;;  %v6835_v24 = vmul.f32 3.8918573e-05, %v13351_v2 }
0x2a9c   :  { %v13375_v20 = vmin.f32 %v7022_v50, 16.0  ;;  %v6873_v0 = vadd.f32 1.1283791, %v6872_v10  ;;  %v6948_v19 = vmul.f32 %v6947_v22, %v13254_v16  ;;  %v6961_v57 = vmul.f32 %v6960_v60, %v13254_v16 }
0x2a9d   :  { %v6825_v36 = vadd.f32 0.00028619796, %v6824_v27  ;;  %v6818_v21 = vsel %vm13319_vm7, %v6817_v63, %v6813_v61  ;;  %v6894_v59 = vand.u32 2147483647, %v13267_v35  ;;  %v6836_v28 = vadd.f32 0.001143296, %v6835_v24 }
0x2a9e   :  { %v13379_v14 = vpop.eup %7858  ;;  %v7035_v18 = vmul.f32 3.8918573e-05, %v13375_v20  ;;  %v6698_v51 = vsel %vm13329_vm15, %v6697_v6, %v6693_v39  ;;  %v6888_v13 = vmul.f32 %v13310_v43, %v6887_v1  ;;  %v6751_v12 = vadd.f32 0.18741608, %v6750_v48 }
0x2a9f   :  { %v13389_v33 = vmul.f32 0.70710677, %v13367_v52  ;;  %v6766_v38 = vmul.f32 %v13379_v14, %v13324_v45  ;;  %v6962_v42 = vadd.f32 0.4994258, %v6961_v57  ;;  %v6826_v63 = vmul.f32 %v6825_v36, %v13351_v2 }
0x2aa0   :  { %v6837_v47 = vmul.f32 %v6836_v28, %v13351_v2  ;;  %v13396_v46 = vmul.f32 %v6818_v21, %v13283_v9  ;;  %v6896_v54 = vand.u32 2147483648, %v13267_v35  ;;  %v6949_v53 = vadd.f32 0.05243302, %v6948_v19 }
0x2aa1   :  { %v7036_v25 = vadd.f32 0.001143296, %v7035_v18  ;;  %v13400_v34 = vmul.f32 %v6698_v51, %v13299_v32  ;;  %v6963_v58 = vmul.f32 %v6962_v42, %v13254_v16  ;;  %v6827_v55 = vadd.f32 0.0036580483, %v6826_v63 }
0x2aa2   :  { %v6838_v23 = vadd.f32 0.014752088, %v6837_v47  ;;  %v6889_v15 = vadd.f32 %v13310_v43, %v6888_v13  ;;  %vm6891_vm14 = vweird.f32 %v13310_v43  ;;  %v6902_v9 = vmul.f32 %v13389_v33, %v13389_v33  ;;  %v6635_v13 = vpop.f32.mrf.mxu3  ;;  %v13439_v47 = vpop.permute.xlu1 %6547 }
0x2aa3   :  { %v7037_v10 = vmul.f32 %v7036_v25, %v13375_v20  ;;  %v6752_v22 = vmul.f32 %v6751_v12, %v13192_v31  ;;  %v6767_v62 = vsub.f32 1.0, %v6766_v38  ;;  %v13409_v61 = vadd.f32 1.0, %v6963_v58 }
0x2aa4   :  { %v6839_v32 = vmul.f32 %v6838_v23, %v13351_v2  ;;  %v6874_v6 = vmul.f32 %v6873_v0, %v13161_v49  ;;  %vm6890_vm1 = vweird.f32 %v13267_v35  ;;  %v6950_v48 = vmul.f32 %v6949_v53, %v13254_v16 }
0x2aa5   :  { %v7038_v50 = vadd.f32 0.014752088, %v7037_v10  ;;  %v7761_v26 = vclamps-f32 %v13396_v46, 1.0  ;;  %vm13416_vm8 = vmor %vm6890_vm1, %vm6891_vm14  ;;  %7860 = vrcp.f32 %v13409_v61  ;;  %v6828_v31 = vmul.f32 %v6827_v55, %v13351_v2 }
0x2aa6   :  { %v13422_v60 = vmin.f32 %v6902_v9, 16.0  ;;  %v6893_v49 = vsel %vm13416_vm8, %v13310_v43, %v6889_v15  ;;  %vm6895_vm2 = vcmp.eq.f32.partialorder %v6894_v59, 8.507059e+37  ;;  %v6897_v35 = vor.u32 1.1754944e-38, %v6896_v54 }
0x2aa7   :  { %v6840_v27 = vadd.f32 0.112945676, %v6839_v32  ;;  %v7758_v39 = vclamps-f32 %v13400_v34, 1.0  ;;  %v6753_v24 = vadd.f32 1.1283791, %v6752_v22  ;;  %v6768_v0 = vmul.f32 %v13379_v14, %v6767_v62 }
0x2aa8   :  { %v7039_v19 = vmul.f32 %v7038_v50, %v13375_v20  ;;  %v6774_v57 = vand.u32 2147483647, %v13324_v45  ;;  %v6951_v36 = vadd.f32 0.18741608, %v6950_v48  ;;  %v7024_v28 = vmul.f32 2.1237322e-06, %v13375_v20 }
0x2aa9   :  { %v6841_v21 = vmul.f32 %v6840_v27, %v13351_v2  ;;  %v6898_v18 = vsel %vm6895_vm2, %v6897_v35, %v6893_v49  ;;  %v6829_v51 = vadd.f32 0.05243302, %v6828_v31  ;;  %v6904_v43 = vmul.f32 2.1237322e-06, %v13422_v60 }
0x2aaa   :  { %v6915_v59 = vmul.f32 3.8918573e-05, %v13422_v60  ;;  %vm6770_vm3 = vweird.f32 %v13324_v45  ;;  %v6776_v12 = vand.u32 2147483648, %v13324_v45  ;;  %v7040_v42 = vadd.f32 0.112945676, %v7039_v19 }
0x2aab   :  { %v6842_v38 = vadd.f32 0.4994258, %v6841_v21  ;;  %v13437_v63 = vpop.eup %7860  ;;  %v6769_v46 = vadd.f32 %v13379_v14, %v6768_v0  ;;  %vm6771_vm4 = vweird.f32 %v13379_v14  ;;  %v6905_v54 = vadd.f32 0.00028619796, %v6904_v43 }
0x2aac   :  { %v6916_v53 = vadd.f32 0.001143296, %v6915_v59  ;;  %v6899_v25 = vmul.f32 %v6898_v18, %v6874_v6  ;;  %v6952_v34 = vmul.f32 %v6951_v36, %v13254_v16  ;;  %v6966_v58 = vmul.f32 %v13437_v63, %v13409_v61  ;;  %vm13454_vm6 = vmor %vm6770_vm3, %vm6771_vm4 }
0x2aad   :  { %v13447_v55 = vadd.f32 %v6635_v13, %v13439_v47  ;;  %v6830_v23 = vmul.f32 %v6829_v51, %v13351_v2  ;;  %v6843_v15 = vmul.f32 %v6842_v38, %v13351_v2  ;;  %v7025_v10 = vadd.f32 0.00028619796, %v7024_v28  ;;  %v6597_v28 = vpop.f32.mrf.mxu2 }
0x2aae   :  { %v6906_v9 = vmul.f32 %v6905_v54, %v13422_v60  ;;  %vm13458_vm12 = vcmp.eq.f32.partialorder %v6774_v57, 8.507059e+37  ;;  %v6777_v62 = vor.u32 1.1754944e-38, %v6776_v12  ;;  %v7041_v32 = vmul.f32 %v7040_v42, %v13375_v20 }
0x2aaf   :  { %v6917_v6 = vmul.f32 %v6916_v53, %v13422_v60  ;;  %v6773_v48 = vsel %vm13454_vm6, %v13379_v14, %v6769_v46  ;;  %v6967_v50 = vsub.f32 1.0, %v6966_v58  ;;  %v13467_v1 = vadd.f32 1.0, %v6843_v15 }
0x2ab0   :  { %v6907_v45 = vadd.f32 0.0036580483, %v6906_v9  ;;  %v6953_v31 = vadd.f32 1.1283791, %v6952_v34  ;;  %v13470_v35 = vmul.f32 0.70710677, %v13447_v55  ;;  %v7026_v19 = vmul.f32 %v7025_v10, %v13375_v20 }
0x2ab1   :  { %v6918_v49 = vadd.f32 0.014752088, %v6917_v6  ;;  %v7763_v27 = vclamps-f32 %v6899_v25, 1.0  ;;  %v6831_v0 = vadd.f32 0.18741608, %v6830_v23  ;;  %7862 = vrcp.f32 %v13467_v1 }
0x2ab2   :  { %v13476_v57 = vmul.f32 %v13369_v44, %v13221_v29  ;;  %v13478_v14 = vadd.f32 1.0, %v7761_v26  ;;  %v6778_v36 = vsel %vm13458_vm12, %v6777_v62, %v6773_v48  ;;  %v7042_v21 = vadd.f32 0.4994258, %v7041_v32 }
0x2ab3   :  { %v6968_v18 = vmul.f32 %v13437_v63, %v6967_v50  ;;  %v6908_v51 = vmul.f32 %v6907_v45, %v13422_v60  ;;  %v6919_v43 = vmul.f32 %v6918_v49, %v13422_v60  ;;  %v7102_v59 = vmul.f32 %v13470_v35, %v13470_v35 }
0x2ab4   :  { %v7142_v13 = vadd.f32 1.0, %v7758_v39  ;;  %v6754_v29 = vmul.f32 %v6753_v24, %v13177_v56  ;;  %v6974_v44 = vand.u32 2147483647, %v13409_v61  ;;  %v6976_v26 = vand.u32 2147483648, %v13409_v61 }
0x2ab5   :  { %v13490_v12 = vadd.f32 1.0, %v7763_v27  ;;  %v6954_v38 = vmul.f32 %v6953_v31, %v13218_v37  ;;  %v6832_v42 = vmul.f32 %v6831_v0, %v13351_v2  ;;  %v7027_v46 = vadd.f32 0.0036580483, %v7026_v19  ;;  %v6600_v0 = vpop.f32.mrf.mxu2 }
0x2ab6   :  { %v6779_v54 = vmul.f32 %v6778_v36, %v6754_v29  ;;  %v7043_v53 = vmul.f32 %v7042_v21, %v13375_v20  ;;  %v6920_v25 = vadd.f32 0.112945676, %v6919_v43  ;;  %v13495_v34 = vmin.f32 %v7102_v59, 16.0 }
0x2ab7   :  { %v7863_v39 = vpop.eup %7862  ;;  %v6969_v56 = vadd.f32 %v13437_v63, %v6968_v18  ;;  %vm6970_vm10 = vweird.f32 %v13409_v61  ;;  %vm6971_vm7 = vweird.f32 %v13437_v63  ;;  %v6909_v24 = vadd.f32 0.05243302, %v6908_v51 }
0x2ab8   :  { %vm13500_vm11 = vcmp.eq.f32.partialorder %v6974_v44, 8.507059e+37  ;;  %v6977_v37 = vor.u32 1.1754944e-38, %v6976_v26  ;;  %v6846_v2 = vmul.f32 %v7863_v39, %v13467_v1  ;;  %v6921_v23 = vmul.f32 %v6920_v25, %v13422_v60  ;;  %vm13511_vm15 = vmor %vm6970_vm10, %vm6971_vm7 }
0x2ab9   :  { %v6833_v15 = vadd.f32 1.1283791, %v6832_v42  ;;  %v6856_v10 = vand.u32 2147483648, %v13467_v1  ;;  %v7115_v9 = vmul.f32 3.8918573e-05, %v13495_v34  ;;  %v13509_v22 = vadd.f32 %v6597_v28, %v13302_v40 }
0x2aba   :  { %v7760_v61 = vclamps-f32 %v6779_v54, 1.0  ;;  %v6847_v62 = vsub.f32 1.0, %v6846_v2  ;;  %v13515_v32 = vadd.f32 1.0, %v7043_v53  ;;  %v6922_v6 = vadd.f32 0.4994258, %v6921_v23 }
0x2abb   :  { %v6973_v48 = vsel %vm13511_vm15, %v13437_v63, %v6969_v56  ;;  %vm6851_vm0 = vweird.f32 %v7863_v39  ;;  %v6854_v50 = vand.u32 2147483647, %v13467_v1  ;;  %v6910_v45 = vmul.f32 %v6909_v24, %v13422_v60 }
0x2abc   :  { %v6848_v40 = vmul.f32 %v7863_v39, %v6847_v62  ;;  %v6923_v31 = vmul.f32 %v6922_v6, %v13422_v60  ;;  %v7104_v49 = vmul.f32 2.1237322e-06, %v13495_v34  ;;  %v7116_v27 = vadd.f32 0.001143296, %v7115_v9 }
0x2abd   :  { %v6834_v19 = vmul.f32 %v6833_v15, %v13308_v5  ;;  %vm6850_vm9 = vweird.f32 %v13467_v1  ;;  %v6857_v36 = vor.u32 1.1754944e-38, %v6856_v10  ;;  %v13527_v21 = vmul.f32 0.70710677, %v13509_v22 }
0x2abe   :  { %v6849_v63 = vadd.f32 %v7863_v39, %v6848_v40  ;;  %7864 = vrcp.f32 %v13515_v32  ;;  %v13530_v28 = vadd.f32 1.0, %v6923_v31  ;;  %v7117_v18 = vmul.f32 %v7116_v27, %v13495_v34  ;;  %vm6852_vm13 = vmor %vm6850_vm9, %vm6851_vm0 }
0x2abf   :  { %v6978_v51 = vsel %vm13500_vm11, %v6977_v37, %v6973_v48  ;;  %v6911_v43 = vadd.f32 0.18741608, %v6910_v45  ;;  %v6982_v5 = vmul.f32 %v13527_v21, %v13527_v21  ;;  %v13539_v1 = vadd.f32 %v6600_v0, %v13439_v47 }
0x2ac0   :  { %v6853_v59 = vsel %vm6852_vm13, %v7863_v39, %v6849_v63  ;;  %vm6855_vm14 = vcmp.eq.f32.partialorder %v6854_v50, 8.507059e+37  ;;  %7866 = vrcp.f32 %v13530_v28  ;;  %v7105_v29 = vadd.f32 0.00028619796, %v7104_v49 }
0x2ac1   :  { %v13543_v44 = vmul.f32 %v7142_v13, %v13228_v11  ;;  %v7144_v26 = vadd.f32 1.0, %v7760_v61  ;;  %v6858_v42 = vsel %vm6855_vm14, %v6857_v36, %v6853_v59  ;;  %v7028_v54 = vmul.f32 %v7027_v46, %v13375_v20 }
0x2ac2   :  { %v6979_v53 = vmul.f32 %v6978_v51, %v6954_v38  ;;  %v6859_v25 = vmul.f32 %v6858_v42, %v6834_v19  ;;  %v7118_v56 = vadd.f32 0.014752088, %v7117_v18  ;;  %v13546_v24 = vmin.f32 %v6982_v5, 16.0 }
0x2ac3   :  { %v13550_v47 = vmul.f32 %v13478_v14, %v13224_v17  ;;  %v6642_v39 = vmul.f32 0.5, %v13290_v41  ;;  %v6912_v58 = vmul.f32 %v6911_v43, %v13422_v60  ;;  %v13555_v11 = vmul.f32 0.70710677, %v13539_v1 }
0x2ac4   :  { %v13557_v13 = vpop.eup %7864  ;;  %v13561_v38 = vmul.f32 %v13490_v12, %v13231_v8  ;;  %v7106_v46 = vmul.f32 %v7105_v29, %v13495_v34  ;;  %v7119_v37 = vmul.f32 %v7118_v56, %v13495_v34  ;;  %v6984_v17 = vmul.f32 2.1237322e-06, %v13546_v24 }
0x2ac5   :  { %v7762_v14 = vclamps-f32 %v6859_v25, 1.0  ;;  %v7029_v2 = vadd.f32 0.05243302, %v7028_v54  ;;  %v6995_v41 = vmul.f32 3.8918573e-05, %v13546_v24  ;;  %v7062_v60 = vmul.f32 %v13555_v11, %v13555_v11 }
0x2ac6   :  { %v7867_v23 = vpop.eup %7866  ;;  %v13570_v15 = vmul.f32 %v7144_v26, %v13244_v3  ;;  %v7765_v10 = vclamps-f32 %v6979_v53, 1.0  ;;  %v7120_v8 = vadd.f32 0.112945676, %v7119_v37  ;;  %v7166_v12 = vmul.f32 %v13543_v44, %v13543_v44 }
0x2ac7   :  { %v7046_v9 = vmul.f32 %v13557_v13, %v13515_v32  ;;  %v6913_v61 = vadd.f32 1.1283791, %v6912_v58  ;;  %v6926_v16 = vmul.f32 %v7867_v23, %v13530_v28  ;;  %v6985_v62 = vadd.f32 0.00028619796, %v6984_v17 }
0x2ac8   :  { %v7107_v6 = vadd.f32 0.0036580483, %v7106_v46  ;;  %v7121_v48 = vmul.f32 %v7120_v8, %v13495_v34  ;;  %v6996_v50 = vadd.f32 0.001143296, %v6995_v41  ;;  %v7167_v3 = vmul.f32 %v13476_v57, %v13476_v57 }
0x2ac9   :  { %v7146_v45 = vadd.f32 1.0, %v7762_v14  ;;  %v6927_v40 = vsub.f32 1.0, %v6926_v16  ;;  %v6936_v31 = vand.u32 2147483648, %v13530_v28  ;;  %v13581_v49 = vmin.f32 %v7062_v60, 16.0 }
0x2aca   :  { %v6934_v27 = vand.u32 2147483647, %v13530_v28  ;;  %v7122_v0 = vadd.f32 0.4994258, %v7121_v48  ;;  %v6997_v19 = vmul.f32 %v6996_v50, %v13546_v24  ;;  %v7178_v36 = vadd.f32 %v7167_v3, %v7166_v12 }
0x2acb   :  { %v6928_v63 = vmul.f32 %v7867_v23, %v6927_v40  ;;  %vm6931_vm1 = vweird.f32 %v7867_v23  ;;  %v6986_v18 = vmul.f32 %v6985_v62, %v13546_v24  ;;  %v7064_v51 = vmul.f32 2.1237322e-06, %v13581_v49 }
0x2acc   :  { %vm6930_vm8 = vweird.f32 %v13530_v28  ;;  %v7123_v43 = vmul.f32 %v7122_v0, %v13495_v34  ;;  %v6998_v5 = vadd.f32 0.014752088, %v6997_v19  ;;  %v7075_v59 = vmul.f32 3.8918573e-05, %v13581_v49  ;;  %7179 = vadd.xlane.f32.xlu0 %v7178_v36 }
0x2acd   :  { %v13590_v29 = vmul.f32 %v7146_v45, %v6642_v39  ;;  %v6929_v26 = vadd.f32 %v7867_v23, %v6928_v63  ;;  %v6937_v42 = vor.u32 1.1754944e-38, %v6936_v31  ;;  %v7065_v54 = vadd.f32 0.00028619796, %v7064_v51  ;;  %vm6932_vm2 = vmor %vm6930_vm8, %vm6931_vm1 }
0x2ace   :  { %v13592_v53 = vadd.f32 1.0, %v7123_v43  ;;  %v6999_v25 = vmul.f32 %v6998_v5, %v13546_v24  ;;  %v7076_v56 = vadd.f32 0.001143296, %v7075_v59  ;;  %v7168_v28 = vmul.f32 %v13570_v15, %v13570_v15 }
0x2acf   :  { %v6914_v58 = vmul.f32 %v6913_v61, %v13389_v33  ;;  %v6933_v46 = vsel %vm6932_vm2, %v7867_v23, %v6929_v26  ;;  %vm6935_vm3 = vcmp.eq.f32.partialorder %v6934_v27, 8.507059e+37  ;;  %v6987_v37 = vadd.f32 0.0036580483, %v6986_v18 }
0x2ad0   :  { %v7149_v17 = vadd.f32 1.0, %v7765_v10  ;;  %v6938_v39 = vsel %vm6935_vm3, %v6937_v42, %v6933_v46  ;;  %7868 = vrcp.f32 %v13592_v53  ;;  %v7169_v14 = vmul.f32 %v13550_v47, %v13550_v47 }
0x2ad1   :  { %v7047_v41 = vsub.f32 1.0, %v7046_v9  ;;  %v6939_v60 = vmul.f32 %v6938_v39, %v6914_v58  ;;  %v7108_v8 = vmul.f32 %v7107_v6, %v13495_v34  ;;  %v7000_v12 = vadd.f32 0.112945676, %v6999_v25 }
0x2ad2   :  { %v7066_v16 = vmul.f32 %v7065_v54, %v13581_v49  ;;  %v7077_v62 = vmul.f32 %v7076_v56, %v13581_v49  ;;  %v7181_v33 = vadd.f32 %v7169_v14, %v7168_v28  ;;  %v7170_v23 = vmul.f32 %v13590_v29, %v13590_v29 }
0x2ad3   :  { %v7030_v10 = vmul.f32 %v7029_v2, %v13375_v20  ;;  %v7764_v61 = vclamps-f32 %v6939_v60, 1.0  ;;  %v6988_v48 = vmul.f32 %v6987_v37, %v13546_v24  ;;  %v7001_v50 = vmul.f32 %v7000_v12, %v13546_v24 }
0x2ad4   :  { %v13610_v9 = vmul.f32 %v7149_v17, %v13287_v30  ;;  %v6644_v6 = vmul.f32 0.5, %v13367_v52  ;;  %v7078_v3 = vadd.f32 0.014752088, %v7077_v62  ;;  %7182 = vadd.xlane.f32.xlu2 %v7181_v33  ;;  %v7171_v45 = vmul.f32 %v13561_v38, %v13561_v38 }
0x2ad5   :  { %v7048_v40 = vmul.f32 %v13557_v13, %v7047_v41  ;;  %v7148_v31 = vadd.f32 1.0, %v7764_v61  ;;  %v7109_v27 = vadd.f32 0.05243302, %v7108_v8  ;;  %v7002_v2 = vadd.f32 0.4994258, %v7001_v50 }
0x2ad6   :  { %v13616_v0 = vpop.eup %7868  ;;  %v7067_v19 = vadd.f32 0.0036580483, %v7066_v16  ;;  %v7079_v36 = vmul.f32 %v7078_v3, %v13581_v49  ;;  %v7184_v63 = vadd.f32 %v7171_v45, %v7170_v23  ;;  %v7031_v30 = vadd.f32 0.18741608, %v7030_v10 }
0x2ad7   :  { %v13619_v18 = vmul.f32 %v7148_v31, %v6644_v6  ;;  %v7126_v52 = vmul.f32 %v13616_v0, %v13592_v53  ;;  %v6989_v51 = vadd.f32 0.05243302, %v6988_v48  ;;  %vm7051_vm4 = vweird.f32 %v13557_v13 }
0x2ad8   :  { %v7003_v43 = vmul.f32 %v7002_v2, %v13546_v24  ;;  %v7080_v5 = vadd.f32 0.112945676, %v7079_v36  ;;  %7185 = vadd.xlane.f32.xlu1 %v7184_v63  ;;  %v7049_v59 = vadd.f32 %v13557_v13, %v7048_v40  ;;  %v7110_v26 = vmul.f32 %v7109_v27, %v13495_v34 }
0x2ad9   :  { %v7172_v42 = vmul.f32 %v13619_v18, %v13619_v18  ;;  %v7173_v54 = vmul.f32 %v13610_v9, %v13610_v9  ;;  %v7127_v25 = vsub.f32 1.0, %v7126_v52  ;;  %v7068_v28 = vmul.f32 %v7067_v19, %v13581_v49 }
0x2ada   :  { %v7004_v56 = vadd.f32 1.0, %v7003_v43  ;;  %v7081_v58 = vmul.f32 %v7080_v5, %v13581_v49  ;;  %v7032_v46 = vmul.f32 %v7031_v30, %v13375_v20  ;;  %v7056_v37 = vand.u32 2147483648, %v13515_v32 }
0x2adb   :  { %v6990_v17 = vmul.f32 %v6989_v51, %v13546_v24  ;;  %v7187_v39 = vadd.f32 %v7173_v54, %v7172_v42  ;;  %vm7050_vm6 = vweird.f32 %v13515_v32  ;;  %v7054_v14 = vand.u32 2147483647, %v13515_v32 }
0x2adc   :  { %7870 = vrcp.f32 %v7004_v56  ;;  %vm7052_vm12 = vmor %vm7050_vm6, %vm7051_vm4  ;;  %v7111_v41 = vadd.f32 0.18741608, %v7110_v26  ;;  %v7082_v60 = vadd.f32 0.4994258, %v7081_v58  ;;  %v7128_v20 = vmul.f32 %v13616_v0, %v7127_v25 }
0x2add   :  { %7188 = vadd.xlane.f32.xlu0 %v7187_v39  ;;  %v7053_v8 = vsel %vm7052_vm12, %v13557_v13, %v7049_v59  ;;  %v7069_v12 = vadd.f32 0.05243302, %v7068_v28  ;;  %v7033_v16 = vadd.f32 1.1283791, %v7032_v46  ;;  %v7057_v62 = vor.u32 1.1754944e-38, %v7056_v37 }
0x2ade   :  { %v6991_v33 = vadd.f32 0.18741608, %v6990_v17  ;;  %v7083_v23 = vmul.f32 %v7082_v60, %v13581_v49  ;;  %vm7055_vm10 = vcmp.eq.f32.partialorder %v7054_v14, 8.507059e+37  ;;  %v7112_v32 = vmul.f32 %v7111_v41, %v13495_v34 }
0x2adf   :  { %v7058_v10 = vsel %vm7055_vm10, %v7057_v62, %v7053_v8  ;;  %v7129_v50 = vadd.f32 %v13616_v0, %v7128_v20  ;;  %vm7131_vm7 = vweird.f32 %v13616_v0  ;;  %v7136_v13 = vand.u32 2147483648, %v13592_v53 }
0x2ae0   :  { %v13644_v61 = vadd.f32 1.0, %v7083_v23  ;;  %v7070_v6 = vmul.f32 %v7069_v12, %v13581_v49  ;;  %v7034_v3 = vmul.f32 %v7033_v16, %v13336_v7  ;;  %v6992_v45 = vmul.f32 %v6991_v33, %v13546_v24 }
0x2ae1   :  { %vm7130_vm11 = vweird.f32 %v13592_v53  ;;  %v7134_v34 = vand.u32 2147483647, %v13592_v53  ;;  %v7113_v27 = vadd.f32 1.1283791, %v7112_v32  ;;  %v7137_v36 = vor.u32 1.1754944e-38, %v7136_v13 }
0x2ae2   :  { %v7871_v48 = vpop.eup %7870  ;;  %7872 = vrcp.f32 %v13644_v61  ;;  %v7059_v31 = vmul.f32 %v7058_v10, %v7034_v3  ;;  %vm7132_vm15 = vmor %vm7130_vm11, %vm7131_vm7  ;;  %v7016_v63 = vand.u32 2147483648, %v7004_v56  ;;  %v7071_v30 = vadd.f32 0.18741608, %v7070_v6 }
0x2ae3   :  { %v7006_v40 = vmul.f32 %v7871_v48, %v7004_v56  ;;  %v7133_v19 = vsel %vm7132_vm15, %v13616_v0, %v7129_v50  ;;  %v6993_v52 = vadd.f32 1.1283791, %v6992_v45  ;;  %vm7011_vm0 = vweird.f32 %v7871_v48 }
0x2ae4   :  { %v7014_v24 = vand.u32 2147483647, %v7004_v56  ;;  %vm7135_vm9 = vcmp.eq.f32.partialorder %v7134_v34, 8.507059e+37  ;;  %v7767_v43 = vclamps-f32 %v7059_v31, 1.0  ;;  %vm7010_vm13 = vweird.f32 %v7004_v56 }
0x2ae5   :  { %v7007_v2 = vsub.f32 1.0, %v7006_v40  ;;  %v7138_v5 = vsel %vm7135_vm9, %v7137_v36, %v7133_v19  ;;  %v7114_v53 = vmul.f32 %v7113_v27, %v13470_v35  ;;  %vm7012_vm14 = vmor %vm7010_vm13, %vm7011_vm0  ;;  %v7017_v26 = vor.u32 1.1754944e-38, %v7016_v63  ;;  %v7305_v19 = vld [vmem:[%s13800_s5 + $0x20] sm:$0xff] }
0x2ae6   :  { %v7072_v42 = vmul.f32 %v7071_v30, %v13581_v49  ;;  %v6994_v54 = vmul.f32 %v6993_v52, %v13527_v21  ;;  %vm7015_vm1 = vcmp.eq.f32.partialorder %v7014_v24, 8.507059e+37  ;;  %v7151_v37 = vadd.f32 1.0, %v7767_v43  ;;  %v7306_v49 = vld [vmem:[%s13800_s5 + $0x28] sm:$0xff]  ;;  %v7361_v36 = vld [vmem:[%s13801_s6] sm:$0xff] }
0x2ae7   :  { %v7008_v7 = vmul.f32 %v7871_v48, %v7007_v2  ;;  %v7139_v28 = vmul.f32 %v7138_v5, %v7114_v53  ;;  %v7096_v39 = vand.u32 2147483648, %v13644_v61  ;;  %v7094_v35 = vand.u32 2147483647, %v13644_v61  ;;  %v7303_v2 = vld [vmem:[%s13800_s5 + $0x10] sm:$0xff]  ;;  %v7365_v63 = vld [vmem:[%s13801_s6 + $0x20] sm:$0xff]  ;;  %v7366_v30 = vld [vmem:[%s13801_s6 + $0x28] sm:$0xff] }
0x2ae8   :  { %v7873_v51 = vpop.eup %7872  ;;  %v7073_v56 = vadd.f32 1.1283791, %v7072_v42  ;;  %v6647_v21 = vmul.f32 0.5, %v13315_v4  ;;  %vm7090_vm2 = vweird.f32 %v13644_v61  ;;  %v6646_v12 = vmul.f32 0.5, %v13509_v22  ;;  %v7302_v52 = vld [vmem:[%s13800_s5 + $0x8] sm:$0xff]  ;;  %v7423_v5 = vld [vmem:[%s13803_s8] sm:$0xff] }
0x2ae9   :  { %v7009_v59 = vadd.f32 %v7871_v48, %v7008_v7  ;;  %v7086_v0 = vmul.f32 %v7873_v51, %v13644_v61  ;;  %vm7091_vm8 = vweird.f32 %v7873_v51  ;;  %v7769_v60 = vclamps-f32 %v7139_v28, 1.0  ;;  %v7364_v7 = vld [vmem:[%s13801_s6 + $0x18] sm:$0xff]  ;;  %v7362_v24 = vld [vmem:[%s13801_s6 + $0x8] sm:$0xff] }
0x2aea   :  { %v13667_v20 = vmul.f32 %v7151_v37, %v6647_v21  ;;  %vm7092_vm3 = vmor %vm7090_vm2, %vm7091_vm8  ;;  %v7097_v62 = vor.u32 1.1754944e-38, %v7096_v39  ;;  %v7074_v33 = vmul.f32 %v7073_v56, %v13555_v11  ;;  %vm7095_vm4 = vcmp.eq.f32.partialorder %v7094_v35, 8.507059e+37  ;;  %v7304_v11 = vld [vmem:[%s13800_s5 + $0x18] sm:$0xff]  ;;  %v7424_v43 = vld [vmem:[%s13803_s8 + $0x8] sm:$0xff] }
0x2aeb   :  { %v7013_v25 = vsel %vm7012_vm14, %v7871_v48, %v7009_v59  ;;  %v7087_v46 = vsub.f32 1.0, %v7086_v0  ;;  %v7153_v32 = vadd.f32 1.0, %v7769_v60  ;;  %v6649_v22 = vmul.f32 0.5, %v13447_v55 }
0x2aec   :  { %v7018_v58 = vsel %vm7015_vm1, %v7017_v26, %v7013_v25  ;;  %v7175_v50 = vmul.f32 %v13667_v20, %v13667_v20  ;;  %v6648_v45 = vmul.f32 0.5, %v13539_v1  ;;  %v7363_v1 = vld [vmem:[%s13801_s6 + $0x10] sm:$0xff] }
0x2aed   :  { %v7019_v17 = vmul.f32 %v7018_v58, %v6994_v54  ;;  %v7088_v14 = vmul.f32 %v7873_v51, %v7087_v46  ;;  %v13681_v3 = vmul.f32 %v7153_v32, %v6649_v22 }
0x2aef   :  { %v7766_v41 = vclamps-f32 %v7019_v17, 1.0  ;;  %v7089_v8 = vadd.f32 %v7873_v51, %v7088_v14  ;;  %v7177_v55 = vmul.f32 %v13681_v3, %v13681_v3 }
0x2af1   :  { %v7150_v16 = vadd.f32 1.0, %v7766_v41  ;;  %7346 = vperm.xlu0 %7798, %v7306_v49   ;;  %v7093_v23 = vsel %vm7092_vm3, %v7873_v51, %v7089_v8  ;;  %v7301_v51 = vld [vmem:[%s13800_s5] sm:$0xff] }
0x2af2   :  { %v7098_v4 = vsel %vm7095_vm4, %v7097_v62, %v7093_v23 }
0x2af3   :  { %v13671_v10 = vmul.f32 %v7150_v16, %v6646_v12  ;;  %v7099_v48 = vmul.f32 %v7098_v4, %v7074_v33 }
0x2af5   :  { %v7174_v61 = vmul.f32 %v13671_v10, %v13671_v10  ;;  %v7768_v13 = vclamps-f32 %v7099_v48, 1.0 }
0x2af7   :  { %v7190_v6 = vadd.f32 %v7175_v50, %v7174_v61  ;;  %v7152_v40 = vadd.f32 1.0, %v7768_v13 }
0x2af9   :  { %7191 = vadd.xlane.f32.xlu2 %v7190_v6  ;;  %7336 = vperm.xlu0 %7798, %v7304_v11   ;;  %v13684_v34 = vmul.f32 %v7152_v40, %v6648_v45 }
0x2afb   :  { %v7176_v31 = vmul.f32 %v13684_v34, %v13684_v34 }
0x2afd   :  { %v7193_v27 = vadd.f32 %v7177_v55, %v7176_v31 }
0x2aff   :  { %7194 = vadd.xlane.f32.xlu1 %v7193_v27 }
0x2b01   :  { %7331 = vperm.xlu0 %7798, %v7303_v2  }
0x2b09   :  { %7379 = vperm.xlu0 %7798, %v7363_v1  }
0x2b11   :  { %7341 = vperm.xlu2 %7797, %v7305_v19   ;;  %7369 = vperm.xlu0 %7798, %v7361_v36  }
0x2b18   :  { %7394 = vperm.xlu1 %7799, %v7366_v30  }
0x2b19   :  { %7389 = vperm.xlu2 %7797, %v7365_v63  }
0x2b20   :  { %7384 = vperm.xlu1 %7799, %v7364_v7  }
0x2b21   :  { %7326 = vperm.xlu2 %7797, %v7302_v52  }
0x2b28   :  { %7321 = vperm.xlu1 %7799, %v7301_v51  }
0x2b29   :  { %7374 = vperm.xlu2 %7797, %v7362_v24  }
0x2b30   :  { %7427 = vperm.xlu1 %7799, %v7423_v5  }
0x2b31   :  { %7432 = vperm.xlu2 %7797, %v7424_v43  }
0x2b3f   :  { %v13726_v59 = vpop.xlane.xlu0 %7179 }
0x2b40   :  { %vm7203_vm12 = vcmp.eq.f32.partialorder %v13726_v59, inf  ;;  %v7206_v19 = vand.u32 2147483648, %v13726_v59  ;;  %vm7205_vm15 = vcmp.eq.f32.partialorder %v13726_v59, 0.0 }
0x2b47   :  { %v7183_v53 = vpop.xlane.xlu2 %7182 }
0x2b48   :  { %7874 = vrsqrt.f32 %v7183_v53  ;;  %vm7215_vm6 = vcmp.eq.f32.partialorder %v7183_v53, inf  ;;  %v7218_v36 = vand.u32 2147483648, %v7183_v53  ;;  %vm7217_vm7 = vcmp.eq.f32.partialorder %v7183_v53, 0.0 }
0x2b49   :  { %7876 = vrsqrt.f32 %v13726_v59 }
0x2b4b   :  { %v13728_v26 = vpop.xlane.xlu1 %7185 }
0x2b4c   :  { %7878 = vrsqrt.f32 %v13728_v26  ;;  %vm7227_vm10 = vcmp.eq.f32.partialorder %v13728_v26, inf  ;;  %v7230_v24 = vand.u32 2147483648, %v13728_v26  ;;  %vm7229_vm0 = vcmp.eq.f32.partialorder %v13728_v26, 0.0 }
0x2b4e   :  { %v7875_v0 = vpop.eup %7874 }
0x2b4f   :  { %v7877_v54 = vpop.eup %7876  ;;  %v7209_v28 = vmul.f32 %v7875_v0, %v7183_v53 }
0x2b50   :  { %v13731_v42 = vpop.xlane.xlu0 %7188  ;;  %v7197_v46 = vmul.f32 %v7877_v54, %v13726_v59 }
0x2b51   :  { %7880 = vrsqrt.f32 %v13731_v42  ;;  %v7210_v17 = vmul.f32 %v7875_v0, %v7209_v28  ;;  %vm7239_vm11 = vcmp.eq.f32.partialorder %v13731_v42, inf  ;;  %vm7241_vm13 = vcmp.eq.f32.partialorder %v13731_v42, 0.0 }
0x2b52   :  { %v7879_v25 = vpop.eup %7878  ;;  %v7198_v56 = vmul.f32 %v7877_v54, %v7197_v46 }
0x2b53   :  { %v7221_v37 = vmul.f32 %v7879_v25, %v13728_v26  ;;  %v7211_v35 = vmul.f32 0.5, %v7210_v17 }
0x2b54   :  { %v7199_v41 = vmul.f32 0.5, %v7198_v56 }
0x2b55   :  { %v7222_v14 = vmul.f32 %v7879_v25, %v7221_v37  ;;  %v7212_v8 = vsub.f32 1.5, %v7211_v35 }
0x2b56   :  { %v7200_v16 = vsub.f32 1.5, %v7199_v41 }
0x2b57   :  { %v7881_v58 = vpop.eup %7880  ;;  %v7223_v60 = vmul.f32 0.5, %v7222_v14  ;;  %v7213_v23 = vmul.f32 %v7875_v0, %v7212_v8 }
0x2b58   :  { %v7233_v39 = vmul.f32 %v7881_v58, %v13731_v42  ;;  %v7201_v61 = vmul.f32 %v7877_v54, %v7200_v16 }
0x2b59   :  { %v7224_v62 = vsub.f32 1.5, %v7223_v60  ;;  %v7214_v13 = vmul.f32 %v7213_v23, %v7183_v53 }
0x2b5a   :  { %v7234_v49 = vmul.f32 %v7881_v58, %v7233_v39  ;;  %v7202_v45 = vmul.f32 %v7201_v61, %v13726_v59 }
0x2b5b   :  { %v7225_v50 = vmul.f32 %v7879_v25, %v7224_v62  ;;  %v7216_v27 = vsel %vm7215_vm6, %v7183_v53, %v7214_v13  ;;  %v7242_v53 = vand.u32 2147483648, %v13731_v42 }
0x2b5c   :  { %v7235_v12 = vmul.f32 0.5, %v7234_v49  ;;  %v7204_v30 = vsel %vm7203_vm12, %v13726_v59, %v7202_v45  ;;  %v7219_v51 = vsel %vm7217_vm7, %v7218_v36, %v7216_v27 }
0x2b5d   :  { %v7226_v40 = vmul.f32 %v7225_v50, %v13728_v26  ;;  %v13751_v54 = vsel %vm7205_vm15, %v7206_v19, %v7204_v30 }
0x2b5e   :  { %v7236_v4 = vsub.f32 1.5, %v7235_v12  ;;  %v7268_v46 = vadd.f32 %v7219_v51, %v13751_v54 }
0x2b5f   :  { %v7228_v7 = vsel %vm7227_vm10, %v13728_v26, %v7226_v40 }
0x2b60   :  { %v7237_v11 = vmul.f32 %v7881_v58, %v7236_v4  ;;  %v7231_v25 = vsel %vm7229_vm0, %v7230_v24, %v7228_v7 }
0x2b61   :  { %v7269_v39 = vadd.f32 %v7268_v46, %v7231_v25 }
0x2b62   :  { %v7238_v2 = vmul.f32 %v7237_v11, %v13731_v42 }
0x2b64   :  { %v7240_v0 = vsel %vm7239_vm11, %v13731_v42, %v7238_v2 }
0x2b65   :  { %v7243_v37 = vsel %vm7241_vm13, %v7242_v53, %v7240_v0 }
0x2b66   :  { %v7270_v14 = vadd.f32 %v7269_v39, %v7243_v37 }
0x2b6c   :  { %v7192_v21 = vpop.xlane.xlu2 %7191 }
0x2b6d   :  { %7882 = vrsqrt.f32 %v7192_v21  ;;  %vm7251_vm9 = vcmp.eq.f32.partialorder %v7192_v21, inf  ;;  %v7254_v17 = vand.u32 2147483648, %v7192_v21  ;;  %vm7253_vm14 = vcmp.eq.f32.partialorder %v7192_v21, 0.0 }
0x2b72   :  { %v7195_v32 = vpop.xlane.xlu1 %7194 }
0x2b73   :  { %v7883_v33 = vpop.eup %7882  ;;  %7884 = vrsqrt.f32 %v7195_v32  ;;  %vm7263_vm1 = vcmp.eq.f32.partialorder %v7195_v32, inf  ;;  %v7266_v35 = vand.u32 2147483648, %v7195_v32  ;;  %vm7265_vm8 = vcmp.eq.f32.partialorder %v7195_v32, 0.0 }
0x2b74   :  { %v7245_v48 = vmul.f32 %v7883_v33, %v7192_v21  ;;  %v7342_v50 = vpop.permute.xlu2 %7341 }
0x2b76   :  { %v7246_v22 = vmul.f32 %v7883_v33, %v7245_v48  ;;  %v14782_v48 = vld [vmem:[#allocation44_spill] sm:$0xff] }
0x2b78   :  { %v7247_v6 = vmul.f32 0.5, %v7246_v22 }
0x2b79   :  { %v7885_v31 = vpop.eup %7884 }
0x2b7a   :  { %v7248_v55 = vsub.f32 1.5, %v7247_v6  ;;  %v7257_v1 = vmul.f32 %v7885_v31, %v7195_v32 }
0x2b7c   :  { %v7249_v63 = vmul.f32 %v7883_v33, %v7248_v55  ;;  %v7258_v52 = vmul.f32 %v7885_v31, %v7257_v1  ;;  %v7347_v33 = vpop.permute.xlu0 %7346 }
0x2b7e   :  { %v7250_v43 = vmul.f32 %v7249_v63, %v7192_v21  ;;  %v7259_v5 = vmul.f32 0.5, %v7258_v52 }
0x2b80   :  { %v7260_v28 = vsub.f32 1.5, %v7259_v5  ;;  %v7252_v58 = vsel %vm7251_vm9, %v7192_v21, %v7250_v43 }
0x2b81   :  { %v7255_v26 = vsel %vm7253_vm14, %v7254_v17, %v7252_v58 }
0x2b82   :  { %v7261_v59 = vmul.f32 %v7885_v31, %v7260_v28  ;;  %v7271_v41 = vadd.f32 %v7270_v14, %v7255_v26 }
0x2b84   :  { %v7262_v56 = vmul.f32 %v7261_v59, %v7195_v32  ;;  %v7337_v22 = vpop.permute.xlu0 %7336 }
0x2b86   :  { %v7264_v49 = vsel %vm7263_vm1, %v7195_v32, %v7262_v56  ;;  %v7390_v32 = vpop.permute.xlu2 %7389 }
0x2b87   :  { %v7267_v60 = vsel %vm7265_vm8, %v7266_v35, %v7264_v49 }
0x2b88   :  { %v7272_v8 = vadd.f32 %v7271_v41, %v7267_v60 }
0x2b8a   :  { %v7273_v12 = vrot.slane %v7272_v8, 4  ;;  %v7395_v6 = vpop.permute.xlu1 %7394 }
0x2b8c   :  { %v7274_v42 = vadd.f32 %v7273_v12, %v7272_v8  ;;  %v7332_v27 = vpop.permute.xlu0 %7331 }
0x2b8e   :  { %v7275_v16 = vrot.slane %v7274_v42, 2  ;;  %v7327_v43 = vpop.permute.xlu2 %7326 }
0x2b90   :  { %v7276_v62 = vadd.f32 %v7275_v16, %v7274_v42 }
0x2b92   :  { %v7277_v23 = vrot.slane %v7276_v62, 1  ;;  %v7385_v24 = vpop.permute.xlu1 %7384 }
0x2b94   :  { %v7278_v4 = vadd.f32 %v7277_v23, %v7276_v62  ;;  %v7380_v56 = vpop.permute.xlu0 %7379 }
0x2b96   :  { %v7279_v21 = vmul.f32 %v7278_v4, %v14782_v48 }
0x2b98   :  { %v7280_v61 = vadd.f32 1e-06, %v7279_v21 }
0x2b9a   :  { %7886 = vrcp.f32 %v7280_v61  ;;  %v7292_v40 = vand.u32 2147483648, %v7280_v61  ;;  %v7290_v55 = vand.u32 2147483647, %v7280_v61  ;;  %vm7286_vm3 = vweird.f32 %v7280_v61 }
0x2b9c   :  { %v7293_v1 = vor.u32 1.1754944e-38, %v7292_v40  ;;  %vm7291_vm6 = vcmp.eq.f32.partialorder %v7290_v55, 8.507059e+37  ;;  %v7375_v40 = vpop.permute.xlu2 %7374 }
0x2ba0   :  { %v7887_v13 = vpop.eup %7886 }
0x2ba1   :  { %v7282_v11 = vmul.f32 %v7887_v13, %v7280_v61  ;;  %vm7287_vm2 = vweird.f32 %v7887_v13 }
0x2ba2   :  { %vm7288_vm4 = vmor %vm7286_vm3, %vm7287_vm2 }
0x2ba3   :  { %v7283_v45 = vsub.f32 1.0, %v7282_v11 }
0x2ba5   :  { %v7284_v31 = vmul.f32 %v7887_v13, %v7283_v45  ;;  %v7322_v45 = vpop.permute.xlu1 %7321 }
0x2ba7   :  { %v7285_v2 = vadd.f32 %v7887_v13, %v7284_v31 }
0x2ba9   :  { %v7289_v19 = vsel %vm7288_vm4, %v7887_v13, %v7285_v2 }
0x2baa   :  { %v7294_v36 = vsel %vm7291_vm6, %v7293_v1, %v7289_v19  ;;  %v7370_v1 = vpop.permute.xlu0 %7369 }
0x2bab   :  { %v7299_v63 = vmul.f32 %v7294_v36, %v7255_v26  ;;  %v7300_v30 = vmul.f32 %v7294_v36, %v7267_v60  ;;  %v7298_v52 = vmul.f32 %v7294_v36, %v7243_v37  ;;  %v7296_v7 = vmul.f32 %v7294_v36, %v7219_v51 }
0x2bac   :  { %v7297_v5 = vmul.f32 %v7294_v36, %v7231_v25  ;;  %v7295_v49 = vmul.f32 %v7294_v36, %v13751_v54 }
0x2bad   :  { %v7315_v0 = vmul.f32 %v7299_v63, %v13671_v10  ;;  %v7316_v53 = vmul.f32 %v7299_v63, %v13667_v20  ;;  %v7317_v28 = vmul.f32 %v7300_v30, %v13684_v34  ;;  %v7318_v58 = vmul.f32 %v7300_v30, %v13681_v3 }
0x2bae   :  { %v7313_v46 = vmul.f32 %v7298_v52, %v13619_v18  ;;  %v7314_v17 = vmul.f32 %v7298_v52, %v13610_v9  ;;  %v7309_v59 = vmul.f32 %v7296_v7, %v13570_v15  ;;  %v7310_v37 = vmul.f32 %v7296_v7, %v13550_v47  ;;  %v7433_v7 = vpop.permute.xlu2 %7432 }
0x2baf   :  { %v7357_v51 = vmul.f32 %v7342_v50, %v7315_v0  ;;  %v7358_v39 = vmul.f32 %v7342_v50, %v7316_v53  ;;  %v7359_v26 = vmul.f32 %v7347_v33, %v7317_v28  ;;  %v7360_v25 = vmul.f32 %v7347_v33, %v7318_v58 }
0x2bb0   :  { %v7355_v14 = vmul.f32 %v7337_v22, %v7313_v46  ;;  %v7356_v35 = vmul.f32 %v7337_v22, %v7314_v17  ;;  %v7351_v60 = vmul.f32 %v7327_v43, %v7309_v59  ;;  %v7311_v8 = vmul.f32 %v7297_v5, %v13590_v29 }
0x2bb1   :  { %v7405_v41 = vadd.f32 %v7390_v32, %v7357_v51  ;;  %v7312_v12 = vmul.f32 %v7297_v5, %v13561_v38  ;;  %v7406_v42 = vadd.f32 %v7390_v32, %v7358_v39  ;;  %v7352_v16 = vmul.f32 %v7327_v43, %v7310_v37 }
0x2bb2   :  { %v7407_v62 = vadd.f32 %v7395_v6, %v7359_v26  ;;  %v7408_v23 = vadd.f32 %v7395_v6, %v7360_v25  ;;  %v7353_v4 = vmul.f32 %v7332_v27, %v7311_v8  ;;  %v7403_v21 = vadd.f32 %v7385_v24, %v7355_v14 }
0x2bb3   :  { %v7354_v48 = vmul.f32 %v7332_v27, %v7312_v12  ;;  %v7404_v61 = vadd.f32 %v7385_v24, %v7356_v35  ;;  %v7307_v33 = vmul.f32 %v7295_v49, %v13543_v44  ;;  %v7308_v50 = vmul.f32 %v7295_v49, %v13476_v57 }
0x2bb4   :  { %v7419_v54 = vadd.f32 %v7407_v62, %v13684_v34  ;;  %v7420_v22 = vadd.f32 %v7408_v23, %v13681_v3  ;;  %v7401_v13 = vadd.f32 %v7380_v56, %v7353_v4  ;;  %v7417_v32 = vadd.f32 %v7405_v41, %v13671_v10 }
0x2bb5   :  { %v7402_v11 = vadd.f32 %v7380_v56, %v7354_v48  ;;  %v7349_v31 = vmul.f32 %v7322_v45, %v7307_v33  ;;  %v7350_v6 = vmul.f32 %v7322_v45, %v7308_v50  ;;  %v7418_v55 = vadd.f32 %v7406_v42, %v13667_v20 }
0x2bb6   :  { %7451 = vmatpush.msrb.mxu0 %v7419_v54  ;;  %7474 = vmatpush.msrb.mxu1 %v7420_v22  ;;  %v7399_v27 = vadd.f32 %v7375_v40, %v7351_v60  ;;  %v7400_v2 = vadd.f32 %v7375_v40, %v7352_v16  ;;  %v7415_v34 = vadd.f32 %v7403_v21, %v13619_v18 }
0x2bb7   :  { %v7416_v3 = vadd.f32 %v7404_v61, %v13610_v9  ;;  %v7413_v19 = vadd.f32 %v7401_v13, %v13590_v29  ;;  %v7414_v10 = vadd.f32 %v7402_v11, %v13561_v38  ;;  %v7397_v36 = vadd.f32 %v7370_v1, %v7349_v31  ;;  %v7421_v29 = vld [vmem:[%s13802_s7] sm:$0xff] }
0x2bb8   :  { %7452 = vmatpush.msrb.mxu0 %v7417_v32  ;;  %7475 = vmatpush.msrb.mxu1 %v7418_v55  ;;  %v7398_v63 = vadd.f32 %v7370_v1, %v7350_v6  ;;  %v7411_v20 = vadd.f32 %v7399_v27, %v13570_v15  ;;  %v7412_v30 = vadd.f32 %v7400_v2, %v13550_v47  ;;  %v7422_v47 = vld [vmem:[%s13802_s7 + $0x8] sm:$0xff]  ;;  %s7969_s7 = smov 256  }
0x2bb9   :  { %v7409_v18 = vadd.f32 %v7397_v36, %v13543_v44  ;;  %v7428_v44 = vpop.permute.xlu1 %7427 }
0x2bba   :  { %7453 = vmatpush.msrb.mxu0 %v7415_v34  ;;  %7476 = vmatpush.msrb.mxu1 %v7416_v3  ;;  %v7410_v9 = vadd.f32 %v7398_v63, %v13476_v57 }
0x2bbc   :  { %7454 = vmatpush.msrb.mxu0 %v7413_v19  ;;  %7477 = vmatpush.msrb.mxu1 %v7414_v10 }
0x2bbe   :  { %7455 = vmatpush.msrb.mxu0 %v7411_v20  ;;  %7478 = vmatpush.msrb.mxu1 %v7412_v30 }
0x2bc0   :  { %7456 = vmatpush.msrb.mxu0 %v7409_v18  ;;  %7479 = vmatpush.msrb.mxu1 %v7410_v9 }
0x2bc1   :  { %7770 = vmatmul.msk.f32.vlgmr.msrb.gmra.mxu0 %vm330_vm5, %v7421_v29  ;;  %7772 = vmatmul.msk.f32.vlgmr.msrb.gmra.mxu1 %vm330_vm5, %v7421_v29 }
0x2bc9   :  { %7771 = vmatmul.msk.f32.gmra.mxu0 %vm330_vm5, %v7422_v47  ;;  %7773 = vmatmul.msk.f32.gmra.mxu1 %vm330_vm5, %v7422_v47 }
0x2c3e   :  { %v7458_v57 = vpop.f32.mrf.mxu0  ;;  %v7481_v38 = vpop.f32.mrf.mxu1 }
0x2c3f   :  { %v7459_v15 = vadd.f32 %v7458_v57, %v7428_v44  ;;  %v7482_v52 = vadd.f32 %v7481_v38, %v7428_v44 }
0x2c41   :  { %7488 = vst [vmem:[#allocation3 + $0x20] sm:$0xff] %v7459_v15 }
0x2c42   :  { %7489 = vst [vmem:[#allocation3 + $0x28] sm:$0xff] %v7482_v52 }
0x2c46   :  { %v7461_v24 = vpop.f32.mrf.mxu0  ;;  %v7484_v43 = vpop.f32.mrf.mxu1 }
0x2c47   :  { %v7462_v5 = vadd.f32 %v7461_v24, %v7433_v7  ;;  %v7485_v0 = vadd.f32 %v7484_v43, %v7433_v7 }
0x2c49   :  { %7490 = vst [vmem:[#allocation3 + $0x30] sm:$0xff] %v7462_v5 }
0x2c4a   :  { %7491 = vst [vmem:[#allocation3 + $0x38] sm:$0xff] %v7485_v0 }
0x2c4b   :  { %7504 = dma.vmem_to_hbm [thread:$0]  %s7497_s15, 1024, %s7499_s25, [#allocation4], %s7969_s7, %s7969_s7, %s7970_s26  }
0x2c4c   :  { %7946 = dma.done.wait [#allocation4], 1024  }
0x2c4d   :  { %7947 = vsyncadd [#allocation4], 4294966272 }
0x2c4e   :  { %7509 = vsyncpa [#allocation4], 1 }

</bundles_post_ra>
